<compile_context>
chip_gen: v6e
topology: v6e:2x2x1
jax: 0.10.0
libtpu: 0.0.40
codegen_flags: <defaults>
</compile_context>

<pallas_src>
import jax
import jax.numpy as jnp
from jax.experimental import pallas as pl
from jax.experimental.pallas import tpu as pltpu

C = 64               # fixed by the module: nn.Conv2d(64, 64, 3, 1, 1)
K_TAPS = 9 * C       # 576 = im2col contraction size
K_PAD = 640          # pad K to 5*128 -> lane-dense im2col matrix
BN_EPS = 1e-5


def _res_block_kernel(x_ref, w1_ref, w2_ref, misc_ref, o_ref, pad_ref, col_ref):
    _, H, W, Cc = x_ref.shape
    HW = H * W
    k_pad = col_ref.shape[1]
    taps = 9 * Cc

    # --- per-step scratch init (cheap; stays correct under megacore
    # "parallel" sharding because it is done every grid step) ---
    # Only the 1-px border of the padded image needs zeroing: the interior is
    # fully overwritten before every conv.
    zrow = jnp.zeros((1, W + 2, Cc), pad_ref.dtype)
    zcol = jnp.zeros((H, 1, Cc), pad_ref.dtype)
    pad_ref[pl.ds(0, 1), :, :] = zrow
    pad_ref[pl.ds(H + 1, 1), :, :] = zrow
    pad_ref[pl.ds(1, H), pl.ds(0, 1), :] = zcol
    pad_ref[pl.ds(1, H), pl.ds(W + 1, 1), :] = zcol
    # Zero the K-padding tail of the im2col matrix (its weight rows are zero,
    # but uninitialised VMEM could hold NaNs; NaN * 0 = NaN).
    col_ref[:, pl.ds(taps, k_pad - taps)] = jnp.zeros(
        (HW, k_pad - taps), col_ref.dtype)

    def conv3x3(w_ref):
        # pad_ref interior already holds the bf16 activation.  Gather the 9
        # shifted windows into one (H*W, 9*C) im2col block, then a single MXU
        # matmul with K=576 (bf16 operands, f32 accumulate).
        for k in range(9):                                 # static unroll: 9 copies
            dy, dx = k // 3, k % 3
            win = pad_ref[pl.ds(dy, H), pl.ds(dx, W), :]   # (H, W, C) bf16
            col_ref[:, pl.ds(k * Cc, Cc)] = win.reshape(HW, Cc)
        return jnp.dot(col_ref[...], w_ref[...],
                       preferred_element_type=jnp.float32)  # (H*W, C) f32

    shift1 = misc_ref[pl.ds(0, 1), pl.ds(0, Cc)]           # (1, C) f32
    shift2 = misc_ref[pl.ds(1, 1), pl.ds(0, Cc)]
    alpha = misc_ref[pl.ds(2, 1), pl.ds(0, Cc)]

    # conv1 (bias + BN folded into weights/shift) -> PReLU
    pad_ref[pl.ds(1, H), pl.ds(1, W), :] = x_ref[0].astype(pad_ref.dtype)
    h = conv3x3(w1_ref) + shift1
    h = jnp.where(h > 0, h, h * alpha)
    # conv2 (bias + BN folded) -> residual add (f32).  x is re-read from the
    # VMEM input block here instead of being kept live across both matmuls.
    pad_ref[pl.ds(1, H), pl.ds(1, W), :] = h.reshape(H, W, Cc).astype(pad_ref.dtype)
    h2 = conv3x3(w2_ref) + shift2
    o_ref[0] = h2.reshape(H, W, Cc) + x_ref[0]


def _prelu_alpha_vec(alpha):
    a = jnp.asarray(alpha, jnp.float32).reshape(-1)
    return jnp.broadcast_to(a, (C,)) if a.shape[0] == 1 else a


def _fold_conv_bn(w_oihw, b, gamma, beta, rmean, rvar):
    """Fold conv bias + BatchNorm(eval) into bf16 weights and a f32 shift."""
    scale = gamma / jnp.sqrt(rvar + BN_EPS)                 # (C,)
    shift = scale * (b - rmean) + beta                      # (C,)
    # (O,I,kH,kW) -> (kH,kW,I,O) -> (576, 64), scale folded per output channel.
    w2d = jnp.transpose(w_oihw, (2, 3, 1, 0)).reshape(K_TAPS, C) * scale[None, :]
    w_pad = jnp.zeros((K_PAD, C), jnp.float32).at[:K_TAPS, :].set(w2d)
    return w_pad.astype(jnp.bfloat16), shift.astype(jnp.float32)


def _pack_misc(shift1, shift2, alpha):
    misc = jnp.zeros((8, 128), jnp.float32)
    misc = misc.at[0, :C].set(shift1)
    misc = misc.at[1, :C].set(shift2)
    misc = misc.at[2, :C].set(_prelu_alpha_vec(alpha))
    return misc


def res_block_forward(x_nchw, p):
    """Forward pass of res_block. x_nchw: (N, 64, H, W) float32."""
    N, Cin, H, W = x_nchw.shape
    assert Cin == C
    x = jnp.transpose(x_nchw, (0, 2, 3, 1)).astype(jnp.float32)   # NHWC

    w1b, shift1 = _fold_conv_bn(p["w1"], p["b1"], p["g1"], p["be1"],
                                p["rm1"], p["rv1"])
    w2b, shift2 = _fold_conv_bn(p["w2"], p["b2"], p["g2"], p["be2"],
                                p["rm2"], p["rv2"])
    misc = _pack_misc(shift1, shift2, p["alpha"])

    # Advisory cost hint: 2 convs x (2 * HW * K * C) MACs per image.
    flops = int(N) * 2 * 2 * (H * W) * K_TAPS * C
    bytes_accessed = (2 * N * H * W * C * 4          # x in + out (f32)
                      + 2 * K_PAD * C * 2            # two bf16 weight mats
                      + 8 * 128 * 4)                 # misc
    cost = pl.CostEstimate(flops=flops, transcendentals=0,
                           bytes_accessed=bytes_accessed)

    out = pl.pallas_call(
        _res_block_kernel,
        out_shape=jax.ShapeDtypeStruct((N, H, W, C), jnp.float32),
        grid_spec=pltpu.PrefetchScalarGridSpec(
            num_scalar_prefetch=0,
            grid=(N,),
            in_specs=[
                pl.BlockSpec((1, H, W, C), lambda n: (n, 0, 0, 0)),  # x
                pl.BlockSpec((K_PAD, C), lambda n: (0, 0)),          # folded w1 (bf16)
                pl.BlockSpec((K_PAD, C), lambda n: (0, 0)),          # folded w2 (bf16)
                pl.BlockSpec((8, 128), lambda n: (0, 0)),            # shifts + alpha
            ],
            out_specs=pl.BlockSpec((1, H, W, C), lambda n: (n, 0, 0, 0)),
            scratch_shapes=[
                pltpu.VMEM((H + 2, W + 2, C), jnp.bfloat16),         # padded image
                pltpu.VMEM((H * W, K_PAD), jnp.bfloat16),            # im2col matrix
            ],
        ),
        compiler_params=pltpu.CompilerParams(
            dimension_semantics=("parallel",)),                      # v7x: 2 TCs
        cost_estimate=cost,
    )(x, w1b, w2b, misc)

    return jnp.transpose(out, (0, 3, 1, 2))                          # back to NCHW


def init_params(key):
    ks = jax.random.split(key, 13)
    return {
        "w1": jax.random.normal(ks[0], (C, C, 3, 3), jnp.float32) * 0.05,
        "b1": jax.random.normal(ks[1], (C,), jnp.float32) * 0.05,
        "g1": 1.0 + 0.1 * jax.random.normal(ks[2], (C,), jnp.float32),
        "be1": 0.1 * jax.random.normal(ks[3], (C,), jnp.float32),
        "rm1": 0.1 * jax.random.normal(ks[4], (C,), jnp.float32),
        "rv1": jax.random.uniform(ks[5], (C,), jnp.float32, 0.5, 1.5),
        "w2": jax.random.normal(ks[6], (C, C, 3, 3), jnp.float32) * 0.05,
        "b2": jax.random.normal(ks[7], (C,), jnp.float32) * 0.05,
        "g2": 1.0 + 0.1 * jax.random.normal(ks[8], (C,), jnp.float32),
        "be2": 0.1 * jax.random.normal(ks[9], (C,), jnp.float32),
        "rm2": 0.1 * jax.random.normal(ks[10], (C,), jnp.float32),
        "rv2": jax.random.uniform(ks[11], (C,), jnp.float32, 0.5, 1.5),
        # nn.PReLU() single learned parameter (init 0.25, perturbed so the
        # parameter path is actually exercised).
        "alpha": 0.25 + 0.05 * jax.random.normal(ks[12], (1,), jnp.float32),
    }


def _conv_nchw(x, w, **kw):
    return jax.lax.conv_general_dilated(
        x, w, (1, 1), ((1, 1), (1, 1)),
        dimension_numbers=("NCHW", "OIHW", "NCHW"), **kw)


def reference_nchw(x, p):
    """Pure-JAX f32 reference (matches PyTorch eval-mode forward)."""
    def bn(y, g, be, rm, rv):
        bc = lambda v: v[None, :, None, None]
        return (y - bc(rm)) / jnp.sqrt(bc(rv) + BN_EPS) * bc(g) + bc(be)

    av = _prelu_alpha_vec(p["alpha"])[None, :, None, None]
    y = _conv_nchw(x, p["w1"]) + p["b1"][None, :, None, None]
    y = bn(y, p["g1"], p["be1"], p["rm1"], p["rv1"])
    y = jnp.where(y > 0, y, av * y)
    y = _conv_nchw(y, p["w2"]) + p["b2"][None, :, None, None]
    y = bn(y, p["g2"], p["be2"], p["rm2"], p["rv2"])
    return y + x


def reference_bf16_nchw(x, p):
    """Reference mirroring the kernel's numerics (bias+BN folded into bf16
    weights, bf16 conv operands, f32 accumulation / elementwise)."""
    def folded(w, b, g, be, rm, rv):
        s = g / jnp.sqrt(rv + BN_EPS)
        return (w * s[:, None, None, None]).astype(jnp.bfloat16), s * (b - rm) + be

    def conv(h_f32, wb, shift):
        y = _conv_nchw(h_f32.astype(jnp.bfloat16), wb,
                       preferred_element_type=jnp.float32)
        return y + shift[None, :, None, None]

    w1b, sh1 = folded(p["w1"], p["b1"], p["g1"], p["be1"], p["rm1"], p["rv1"])
    w2b, sh2 = folded(p["w2"], p["b2"], p["g2"], p["be2"], p["rm2"], p["rv2"])
    av = _prelu_alpha_vec(p["alpha"])[None, :, None, None]
    y = conv(x, w1b, sh1)
    y = jnp.where(y > 0, y, av * y)
    y = conv(y, w2b, sh2)
    return y + x


if __name__ == "__main__":
    key = jax.random.PRNGKey(0)
    pkey, xkey = jax.random.split(key)
    params = init_params(pkey)
    # batch=2, channels=64 (fixed by the module), spatial=16
    x = jax.random.normal(xkey, (2, C, 16, 16), jnp.float32)

    out = jax.block_until_ready(res_block_forward(x, params))
    assert out.shape == x.shape

    # Strict check vs. a reference with identical bf16 numerics.
    err_impl = float(jnp.max(jnp.abs(out - reference_bf16_nchw(x, params))))
    # Looser check vs. the exact f32 PyTorch-semantics reference (bf16
    # operand rounding bound).
    err_f32 = float(jnp.max(jnp.abs(out - reference_nchw(x, params))))
    if not (err_impl < 2e-3 and err_f32 < 5e-2):
        raise AssertionError(
            f"kernel mismatch: bf16-mirror err {err_impl}, f32 err {err_f32}")
    print("KERNEL_OK")
</pallas_src>

<mosaic_0001>
module attributes {stable_mosaic.version = 11 : i64} {
  func.func @_res_block_kernel(%arg0: i32, %arg1: memref<1x16x16x64xf32, #tpu.memory_space<vmem>>, %arg2: memref<640x64xbf16, #tpu.memory_space<vmem>>, %arg3: memref<640x64xbf16, #tpu.memory_space<vmem>>, %arg4: memref<8x128xf32, #tpu.memory_space<vmem>>, %arg5: memref<1x16x16x64xf32, #tpu.memory_space<vmem>>, %arg6: memref<18x18x64xbf16, #tpu.memory_space<vmem>>, %arg7: memref<256x640xbf16, #tpu.memory_space<vmem>>) attributes {dimension_semantics = [#tpu.dimension_semantics<parallel>], iteration_bounds = array<i64: 2>, scalar_prefetch = 0 : i64, scratch_operands = 2 : i64, tpu.core_type = #tpu.core_type<tc>, window_params = [{transform_indices = @transform_0, window_bounds = array<i64: 1, 16, 16, 64>}, {pipeline_mode = #tpu.pipeline_mode<synchronous>, transform_indices = @transform_1, window_bounds = array<i64: 640, 64>}, {pipeline_mode = #tpu.pipeline_mode<synchronous>, transform_indices = @transform_2, window_bounds = array<i64: 640, 64>}, {pipeline_mode = #tpu.pipeline_mode<synchronous>, transform_indices = @transform_3, window_bounds = array<i64: 8, 128>}, {transform_indices = @transform_4, window_bounds = array<i64: 1, 16, 16, 64>}]} {
    %cst = arith.constant 0.000000e+00 : bf16
    %0 = vector.broadcast %cst : bf16 to vector<1x18x64xbf16>
    %cst_0 = arith.constant 0.000000e+00 : bf16
    %1 = vector.broadcast %cst_0 : bf16 to vector<16x1x64xbf16>
    %c0 = arith.constant 0 : index
    %c0_1 = arith.constant 0 : index
    %c0_2 = arith.constant 0 : index
    %2 = vector.load %arg6[%c0, %c0_1, %c0_2] : memref<18x18x64xbf16, #tpu.memory_space<vmem>>, vector<1x18x64xbf16>
    tpu.vector_store %arg6[%c0, %c0_1, %c0_2], %0 {strides = array<i32>} : memref<18x18x64xbf16, #tpu.memory_space<vmem>>, vector<1x18x64xbf16>,
    %c17 = arith.constant 17 : index
    %c0_3 = arith.constant 0 : index
    %c0_4 = arith.constant 0 : index
    %3 = vector.load %arg6[%c17, %c0_3, %c0_4] : memref<18x18x64xbf16, #tpu.memory_space<vmem>>, vector<1x18x64xbf16>
    tpu.vector_store %arg6[%c17, %c0_3, %c0_4], %0 {strides = array<i32>} : memref<18x18x64xbf16, #tpu.memory_space<vmem>>, vector<1x18x64xbf16>,
    %c1 = arith.constant 1 : index
    %c0_5 = arith.constant 0 : index
    %c0_6 = arith.constant 0 : index
    %4 = vector.load %arg6[%c1, %c0_5, %c0_6] : memref<18x18x64xbf16, #tpu.memory_space<vmem>>, vector<16x1x64xbf16>
    tpu.vector_store %arg6[%c1, %c0_5, %c0_6], %1 {strides = array<i32>} : memref<18x18x64xbf16, #tpu.memory_space<vmem>>, vector<16x1x64xbf16>,
    %c1_7 = arith.constant 1 : index
    %c17_8 = arith.constant 17 : index
    %c0_9 = arith.constant 0 : index
    %5 = vector.load %arg6[%c1_7, %c17_8, %c0_9] : memref<18x18x64xbf16, #tpu.memory_space<vmem>>, vector<16x1x64xbf16>
    tpu.vector_store %arg6[%c1_7, %c17_8, %c0_9], %1 {strides = array<i32>} : memref<18x18x64xbf16, #tpu.memory_space<vmem>>, vector<16x1x64xbf16>,
    %cst_10 = arith.constant 0.000000e+00 : bf16
    %6 = vector.broadcast %cst_10 : bf16 to vector<256x64xbf16>
    %c0_11 = arith.constant 0 : index
    %c576 = arith.constant 576 : index
    %7 = vector.load %arg7[%c0_11, %c576] : memref<256x640xbf16, #tpu.memory_space<vmem>>, vector<256x64xbf16>
    tpu.vector_store %arg7[%c0_11, %c576], %6 {strides = array<i32>} : memref<256x640xbf16, #tpu.memory_space<vmem>>, vector<256x64xbf16>,
    %c0_12 = arith.constant 0 : index
    %c0_13 = arith.constant 0 : index
    %8 = vector.load %arg4[%c0_12, %c0_13] : memref<8x128xf32, #tpu.memory_space<vmem>>, vector<1x64xf32>
    %c1_14 = arith.constant 1 : index
    %c0_15 = arith.constant 0 : index
    %9 = vector.load %arg4[%c1_14, %c0_15] : memref<8x128xf32, #tpu.memory_space<vmem>>, vector<1x64xf32>
    %c2 = arith.constant 2 : index
    %c0_16 = arith.constant 0 : index
    %10 = vector.load %arg4[%c2, %c0_16] : memref<8x128xf32, #tpu.memory_space<vmem>>, vector<1x64xf32>
    %c0_17 = arith.constant 0 : index
    %c0_18 = arith.constant 0 : index
    %c0_19 = arith.constant 0 : index
    %c0_20 = arith.constant 0 : index
    %11 = vector.load %arg1[%c0_17, %c0_18, %c0_19, %c0_20] : memref<1x16x16x64xf32, #tpu.memory_space<vmem>>, vector<1x16x16x64xf32>
    %12 = vector.shape_cast %11 : vector<1x16x16x64xf32> to vector<16x16x64xf32>
    %13 = arith.truncf %12 : vector<16x16x64xf32> to vector<16x16x64xbf16>
    %c1_21 = arith.constant 1 : index
    %c1_22 = arith.constant 1 : index
    %c0_23 = arith.constant 0 : index
    %14 = vector.load %arg6[%c1_21, %c1_22, %c0_23] : memref<18x18x64xbf16, #tpu.memory_space<vmem>>, vector<16x16x64xbf16>
    tpu.vector_store %arg6[%c1_21, %c1_22, %c0_23], %13 {strides = array<i32>} : memref<18x18x64xbf16, #tpu.memory_space<vmem>>, vector<16x16x64xbf16>,
    %c0_24 = arith.constant 0 : index
    %c0_25 = arith.constant 0 : index
    %c0_26 = arith.constant 0 : index
    %15 = vector.load %arg6[%c0_24, %c0_25, %c0_26] : memref<18x18x64xbf16, #tpu.memory_space<vmem>>, vector<16x16x64xbf16>
    %16 = vector.shape_cast %15 : vector<16x16x64xbf16> to vector<256x64xbf16>
    %c0_27 = arith.constant 0 : index
    %c0_28 = arith.constant 0 : index
    %17 = vector.load %arg7[%c0_27, %c0_28] : memref<256x640xbf16, #tpu.memory_space<vmem>>, vector<256x64xbf16>
    tpu.vector_store %arg7[%c0_27, %c0_28], %16 {strides = array<i32>} : memref<256x640xbf16, #tpu.memory_space<vmem>>, vector<256x64xbf16>,
    %c0_29 = arith.constant 0 : index
    %c1_30 = arith.constant 1 : index
    %c0_31 = arith.constant 0 : index
    %18 = vector.load %arg6[%c0_29, %c1_30, %c0_31] : memref<18x18x64xbf16, #tpu.memory_space<vmem>>, vector<16x16x64xbf16>
    %19 = vector.shape_cast %18 : vector<16x16x64xbf16> to vector<256x64xbf16>
    %c0_32 = arith.constant 0 : index
    %c64 = arith.constant 64 : index
    %20 = vector.load %arg7[%c0_32, %c64] : memref<256x640xbf16, #tpu.memory_space<vmem>>, vector<256x64xbf16>
    tpu.vector_store %arg7[%c0_32, %c64], %19 {strides = array<i32>} : memref<256x640xbf16, #tpu.memory_space<vmem>>, vector<256x64xbf16>,
    %c0_33 = arith.constant 0 : index
    %c2_34 = arith.constant 2 : index
    %c0_35 = arith.constant 0 : index
    %21 = vector.load %arg6[%c0_33, %c2_34, %c0_35] : memref<18x18x64xbf16, #tpu.memory_space<vmem>>, vector<16x16x64xbf16>
    %22 = vector.shape_cast %21 : vector<16x16x64xbf16> to vector<256x64xbf16>
    %c0_36 = arith.constant 0 : index
    %c128 = arith.constant 128 : index
    %23 = vector.load %arg7[%c0_36, %c128] : memref<256x640xbf16, #tpu.memory_space<vmem>>, vector<256x64xbf16>
    tpu.vector_store %arg7[%c0_36, %c128], %22 {strides = array<i32>} : memref<256x640xbf16, #tpu.memory_space<vmem>>, vector<256x64xbf16>,
    %c1_37 = arith.constant 1 : index
    %c0_38 = arith.constant 0 : index
    %c0_39 = arith.constant 0 : index
    %24 = vector.load %arg6[%c1_37, %c0_38, %c0_39] : memref<18x18x64xbf16, #tpu.memory_space<vmem>>, vector<16x16x64xbf16>
    %25 = vector.shape_cast %24 : vector<16x16x64xbf16> to vector<256x64xbf16>
    %c0_40 = arith.constant 0 : index
    %c192 = arith.constant 192 : index
    %26 = vector.load %arg7[%c0_40, %c192] : memref<256x640xbf16, #tpu.memory_space<vmem>>, vector<256x64xbf16>
    tpu.vector_store %arg7[%c0_40, %c192], %25 {strides = array<i32>} : memref<256x640xbf16, #tpu.memory_space<vmem>>, vector<256x64xbf16>,
    %c1_41 = arith.constant 1 : index
    %c1_42 = arith.constant 1 : index
    %c0_43 = arith.constant 0 : index
    %27 = vector.load %arg6[%c1_41, %c1_42, %c0_43] : memref<18x18x64xbf16, #tpu.memory_space<vmem>>, vector<16x16x64xbf16>
    %28 = vector.shape_cast %27 : vector<16x16x64xbf16> to vector<256x64xbf16>
    %c0_44 = arith.constant 0 : index
    %c256 = arith.constant 256 : index
    %29 = vector.load %arg7[%c0_44, %c256] : memref<256x640xbf16, #tpu.memory_space<vmem>>, vector<256x64xbf16>
    tpu.vector_store %arg7[%c0_44, %c256], %28 {strides = array<i32>} : memref<256x640xbf16, #tpu.memory_space<vmem>>, vector<256x64xbf16>,
    %c1_45 = arith.constant 1 : index
    %c2_46 = arith.constant 2 : index
    %c0_47 = arith.constant 0 : index
    %30 = vector.load %arg6[%c1_45, %c2_46, %c0_47] : memref<18x18x64xbf16, #tpu.memory_space<vmem>>, vector<16x16x64xbf16>
    %31 = vector.shape_cast %30 : vector<16x16x64xbf16> to vector<256x64xbf16>
    %c0_48 = arith.constant 0 : index
    %c320 = arith.constant 320 : index
    %32 = vector.load %arg7[%c0_48, %c320] : memref<256x640xbf16, #tpu.memory_space<vmem>>, vector<256x64xbf16>
    tpu.vector_store %arg7[%c0_48, %c320], %31 {strides = array<i32>} : memref<256x640xbf16, #tpu.memory_space<vmem>>, vector<256x64xbf16>,
    %c2_49 = arith.constant 2 : index
    %c0_50 = arith.constant 0 : index
    %c0_51 = arith.constant 0 : index
    %33 = vector.load %arg6[%c2_49, %c0_50, %c0_51] : memref<18x18x64xbf16, #tpu.memory_space<vmem>>, vector<16x16x64xbf16>
    %34 = vector.shape_cast %33 : vector<16x16x64xbf16> to vector<256x64xbf16>
    %c0_52 = arith.constant 0 : index
    %c384 = arith.constant 384 : index
    %35 = vector.load %arg7[%c0_52, %c384] : memref<256x640xbf16, #tpu.memory_space<vmem>>, vector<256x64xbf16>
    tpu.vector_store %arg7[%c0_52, %c384], %34 {strides = array<i32>} : memref<256x640xbf16, #tpu.memory_space<vmem>>, vector<256x64xbf16>,
    %c2_53 = arith.constant 2 : index
    %c1_54 = arith.constant 1 : index
    %c0_55 = arith.constant 0 : index
    %36 = vector.load %arg6[%c2_53, %c1_54, %c0_55] : memref<18x18x64xbf16, #tpu.memory_space<vmem>>, vector<16x16x64xbf16>
    %37 = vector.shape_cast %36 : vector<16x16x64xbf16> to vector<256x64xbf16>
    %c0_56 = arith.constant 0 : index
    %c448 = arith.constant 448 : index
    %38 = vector.load %arg7[%c0_56, %c448] : memref<256x640xbf16, #tpu.memory_space<vmem>>, vector<256x64xbf16>
    tpu.vector_store %arg7[%c0_56, %c448], %37 {strides = array<i32>} : memref<256x640xbf16, #tpu.memory_space<vmem>>, vector<256x64xbf16>,
    %c2_57 = arith.constant 2 : index
    %c2_58 = arith.constant 2 : index
    %c0_59 = arith.constant 0 : index
    %39 = vector.load %arg6[%c2_57, %c2_58, %c0_59] : memref<18x18x64xbf16, #tpu.memory_space<vmem>>, vector<16x16x64xbf16>
    %40 = vector.shape_cast %39 : vector<16x16x64xbf16> to vector<256x64xbf16>
    %c0_60 = arith.constant 0 : index
    %c512 = arith.constant 512 : index
    %41 = vector.load %arg7[%c0_60, %c512] : memref<256x640xbf16, #tpu.memory_space<vmem>>, vector<256x64xbf16>
    tpu.vector_store %arg7[%c0_60, %c512], %40 {strides = array<i32>} : memref<256x640xbf16, #tpu.memory_space<vmem>>, vector<256x64xbf16>,
    %c0_61 = arith.constant 0 : index
    %c0_62 = arith.constant 0 : index
    %42 = vector.load %arg7[%c0_61, %c0_62] : memref<256x640xbf16, #tpu.memory_space<vmem>>, vector<256x640xbf16>
    %c0_63 = arith.constant 0 : index
    %c0_64 = arith.constant 0 : index
    %43 = vector.load %arg2[%c0_63, %c0_64] : memref<640x64xbf16, #tpu.memory_space<vmem>>, vector<640x64xbf16>
    %cst_65 = arith.constant dense<0.000000e+00> : vector<256x64xf32>
    %44 = tpu.matmul %42, %43, %cst_65 {dimension_numbers = #tpu.dot_dimension_numbers<[1], [0], [0], [1], [0, 0, 1, 1], [], []>} : vector<256x640xbf16>, vector<640x64xbf16>, vector<256x64xf32> -> vector<256x64xf32>
    %45 = vector.broadcast %8 : vector<1x64xf32> to vector<256x64xf32>
    %46 = arith.addf %44, %45 : vector<256x64xf32>
    %cst_66 = arith.constant 0.000000e+00 : f32
    %47 = vector.broadcast %cst_66 : f32 to vector<256x64xf32>
    %48 = arith.cmpf ogt, %46, %47 : vector<256x64xf32>
    %49 = vector.broadcast %10 : vector<1x64xf32> to vector<256x64xf32>
    %50 = arith.mulf %46, %49 : vector<256x64xf32>
    %51 = arith.select %48, %46, %50 : vector<256x64xi1>, vector<256x64xf32>
    %52 = vector.shape_cast %51 : vector<256x64xf32> to vector<16x16x64xf32>
    %53 = arith.truncf %52 : vector<16x16x64xf32> to vector<16x16x64xbf16>
    %c1_67 = arith.constant 1 : index
    %c1_68 = arith.constant 1 : index
    %c0_69 = arith.constant 0 : index
    %54 = vector.load %arg6[%c1_67, %c1_68, %c0_69] : memref<18x18x64xbf16, #tpu.memory_space<vmem>>, vector<16x16x64xbf16>
    tpu.vector_store %arg6[%c1_67, %c1_68, %c0_69], %53 {strides = array<i32>} : memref<18x18x64xbf16, #tpu.memory_space<vmem>>, vector<16x16x64xbf16>,
    %c0_70 = arith.constant 0 : index
    %c0_71 = arith.constant 0 : index
    %c0_72 = arith.constant 0 : index
    %55 = vector.load %arg6[%c0_70, %c0_71, %c0_72] : memref<18x18x64xbf16, #tpu.memory_space<vmem>>, vector<16x16x64xbf16>
    %56 = vector.shape_cast %55 : vector<16x16x64xbf16> to vector<256x64xbf16>
    %c0_73 = arith.constant 0 : index
    %c0_74 = arith.constant 0 : index
    %57 = vector.load %arg7[%c0_73, %c0_74] : memref<256x640xbf16, #tpu.memory_space<vmem>>, vector<256x64xbf16>
    tpu.vector_store %arg7[%c0_73, %c0_74], %56 {strides = array<i32>} : memref<256x640xbf16, #tpu.memory_space<vmem>>, vector<256x64xbf16>,
    %c0_75 = arith.constant 0 : index
    %c1_76 = arith.constant 1 : index
    %c0_77 = arith.constant 0 : index
    %58 = vector.load %arg6[%c0_75, %c1_76, %c0_77] : memref<18x18x64xbf16, #tpu.memory_space<vmem>>, vector<16x16x64xbf16>
    %59 = vector.shape_cast %58 : vector<16x16x64xbf16> to vector<256x64xbf16>
    %c0_78 = arith.constant 0 : index
    %c64_79 = arith.constant 64 : index
    %60 = vector.load %arg7[%c0_78, %c64_79] : memref<256x640xbf16, #tpu.memory_space<vmem>>, vector<256x64xbf16>
    tpu.vector_store %arg7[%c0_78, %c64_79], %59 {strides = array<i32>} : memref<256x640xbf16, #tpu.memory_space<vmem>>, vector<256x64xbf16>,
    %c0_80 = arith.constant 0 : index
    %c2_81 = arith.constant 2 : index
    %c0_82 = arith.constant 0 : index
    %61 = vector.load %arg6[%c0_80, %c2_81, %c0_82] : memref<18x18x64xbf16, #tpu.memory_space<vmem>>, vector<16x16x64xbf16>
    %62 = vector.shape_cast %61 : vector<16x16x64xbf16> to vector<256x64xbf16>
    %c0_83 = arith.constant 0 : index
    %c128_84 = arith.constant 128 : index
    %63 = vector.load %arg7[%c0_83, %c128_84] : memref<256x640xbf16, #tpu.memory_space<vmem>>, vector<256x64xbf16>
    tpu.vector_store %arg7[%c0_83, %c128_84], %62 {strides = array<i32>} : memref<256x640xbf16, #tpu.memory_space<vmem>>, vector<256x64xbf16>,
    %c1_85 = arith.constant 1 : index
    %c0_86 = arith.constant 0 : index
    %c0_87 = arith.constant 0 : index
    %64 = vector.load %arg6[%c1_85, %c0_86, %c0_87] : memref<18x18x64xbf16, #tpu.memory_space<vmem>>, vector<16x16x64xbf16>
    %65 = vector.shape_cast %64 : vector<16x16x64xbf16> to vector<256x64xbf16>
    %c0_88 = arith.constant 0 : index
    %c192_89 = arith.constant 192 : index
    %66 = vector.load %arg7[%c0_88, %c192_89] : memref<256x640xbf16, #tpu.memory_space<vmem>>, vector<256x64xbf16>
    tpu.vector_store %arg7[%c0_88, %c192_89], %65 {strides = array<i32>} : memref<256x640xbf16, #tpu.memory_space<vmem>>, vector<256x64xbf16>,
    %c1_90 = arith.constant 1 : index
    %c1_91 = arith.constant 1 : index
    %c0_92 = arith.constant 0 : index
    %67 = vector.load %arg6[%c1_90, %c1_91, %c0_92] : memref<18x18x64xbf16, #tpu.memory_space<vmem>>, vector<16x16x64xbf16>
    %68 = vector.shape_cast %67 : vector<16x16x64xbf16> to vector<256x64xbf16>
    %c0_93 = arith.constant 0 : index
    %c256_94 = arith.constant 256 : index
    %69 = vector.load %arg7[%c0_93, %c256_94] : memref<256x640xbf16, #tpu.memory_space<vmem>>, vector<256x64xbf16>
    tpu.vector_store %arg7[%c0_93, %c256_94], %68 {strides = array<i32>} : memref<256x640xbf16, #tpu.memory_space<vmem>>, vector<256x64xbf16>,
    %c1_95 = arith.constant 1 : index
    %c2_96 = arith.constant 2 : index
    %c0_97 = arith.constant 0 : index
    %70 = vector.load %arg6[%c1_95, %c2_96, %c0_97] : memref<18x18x64xbf16, #tpu.memory_space<vmem>>, vector<16x16x64xbf16>
    %71 = vector.shape_cast %70 : vector<16x16x64xbf16> to vector<256x64xbf16>
    %c0_98 = arith.constant 0 : index
    %c320_99 = arith.constant 320 : index
    %72 = vector.load %arg7[%c0_98, %c320_99] : memref<256x640xbf16, #tpu.memory_space<vmem>>, vector<256x64xbf16>
    tpu.vector_store %arg7[%c0_98, %c320_99], %71 {strides = array<i32>} : memref<256x640xbf16, #tpu.memory_space<vmem>>, vector<256x64xbf16>,
    %c2_100 = arith.constant 2 : index
    %c0_101 = arith.constant 0 : index
    %c0_102 = arith.constant 0 : index
    %73 = vector.load %arg6[%c2_100, %c0_101, %c0_102] : memref<18x18x64xbf16, #tpu.memory_space<vmem>>, vector<16x16x64xbf16>
    %74 = vector.shape_cast %73 : vector<16x16x64xbf16> to vector<256x64xbf16>
    %c0_103 = arith.constant 0 : index
    %c384_104 = arith.constant 384 : index
    %75 = vector.load %arg7[%c0_103, %c384_104] : memref<256x640xbf16, #tpu.memory_space<vmem>>, vector<256x64xbf16>
    tpu.vector_store %arg7[%c0_103, %c384_104], %74 {strides = array<i32>} : memref<256x640xbf16, #tpu.memory_space<vmem>>, vector<256x64xbf16>,
    %c2_105 = arith.constant 2 : index
    %c1_106 = arith.constant 1 : index
    %c0_107 = arith.constant 0 : index
    %76 = vector.load %arg6[%c2_105, %c1_106, %c0_107] : memref<18x18x64xbf16, #tpu.memory_space<vmem>>, vector<16x16x64xbf16>
    %77 = vector.shape_cast %76 : vector<16x16x64xbf16> to vector<256x64xbf16>
    %c0_108 = arith.constant 0 : index
    %c448_109 = arith.constant 448 : index
    %78 = vector.load %arg7[%c0_108, %c448_109] : memref<256x640xbf16, #tpu.memory_space<vmem>>, vector<256x64xbf16>
    tpu.vector_store %arg7[%c0_108, %c448_109], %77 {strides = array<i32>} : memref<256x640xbf16, #tpu.memory_space<vmem>>, vector<256x64xbf16>,
    %c2_110 = arith.constant 2 : index
    %c2_111 = arith.constant 2 : index
    %c0_112 = arith.constant 0 : index
    %79 = vector.load %arg6[%c2_110, %c2_111, %c0_112] : memref<18x18x64xbf16, #tpu.memory_space<vmem>>, vector<16x16x64xbf16>
    %80 = vector.shape_cast %79 : vector<16x16x64xbf16> to vector<256x64xbf16>
    %c0_113 = arith.constant 0 : index
    %c512_114 = arith.constant 512 : index
    %81 = vector.load %arg7[%c0_113, %c512_114] : memref<256x640xbf16, #tpu.memory_space<vmem>>, vector<256x64xbf16>
    tpu.vector_store %arg7[%c0_113, %c512_114], %80 {strides = array<i32>} : memref<256x640xbf16, #tpu.memory_space<vmem>>, vector<256x64xbf16>,
    %c0_115 = arith.constant 0 : index
    %c0_116 = arith.constant 0 : index
    %82 = vector.load %arg7[%c0_115, %c0_116] : memref<256x640xbf16, #tpu.memory_space<vmem>>, vector<256x640xbf16>
    %c0_117 = arith.constant 0 : index
    %c0_118 = arith.constant 0 : index
    %83 = vector.load %arg3[%c0_117, %c0_118] : memref<640x64xbf16, #tpu.memory_space<vmem>>, vector<640x64xbf16>
    %cst_119 = arith.constant dense<0.000000e+00> : vector<256x64xf32>
    %84 = tpu.matmul %82, %83, %cst_119 {dimension_numbers = #tpu.dot_dimension_numbers<[1], [0], [0], [1], [0, 0, 1, 1], [], []>} : vector<256x640xbf16>, vector<640x64xbf16>, vector<256x64xf32> -> vector<256x64xf32>
    %85 = vector.broadcast %9 : vector<1x64xf32> to vector<256x64xf32>
    %86 = arith.addf %84, %85 : vector<256x64xf32>
    %87 = vector.shape_cast %86 : vector<256x64xf32> to vector<16x16x64xf32>
    %c0_120 = arith.constant 0 : index
    %c0_121 = arith.constant 0 : index
    %c0_122 = arith.constant 0 : index
    %c0_123 = arith.constant 0 : index
    %88 = vector.load %arg1[%c0_120, %c0_121, %c0_122, %c0_123] : memref<1x16x16x64xf32, #tpu.memory_space<vmem>>, vector<1x16x16x64xf32>
    %89 = vector.shape_cast %88 : vector<1x16x16x64xf32> to vector<16x16x64xf32>
    %90 = arith.addf %87, %89 : vector<16x16x64xf32>
    %c0_124 = arith.constant 0 : index
    %c0_125 = arith.constant 0 : index
    %c0_126 = arith.constant 0 : index
    %c0_127 = arith.constant 0 : index
    %91 = vector.load %arg5[%c0_124, %c0_125, %c0_126, %c0_127] : memref<1x16x16x64xf32, #tpu.memory_space<vmem>>, vector<1x16x16x64xf32>
    %92 = vector.shape_cast %91 : vector<1x16x16x64xf32> to vector<16x16x64xf32>
    %93 = vector.shape_cast %90 : vector<16x16x64xf32> to vector<1x16x16x64xf32>
    tpu.vector_store %arg5[%c0_124, %c0_125, %c0_126, %c0_127], %93 {strides = array<i32>} : memref<1x16x16x64xf32, #tpu.memory_space<vmem>>, vector<1x16x16x64xf32>,
    return
  }
  func.func @transform_0(%arg0: i32) -> (i32, i32, i32, i32) {
    %c0_i32 = arith.constant 0 : i32
    %c0_i32_0 = arith.constant 0 : i32
    %c0_i32_1 = arith.constant 0 : i32
    %c0_i32_2 = arith.constant 0 : i32
    return %arg0, %c0_i32, %c0_i32_0, %c0_i32_1 : i32, i32, i32, i32
  }
  func.func @transform_1(%arg0: i32) -> (i32, i32) {
    %c0_i32 = arith.constant 0 : i32
    %c0_i32_0 = arith.constant 0 : i32
    %c0_i32_1 = arith.constant 0 : i32
    return %c0_i32, %c0_i32_0 : i32, i32
  }
  func.func @transform_2(%arg0: i32) -> (i32, i32) {
    %c0_i32 = arith.constant 0 : i32
    %c0_i32_0 = arith.constant 0 : i32
    %c0_i32_1 = arith.constant 0 : i32
    return %c0_i32, %c0_i32_0 : i32, i32
  }
  func.func @transform_3(%arg0: i32) -> (i32, i32) {
    %c0_i32 = arith.constant 0 : i32
    %c0_i32_0 = arith.constant 0 : i32
    %c0_i32_1 = arith.constant 0 : i32
    return %c0_i32, %c0_i32_0 : i32, i32
  }
  func.func @transform_4(%arg0: i32) -> (i32, i32, i32, i32) {
    %c0_i32 = arith.constant 0 : i32
    %c0_i32_0 = arith.constant 0 : i32
    %c0_i32_1 = arith.constant 0 : i32
    %c0_i32_2 = arith.constant 0 : i32
    return %arg0, %c0_i32, %c0_i32_0, %c0_i32_1 : i32, i32, i32, i32
  }
}

</mosaic_0001>

<bundles_post_ra>
// kernel: tpu_custom_call.1
= control target key start
LH: loop header
LB: loop body
LE: loop exit
PB: predicated region body
PF: predicated region fallthrough
CT: control target
= control target key end

     0   :  { %9 = vsyncpa [#allocation5], 0  ;;  %s15872_s0 = inlined_call_operand.vmem [shape: f32[2,16,16,64], index: 0, kind: input, shape index: {}]   ;;  %s15873_s1 = inlined_call_operand.vmem [shape: bf16[640,64], index: 1, kind: input, shape index: {}]   ;;  %s15874_s2 = inlined_call_operand.vmem [shape: bf16[640,64], index: 2, kind: input, shape index: {}]   ;;  %s15875_s3 = inlined_call_operand.vmem [shape: f32[8,128], index: 3, kind: input, shape index: {}]   ;;  %s15876_s4 = inlined_call_operand.hbm [shape: f32[2,16,16,64], index: 4, kind: output, shape index: {}]  }
   0x1   :  { %11 = vsyncpa [#allocation5 + $0x1], 0  ;;  %s11451_s15 = smov 0   ;;  %s11453_s16 = smov 0  }
   0x2   :  { %s11455_s17 = smov 0   ;;  %s11457_s18 = smov 0  }
   0x3 LB: > { %s11472_s19 = sadd.s32 4294967295, %s11419_s18   ;;  %s9986_s20 = sadd.s32 4294967294, %s11419_s18   ;;  %s11419_s18 = sphi %s11457_s18, %s15920_s18   ;;  %s11415_s17 = sphi %s11455_s17, %s15919_s17   ;;  %s11411_s16 = sphi %s11453_s16, %s15918_s16   ;;  %s11407_s15 = sphi %s11451_s15, %s15917_s15  }
   0x4   : > { %s11476_s21 = sadd.s32 1, %s11419_s18   ;;  %s113_s22 = sadd.s32 1, %s11415_s17 }
   0x5   : > { %s110_s23 = ssub.s32 %s11419_s18, %s11476_s21  ;;  %p123_p0 = scmp.ne.s32.totalorder %s11415_s17, %s11411_s16 }
   0x6   : > { %p111_p1 = scmp.eq.s32.totalorder %s110_s23, 0  ;;  %p124_p2 = scmp.eq.s32.totalorder %s11472_s19, 1 }
   0x7   : > { %p129_p3 = scmp.ne.s32.totalorder %s11411_s16, %s11407_s15  ;;  %p130_p4 = scmp.eq.s32.totalorder %s9986_s20, 1 }
   0x8   : > { %s11487_s24 = scalar_select %p111_p1, %s11415_s17, %s113_s22  }
   0x9   : > { %p11489_p5 = por %p124_p2, %p123_p0  ;;  %p11493_p6 = por %p130_p4, %p129_p3 }
   0xa   : > { %p9989_p7 = scmp.ge.s32.totalorder %s11419_s18, 1  ;;  %p165_p8 = scmp.lt.s32.totalorder %s11419_s18, 3 }
   0xc   : > { %p166_p9 = pnand %p9989_p7, %p165_p8 }
   0xe   : > { %169 = sbr.rel (%p166_p9) target bundleno = 1324 (0x52c), region = 36 }
  0x13   : > { %vm197_vm0 = vcmask 519168   ;;  %v11421_v0 = vmov 0   ;;  %vm200_vm1 = vcmask 516096   ;;  %vm208_vm2 = vsmask.f32 256  ;;  %p191_p10 = scmp.lt.s32.totalorder %s11472_s19, 1 }
  0x14   : > { %198 = vst.msk [vmem:[#allocation2] sm:$0xf] %vm197_vm0, %v11421_v0  ;;  %199 = vst.msk [vmem:[#allocation2 + $0x4] sm:$0xf] %vm197_vm0, %v11421_v0  ;;  %vm258_vm3 = vsmask.f32 7938 }
  0x15   : > { %203 = vst.msk [vmem:[#allocation2 + $0xcc] sm:$0xf] %vm197_vm0, %v11421_v0  ;;  %204 = vst.msk [vmem:[#allocation2 + $0xd0] sm:$0xf] %vm197_vm0, %v11421_v0  ;;  %v210_v2 = vld [vmem:[#allocation2 + $0xc] sm:$0x1] }
  0x16   : > { %201 = vst.msk [vmem:[#allocation2 + $0x8] sm:$0x1] %vm200_vm1, %v11421_v0  ;;  %vm11509_vm4 = vmand %vm200_vm1, %vm208_vm2  ;;  %v213_v3 = vld [vmem:[#allocation2 + $0x18] sm:$0x1]  ;;  %vm1020_vm5 = vsmask.f32 3328 }
  0x17   : > { %205 = vst.msk [vmem:[#allocation2 + $0xd4] sm:$0x1] %vm200_vm1, %v11421_v0  ;;  %vm1021_vm6 = vsmask.f32 7440  ;;  %vm11516_vm7 = vmand %vm200_vm1, %vm258_vm3  ;;  %v211_v5 = vsel %vm11509_vm4, 0, %v210_v2  ;;  %v214_v6 = vsel %vm11509_vm4, 0, %v213_v3 }
  0x18   : > { %v216_v7 = vld [vmem:[#allocation2 + $0x24] sm:$0x1]  ;;  %s192_s27 = scalar_select %p191_p10, %s11472_s19, 1  ;;  %212 = vst [vmem:[#allocation2 + $0xc] sm:$0x1] %v211_v5  ;;  %v11102_v18 = vld [vmem:[%s15873_s1 + $0x78] sm:$0xff]   ;;  %vm11630_vm10 = vmor %vm1020_vm5, %vm1021_vm6 }
  0x19   : > { %215 = vst [vmem:[#allocation2 + $0x18] sm:$0x1] %v214_v6  ;;  %v217_v8 = vsel %vm11509_vm4, 0, %v216_v7  ;;  %v219_v9 = vld [vmem:[#allocation2 + $0x30] sm:$0x1]  ;;  %v11103_v22 = vld [vmem:[%s15873_s1 + $0x38] sm:$0xff]   ;;  %10467 = vmatprep.subr.bf16.mxu0 %v11102_v18  ;;  %vm11636_vm11 = vmand %vm197_vm0, %vm258_vm3 }
  0x1a   : > { %v260_v10 = vld [vmem:[#allocation2 + $0x14] sm:$0x1]  ;;  %218 = vst [vmem:[#allocation2 + $0x24] sm:$0x1] %v217_v8  ;;  %v220_v11 = vsel %vm11509_vm4, 0, %v219_v9  ;;  %s10401_s28 = sshll.u32 %s192_s27, 8  ;;  %10468 = vmatpush3.bf16.msra.mxu0 %v11103_v22 }
  0x1b   : > { %v261_v12 = vsel %vm11516_vm7, 0, %v260_v10  ;;  %v263_v13 = vld [vmem:[#allocation2 + $0x20] sm:$0x1]  ;;  %v266_v14 = vld [vmem:[#allocation2 + $0x2c] sm:$0x1]  ;;  %s11541_s7 = scalar_lea.vmem %s15872_s0, %s10401_s28  ;;  %vm308_vm9 = vcmask 1043968  }
  0x1c   : > { %221 = vst [vmem:[#allocation2 + $0x30] sm:$0x1] %v220_v11  ;;  %262 = vst [vmem:[#allocation2 + $0x14] sm:$0x1] %v261_v12  ;;  %v264_v15 = vsel %vm11516_vm7, 0, %v263_v13  ;;  %v267_v16 = vsel %vm11516_vm7, 0, %v266_v14 }
  0x1d   : > { %v269_v17 = vld [vmem:[#allocation2 + $0x38] sm:$0x1]  ;;  %vm472_vm8 = vsmask.f32 4368  ;;  %265 = vst [vmem:[#allocation2 + $0x20] sm:$0x1] %v264_v15 }
  0x1e   : > { %268 = vst [vmem:[#allocation2 + $0x2c] sm:$0x1] %v267_v16  ;;  %v270_v19 = vsel %vm11516_vm7, 0, %v269_v17  ;;  %v222_v20 = vld [vmem:[#allocation2 + $0x3c] sm:$0x1]  ;;  %v344_v25 = vld [vmem:[%s11541_s7] sm:$0xff]  ;;  %vm11651_vm12 = vmor %vm208_vm2, %vm472_vm8 }
  0x1f   : > { %v272_v21 = vld [vmem:[#allocation2 + $0x44] sm:$0x1]  ;;  %v972_v23 = vld [vmem:[#allocation2] sm:$0xf]  ;;  %271 = vst [vmem:[#allocation2 + $0x38] sm:$0x1] %v270_v19  ;;  %v11551_v33 = vpack.c.bf16 %v344_v25, %v344_v25 }
  0x20   : > { %v973_v24 = vld [vmem:[#allocation2 + $0x4] sm:$0xf]  ;;  %v223_v26 = vsel %vm11509_vm4, 0, %v222_v20  ;;  %v1024_v27 = vshrl.u32 %v972_v23, 16  ;;  %v1027_v28 = vshll.u32 %v972_v23, 16  ;;  %v346_v34 = vld [vmem:[%s11541_s7 + $0x10] sm:$0xff] }
  0x21   : > { %v1033_v29 = vshll.u32 %v973_v24, 16  ;;  %v1037_v30 = vshrl.u32 %v973_v24, 16  ;;  %v974_v31 = vld [vmem:[#allocation2 + $0x8] sm:$0x1]  ;;  %224 = vst [vmem:[#allocation2 + $0x3c] sm:$0x1] %v223_v26  ;;  %v10404_v45 = vpack.c.bf16 %v346_v34, %v346_v34 }
  0x22   : > { %v1043_v32 = vshll.u32 %v974_v31, 16  ;;  %v345_v35 = vld [vmem:[%s11541_s7 + $0x8] sm:$0xff]  ;;  %v348_v36 = vld [vmem:[%s11541_s7 + $0x20] sm:$0xff]  ;;  %v273_v37 = vsel %vm11516_vm7, 0, %v272_v21  ;;  %v1026_v38 = vrot.slane %v1024_v27, 4  ;;  %v1029_v39 = vrot.slane %v1027_v28, 5 }
  0x23   : > { %v11558_v40 = vrot.slane %v1033_v29, 5  ;;  %v1039_v41 = vrot.slane %v1037_v30, 4  ;;  %274 = vst [vmem:[#allocation2 + $0x44] sm:$0x1] %v273_v37  ;;  %309 = vst.msk [vmem:[#allocation3 + $0x10] sm:$0xf] %vm308_vm9, %v11421_v0  ;;  %v10403_v49 = vpack.c.bf16 %v345_v35, %v345_v35  ;;  %v10406_v50 = vpack.c.bf16 %v348_v36, %v348_v36 }
  0x24   : > { %310 = vst.msk [vmem:[#allocation3 + $0x24] sm:$0xf] %vm308_vm9, %v11421_v0  ;;  %311 = vst.msk [vmem:[#allocation3 + $0x38] sm:$0xf] %vm308_vm9, %v11421_v0  ;;  %v1045_v42 = vrot.slane %v1043_v32, 5  ;;  %v475_v43 = vshrl.u32 %v11551_v33, 16  ;;  %v1030_v47 = vor.u32 %v1029_v39, %v1026_v38 }
  0x25   : > { %312 = vst.msk [vmem:[#allocation3 + $0x4c] sm:$0xf] %vm308_vm9, %v11421_v0  ;;  %313 = vst.msk [vmem:[#allocation3 + $0x60] sm:$0xf] %vm308_vm9, %v11421_v0  ;;  %v478_v44 = vshll.u32 %v11551_v33, 16  ;;  %v347_v46 = vld [vmem:[%s11541_s7 + $0x18] sm:$0xff]  ;;  %v1040_v48 = vor.u32 %v1039_v41, %v11558_v40 }
  0x26   : > { %314 = vst.msk [vmem:[#allocation3 + $0x74] sm:$0xf] %vm308_vm9, %v11421_v0  ;;  %315 = vst.msk [vmem:[#allocation3 + $0x88] sm:$0xf] %vm308_vm9, %v11421_v0  ;;  %v477_v52 = vrot.slane %v475_v43, 7  ;;  %v492_v53 = vshrl.u32 %v10404_v45, 16  ;;  %v10405_v55 = vpack.c.bf16 %v347_v46, %v347_v46 }
  0x27   : > { %316 = vst.msk [vmem:[#allocation3 + $0x9c] sm:$0xf] %vm308_vm9, %v11421_v0  ;;  %317 = vst.msk [vmem:[#allocation3 + $0xb0] sm:$0xf] %vm308_vm9, %v11421_v0  ;;  %v495_v54 = vshll.u32 %v10404_v45, 16  ;;  %v1031_v56 = vrot.slane %v1030_v47, 4 }
  0x28   : > { %318 = vst.msk [vmem:[#allocation3 + $0xc4] sm:$0xf] %vm308_vm9, %v11421_v0  ;;  %319 = vst.msk [vmem:[#allocation3 + $0xd8] sm:$0xf] %vm308_vm9, %v11421_v0  ;;  %v1041_v58 = vrot.slane %v1040_v48, 4  ;;  %v483_v60 = vshrl.u32 %v10403_v49, 16  ;;  %v480_v62 = vor.u32 %v478_v44, %v477_v52 }
  0x29   : > { %320 = vst.msk [vmem:[#allocation3 + $0xec] sm:$0xf] %vm308_vm9, %v11421_v0  ;;  %321 = vst.msk [vmem:[#allocation3 + $0x100] sm:$0xf] %vm308_vm9, %v11421_v0  ;;  %v796_v59 = vld [vmem:[#allocation2 + $0xc] sm:$0xf]  ;;  %v1036_v3 = vsel %vm11630_vm10, %v1031_v56, %v11558_v40 }
  0x2a   : > { %322 = vst.msk [vmem:[#allocation3 + $0x114] sm:$0xf] %vm308_vm9, %v11421_v0  ;;  %323 = vst.msk [vmem:[#allocation3 + $0x128] sm:$0xf] %vm308_vm9, %v11421_v0  ;;  %v486_v61 = vshll.u32 %v10403_v49, 16  ;;  %v494_v63 = vrot.slane %v492_v53, 7  ;;  %v1046_v5 = vsel %vm11630_vm10, %v1041_v58, %v1045_v42  ;;  %v797_v10 = vsel %vm11636_vm11, %v480_v62, %v796_v59 }
  0x2b   : > { %324 = vst.msk [vmem:[#allocation3 + $0x13c] sm:$0xf] %vm308_vm9, %v11421_v0  ;;  %325 = vst.msk [vmem:[#allocation3 + $0x150] sm:$0xf] %vm308_vm9, %v11421_v0  ;;  %v509_v2 = vshrl.u32 %v10406_v50, 16  ;;  %v485_v7 = vrot.slane %v483_v60, 7 }
  0x2c   : > { %326 = vst.msk [vmem:[#allocation3 + $0x164] sm:$0xf] %vm308_vm9, %v11421_v0  ;;  %327 = vst.msk [vmem:[#allocation3 + $0x178] sm:$0xf] %vm308_vm9, %v11421_v0  ;;  %v803_v6 = vld [vmem:[#allocation2 + $0x18] sm:$0xf]  ;;  %v497_v11 = vor.u32 %v495_v54, %v494_v63 }
  0x2d   : > { %328 = vst.msk [vmem:[#allocation3 + $0x18c] sm:$0xf] %vm308_vm9, %v11421_v0  ;;  %329 = vst.msk [vmem:[#allocation3 + $0x1a0] sm:$0xf] %vm308_vm9, %v11421_v0  ;;  %v512_v8 = vshll.u32 %v10406_v50, 16  ;;  %v349_v9 = vld [vmem:[%s11541_s7 + $0x28] sm:$0xff]  ;;  %v488_v17 = vor.u32 %v486_v61, %v485_v7 }
  0x2e   : > { %330 = vst.msk [vmem:[#allocation3 + $0x1b4] sm:$0xf] %vm308_vm9, %v11421_v0  ;;  %331 = vst.msk [vmem:[#allocation3 + $0x1c8] sm:$0xf] %vm308_vm9, %v11421_v0  ;;  %s11422_s10 = smov 64   ;;  %v11655_v13 = vrot.slane %v509_v2, 7  ;;  %v804_v23 = vsel %vm11636_vm11, %v497_v11, %v803_v6  ;;  %v10407_v25 = vpack.c.bf16 %v349_v9, %v349_v9 }
  0x2f   : > { %332 = vst.msk [vmem:[#allocation3 + $0x1dc] sm:$0xf] %vm308_vm9, %v11421_v0  ;;  %333 = vst.msk [vmem:[#allocation3 + $0x1f0] sm:$0xf] %vm308_vm9, %v11421_v0  ;;  %1407 = vrot.lane.b32.xlu0 %v1036_v3, %s11422_s10  ;;  %v498_v14 = vrot.slane %v494_v63, 4  ;;  %v350_v15 = vld [vmem:[%s11541_s7 + $0x30] sm:$0xff] }
  0x30   : > { %334 = vst.msk [vmem:[#allocation3 + $0x204] sm:$0xf] %vm308_vm9, %v11421_v0  ;;  %335 = vst.msk [vmem:[#allocation3 + $0x218] sm:$0xf] %vm308_vm9, %v11421_v0  ;;  %v800_v16 = vld [vmem:[#allocation2 + $0x14] sm:$0x1]  ;;  %v514_v24 = vor.u32 %v512_v8, %v11655_v13  ;;  %v10408_v29 = vpack.c.bf16 %v350_v15, %v350_v15 }
  0x31   : > { %336 = vst.msk [vmem:[#allocation3 + $0x22c] sm:$0xf] %vm308_vm9, %v11421_v0  ;;  %337 = vst.msk [vmem:[#allocation3 + $0x240] sm:$0xf] %vm308_vm9, %v11421_v0  ;;  %v490_v18 = vrot.slane %v485_v7, 4  ;;  %v500_v20 = vshrl.u32 %v10405_v55, 16 }
  0x32   : > { %338 = vst.msk [vmem:[#allocation3 + $0x254] sm:$0xf] %vm308_vm9, %v11421_v0  ;;  %339 = vst.msk [vmem:[#allocation3 + $0x268] sm:$0xf] %vm308_vm9, %v11421_v0  ;;  %v810_v19 = vld [vmem:[#allocation2 + $0x24] sm:$0xf] }
  0x33   : > { %340 = vst.msk [vmem:[#allocation3 + $0x27c] sm:$0xf] %vm308_vm9, %v11421_v0  ;;  %v481_v0 = vrot.slane %v477_v52, 4  ;;  %798 = vst [vmem:[#allocation2 + $0xc] sm:$0xf] %v797_v10  ;;  %v503_v21 = vshll.u32 %v10405_v55, 16  ;;  %v801_v30 = vsel %vm11509_vm4, %v490_v18, %v800_v16  ;;  %1409 = vrot.lane.b32.xlu0 %v1046_v5, %s11422_s10  ;;  %v811_v32 = vsel %vm11636_vm11, %v514_v24, %v810_v19 }
  0x34   : > { %v351_v22 = vld [vmem:[%s11541_s7 + $0x38] sm:$0xff]  ;;  %v515_v26 = vrot.slane %v11655_v13, 4  ;;  %805 = vst [vmem:[#allocation2 + $0x18] sm:$0xf] %v804_v23  ;;  %v502_v28 = vrot.slane %v500_v20, 7  ;;  %v352_v31 = vld [vmem:[%s11541_s7 + $0x40] sm:$0xff] }
  0x35   : > { %v489_v27 = vsel %vm11651_vm12, %v481_v0, %v488_v17  ;;  %v517_v33 = vshrl.u32 %v10407_v25, 16  ;;  %v520_v34 = vshll.u32 %v10407_v25, 16  ;;  %802 = vst [vmem:[#allocation2 + $0x14] sm:$0x1] %v801_v30  ;;  %v10409_v35 = vpack.c.bf16 %v351_v22, %v351_v22  ;;  %v807_v36 = vld [vmem:[#allocation2 + $0x20] sm:$0x1] }
  0x36   : > { %799 = vst.msk [vmem:[#allocation2 + $0x10] sm:$0xf] %vm197_vm0, %v489_v27  ;;  %v353_v37 = vld [vmem:[%s11541_s7 + $0x48] sm:$0xff]  ;;  %812 = vst [vmem:[#allocation2 + $0x24] sm:$0xf] %v811_v32  ;;  %v505_v38 = vor.u32 %v503_v21, %v502_v28  ;;  %v507_v39 = vrot.slane %v502_v28, 4  ;;  %v11674_v46 = vpack.c.bf16 %v352_v31, %v352_v31 }
  0x37   : > { %v526_v40 = vshrl.u32 %v10408_v29, 16  ;;  %v529_v41 = vshll.u32 %v10408_v29, 16  ;;  %v354_v42 = vld [vmem:[%s11541_s7 + $0x50] sm:$0xff]  ;;  %v519_v43 = vrot.slane %v517_v33, 7  ;;  %v534_v44 = vshrl.u32 %v10409_v35, 16  ;;  %v355_v54 = vld [vmem:[%s11541_s7 + $0x58] sm:$0xff] }
  0x38   : > { %v537_v45 = vshll.u32 %v10409_v35, 16  ;;  %v506_v47 = vsel %vm11651_vm12, %v498_v14, %v505_v38  ;;  %v817_v49 = vld [vmem:[#allocation2 + $0x30] sm:$0xf]  ;;  %v808_v50 = vsel %vm11509_vm4, %v507_v39, %v807_v36  ;;  %v814_v52 = vld [vmem:[#allocation2 + $0x2c] sm:$0x1]  ;;  %v11680_v53 = vpack.c.bf16 %v353_v37, %v353_v37  ;;  %v356_v11 = vld [vmem:[%s11541_s7 + $0x60] sm:$0xff] }
  0x39   : > { %v528_v48 = vrot.slane %v526_v40, 7  ;;  %806 = vst.msk [vmem:[#allocation2 + $0x1c] sm:$0xf] %vm197_vm0, %v506_v47  ;;  %v522_v58 = vor.u32 %v520_v34, %v519_v43  ;;  %v524_v59 = vrot.slane %v519_v43, 4  ;;  %v536_v60 = vrot.slane %v534_v44, 7  ;;  %v357_v13 = vld [vmem:[%s11541_s7 + $0x68] sm:$0xff] }
  0x3a   : > { %v1810_v55 = vld [vmem:[#allocation2 + $0xc] sm:$0xf]  ;;  %809 = vst [vmem:[#allocation2 + $0x20] sm:$0x1] %v808_v50  ;;  %v11684_v61 = vpack.c.bf16 %v354_v42, %v354_v42  ;;  %v821_v3 = vld [vmem:[#allocation2 + $0x38] sm:$0x1]  ;;  %v11697_v19 = vpack.c.bf16 %v355_v54, %v355_v54  ;;  %v11707_v40 = vpack.c.bf16 %v356_v11, %v356_v11 }
  0x3b   : > { %v975_v56 = vld [vmem:[#allocation2 + $0xc] sm:$0xf]  ;;  %1874 = vrot.lane.b32.xlu1 %v1810_v55, %s11422_s10  ;;  %v531_v0 = vor.u32 %v529_v41, %v528_v48  ;;  %v532_v2 = vrot.slane %v528_v48, 4  ;;  %v1812_v5 = vld [vmem:[#allocation2 + $0x18] sm:$0xf]  ;;  %v523_v6 = vsel %vm11651_vm12, %v515_v26, %v522_v58  ;;  %v539_v8 = vor.u32 %v537_v45, %v536_v60  ;;  %v358_v35 = vld [vmem:[%s11541_s7 + $0x70] sm:$0xff] }
  0x3c   : > { %v1048_v62 = vshrl.u32 %v975_v56, 16  ;;  %v1051_v63 = vshll.u32 %v975_v56, 16  ;;  %v978_v7 = vld [vmem:[#allocation2 + $0x18] sm:$0xf]  ;;  %v541_v9 = vrot.slane %v536_v60, 4  ;;  %v815_v10 = vsel %vm11509_vm4, %v524_v59, %v814_v52  ;;  %1878 = vrot.lane.b32.xlu0 %v1812_v5, %s11422_s10  ;;  %s188_s11 = sand.u32 1, %s11411_s16  }
  0x3d   : > { %v1811_v14 = vld [vmem:[#allocation2 + $0x10] sm:$0xf]  ;;  %813 = vst.msk [vmem:[#allocation2 + $0x28] sm:$0xf] %vm197_vm0, %v523_v6  ;;  %v818_v18 = vsel %vm11636_vm11, %v531_v0, %v817_v49  ;;  %816 = vst [vmem:[#allocation2 + $0x2c] sm:$0x1] %v815_v10  ;;  %v540_v24 = vsel %vm11651_vm12, %v532_v2, %v539_v8  ;;  %v11709_v41 = vpack.c.bf16 %v357_v13, %v357_v13 }
  0x3e   : > { %v976_v15 = vld [vmem:[#allocation2 + $0x10] sm:$0xf]  ;;  %v1050_v16 = vrot.slane %v1048_v62, 4  ;;  %v1053_v17 = vrot.slane %v1051_v63, 5  ;;  %v1814_v20 = vld [vmem:[#allocation2 + $0x24] sm:$0xf]  ;;  %v822_v25 = vsel %vm11509_vm4, %v541_v9, %v821_v3  ;;  %v11715_v62 = vpack.c.bf16 %v358_v35, %v358_v35 }
  0x3f   : > { %v1057_v21 = vshll.u32 %v976_v15, 16  ;;  %819 = vst [vmem:[#allocation2 + $0x30] sm:$0xf] %v818_v18  ;;  %v977_v22 = vld [vmem:[#allocation2 + $0x14] sm:$0x1]  ;;  %v1061_v23 = vshrl.u32 %v976_v15, 16  ;;  %1876 = vrot.lane.b32.xlu1 %v1811_v14, %s11422_s10 }
  0x40   : > { %v1054_v26 = vor.u32 %v1053_v17, %v1050_v16  ;;  %v1067_v27 = vshll.u32 %v977_v22, 16  ;;  %v1072_v28 = vshrl.u32 %v978_v7, 16  ;;  %v1075_v29 = vshll.u32 %v978_v7, 16  ;;  %820 = vst.msk [vmem:[#allocation2 + $0x34] sm:$0xf] %vm197_vm0, %v540_v24  ;;  %1882 = vrot.lane.b32.xlu0 %v1814_v20, %s11422_s10  ;;  %v359_v54 = vld [vmem:[%s11541_s7 + $0x78] sm:$0xff] }
  0x41   : > { %v981_v30 = vld [vmem:[#allocation2 + $0x24] sm:$0xf]  ;;  %823 = vst [vmem:[#allocation2 + $0x38] sm:$0x1] %v822_v25  ;;  %v1059_v31 = vrot.slane %v1057_v21, 5  ;;  %v1063_v32 = vrot.slane %v1061_v23, 4  ;;  %v11720_v10 = vpack.c.bf16 %v359_v54, %v359_v54 }
  0x42   : > { %v1096_v33 = vshrl.u32 %v981_v30, 16  ;;  %v1099_v34 = vshll.u32 %v981_v30, 16  ;;  %v1813_v36 = vld [vmem:[#allocation2 + $0x1c] sm:$0xf]  ;;  %v1055_v37 = vrot.slane %v1054_v26, 4  ;;  %v1069_v38 = vrot.slane %v1067_v27, 5 }
  0x43   : > { %v979_v39 = vld [vmem:[#allocation2 + $0x1c] sm:$0xf]  ;;  %v1064_v42 = vor.u32 %v1063_v32, %v1059_v31  ;;  %v1074_v43 = vrot.slane %v1072_v28, 4  ;;  %v1077_v44 = vrot.slane %v1075_v29, 5  ;;  %v980_v47 = vld [vmem:[#allocation2 + $0x20] sm:$0x1]  ;;  %1880 = vrot.lane.b32.xlu1 %v1813_v36, %s11422_s10 }
  0x44   : > { %v1081_v45 = vshll.u32 %v979_v39, 16  ;;  %v1060_v48 = vsel %vm11630_vm10, %v1055_v37, %v1059_v31  ;;  %v1098_v49 = vrot.slane %v1096_v33, 4  ;;  %v1101_v50 = vrot.slane %v1099_v34, 5  ;;  %v1815_v55 = vld [vmem:[#allocation2 + $0x28] sm:$0xf]  ;;  %v11104_v23 = vld [vmem:[%s15873_s1 + $0x70] sm:$0xff]  }
  0x45   : > { %v1085_v52 = vshrl.u32 %v979_v39, 16  ;;  %v1065_v56 = vrot.slane %v1064_v42, 4  ;;  %v1078_v58 = vor.u32 %v1077_v44, %v1074_v43  ;;  %v982_v60 = vld [vmem:[#allocation2 + $0x28] sm:$0xf]  ;;  %1411 = vrot.lane.b32.xlu0 %v1060_v48, %s11422_s10  ;;  %v1091_v3 = vshll.u32 %v980_v47, 16  ;;  %v11105_v29 = vld [vmem:[%s15873_s1 + $0x30] sm:$0xff]   ;;  %10469 = vmatprep.subr.bf16.mxu0 %v11104_v23 }
  0x46   : > { %v1083_v59 = vrot.slane %v1081_v45, 5  ;;  %v1102_v63 = vor.u32 %v1101_v50, %v1098_v49  ;;  %v1105_v0 = vshll.u32 %v982_v60, 16  ;;  %v1816_v5 = vld [vmem:[#allocation2 + $0x30] sm:$0xf]  ;;  %v983_v8 = vld [vmem:[#allocation2 + $0x2c] sm:$0x1]  ;;  %10470 = vmatpush3.bf16.msra.mxu0 %v11105_v29 }
  0x47   : > { %v1087_v2 = vrot.slane %v1085_v52, 4  ;;  %v1070_v6 = vsel %vm11630_vm10, %v1065_v56, %v1069_v38  ;;  %v1079_v7 = vrot.slane %v1078_v58, 4  ;;  %v1109_v9 = vshrl.u32 %v982_v60, 16  ;;  %1884 = vrot.lane.b32.xlu1 %v1815_v55, %s11422_s10  ;;  %v984_v16 = vld [vmem:[#allocation2 + $0x30] sm:$0xf]  ;;  %v11106_v39 = vld [vmem:[%s15873_s1 + $0x68] sm:$0xff]  }
  0x48   : > { %v1103_v11 = vrot.slane %v1102_v63, 4  ;;  %v1107_v13 = vrot.slane %v1105_v0, 5  ;;  %v11723_v15 = vrot.slane %v1091_v3, 5  ;;  %v1115_v20 = vshll.u32 %v983_v8, 16  ;;  %v985_v21 = vld [vmem:[#allocation2 + $0x34] sm:$0xf]  ;;  %10471 = vmatprep.subr.bf16.mxu0 %v11106_v39 }
  0x49   : > { %v1088_v14 = vor.u32 %v1087_v2, %v1083_v59  ;;  %v1084_v17 = vsel %vm11630_vm10, %v1079_v7, %v1083_v59  ;;  %v1111_v18 = vrot.slane %v1109_v9, 4  ;;  %v1120_v22 = vshrl.u32 %v984_v16, 16  ;;  %1886 = vrot.lane.b32.xlu0 %v1816_v5, %s11422_s10  ;;  %v986_v28 = vld [vmem:[#allocation2 + $0x38] sm:$0x1]  ;;  %v225_v38 = vld [vmem:[#allocation2 + $0x48] sm:$0x1] }
  0x4a   : > { %v1108_v24 = vsel %vm11630_vm10, %v1103_v11, %v1107_v13  ;;  %v1123_v26 = vshll.u32 %v984_v16, 16  ;;  %v1129_v27 = vshll.u32 %v985_v21, 16  ;;  %v11736_v31 = vrot.slane %v1115_v20, 5  ;;  %v1817_v42 = vld [vmem:[#allocation2 + $0x34] sm:$0xf]  ;;  %v11107_v55 = vld [vmem:[%s15873_s1 + $0x28] sm:$0xff]  }
  0x4b   : > { %v1089_v25 = vrot.slane %v1088_v14, 4  ;;  %v1112_v30 = vor.u32 %v1111_v18, %v1107_v13  ;;  %v1122_v32 = vrot.slane %v1120_v22, 4  ;;  %v1133_v33 = vshrl.u32 %v985_v21, 16  ;;  %1413 = vrot.lane.b32.xlu1 %v1070_v6, %s11422_s10  ;;  %v824_v50 = vld [vmem:[#allocation2 + $0x3c] sm:$0xf]  ;;  %10472 = vmatpush3.bf16.msra.mxu0 %v11107_v55  ;;  %s9990_s12 = sshll.u32 %s188_s11, 8 }
  0x4c   : > { %v1125_v35 = vrot.slane %v1123_v26, 5  ;;  %v1131_v36 = vrot.slane %v1129_v27, 5  ;;  %v1139_v37 = vshll.u32 %v986_v28, 16  ;;  %v543_v45 = vshrl.u32 %v11674_v46, 16  ;;  %v828_v59 = vld [vmem:[#allocation2 + $0x44] sm:$0x1] }
  0x4d   : > { %v1094_v34 = vsel %vm11630_vm10, %v1089_v25, %v11723_v15  ;;  %v11745_v43 = vrot.slane %v1112_v30, 4  ;;  %v1135_v44 = vrot.slane %v1133_v33, 4  ;;  %v546_v47 = vshll.u32 %v11674_v46, 16  ;;  %1415 = vrot.lane.b32.xlu0 %v1084_v17, %s11422_s10  ;;  %v275_v3 = vld [vmem:[#allocation2 + $0x50] sm:$0x1]  ;;  %v11108_v27 = vld [vmem:[%s15873_s1 + $0x60] sm:$0xff]  }
  0x4e   : > { %v1126_v48 = vor.u32 %v1125_v35, %v1122_v32  ;;  %v11750_v49 = vrot.slane %v1139_v37, 5  ;;  %v551_v52 = vshrl.u32 %v11680_v53, 16  ;;  %v554_v54 = vshll.u32 %v11680_v53, 16  ;;  %v228_v5 = vld [vmem:[#allocation2 + $0x54] sm:$0x1]  ;;  %10473 = vmatprep.subr.bf16.mxu0 %v11108_v27  ;;  %s15605_s13 = scalar_lea.vmem [#allocation4], %s9990_s12 }
  0x4f   : > { %v1118_v46 = vsel %vm11630_vm10, %v11745_v43, %v11736_v31  ;;  %v1136_v56 = vor.u32 %v1135_v44, %v1131_v36  ;;  %v545_v58 = vrot.slane %v543_v45, 7  ;;  %v226_v60 = vsel %vm11509_vm4, 0, %v225_v38  ;;  %1888 = vrot.lane.b32.xlu1 %v1817_v42, %s11422_s10  ;;  %v278_v16 = vld [vmem:[#allocation2 + $0x5c] sm:$0x1]  ;;  %v231_v21 = vld [vmem:[#allocation2 + $0x60] sm:$0x1] }
  0x50   : > { %v1127_v63 = vrot.slane %v1126_v48, 4  ;;  %v553_v53 = vrot.slane %v551_v52, 7  ;;  %227 = vst [vmem:[#allocation2 + $0x48] sm:$0x1] %v226_v60  ;;  %v560_v0 = vshrl.u32 %v11684_v61, 16  ;;  %v563_v2 = vshll.u32 %v11684_v61, 16 }
  0x51   : > { %v11766_v6 = vrot.slane %v1136_v56, 4  ;;  %v548_v7 = vor.u32 %v546_v47, %v545_v58  ;;  %v549_v8 = vrot.slane %v545_v58, 4  ;;  %v568_v9 = vshrl.u32 %v11697_v19, 16  ;;  %1419 = vrot.lane.b32.xlu0 %v1108_v24, %s11422_s10  ;;  %v281_v26 = vld [vmem:[#allocation2 + $0x68] sm:$0x1]  ;;  %v11109_v31 = vld [vmem:[%s15873_s1 + $0x20] sm:$0xff]  }
  0x52   : > { %v1132_v11 = vsel %vm11630_vm10, %v1127_v63, %v1131_v36  ;;  %v556_v13 = vor.u32 %v554_v54, %v553_v53  ;;  %v558_v14 = vrot.slane %v553_v53, 4  ;;  %v562_v15 = vrot.slane %v560_v0, 7  ;;  %10474 = vmatpush3.bf16.msra.mxu0 %v11109_v31  ;;  %v360_v45 = vld [vmem:[%s11541_s7 + $0x80] sm:$0xff]  ;;  %v11110_v47 = vld [vmem:[%s15873_s1 + $0x58] sm:$0xff]   ;;  %v361_v53 = vld [vmem:[%s11541_s7 + $0x88] sm:$0xff]  ;;  %s10466_s14 = sshll.u32 %s11472_s19, 12 }
  0x53   : > { %v1142_v61 = vsel %vm11630_vm10, %v11766_v6, %v11750_v49  ;;  %v825_v17 = vsel %vm11636_vm11, %v548_v7, %v824_v50  ;;  %v11778_v18 = vrot.slane %v568_v9, 7  ;;  %v571_v20 = vshll.u32 %v11697_v19, 16  ;;  %1417 = vrot.lane.b32.xlu1 %v1094_v34, %s11422_s10  ;;  %v908_v54 = vld [vmem:[#allocation2] sm:$0xf]  ;;  %10475 = vmatprep.subr.bf16.mxu0 %v11110_v47  ;;  %s9924_s20 = sshll.u32 %s15605_s13, 4  ;;  %s15822_s27 = scalar_lea.hbm %s15876_s4, %s10466_s14  ;;  %s15824_s20 = int_to_ptr.vmem [resolvable:$true] %s9924_s20 }
  0x54   : > { %826 = vst [vmem:[#allocation2 + $0x3c] sm:$0xf] %v825_v17  ;;  %v557_v22 = vsel %vm11651_vm12, %v549_v8, %v556_v13  ;;  %v829_v23 = vsel %vm11509_vm4, %v558_v14, %v828_v59  ;;  %v565_v24 = vor.u32 %v563_v2, %v562_v15  ;;  %v566_v25 = vrot.slane %v562_v15, 4  ;;  %940 = vst.msk [vmem:[#allocation3] sm:$0xf] %vm197_vm0, %v908_v54  ;;  %s15832_s19 = scalar_lea.sflag [#allocation5], %s188_s11 }
  0x55   : > { %827 = vst.msk [vmem:[#allocation2 + $0x40] sm:$0xf] %vm197_vm0, %v557_v22  ;;  %830 = vst [vmem:[#allocation2 + $0x44] sm:$0x1] %v829_v23  ;;  %v573_v19 = vor.u32 %v571_v20, %v11778_v18  ;;  %v575_v28 = vrot.slane %v11778_v18, 4  ;;  %v276_v29 = vsel %vm11516_vm7, 0, %v275_v3  ;;  %1423 = vrot.lane.b32.xlu0 %v1132_v11, %s11422_s10  ;;  %v11835_v14 = vpack.c.bf16 %v360_v45, %v360_v45 }
  0x56   : > { %v229_v30 = vsel %vm11509_vm4, 0, %v228_v5  ;;  %277 = vst [vmem:[#allocation2 + $0x50] sm:$0x1] %v276_v29  ;;  %v577_v32 = vshrl.u32 %v11707_v40, 16  ;;  %v580_v33 = vshll.u32 %v11707_v40, 16  ;;  %v585_v34 = vshrl.u32 %v11709_v41, 16 }
  0x57   : > { %230 = vst [vmem:[#allocation2 + $0x54] sm:$0x1] %v229_v30  ;;  %v588_v35 = vshll.u32 %v11709_v41, 16  ;;  %v831_v36 = vld [vmem:[#allocation2 + $0x48] sm:$0xf]  ;;  %v574_v37 = vsel %vm11651_vm12, %v566_v25, %v573_v19  ;;  %v279_v38 = vsel %vm11516_vm7, 0, %v278_v16  ;;  %1421 = vrot.lane.b32.xlu1 %v1118_v46, %s11422_s10  ;;  %v11850_v30 = vpack.c.bf16 %v361_v53, %v361_v53 }
  0x58   : > { %v232_v39 = vsel %vm11509_vm4, 0, %v231_v21  ;;  %v594_v42 = vshrl.u32 %v11715_v62, 16  ;;  %v832_v40 = vsel %vm11636_vm11, %v565_v24, %v831_v36  ;;  %834 = vst.msk [vmem:[#allocation2 + $0x4c] sm:$0xf] %vm197_vm0, %v574_v37  ;;  %v579_v41 = vrot.slane %v577_v32, 7  ;;  %v11111_v21 = vld [vmem:[%s15873_s1 + $0x18] sm:$0xff]  }
  0x59   : > { %v11815_v43 = vrot.slane %v585_v34, 7  ;;  %280 = vst [vmem:[#allocation2 + $0x5c] sm:$0x1] %v279_v38  ;;  %233 = vst [vmem:[#allocation2 + $0x60] sm:$0x1] %v232_v39  ;;  %v597_v44 = vshll.u32 %v11715_v62, 16  ;;  %10476 = vmatpush3.bf16.msra.mxu0 %v11111_v21 }
  0x5a   : > { %833 = vst [vmem:[#allocation2 + $0x48] sm:$0xf] %v832_v40  ;;  %v596_v48 = vrot.slane %v594_v42, 7  ;;  %v602_v49 = vshrl.u32 %v11720_v10, 16  ;;  %v605_v50 = vshll.u32 %v11720_v10, 16  ;;  %v282_v52 = vsel %vm11516_vm7, 0, %v281_v26 }
  0x5b   : > { %v583_v55 = vrot.slane %v579_v41, 4  ;;  %v590_v46 = vor.u32 %v588_v35, %v11815_v43  ;;  %v592_v62 = vrot.slane %v11815_v43, 4  ;;  %283 = vst [vmem:[#allocation2 + $0x68] sm:$0x1] %v282_v52  ;;  %v1818_v56 = vld [vmem:[#allocation2 + $0x3c] sm:$0xf]  ;;  %v582_v59 = vor.u32 %v580_v33, %v579_v41  ;;  %1425 = vrot.lane.b32.xlu1 %v1142_v61, %s11422_s10 }
  0x5c   : > { %v987_v58 = vld [vmem:[#allocation2 + $0x3c] sm:$0xf]  ;;  %v600_v60 = vrot.slane %v596_v48, 4  ;;  %v604_v63 = vrot.slane %v602_v49, 7  ;;  %1890 = vrot.lane.b32.xlu0 %v1818_v56, %s11422_s10  ;;  %v1819_v10 = vld [vmem:[#allocation2 + $0x40] sm:$0xf]  ;;  %v599_v6 = vor.u32 %v597_v44, %v596_v48 }
  0x5d   : > { %v988_v0 = vld [vmem:[#allocation2 + $0x40] sm:$0xf]  ;;  %v1144_v2 = vshrl.u32 %v987_v58, 16  ;;  %v1147_v3 = vshll.u32 %v987_v58, 16  ;;  %v591_v5 = vsel %vm11651_vm12, %v583_v55, %v590_v46  ;;  %v989_v8 = vld [vmem:[#allocation2 + $0x44] sm:$0x1] }
  0x5e   : > { %v1153_v7 = vshll.u32 %v988_v0, 16  ;;  %v1157_v9 = vshrl.u32 %v988_v0, 16  ;;  %v835_v11 = vld [vmem:[#allocation2 + $0x50] sm:$0x1]  ;;  %841 = vst.msk [vmem:[#allocation2 + $0x58] sm:$0xf] %vm197_vm0, %v591_v5  ;;  %v607_v13 = vor.u32 %v605_v50, %v604_v63 }
  0x5f   : > { %v1146_v15 = vrot.slane %v1144_v2, 4  ;;  %v1149_v16 = vrot.slane %v1147_v3, 5  ;;  %v1163_v61 = vshll.u32 %v989_v8, 16  ;;  %v836_v17 = vsel %vm11509_vm4, %v575_v28, %v835_v11  ;;  %v838_v20 = vld [vmem:[#allocation2 + $0x54] sm:$0xf]  ;;  %1892 = vrot.lane.b32.xlu1 %v1819_v10, %s11422_s10  ;;  %s11423_s28 = smov [#allocation4]  }
  0x60   : > { %v1155_v22 = vrot.slane %v1153_v7, 5  ;;  %v1159_v23 = vrot.slane %v1157_v9, 4  ;;  %v991_v24 = vld [vmem:[#allocation2 + $0x4c] sm:$0xf]  ;;  %837 = vst [vmem:[#allocation2 + $0x50] sm:$0x1] %v836_v17  ;;  %v839_v25 = vsel %vm11636_vm11, %v582_v59, %v838_v20  ;;  %v608_v26 = vsel %vm11651_vm12, %v600_v60, %v607_v13 }
  0x61   : > { %v1150_v18 = vor.u32 %v1149_v16, %v1146_v15  ;;  %v1165_v27 = vrot.slane %v1163_v61, 5  ;;  %v990_v19 = vld [vmem:[#allocation2 + $0x48] sm:$0xf]  ;;  %v1177_v28 = vshll.u32 %v991_v24, 16  ;;  %840 = vst [vmem:[#allocation2 + $0x54] sm:$0xf] %v839_v25 }
  0x62   : > { %848 = vst.msk [vmem:[#allocation2 + $0x64] sm:$0xf] %vm197_vm0, %v608_v26  ;;  %v234_v29 = vld [vmem:[#allocation2 + $0x6c] sm:$0x1]  ;;  %v1160_v31 = vor.u32 %v1159_v23, %v1155_v22  ;;  %v1168_v32 = vshrl.u32 %v990_v19, 16  ;;  %v1171_v33 = vshll.u32 %v990_v19, 16 }
  0x63   : > { %v1181_v34 = vshrl.u32 %v991_v24, 16  ;;  %v842_v35 = vld [vmem:[#allocation2 + $0x5c] sm:$0x1]  ;;  %v362_v36 = vld [vmem:[%s11541_s7 + $0x90] sm:$0xff]  ;;  %v1151_v37 = vrot.slane %v1150_v18, 4  ;;  %v11853_v38 = vrot.slane %v1177_v28, 5 }
  0x64   : > { %v843_v39 = vsel %vm11509_vm4, %v592_v62, %v842_v35  ;;  %v845_v42 = vld [vmem:[#allocation2 + $0x60] sm:$0xf]  ;;  %v609_v40 = vrot.slane %v604_v63, 4  ;;  %v11112_v41 = vld [vmem:[%s15873_s1 + $0x50] sm:$0xff]   ;;  %v1161_v43 = vrot.slane %v1160_v31, 4  ;;  %v1170_v44 = vrot.slane %v1168_v32, 4 }
  0x65   : > { %v1173_v45 = vrot.slane %v1171_v33, 5  ;;  %v1183_v47 = vrot.slane %v1181_v34, 4  ;;  %844 = vst [vmem:[#allocation2 + $0x5c] sm:$0x1] %v843_v39  ;;  %v849_v48 = vld [vmem:[#allocation2 + $0x68] sm:$0x1]  ;;  %v1156_v49 = vsel %vm11630_vm10, %v1151_v37, %v1155_v22  ;;  %v846_v52 = vsel %vm11636_vm11, %v599_v6, %v845_v42  ;;  %10477 = vmatprep.subr.bf16.mxu0 %v11112_v41 }
  0x66   : > { %v994_v50 = vld [vmem:[#allocation2 + $0x58] sm:$0xf]  ;;  %v850_v54 = vsel %vm11509_vm4, %v609_v40, %v849_v48  ;;  %v235_v55 = vsel %vm11509_vm4, 0, %v234_v29  ;;  %v11113_v46 = vld [vmem:[%s15873_s1 + $0x10] sm:$0xff]   ;;  %1427 = vrot.lane.b32.xlu0 %v1156_v49, %s11422_s10  ;;  %v1166_v62 = vsel %vm11630_vm10, %v1161_v43, %v1165_v27  ;;  %847 = vst [vmem:[#allocation2 + $0x60] sm:$0xf] %v846_v52  ;;  %v11878_v2 = vpack.c.bf16 %v362_v36, %v362_v36 }
  0x67   : > { %v1174_v56 = vor.u32 %v1173_v45, %v1170_v44  ;;  %v1184_v58 = vor.u32 %v1183_v47, %v11853_v38  ;;  %v1201_v59 = vshll.u32 %v994_v50, 16  ;;  %851 = vst [vmem:[#allocation2 + $0x68] sm:$0x1] %v850_v54  ;;  %236 = vst [vmem:[#allocation2 + $0x6c] sm:$0x1] %v235_v55  ;;  %v363_v60 = vld [vmem:[%s11541_s7 + $0x98] sm:$0xff]  ;;  %1429 = vrot.lane.b32.xlu1 %v1166_v62, %s11422_s10  ;;  %10478 = vmatpush3.bf16.msra.mxu0 %v11113_v46 }
  0x68   : > { %v1820_v63 = vld [vmem:[#allocation2 + $0x48] sm:$0xf]  ;;  %v992_v53 = vld [vmem:[#allocation2 + $0x50] sm:$0x1]  ;;  %v1205_v10 = vshrl.u32 %v994_v50, 16  ;;  %v611_v0 = vshrl.u32 %v11835_v14, 16  ;;  %v11888_v23 = vpack.c.bf16 %v363_v60, %v363_v60 }
  0x69   : > { %v1821_v3 = vld [vmem:[#allocation2 + $0x4c] sm:$0xf]  ;;  %v1175_v5 = vrot.slane %v1174_v56, 4  ;;  %v1185_v6 = vrot.slane %v1184_v58, 4  ;;  %v1187_v7 = vshll.u32 %v992_v53, 16  ;;  %v11880_v8 = vrot.slane %v1201_v59, 5 }
  0x6a   : > { %v364_v9 = vld [vmem:[%s11541_s7 + $0xa0] sm:$0xff]  ;;  %v993_v11 = vld [vmem:[#allocation2 + $0x54] sm:$0xf]  ;;  %v1207_v13 = vrot.slane %v1205_v10, 4  ;;  %v11883_v15 = vrot.slane %v611_v0, 7  ;;  %v614_v16 = vshll.u32 %v11835_v14, 16  ;;  %1894 = vrot.lane.b32.xlu0 %v1820_v63, %s11422_s10 }
  0x6b   : > { %v619_v61 = vshrl.u32 %v11850_v30, 16  ;;  %v1189_v17 = vrot.slane %v1187_v7, 5  ;;  %v1192_v20 = vshrl.u32 %v993_v11, 16  ;;  %v1195_v21 = vshll.u32 %v993_v11, 16  ;;  %v997_v22 = vld [vmem:[#allocation2 + $0x64] sm:$0xf]  ;;  %1896 = vrot.lane.b32.xlu1 %v1821_v3, %s11422_s10 }
  0x6c   : > { %v11114_v24 = vld [vmem:[%s15873_s1 + $0x48] sm:$0xff]   ;;  %v1180_v14 = vsel %vm11630_vm10, %v1175_v5, %v11853_v38  ;;  %v995_v25 = vld [vmem:[#allocation2 + $0x5c] sm:$0x1]  ;;  %v1208_v26 = vor.u32 %v1207_v13, %v11880_v8  ;;  %v1225_v18 = vshll.u32 %v997_v22, 16  ;;  %v1229_v27 = vshrl.u32 %v997_v22, 16  ;;  %v366_v34 = vld [vmem:[%s11541_s7 + $0xb0] sm:$0xff] }
  0x6d   : > { %v909_v19 = vld [vmem:[#allocation2 + $0x4] sm:$0xf]  ;;  %v1190_v28 = vsel %vm11630_vm10, %v1185_v6, %v1189_v17  ;;  %v1194_v29 = vrot.slane %v1192_v20, 4  ;;  %v1197_v31 = vrot.slane %v1195_v21, 5  ;;  %v1211_v32 = vshll.u32 %v995_v25, 16  ;;  %v365_v33 = vld [vmem:[%s11541_s7 + $0xa8] sm:$0xff]  ;;  %10479 = vmatprep.subr.bf16.mxu0 %v11114_v24 }
  0x6e   : > { %941 = vst.msk [vmem:[#allocation3 + $0x14] sm:$0xf] %vm197_vm0, %v909_v19  ;;  %v11115_v35 = vld [vmem:[%s15873_s1 + $0x8] sm:$0xff]   ;;  %v1822_v36 = vld [vmem:[#allocation2 + $0x54] sm:$0xf]  ;;  %v11906_v37 = vrot.slane %v1208_v26, 4  ;;  %v616_v42 = vor.u32 %v614_v16, %v11883_v15  ;;  %v11911_v41 = vpack.c.bf16 %v364_v9, %v364_v9  ;;  %1431 = vrot.lane.b32.xlu0 %v1180_v14, %s11422_s10  ;;  %v11917_v46 = vpack.c.bf16 %v365_v33, %v365_v33 }
  0x6f   : > { %v996_v38 = vld [vmem:[#allocation2 + $0x60] sm:$0xf]  ;;  %v11908_v39 = vrot.slane %v1225_v18, 5  ;;  %v284_v40 = vld [vmem:[#allocation2 + $0x74] sm:$0x1]  ;;  %v1198_v43 = vor.u32 %v1197_v31, %v1194_v29  ;;  %v1213_v44 = vrot.slane %v1211_v32, 5  ;;  %10480 = vmatpush3.bf16.msra.mxu0 %v11115_v35  ;;  %1433 = vrot.lane.b32.xlu1 %v1190_v28, %s11422_s10  ;;  %v11919_v60 = vpack.c.bf16 %v366_v34, %v366_v34 }
  0x70   : > { %v1216_v45 = vshrl.u32 %v996_v38, 16  ;;  %v1219_v47 = vshll.u32 %v996_v38, 16  ;;  %v998_v48 = vld [vmem:[#allocation2 + $0x68] sm:$0x1]  ;;  %v237_v49 = vld [vmem:[#allocation2 + $0x78] sm:$0x1] }
  0x71   : > { %v1231_v50 = vrot.slane %v1229_v27, 4  ;;  %v1235_v52 = vshll.u32 %v998_v48, 16  ;;  %v852_v54 = vld [vmem:[#allocation2 + $0x6c] sm:$0xf]  ;;  %v11915_v55 = vrot.slane %v619_v61, 7  ;;  %v1199_v56 = vrot.slane %v1198_v43, 4 }
  0x72   : > { %v1823_v62 = vld [vmem:[#allocation2 + $0x58] sm:$0xf]  ;;  %v1218_v58 = vrot.slane %v1216_v45, 4  ;;  %v1221_v59 = vrot.slane %v1219_v47, 5  ;;  %v11116_v63 = vld [vmem:[%s15873_s1 + $0x40] sm:$0xff]   ;;  %v853_v10 = vsel %vm11636_vm11, %v616_v42, %v852_v54  ;;  %v617_v0 = vrot.slane %v11883_v15, 4  ;;  %1898 = vrot.lane.b32.xlu0 %v1822_v36, %s11422_s10 }
  0x73   : > { %v1232_v53 = vor.u32 %v1231_v50, %v11908_v39  ;;  %v622_v3 = vshll.u32 %v11850_v30, 16  ;;  %v1214_v5 = vsel %vm11630_vm10, %v11906_v37, %v1213_v44  ;;  %v11933_v7 = vrot.slane %v1235_v52, 5  ;;  %854 = vst [vmem:[#allocation2 + $0x6c] sm:$0xf] %v853_v10  ;;  %v287_v11 = vld [vmem:[#allocation2 + $0x80] sm:$0x1]  ;;  %10481 = vmatprep.subr.bf16.mxu0 %v11116_v63  ;;  %1900 = vrot.lane.b32.xlu1 %v1823_v62, %s11422_s10 }
  0x74   : > { %v1222_v6 = vor.u32 %v1221_v59, %v1218_v58  ;;  %v285_v9 = vsel %vm11516_vm7, 0, %v284_v40  ;;  %v367_v13 = vld [vmem:[%s11541_s7 + $0xb8] sm:$0xff]  ;;  %v1204_v30 = vsel %vm11630_vm10, %v1199_v56, %v11880_v8  ;;  %v238_v16 = vsel %vm11509_vm4, 0, %v237_v49  ;;  %v240_v17 = vld [vmem:[#allocation2 + $0x84] sm:$0x1]  ;;  %s11363_s29 = sshll.u32 %s11423_s28, 4  ;;  %s11364_s29 = int_to_ptr.vmem [resolvable:$false] %s11363_s29 }
  0x75   : > { %v624_v15 = vor.u32 %v622_v3, %v11915_v55  ;;  %286 = vst [vmem:[#allocation2 + $0x74] sm:$0x1] %v285_v9  ;;  %v628_v61 = vshrl.u32 %v11878_v2, 16  ;;  %v11117_v20 = vld [vmem:[%s15873_s1] sm:$0xff]   ;;  %v11949_v21 = vrot.slane %v1232_v53, 4  ;;  %v631_v22 = vshll.u32 %v11878_v2, 16  ;;  %p11366_p0 = scmp.lt.s32.totalorder %s15824_s20, %s11364_s29 }
  0x76   : > { %239 = vst [vmem:[#allocation2 + $0x78] sm:$0x1] %v238_v16  ;;  %v636_v8 = vshrl.u32 %v11888_v23, 16  ;;  %v639_v24 = vshll.u32 %v11888_v23, 16  ;;  %v290_v14 = vld [vmem:[#allocation2 + $0x8c] sm:$0x1]  ;;  %v11958_v27 = vpack.c.bf16 %v367_v13, %v367_v13  ;;  %10482 = vmatpush3.bf16.msra.mxu0 %v11117_v20  ;;  %1435 = vrot.lane.b32.xlu0 %v1204_v30, %s11422_s10 }
  0x77   : > { %v625_v25 = vsel %vm11651_vm12, %v617_v0, %v624_v15  ;;  %v630_v26 = vrot.slane %v628_v61, 7  ;;  %v288_v18 = vsel %vm11516_vm7, 0, %v287_v11  ;;  %v1223_v19 = vrot.slane %v1222_v6, 4  ;;  %v11120_v29 = vld [vmem:[%s15873_s1 + $0x138] sm:$0xff]   ;;  %1437 = vrot.lane.b32.xlu1 %v1214_v5, %s11422_s10  ;;  %v1824_v31 = vld [vmem:[#allocation2 + $0x60] sm:$0xf] }
  0x78   : > { %855 = vst.msk [vmem:[#allocation2 + $0x70] sm:$0xf] %vm197_vm0, %v625_v25  ;;  %v638_v2 = vrot.slane %v636_v8, 7  ;;  %289 = vst [vmem:[#allocation2 + $0x80] sm:$0x1] %v288_v18  ;;  %v241_v23 = vsel %vm11509_vm4, 0, %v240_v17  ;;  %10963 = vmatprep.subr.bf16.mxu0 %v11120_v29  ;;  %v1238_v44 = vsel %vm11630_vm10, %v11949_v21, %v11933_v7 }
  0x79   : > { %v645_v28 = vshrl.u32 %v11911_v41, 16  ;;  %v626_v32 = vrot.slane %v11915_v55, 4  ;;  %v634_v33 = vrot.slane %v630_v26, 4  ;;  %242 = vst [vmem:[#allocation2 + $0x84] sm:$0x1] %v241_v23  ;;  %v648_v34 = vshll.u32 %v11911_v41, 16 }
  0x7a   : > { %v653_v35 = vshrl.u32 %v11917_v46, 16  ;;  %v243_v36 = vld [vmem:[#allocation2 + $0x90] sm:$0x1]  ;;  %v1825_v37 = vld [vmem:[#allocation2 + $0x64] sm:$0xf]  ;;  %v633_v38 = vor.u32 %v631_v22, %v630_v26  ;;  %v641_v42 = vor.u32 %v639_v24, %v638_v2  ;;  %v656_v43 = vshll.u32 %v11917_v46, 16  ;;  %1902 = vrot.lane.b32.xlu0 %v1824_v31, %s11422_s10 }
  0x7b   : > { %v647_v40 = vrot.slane %v645_v28, 7  ;;  %v999_v45 = vld [vmem:[#allocation2 + $0x6c] sm:$0xf]  ;;  %v643_v47 = vrot.slane %v638_v2, 4  ;;  %v291_v41 = vsel %vm11516_vm7, 0, %v290_v14  ;;  %v1228_v49 = vsel %vm11630_vm10, %v1223_v19, %v11908_v39  ;;  %1904 = vrot.lane.b32.xlu1 %v1825_v37, %s11422_s10  ;;  %v368_v5 = vld [vmem:[%s11541_s7 + $0xc0] sm:$0xff] }
  0x7c   : > { %v655_v48 = vrot.slane %v653_v35, 7  ;;  %v1240_v50 = vshrl.u32 %v999_v45, 16  ;;  %v1243_v52 = vshll.u32 %v999_v45, 16  ;;  %v856_v54 = vld [vmem:[#allocation2 + $0x74] sm:$0x1]  ;;  %v642_v55 = vsel %vm11651_vm12, %v634_v33, %v641_v42  ;;  %s11365_s30 = scalar_lea.vmem %s11364_s29, 8192 }
  0x7d   : > { %292 = vst [vmem:[#allocation2 + $0x8c] sm:$0x1] %v291_v41  ;;  %v857_v46 = vsel %vm11509_vm4, %v626_v32, %v856_v54  ;;  %v859_v62 = vld [vmem:[#allocation2 + $0x78] sm:$0xf]  ;;  %862 = vst.msk [vmem:[#allocation2 + $0x7c] sm:$0xf] %vm197_vm0, %v642_v55  ;;  %v650_v56 = vor.u32 %v648_v34, %v647_v40  ;;  %v12005_v8 = vpack.c.bf16 %v368_v5, %v368_v5 }
  0x7e   : > { %v651_v58 = vrot.slane %v647_v40, 4  ;;  %v658_v59 = vor.u32 %v656_v43, %v655_v48  ;;  %v1242_v39 = vrot.slane %v1240_v50, 4  ;;  %v1245_v63 = vrot.slane %v1243_v52, 5  ;;  %858 = vst [vmem:[#allocation2 + $0x74] sm:$0x1] %v857_v46  ;;  %1439 = vrot.lane.b32.xlu0 %v1228_v49, %s11422_s10  ;;  %v369_v49 = vld [vmem:[%s11541_s7 + $0xc8] sm:$0xff] }
  0x7f   : > { %v860_v53 = vsel %vm11636_vm11, %v633_v38, %v859_v62  ;;  %v244_v10 = vsel %vm11509_vm4, 0, %v243_v36  ;;  %v293_v0 = vld [vmem:[#allocation2 + $0x98] sm:$0x1]  ;;  %v246_v3 = vld [vmem:[#allocation2 + $0x9c] sm:$0x1]  ;;  %v660_v11 = vrot.slane %v655_v48, 4  ;;  %1441 = vrot.lane.b32.xlu1 %v1238_v44, %s11422_s10 }
  0x80   : > { %v1000_v6 = vld [vmem:[#allocation2 + $0x70] sm:$0xf]  ;;  %861 = vst [vmem:[#allocation2 + $0x78] sm:$0xf] %v860_v53  ;;  %v863_v7 = vld [vmem:[#allocation2 + $0x80] sm:$0x1]  ;;  %v659_v9 = vsel %vm11651_vm12, %v651_v58, %v658_v59  ;;  %v1246_v13 = vor.u32 %v1245_v63, %v1242_v39 }
  0x81   : > { %245 = vst [vmem:[#allocation2 + $0x90] sm:$0x1] %v244_v10  ;;  %v1249_v30 = vshll.u32 %v1000_v6, 16  ;;  %v1253_v15 = vshrl.u32 %v1000_v6, 16  ;;  %v864_v16 = vsel %vm11509_vm4, %v643_v47, %v863_v7  ;;  %v866_v61 = vld [vmem:[#allocation2 + $0x84] sm:$0xf] }
  0x82   : > { %869 = vst.msk [vmem:[#allocation2 + $0x88] sm:$0xf] %vm197_vm0, %v659_v9  ;;  %v1826_v17 = vld [vmem:[#allocation2 + $0x6c] sm:$0xf]  ;;  %865 = vst [vmem:[#allocation2 + $0x80] sm:$0x1] %v864_v16  ;;  %v867_v20 = vsel %vm11636_vm11, %v650_v56, %v866_v61  ;;  %v10427_v9 = vpack.c.bf16 %v369_v49, %v369_v49 }
  0x83   : > { %v662_v21 = vshrl.u32 %v11919_v60, 16  ;;  %v670_v22 = vshrl.u32 %v11958_v27, 16  ;;  %v1827_v24 = vld [vmem:[#allocation2 + $0x70] sm:$0xf]  ;;  %v1247_v14 = vrot.slane %v1246_v13, 4  ;;  %v1251_v25 = vrot.slane %v1249_v30, 5  ;;  %1906 = vrot.lane.b32.xlu0 %v1826_v17, %s11422_s10 }
  0x84   : > { %v1255_v26 = vrot.slane %v1253_v15, 4  ;;  %868 = vst [vmem:[#allocation2 + $0x84] sm:$0xf] %v867_v20  ;;  %v673_v18 = vshll.u32 %v11958_v27, 16  ;;  %v870_v19 = vld [vmem:[#allocation2 + $0x8c] sm:$0x1]  ;;  %1908 = vrot.lane.b32.xlu1 %v1827_v24, %s11422_s10 }
  0x85   : > { %v664_v2 = vrot.slane %v662_v21, 7  ;;  %v12008_v23 = vrot.slane %v670_v22, 7  ;;  %v294_v28 = vsel %vm11516_vm7, 0, %v293_v0  ;;  %v247_v29 = vsel %vm11509_vm4, 0, %v246_v3  ;;  %v1003_v32 = vld [vmem:[#allocation2 + $0x7c] sm:$0xf] }
  0x86   : > { %v1256_v31 = vor.u32 %v1255_v26, %v1251_v25  ;;  %v871_v33 = vsel %vm11509_vm4, %v660_v11, %v870_v19  ;;  %v665_v34 = vshll.u32 %v11919_v60, 16  ;;  %295 = vst [vmem:[#allocation2 + $0x98] sm:$0x1] %v294_v28  ;;  %248 = vst [vmem:[#allocation2 + $0x9c] sm:$0x1] %v247_v29  ;;  %v1252_v27 = vsel %vm11630_vm10, %v1247_v14, %v1251_v25  ;;  %v370_v53 = vld [vmem:[%s11541_s7 + $0xd0] sm:$0xff] }
  0x87   : > { %v1001_v35 = vld [vmem:[#allocation2 + $0x74] sm:$0x1]  ;;  %v1273_v36 = vshll.u32 %v1003_v32, 16  ;;  %v1277_v37 = vshrl.u32 %v1003_v32, 16  ;;  %872 = vst [vmem:[#allocation2 + $0x8c] sm:$0x1] %v871_v33  ;;  %v675_v44 = vor.u32 %v673_v18, %v12008_v23  ;;  %1443 = vrot.lane.b32.xlu0 %v1252_v27, %s11422_s10  ;;  %v12039_v18 = vpack.c.bf16 %v370_v53, %v370_v53 }
  0x88   : > { %v668_v38 = vrot.slane %v664_v2, 4  ;;  %v1257_v42 = vrot.slane %v1256_v31, 4  ;;  %v1259_v40 = vshll.u32 %v1001_v35, 16  ;;  %v1002_v43 = vld [vmem:[#allocation2 + $0x78] sm:$0xf]  ;;  %v679_v60 = vshrl.u32 %v12005_v8, 16 }
  0x89   : > { %v1264_v45 = vshrl.u32 %v1002_v43, 16  ;;  %v1267_v47 = vshll.u32 %v1002_v43, 16  ;;  %v1275_v48 = vrot.slane %v1273_v36, 5  ;;  %v1279_v41 = vrot.slane %v1277_v37, 4  ;;  %v1004_v52 = vld [vmem:[#allocation2 + $0x80] sm:$0x1] }
  0x8a   : > { %v1261_v50 = vrot.slane %v1259_v40, 5  ;;  %v1006_v54 = vld [vmem:[#allocation2 + $0x88] sm:$0xf]  ;;  %v667_v55 = vor.u32 %v665_v34, %v664_v2  ;;  %v676_v46 = vsel %vm11651_vm12, %v668_v38, %v675_v44  ;;  %v677_v62 = vrot.slane %v12008_v23, 4  ;;  %v1828_v56 = vld [vmem:[#allocation2 + $0x78] sm:$0xf] }
  0x8b   : > { %v1266_v58 = vrot.slane %v1264_v45, 4  ;;  %v1269_v59 = vrot.slane %v1267_v47, 5  ;;  %v1280_v39 = vor.u32 %v1279_v41, %v1275_v48  ;;  %v1283_v63 = vshll.u32 %v1004_v52, 16  ;;  %876 = vst.msk [vmem:[#allocation2 + $0x94] sm:$0xf] %vm197_vm0, %v676_v46  ;;  %v371_v61 = vld [vmem:[%s11541_s7 + $0xd8] sm:$0xff]  ;;  %1910 = vrot.lane.b32.xlu0 %v1828_v56, %s11422_s10 }
  0x8c   : > { %v1262_v10 = vsel %vm11630_vm10, %v1257_v42, %v1261_v50  ;;  %v1829_v0 = vld [vmem:[#allocation2 + $0x7c] sm:$0xf]  ;;  %v1005_v3 = vld [vmem:[#allocation2 + $0x84] sm:$0xf]  ;;  %v1297_v5 = vshll.u32 %v1006_v54, 16  ;;  %v1301_v6 = vshrl.u32 %v1006_v54, 16  ;;  %v12044_v31 = vpack.c.bf16 %v371_v61, %v371_v61 }
  0x8d   : > { %v873_v7 = vld [vmem:[#allocation2 + $0x90] sm:$0xf]  ;;  %1445 = vrot.lane.b32.xlu1 %v1262_v10, %s11422_s10  ;;  %v1270_v11 = vor.u32 %v1269_v59, %v1266_v58  ;;  %v1281_v13 = vrot.slane %v1280_v39, 4  ;;  %v1285_v30 = vrot.slane %v1283_v63, 5  ;;  %v1288_v15 = vshrl.u32 %v1005_v3, 16  ;;  %v372_v19 = vld [vmem:[%s11541_s7 + $0xe0] sm:$0xff] }
  0x8e   : > { %v877_v16 = vld [vmem:[#allocation2 + $0x98] sm:$0x1]  ;;  %v1291_v17 = vshll.u32 %v1005_v3, 16  ;;  %v12035_v20 = vrot.slane %v1297_v5, 5  ;;  %v1007_v21 = vld [vmem:[#allocation2 + $0x8c] sm:$0x1]  ;;  %v874_v24 = vsel %vm11636_vm11, %v667_v55, %v873_v7  ;;  %v12056_v44 = vpack.c.bf16 %v372_v19, %v372_v19 }
  0x8f   : > { %v1303_v22 = vrot.slane %v1301_v6, 4  ;;  %v1271_v14 = vrot.slane %v1270_v11, 4  ;;  %v1290_v25 = vrot.slane %v1288_v15, 4  ;;  %v1307_v26 = vshll.u32 %v1007_v21, 16  ;;  %875 = vst [vmem:[#allocation2 + $0x90] sm:$0xf] %v874_v24 }
  0x90   : > { %v1293_v2 = vrot.slane %v1291_v17, 5  ;;  %v878_v23 = vsel %vm11509_vm4, %v677_v62, %v877_v16  ;;  %v681_v28 = vrot.slane %v679_v60, 7  ;;  %v296_v29 = vld [vmem:[#allocation2 + $0xa4] sm:$0x1]  ;;  %v682_v27 = vshll.u32 %v12005_v8, 16 }
  0x91   : > { %1912 = vrot.lane.b32.xlu1 %v1829_v0, %s11422_s10  ;;  %v1276_v32 = vsel %vm11630_vm10, %v1271_v14, %v1275_v48  ;;  %v1830_v33 = vld [vmem:[#allocation2 + $0x84] sm:$0xf]  ;;  %v1304_v34 = vor.u32 %v1303_v22, %v12035_v20  ;;  %879 = vst [vmem:[#allocation2 + $0x98] sm:$0x1] %v878_v23  ;;  %v687_v35 = vshrl.u32 %v10427_v9, 16  ;;  %v1286_v37 = vsel %vm11630_vm10, %v1281_v13, %v1285_v30 }
  0x92   : > { %v249_v36 = vld [vmem:[#allocation2 + $0xa8] sm:$0x1]  ;;  %1447 = vrot.lane.b32.xlu0 %v1276_v32, %s11422_s10  ;;  %v1294_v38 = vor.u32 %v1293_v2, %v1290_v25  ;;  %v12054_v42 = vrot.slane %v1307_v26, 5  ;;  %v1009_v40 = vld [vmem:[#allocation2 + $0x94] sm:$0xf]  ;;  %v684_v47 = vor.u32 %v682_v27, %v681_v28  ;;  %v685_v8 = vrot.slane %v681_v28, 4 }
  0x93   : > { %v880_v43 = vld [vmem:[#allocation2 + $0x9c] sm:$0xf]  ;;  %v1321_v60 = vshll.u32 %v1009_v40, 16  ;;  %v1325_v45 = vshrl.u32 %v1009_v40, 16  ;;  %v689_v48 = vrot.slane %v687_v35, 7  ;;  %v690_v49 = vshll.u32 %v10427_v9, 16 }
  0x94   : > { %v1295_v41 = vrot.slane %v1294_v38, 4  ;;  %v297_v50 = vsel %vm11516_vm7, 0, %v296_v29  ;;  %v1305_v52 = vrot.slane %v1304_v34, 4  ;;  %v881_v46 = vsel %vm11636_vm11, %v684_v47, %v880_v43  ;;  %v299_v62 = vld [vmem:[#allocation2 + $0xb0] sm:$0x1] }
  0x95   : > { %1449 = vrot.lane.b32.xlu1 %v1286_v37, %s11422_s10  ;;  %v12061_v54 = vrot.slane %v1321_v60, 5  ;;  %v1327_v55 = vrot.slane %v1325_v45, 4  ;;  %298 = vst [vmem:[#allocation2 + $0xa4] sm:$0x1] %v297_v50  ;;  %v1831_v56 = vld [vmem:[#allocation2 + $0x88] sm:$0xf]  ;;  %v692_v39 = vor.u32 %v690_v49, %v689_v48 }
  0x96   : > { %1914 = vrot.lane.b32.xlu0 %v1830_v33, %s11422_s10  ;;  %v1300_v58 = vsel %vm11630_vm10, %v1295_v41, %v12035_v20  ;;  %v1008_v59 = vld [vmem:[#allocation2 + $0x90] sm:$0xf]  ;;  %882 = vst [vmem:[#allocation2 + $0x9c] sm:$0xf] %v881_v46  ;;  %v250_v63 = vsel %vm11509_vm4, 0, %v249_v36  ;;  %v696_v53 = vshrl.u32 %v12039_v18, 16  ;;  %v1310_v20 = vsel %vm11630_vm10, %v1305_v52, %v12054_v42 }
  0x97   : > { %v252_v10 = vld [vmem:[#allocation2 + $0xb4] sm:$0x1]  ;;  %v1312_v0 = vshrl.u32 %v1008_v59, 16  ;;  %v1315_v3 = vshll.u32 %v1008_v59, 16  ;;  %v1328_v5 = vor.u32 %v1327_v55, %v12061_v54  ;;  %251 = vst [vmem:[#allocation2 + $0xa8] sm:$0x1] %v250_v63  ;;  %v693_v9 = vsel %vm11651_vm12, %v685_v8, %v692_v39 }
  0x98   : > { %v699_v6 = vshll.u32 %v12039_v18, 16  ;;  %v1010_v7 = vld [vmem:[#allocation2 + $0x98] sm:$0x1]  ;;  %v698_v11 = vrot.slane %v696_v53, 7  ;;  %v704_v13 = vshrl.u32 %v12044_v31, 16  ;;  %v707_v30 = vshll.u32 %v12044_v31, 16 }
  0x99   : > { %1916 = vrot.lane.b32.xlu1 %v1831_v56, %s11422_s10  ;;  %v1314_v15 = vrot.slane %v1312_v0, 4  ;;  %v1317_v16 = vrot.slane %v1315_v3, 5  ;;  %v1331_v61 = vshll.u32 %v1010_v7, 16  ;;  %v694_v17 = vrot.slane %v689_v48, 4  ;;  %883 = vst.msk [vmem:[#allocation2 + $0xa0] sm:$0xf] %vm197_vm0, %v693_v9 }
  0x9a   : > { %1451 = vrot.lane.b32.xlu0 %v1300_v58, %s11422_s10  ;;  %v702_v21 = vrot.slane %v698_v11, 4  ;;  %v706_v22 = vrot.slane %v704_v13, 7  ;;  %v300_v24 = vsel %vm11516_vm7, 0, %v299_v62  ;;  %v1832_v14 = vld [vmem:[#allocation2 + $0x90] sm:$0xf]  ;;  %v701_v26 = vor.u32 %v699_v6, %v698_v11  ;;  %v373_v45 = vld [vmem:[%s11541_s7 + $0xe8] sm:$0xff] }
  0x9b   : > { %v1318_v25 = vor.u32 %v1317_v16, %v1314_v15  ;;  %301 = vst [vmem:[#allocation2 + $0xb0] sm:$0x1] %v300_v24  ;;  %v253_v18 = vsel %vm11509_vm4, 0, %v252_v10  ;;  %v713_v19 = vshrl.u32 %v12056_v44, 16  ;;  %v1535_v2 = vld [vmem:[#allocation2] sm:$0xe]  ;;  %v10431_v59 = vpack.c.bf16 %v373_v45, %v373_v45 }
  0x9c   : > { %v1833_v23 = vld [vmem:[#allocation2 + $0x94] sm:$0xf]  ;;  %v1329_v28 = vrot.slane %v1328_v5, 4  ;;  %v1333_v29 = vrot.slane %v1331_v61, 5  ;;  %v884_v31 = vld [vmem:[#allocation2 + $0xa4] sm:$0x1]  ;;  %v709_v32 = vor.u32 %v707_v30, %v706_v22 }
  0x9d   : > { %254 = vst [vmem:[#allocation2 + $0xb4] sm:$0x1] %v253_v18  ;;  %v716_v33 = vshll.u32 %v12056_v44, 16  ;;  %v12090_v34 = vld [vmem:[#allocation2 + $0x4] sm:$0xf]  ;;  %1453 = vrot.lane.b32.xlu1 %v1310_v20, %s11422_s10  ;;  %v1319_v27 = vrot.slane %v1318_v25, 4  ;;  %v885_v36 = vsel %vm11509_vm4, %v694_v17, %v884_v31 }
  0x9e   : > { %v1011_v35 = vld [vmem:[#allocation2 + $0x9c] sm:$0xf]  ;;  %v12095_v37 = vrot.slane %v713_v19, 7  ;;  %vm1631_vm13 = vcmask 1042432   ;;  %v1538_v38 = vld [vmem:[#allocation2 + $0xc] sm:$0xe]  ;;  %1918 = vrot.lane.b32.xlu0 %v1832_v14, %s11422_s10  ;;  %v710_v60 = vsel %vm11651_vm12, %v702_v21, %v709_v32  ;;  %v1334_v39 = vsel %vm11630_vm10, %v1329_v28, %v1333_v29 }
  0x9f   : > { %v12097_v42 = vld [vmem:[#allocation2 + $0x10] sm:$0xf]  ;;  %v1336_v40 = vshrl.u32 %v1011_v35, 16  ;;  %v1339_v43 = vshll.u32 %v1011_v35, 16  ;;  %886 = vst [vmem:[#allocation2 + $0xa4] sm:$0x1] %v885_v36  ;;  %v1324_v47 = vsel %vm11630_vm10, %v1319_v27, %v12061_v54 }
  0xa0   : > { %v887_v44 = vld [vmem:[#allocation2 + $0xa8] sm:$0xf]  ;;  %vm1632_vm14 = vcmask 1046532   ;;  %v711_v41 = vrot.slane %v706_v22, 4  ;;  %890 = vst.msk [vmem:[#allocation2 + $0xac] sm:$0xf] %vm197_vm0, %v710_v60  ;;  %v718_v46 = vor.u32 %v716_v33, %v12095_v37 }
  0xa1   : > { %v888_v48 = vsel %vm11636_vm11, %v701_v26, %v887_v44  ;;  %v10025_v8 = vrot.slane %v1535_v2, 9  ;;  %v910_v49 = vld [vmem:[#allocation2 + $0xc] sm:$0xf]  ;;  %v1012_v50 = vld [vmem:[#allocation2 + $0xa0] sm:$0xf]  ;;  %v1338_v52 = vrot.slane %v1336_v40, 4  ;;  %vm12111_vm15 = vmor %vm1631_vm13, %vm1632_vm14  ;;  %1920 = vrot.lane.b32.xlu1 %v1833_v23, %s11422_s10  ;;  %v1408_v44 = vpop.permute.xlu0 %1407 }
  0xa2   : > { %v1341_v55 = vrot.slane %v1339_v43, 5  ;;  %889 = vst [vmem:[#allocation2 + $0xa8] sm:$0xf] %v888_v48  ;;  %942 = vst.msk [vmem:[#allocation3 + $0x28] sm:$0xf] %vm197_vm0, %v910_v49  ;;  %v1345_v54 = vshll.u32 %v1012_v50, 16  ;;  %1455 = vrot.lane.b32.xlu0 %v1324_v47, %s11422_s10 }
  0xa3   : > { %v1349_v56 = vshrl.u32 %v1012_v50, 16  ;;  %v1636_v58 = vrot.slane %v12090_v34, 5  ;;  %v891_v53 = vld [vmem:[#allocation2 + $0xb0] sm:$0x1]  ;;  %v10026_v10 = vrot.slane %v1538_v38, 9  ;;  %v1643_v0 = vrot.slane %v12097_v42, 5 }
  0xa4   : > { %v1342_v63 = vor.u32 %v1341_v55, %v1338_v52  ;;  %v1834_v3 = vld [vmem:[#allocation2 + $0x9c] sm:$0xf]  ;;  %v1347_v5 = vrot.slane %v1345_v54, 5  ;;  %v892_v7 = vsel %vm11509_vm4, %v711_v41, %v891_v53  ;;  %v894_v9 = vld [vmem:[#allocation2 + $0xb4] sm:$0xf]  ;;  %v721_v17 = vshrl.u32 %v10431_v59, 16 }
  0xa5   : > { %v1351_v6 = vrot.slane %v1349_v56, 4  ;;  %v1637_v11 = vsel %vm12111_vm15, %v10025_v8, %v1636_v58  ;;  %893 = vst [vmem:[#allocation2 + $0xb0] sm:$0x1] %v892_v7  ;;  %v895_v30 = vsel %vm11636_vm11, %v718_v46, %v894_v9  ;;  %v1644_v15 = vsel %vm12111_vm15, %v10026_v10, %v1643_v0  ;;  %1457 = vrot.lane.b32.xlu1 %v1334_v39, %s11422_s10  ;;  %v1537_v20 = vld [vmem:[#allocation2 + $0x8] sm:$0x1]  ;;  %v374_v25 = vld [vmem:[%s11541_s7 + $0xf0] sm:$0xff]  ;;  %v1410_v7 = vpop.permute.xlu0 %1409 }
  0xa6   : > { %v1343_v13 = vrot.slane %v1342_v63, 4  ;;  %1778 = vst.msk [vmem:[#allocation3 + $0x4] sm:$0xf] %vm197_vm0, %v1637_v11  ;;  %v1013_v16 = vld [vmem:[#allocation2 + $0xa4] sm:$0x1]  ;;  %1922 = vrot.lane.b32.xlu0 %v1834_v3, %s11422_s10  ;;  %v724_v14 = vshll.u32 %v10431_v59, 16  ;;  %v12155_v52 = vpack.c.bf16 %v374_v25, %v374_v25 }
  0xa7   : > { %v1352_v61 = vor.u32 %v1351_v6, %v1347_v5  ;;  %896 = vst [vmem:[#allocation2 + $0xb4] sm:$0xf] %v895_v30  ;;  %1780 = vst.msk [vmem:[#allocation3 + $0x2c] sm:$0xf] %vm197_vm0, %v1644_v15  ;;  %v1835_v21 = vld [vmem:[#allocation2 + $0xa0] sm:$0xf] }
  0xa8   : > { %v1355_v22 = vshll.u32 %v1013_v16, 16  ;;  %v1015_v24 = vld [vmem:[#allocation2 + $0xac] sm:$0xf]  ;;  %v1348_v26 = vsel %vm11630_vm10, %v1343_v13, %v1347_v5  ;;  %v1638_v23 = vrot.slane %v1636_v58, 4  ;;  %v375_v28 = vld [vmem:[%s11541_s7 + $0xf8] sm:$0xff]  ;;  %v719_v35 = vrot.slane %v12095_v37, 4 }
  0xa9   : > { %v1353_v18 = vrot.slane %v1352_v61, 4  ;;  %v1014_v19 = vld [vmem:[#allocation2 + $0xa8] sm:$0xf]  ;;  %v1369_v2 = vshll.u32 %v1015_v24, 16  ;;  %v1373_v33 = vshrl.u32 %v1015_v24, 16  ;;  %1924 = vrot.lane.b32.xlu1 %v1835_v21, %s11422_s10  ;;  %v12146_v36 = vrot.slane %v721_v17, 7 }
  0xaa   : > { %v1357_v29 = vrot.slane %v1355_v22, 5  ;;  %v1360_v31 = vshrl.u32 %v1014_v19, 16  ;;  %v1363_v32 = vshll.u32 %v1014_v19, 16  ;;  %v12140_v34 = vld [vmem:[#allocation2 + $0x1c] sm:$0xf]  ;;  %v1639_v38 = vrot.slane %v1537_v20, 5  ;;  %1459 = vrot.lane.b32.xlu0 %v1348_v26, %s11422_s10 }
  0xab   : > { %v12143_v27 = vrot.slane %v1369_v2, 5  ;;  %v1541_v40 = vld [vmem:[#allocation2 + $0x18] sm:$0xe]  ;;  %v1375_v47 = vrot.slane %v1373_v33, 4  ;;  %v302_v48 = vld [vmem:[#allocation2 + $0xbc] sm:$0x1]  ;;  %v726_v37 = vor.u32 %v724_v14, %v12146_v36  ;;  %v12159_v59 = vpack.c.bf16 %v375_v28, %v375_v28 }
  0xac   : > { %v1358_v43 = vsel %vm11630_vm10, %v1353_v18, %v1357_v29  ;;  %v1362_v60 = vrot.slane %v1360_v31, 4  ;;  %v1365_v45 = vrot.slane %v1363_v32, 5  ;;  %v1836_v41 = vld [vmem:[#allocation2 + $0xa8] sm:$0xf]  ;;  %1503 = vst.msk [vmem:[#allocation3] sm:$0xf] %vm308_vm9, %v1408_v44  ;;  %v1640_v49 = vsel %vm12111_vm15, %v1638_v23, %v1639_v38 }
  0xad   : > { %v1016_v8 = vld [vmem:[#allocation2 + $0xb0] sm:$0x1]  ;;  %v255_v50 = vld [vmem:[#allocation2 + $0xc0] sm:$0x1]  ;;  %v1376_v46 = vor.u32 %v1375_v47, %v12143_v27  ;;  %1779 = vst.msk [vmem:[#allocation3 + $0x18] sm:$0xf] %vm197_vm0, %v1640_v49  ;;  %1461 = vrot.lane.b32.xlu1 %v1358_v43, %s11422_s10  ;;  %v727_v39 = vsel %vm11651_vm12, %v719_v35, %v726_v37 }
  0xae   : > { %v1366_v55 = vor.u32 %v1365_v45, %v1362_v60  ;;  %v1379_v54 = vshll.u32 %v1016_v8, 16  ;;  %v1017_v56 = vld [vmem:[#allocation2 + $0xb4] sm:$0xf]  ;;  %v1650_v10 = vrot.slane %v12140_v34, 5  ;;  %v911_v3 = vld [vmem:[#allocation2 + $0x10] sm:$0xf]  ;;  %1926 = vrot.lane.b32.xlu0 %v1836_v41, %s11422_s10  ;;  %v1879_v8 = vpop.permute.xlu0 %1878 }
  0xaf   : > { %v1540_v58 = vld [vmem:[#allocation2 + $0x14] sm:$0x1]  ;;  %v1384_v63 = vshrl.u32 %v1017_v56, 16  ;;  %v1387_v53 = vshll.u32 %v1017_v56, 16  ;;  %v1837_v5 = vld [vmem:[#allocation2 + $0xac] sm:$0xf] }
  0xb0   : > { %v1367_v6 = vrot.slane %v1366_v55, 4  ;;  %v1377_v9 = vrot.slane %v1376_v46, 4  ;;  %v1381_v11 = vrot.slane %v1379_v54, 5  ;;  %897 = vst.msk [vmem:[#allocation2 + $0xb8] sm:$0xf] %vm197_vm0, %v727_v39  ;;  %v10027_v13 = vrot.slane %v1541_v40, 9 }
  0xb1   : > { %943 = vst.msk [vmem:[#allocation3 + $0x3c] sm:$0xf] %vm197_vm0, %v911_v3  ;;  %v12169_v30 = vld [vmem:[#allocation2] sm:$0xe]  ;;  %v1386_v15 = vrot.slane %v1384_v63, 4  ;;  %v1389_v16 = vrot.slane %v1387_v53, 5  ;;  %1928 = vrot.lane.b32.xlu1 %v1837_v5, %s11422_s10 }
  0xb2   : > { %1504 = vst.msk [vmem:[#allocation3 + $0x14] sm:$0xf] %vm308_vm9, %v1410_v7  ;;  %v303_v61 = vsel %vm11516_vm7, 0, %v302_v48  ;;  %v256_v17 = vsel %vm11509_vm4, 0, %v255_v50  ;;  %v1372_v20 = vsel %vm11630_vm10, %v1367_v6, %v12143_v27  ;;  %v12178_v21 = vld [vmem:[#allocation2 + $0x4] sm:$0xf]  ;;  %v1651_v22 = vsel %vm12111_vm15, %v10027_v13, %v1650_v10  ;;  %v1875_v27 = vpop.permute.xlu1 %1874 }
  0xb3   : > { %304 = vst [vmem:[#allocation2 + $0xbc] sm:$0x1] %v303_v61  ;;  %257 = vst [vmem:[#allocation2 + $0xc0] sm:$0x1] %v256_v17  ;;  %v730_v24 = vshrl.u32 %v12155_v52, 16  ;;  %v11148_v25 = vld [vmem:[%s15873_s1 + $0xf8] sm:$0xff]   ;;  %v1382_v26 = vsel %vm11630_vm10, %v1377_v9, %v1381_v11  ;;  %1463 = vrot.lane.b32.xlu0 %v1372_v20, %s11422_s10  ;;  %v1390_v29 = vor.u32 %v1389_v16, %v1386_v15  ;;  %v1883_v61 = vpop.permute.xlu0 %1882 }
  0xb4   : > { %v912_v14 = vld [vmem:[#allocation2 + $0x18] sm:$0xf]  ;;  %1782 = vst.msk [vmem:[#allocation3 + $0x54] sm:$0xf] %vm197_vm0, %v1651_v22  ;;  %v733_v18 = vshll.u32 %v12155_v52, 16  ;;  %v1645_v19 = vrot.slane %v1643_v0, 4  ;;  %10579 = vmatprep.subr.bf16.mxu1 %v11148_v25 }
  0xb5   : > { %v1646_v2 = vrot.slane %v1540_v58, 5  ;;  %v1543_v23 = vld [vmem:[#allocation2 + $0x20] sm:$0x1]  ;;  %944 = vst.msk [vmem:[#allocation3 + $0x50] sm:$0xf] %vm197_vm0, %v912_v14  ;;  %v11149_v28 = vld [vmem:[%s15873_s1 + $0xb8] sm:$0xff]   ;;  %1465 = vrot.lane.b32.xlu1 %v1382_v26, %s11422_s10 }
  0xb6   : > { %v12198_v31 = vrot.slane %v730_v24, 7  ;;  %v738_v32 = vshrl.u32 %v12159_v59, 16  ;;  %v741_v33 = vshll.u32 %v12159_v59, 16  ;;  %v1838_v42 = vld [vmem:[#allocation2 + $0xb4] sm:$0xf]  ;;  %v10227_v0 = vrot.slane %v12169_v30, 9  ;;  %10580 = vmatpush3.bf16.msra.mxu1 %v11149_v28  ;;  %v1877_v63 = vpop.permute.xlu1 %1876 }
  0xb7   : > { %v6400_v34 = vrot.slane %v12178_v21, 5  ;;  %v1647_v35 = vsel %vm12111_vm15, %v1645_v19, %v1646_v2  ;;  %v1652_v38 = vrot.slane %v1650_v10, 4  ;;  %v11150_v40 = vld [vmem:[%s15873_s1 + $0xf0] sm:$0xff]   ;;  %1970 = vst.msk [vmem:[#allocation3 + $0x4] sm:$0xf] %vm308_vm9, %v1875_v27  ;;  %v728_v43 = vrot.slane %v12146_v36, 4  ;;  %1930 = vrot.lane.b32.xlu0 %v1838_v42, %s11422_s10 }
  0xb8   : > { %v12211_v44 = vld [vmem:[#allocation2 + $0x8] sm:$0x1]  ;;  %v735_v60 = vor.u32 %v733_v18, %v12198_v31  ;;  %1781 = vst.msk [vmem:[#allocation3 + $0x40] sm:$0xf] %vm197_vm0, %v1647_v35  ;;  %v12215_v45 = vrot.slane %v738_v32, 7  ;;  %v1653_v47 = vrot.slane %v1543_v23, 5  ;;  %10581 = vmatprep.subr.bf16.mxu1 %v11150_v40 }
  0xb9   : > { %v2899_v48 = vld [vmem:[#allocation2 + $0x18] sm:$0xf]  ;;  %v11151_v41 = vld [vmem:[%s15873_s1 + $0xb0] sm:$0xff]   ;;  %v736_v36 = vrot.slane %v12198_v31, 4  ;;  %v1544_v50 = vld [vmem:[#allocation2 + $0x24] sm:$0xe]  ;;  %v6401_v39 = vsel %vm12111_vm15, %v10227_v0, %v6400_v34 }
  0xba   : > { %v1839_v37 = vld [vmem:[#allocation2 + $0xb8] sm:$0xf]  ;;  %v12222_v52 = vld [vmem:[#allocation2 + $0x28] sm:$0xf]  ;;  %1972 = vst.msk [vmem:[#allocation3 + $0x2c] sm:$0xf] %vm308_vm9, %v1879_v8  ;;  %v743_v56 = vor.u32 %v741_v33, %v12215_v45  ;;  %v1654_v3 = vsel %vm12111_vm15, %v1652_v38, %v1653_v47  ;;  %10582 = vmatpush3.bf16.msra.mxu1 %v11151_v41  ;;  %v1412_v38 = vpop.permute.xlu0 %1411 }
  0xbb   : > { %v1018_v49 = vld [vmem:[#allocation2 + $0xb8] sm:$0xf]  ;;  %v1391_v55 = vrot.slane %v1390_v29, 4  ;;  %v914_v58 = vld [vmem:[#allocation2 + $0x24] sm:$0xf]  ;;  %v11154_v59 = vld [vmem:[%s15873_s1 + $0xe8] sm:$0xff]   ;;  %1932 = vrot.lane.b32.xlu1 %v1839_v37, %s11422_s10  ;;  %v1881_v29 = vpop.permute.xlu1 %1880 }
  0xbc   : > { %v1393_v46 = vshll.u32 %v1018_v49, 16  ;;  %v1397_v54 = vshrl.u32 %v1018_v49, 16  ;;  %v898_v53 = vld [vmem:[#allocation2 + $0xbc] sm:$0x1]  ;;  %v901_v10 = vld [vmem:[#allocation2 + $0xc0] sm:$0xf]  ;;  %10583 = vmatprep.subr.bf16.mxu1 %v11154_v59  ;;  %v744_v20 = vsel %vm11651_vm12, %v736_v36, %v743_v56 }
  0xbd   : > { %v2948_v5 = vshrl.u32 %v2899_v48, 16  ;;  %v2951_v6 = vshll.u32 %v2899_v48, 16  ;;  %946 = vst.msk [vmem:[#allocation3 + $0x78] sm:$0xf] %vm197_vm0, %v914_v58  ;;  %v6402_v9 = vrot.slane %v6400_v34, 4  ;;  %v899_v11 = vsel %vm11509_vm4, %v728_v43, %v898_v53  ;;  %v11155_v25 = vld [vmem:[%s15873_s1 + $0xa8] sm:$0xff]  }
  0xbe   : > { %v12235_v7 = vrot.slane %v1393_v46, 5  ;;  %1971 = vst.msk [vmem:[#allocation3 + $0x18] sm:$0xf] %vm308_vm9, %v1877_v63  ;;  %v902_v13 = vsel %vm11636_vm11, %v735_v60, %v901_v10  ;;  %v2900_v30 = vld [vmem:[#allocation2 + $0x1c] sm:$0xf]  ;;  %v6403_v16 = vrot.slane %v12211_v44, 5  ;;  %10584 = vmatpush3.bf16.msra.mxu1 %v11155_v25 }
  0xbf   : > { %1783 = vst.msk [vmem:[#allocation3 + $0x68] sm:$0xf] %vm197_vm0, %v1654_v3  ;;  %v913_v15 = vld [vmem:[#allocation2 + $0x1c] sm:$0xf]  ;;  %900 = vst [vmem:[#allocation2 + $0xbc] sm:$0x1] %v899_v11  ;;  %v1885_v49 = vpop.permute.xlu1 %1884 }
  0xc0   : > { %v1399_v17 = vrot.slane %v1397_v54, 4  ;;  %903 = vst [vmem:[#allocation2 + $0xc0] sm:$0xf] %v902_v13  ;;  %v12247_v21 = vld [vmem:[#allocation2 + $0xc] sm:$0xe]  ;;  %v12251_v24 = vrot.slane %v2948_v5, 4  ;;  %v1396_v26 = vsel %vm11630_vm10, %v1391_v55, %v12235_v7  ;;  %v6404_v27 = vsel %vm12111_vm15, %v6402_v9, %v6403_v16  ;;  %v1887_v5 = vpop.permute.xlu0 %1886 }
  0xc1   : > { %v12249_v22 = vld [vmem:[#allocation2 + $0x10] sm:$0xf]  ;;  %v1546_v14 = vld [vmem:[#allocation2 + $0x2c] sm:$0x1]  ;;  %945 = vst.msk [vmem:[#allocation3 + $0x64] sm:$0xf] %vm197_vm0, %v913_v15  ;;  %1467 = vrot.lane.b32.xlu0 %v1396_v26, %s11422_s10 }
  0xc2   : > { %1974 = vst.msk [vmem:[#allocation3 + $0x54] sm:$0xf] %vm308_vm9, %v1883_v61  ;;  %v2953_v18 = vrot.slane %v2951_v6, 5  ;;  %v10028_v19 = vrot.slane %v1544_v50, 9  ;;  %v1657_v2 = vrot.slane %v12222_v52, 5  ;;  %v3731_v28 = vld [vmem:[#allocation3] sm:$0xff]  ;;  %v1400_v35 = vor.u32 %v1399_v17, %v12235_v7 }
  0xc3   : > { %904 = vst.msk [vmem:[#allocation2 + $0xc4] sm:$0xf] %vm197_vm0, %v744_v20  ;;  %v915_v23 = vld [vmem:[#allocation2 + $0x28] sm:$0xf]  ;;  %v2957_v31 = vshll.u32 %v2900_v30, 16  ;;  %v2961_v32 = vshrl.u32 %v2900_v30, 16  ;;  %v1414_v20 = vpop.permute.xlu1 %1413 }
  0xc4   : > { %947 = vst.msk [vmem:[#allocation3 + $0x8c] sm:$0xf] %vm197_vm0, %v915_v23  ;;  %v916_v33 = vld [vmem:[#allocation2 + $0x30] sm:$0xf]  ;;  %6542 = vst.msk [vmem:[#allocation3 + $0x4] sm:$0xf] %vm197_vm0, %v6401_v39  ;;  %v1658_v42 = vsel %vm12111_vm15, %v10028_v19, %v1657_v2  ;;  %v2954_v47 = vor.u32 %v2953_v18, %v12251_v24 }
  0xc5   : > { %1973 = vst.msk [vmem:[#allocation3 + $0x40] sm:$0xf] %vm308_vm9, %v1881_v29  ;;  %v2902_v0 = vld [vmem:[#allocation2 + $0x24] sm:$0xf]  ;;  %v1659_v40 = vrot.slane %v1657_v2, 4  ;;  %v10041_v43 = vrot.slane %v12247_v21, 9 }
  0xc6   : > { %948 = vst.msk [vmem:[#allocation3 + $0xa0] sm:$0xf] %vm197_vm0, %v916_v33  ;;  %v11156_v34 = vld [vmem:[%s15873_s1 + $0xe0] sm:$0xff]   ;;  %1784 = vst.msk [vmem:[#allocation3 + $0x7c] sm:$0xf] %vm197_vm0, %v1658_v42  ;;  %v2596_v44 = vrot.slane %v12249_v22, 5 }
  0xc7   : > { %1505 = vst.msk [vmem:[#allocation3 + $0x28] sm:$0xf] %vm308_vm9, %v1412_v38  ;;  %v12280_v60 = vld [vmem:[#allocation2 + $0x14] sm:$0x1]  ;;  %v12283_v48 = vld [vmem:[#allocation2 + $0x20] sm:$0x1]  ;;  %10585 = vmatprep.subr.bf16.mxu1 %v11156_v34 }
  0xc8   : > { %v1660_v41 = vrot.slane %v1546_v14, 5  ;;  %v11157_v8 = vld [vmem:[%s15873_s1 + $0xa0] sm:$0xff]   ;;  %v3734_v37 = vld [vmem:[#allocation3 + $0x14] sm:$0xff]  ;;  %v12288_v36 = vrot.slane %v2957_v31, 5  ;;  %v12290_v50 = vrot.slane %v2961_v32, 4  ;;  %v2972_v52 = vshrl.u32 %v2902_v0, 16  ;;  %v1416_v32 = vpop.permute.xlu0 %1415 }
  0xc9   : > { %v2975_v55 = vshll.u32 %v2902_v0, 16  ;;  %v12295_v46 = vld [vmem:[%s15873_s1 + $0x130] sm:$0xff]   ;;  %6543 = vst.msk [vmem:[#allocation3 + $0x18] sm:$0xf] %vm197_vm0, %v6404_v27  ;;  %v1019_v54 = vld [vmem:[#allocation2 + $0xbc] sm:$0x1]  ;;  %v10075_v58 = vcombine.high %v3731_v28, %v3734_v37  ;;  %v10074_v59 = vcombine.low %v3731_v28, %v3734_v37  ;;  %10586 = vmatpush3.bf16.msra.mxu1 %v11157_v8  ;;  %v2597_v11 = vsel %vm12111_vm15, %v10041_v43, %v2596_v44 }
  0xca   : > { %v1840_v56 = vld [vmem:[#allocation2 + $0xc0] sm:$0xf]  ;;  %1975 = vst.msk [vmem:[#allocation3 + $0x68] sm:$0xf] %vm308_vm9, %v1885_v49  ;;  %v12299_v39 = vld [vmem:[#allocation2 + $0x18] sm:$0xe]  ;;  %v1661_v53 = vsel %vm12111_vm15, %v1659_v40, %v1660_v41  ;;  %v2964_v21 = vor.u32 %v12290_v50, %v12288_v36 }
  0xcb   : > { %v12301_v63 = vld [vmem:[#allocation2 + $0x1c] sm:$0xf]  ;;  %v1401_v10 = vrot.slane %v1400_v35, 4  ;;  %v1403_v3 = vshll.u32 %v1019_v54, 16  ;;  %1934 = vrot.lane.b32.xlu0 %v1840_v56, %s11422_s10  ;;  %1785 = vst.msk [vmem:[#allocation3 + $0x90] sm:$0xf] %vm197_vm0, %v1661_v53  ;;  %4599 = vmatprep.mubr.bf16.mxu0 %v10075_v58 }
  0xcc   : > { %v2903_v6 = vld [vmem:[#allocation2 + $0x28] sm:$0xf]  ;;  %v2974_v7 = vrot.slane %v2972_v52, 4  ;;  %v2977_v9 = vrot.slane %v2975_v55, 5  ;;  %v12309_v13 = vrot.slane %v2596_v44, 4  ;;  %v2955_v30 = vrot.slane %v2954_v47, 4  ;;  %4600 = vmatmul.mubr.bf16.vlgmr.msra.gmra.mxu0 %v10074_v59  ;;  %v1420_v59 = vpop.permute.xlu0 %1419 }
  0xcd   : > { %1976 = vst.msk [vmem:[#allocation3 + $0x7c] sm:$0xf] %vm308_vm9, %v1887_v5  ;;  %v2967_v15 = vshll.u32 %v12283_v48, 16  ;;  %v917_v16 = vld [vmem:[#allocation2 + $0x34] sm:$0xf]  ;;  %v1405_v61 = vrot.slane %v1403_v3, 5  ;;  %v1889_v48 = vpop.permute.xlu1 %1888 }
  0xce   : > { %v2599_v17 = vrot.slane %v12280_v60, 5  ;;  %v12316_v22 = vld [vmem:[#allocation2 + $0x20] sm:$0x1]  ;;  %v12318_v24 = vld [vmem:[#allocation2 + $0x2c] sm:$0x1]  ;;  %v2981_v25 = vshll.u32 %v2903_v6, 16  ;;  %v2978_v33 = vor.u32 %v2977_v9, %v2974_v7  ;;  %v2960_v35 = vsel %vm11630_vm10, %v2955_v30, %v12288_v36 }
  0xcf   : > { %v2905_v14 = vld [vmem:[#allocation2 + $0x30] sm:$0xf]  ;;  %949 = vst.msk [vmem:[#allocation3 + $0xb4] sm:$0xf] %vm197_vm0, %v917_v16  ;;  %v2985_v26 = vshrl.u32 %v2903_v6, 16  ;;  %v11357_v19 = vld [vmem:[%s15873_s1 + $0x138] sm:$0xff]   ;;  %v1406_v28 = vsel %vm11630_vm10, %v1401_v10, %v1405_v61  ;;  %2706 = vrot.lane.b32.xlu0 %v2597_v11, %s11422_s10 }
  0xd0   : > { %1506 = vst.msk [vmem:[#allocation3 + $0x3c] sm:$0xf] %vm308_vm9, %v1414_v20  ;;  %v12322_v18 = vld [vmem:[#allocation2 + $0x24] sm:$0xe]  ;;  %10964 = vmatpush3.bf16.msra.mxu0 %v11357_v19  ;;  %v1547_v2 = vld [vmem:[#allocation2 + $0x30] sm:$0xe]  ;;  %1469 = vrot.lane.b32.xlu1 %v1406_v28, %s11422_s10  ;;  %v1424_v28 = vpop.permute.xlu0 %1423 }
  0xd1   : > { %v1548_v23 = vld [vmem:[#allocation2 + $0x34] sm:$0xf]  ;;  %v10042_v29 = vrot.slane %v12299_v39, 9  ;;  %v2603_v31 = vrot.slane %v12301_v63, 5  ;;  %v12332_v42 = vld [vmem:[#allocation2 + $0x28] sm:$0xf]  ;;  %10965 = vmatprep.subr.bf16.mxu0 %v12295_v46  ;;  %v1418_v61 = vpop.permute.xlu1 %1417 }
  0xd2   : > { %v11130_v0 = vld [vmem:[%s15873_s1 + $0x128] sm:$0xff]   ;;  %v11161_v34 = vld [vmem:[%s15873_s1 + $0xd8] sm:$0xff]   ;;  %v1841_v27 = vld [vmem:[#allocation2 + $0xc4] sm:$0xf]  ;;  %v12345_v38 = vrot.slane %v2967_v15, 5  ;;  %v2996_v40 = vshrl.u32 %v2905_v14, 16  ;;  %v2600_v15 = vsel %vm12111_vm15, %v12309_v13, %v2599_v17 }
  0xd3   : > { %1507 = vst.msk [vmem:[#allocation3 + $0x50] sm:$0xf] %vm308_vm9, %v1416_v32  ;;  %v2999_v43 = vshll.u32 %v2905_v14, 16  ;;  %v11162_v44 = vld [vmem:[%s15873_s1 + $0x98] sm:$0xff]   ;;  %v12351_v47 = vrot.slane %v2964_v21, 4  ;;  %v12353_v41 = vrot.slane %v2603_v31, 4  ;;  %10587 = vmatprep.subr.bf16.mxu1 %v11161_v34  ;;  %3331 = vrot.lane.b32.xlu0 %v2960_v35, %s11422_s10 }
  0xd4   : > { %v10029_v8 = vrot.slane %v1547_v2, 9  ;;  %v1664_v37 = vrot.slane %v1548_v23, 5  ;;  %v918_v49 = vld [vmem:[#allocation2 + $0x3c] sm:$0xf]  ;;  %1977 = vst.msk [vmem:[#allocation3 + $0x90] sm:$0xf] %vm308_vm9, %v1889_v48  ;;  %10966 = vmatpush3.bf16.msra.mxu0 %v12295_v46  ;;  %10588 = vmatpush3.bf16.msra.mxu1 %v11162_v44  ;;  %v2604_v46 = vsel %vm12111_vm15, %v10042_v29, %v2603_v31 }
  0xd5   : > { %v2606_v36 = vrot.slane %v12316_v22, 5  ;;  %v12357_v50 = vrot.slane %v2981_v25, 5  ;;  %v12359_v52 = vrot.slane %v2985_v26, 4  ;;  %v2991_v55 = vshll.u32 %v12318_v24, 16  ;;  %v12362_v54 = vld [vmem:[#allocation2 + $0x2c] sm:$0x1]  ;;  %10967 = vmatprep.subr.bf16.mxu0 %v11130_v0  ;;  %1936 = vrot.lane.b32.xlu1 %v1841_v27, %s11422_s10  ;;  %v1422_v44 = vpop.permute.xlu1 %1421 }
  0xd6   : > { %v1549_v56 = vld [vmem:[#allocation2 + $0x38] sm:$0x1]  ;;  %950 = vst.msk [vmem:[#allocation3 + $0xc8] sm:$0xf] %vm197_vm0, %v918_v49  ;;  %v12367_v58 = vrot.slane %v2978_v33, 4  ;;  %v10043_v39 = vrot.slane %v12322_v18, 9  ;;  %v1665_v10 = vsel %vm12111_vm15, %v10029_v8, %v1664_v37  ;;  %v2970_v16 = vsel %vm11630_vm10, %v12351_v47, %v12345_v38 }
  0xd7   : > { %v2610_v63 = vrot.slane %v12332_v42, 5  ;;  %v2906_v53 = vld [vmem:[#allocation2 + $0x34] sm:$0xf]  ;;  %v11135_v3 = vld [vmem:[%s15873_s1 + $0x120] sm:$0xff]   ;;  %1509 = vst.msk [vmem:[#allocation3 + $0x78] sm:$0xf] %vm308_vm9, %v1420_v59  ;;  %v2988_v13 = vor.u32 %v12359_v52, %v12357_v50  ;;  %2710 = vrot.lane.b32.xlu0 %v2604_v46, %s11422_s10 }
  0xd8   : > { %v3737_v5 = vld [vmem:[#allocation3 + $0x28] sm:$0xff]  ;;  %v12380_v6 = vrot.slane %v2996_v40, 4  ;;  %v12382_v7 = vrot.slane %v2999_v43, 5  ;;  %1786 = vst.msk [vmem:[#allocation3 + $0xa4] sm:$0xf] %vm197_vm0, %v1665_v10  ;;  %v1666_v11 = vrot.slane %v1664_v37, 4  ;;  %10968 = vmatpush3.bf16.msra.mxu0 %v11130_v0  ;;  %v2984_v2 = vsel %vm11630_vm10, %v12367_v58, %v12357_v50 }
  0xd9   : > { %v12385_v9 = vld [vmem:[#allocation2 + $0x38] sm:$0x1]  ;;  %v919_v30 = vld [vmem:[#allocation2 + $0x40] sm:$0xf]  ;;  %v1667_v24 = vrot.slane %v1549_v56, 5  ;;  %v3005_v25 = vshll.u32 %v2906_v53, 16  ;;  %2708 = vrot.lane.b32.xlu1 %v2600_v15, %s11422_s10  ;;  %v2611_v43 = vsel %vm12111_vm15, %v10043_v39, %v2610_v63  ;;  %10969 = vmatprep.subr.bf16.mxu0 %v11135_v3 }
  0xda   : > { %v3740_v20 = vld [vmem:[#allocation3 + $0x3c] sm:$0xff]  ;;  %v2908_v14 = vld [vmem:[#allocation2 + $0x3c] sm:$0xf]  ;;  %951 = vst.msk [vmem:[#allocation3 + $0xdc] sm:$0xf] %vm197_vm0, %v919_v30  ;;  %v3009_v26 = vshrl.u32 %v2906_v53, 16  ;;  %v3002_v42 = vor.u32 %v12382_v7, %v12380_v6  ;;  %v1891_v30 = vpop.permute.xlu0 %1890 }
  0xdb   : > { %v11118_v21 = vld [vmem:[#allocation3 + $0x2c] ss:$20 sps:$4 sm:$0xff]   ;;  %1508 = vst.msk [vmem:[#allocation3 + $0x64] sm:$0xf] %vm308_vm9, %v1418_v61  ;;  %v10079_v17 = vcombine.low %v3737_v5, %v3740_v20  ;;  %v1550_v18 = vld [vmem:[#allocation2 + $0x3c] sm:$0xe]  ;;  %v1668_v32 = vsel %vm12111_vm15, %v1666_v11, %v1667_v24  ;;  %3335 = vrot.lane.b32.xlu0 %v2984_v2, %s11422_s10  ;;  %v1426_v11 = vpop.permute.xlu1 %1425 }
  0xdc   : > { %v12400_v60 = vld [vmem:[%s15873_s1 + $0x118] sm:$0xff]   ;;  %v1551_v19 = vld [vmem:[#allocation2 + $0x40] sm:$0xf]  ;;  %v12410_v23 = vrot.slane %v2991_v55, 5  ;;  %4607 = vmatprep.mubr.bf16.mxu0 %v11118_v21  ;;  %v2613_v29 = vrot.slane %v12362_v54, 5  ;;  %v3020_v34 = vshrl.u32 %v2908_v14, 16  ;;  %10970 = vmatpush3.bf16.msra.mxu0 %v11135_v3 }
  0xdd   : > { %v12413_v31 = vld [vmem:[#allocation2 + $0x34] sm:$0xf]  ;;  %v12417_v33 = vld [vmem:[#allocation2 + $0x40] sm:$0xf]  ;;  %1511 = vst.msk [vmem:[#allocation3 + $0xa0] sm:$0xf] %vm308_vm9, %v1424_v28  ;;  %4608 = vmatmul.mubr.bf16.gmra.mxu0 %v10079_v17  ;;  %10971 = vmatprep.subr.bf16.mxu0 %v12400_v60 }
  0xde   : > { %v12423_v0 = vld [vmem:[#allocation2 + $0x30] sm:$0xe]  ;;  %1787 = vst.msk [vmem:[#allocation3 + $0xb8] sm:$0xf] %vm197_vm0, %v1668_v32  ;;  %v3023_v27 = vshll.u32 %v2908_v14, 16  ;;  %v10030_v35 = vrot.slane %v1550_v18, 9  ;;  %3333 = vrot.lane.b32.xlu1 %v2970_v16, %s11422_s10 }
  0xdf   : > { %v1552_v38 = vld [vmem:[#allocation2 + $0x44] sm:$0x1]  ;;  %v11163_v40 = vld [vmem:[%s15873_s1 + $0xd0] sm:$0xff]   ;;  %v12431_v47 = vrot.slane %v2610_v63, 4  ;;  %v3015_v48 = vshll.u32 %v12385_v9, 16  ;;  %v1671_v8 = vrot.slane %v1551_v19, 5  ;;  %v2607_v9 = vsel %vm12111_vm15, %v12353_v41, %v2606_v36  ;;  %2714 = vrot.lane.b32.xlu0 %v2611_v43, %s11422_s10 }
  0xe0   : > { %v920_v37 = vld [vmem:[#allocation2 + $0x48] sm:$0xf]  ;;  %v11164_v49 = vld [vmem:[%s15873_s1 + $0x90] sm:$0xff]   ;;  %v12437_v50 = vrot.slane %v2988_v13, 4  ;;  %1510 = vst.msk [vmem:[#allocation3 + $0x8c] sm:$0xf] %vm308_vm9, %v1422_v44  ;;  %10589 = vmatprep.subr.bf16.mxu1 %v11163_v40  ;;  %10972 = vmatpush3.bf16.msra.mxu0 %v12400_v60 }
  0xe1   : > { %v12440_v52 = vrot.slane %v3005_v25, 5  ;;  %v12442_v55 = vrot.slane %v3009_v26, 4  ;;  %v3029_v56 = vshll.u32 %v12417_v33, 16  ;;  %952 = vst.msk [vmem:[#allocation3 + $0xf0] sm:$0xf] %vm197_vm0, %v920_v37  ;;  %v1672_v58 = vsel %vm12111_vm15, %v10030_v35, %v1671_v8  ;;  %v3743_v46 = vld [vmem:[#allocation3 + $0x50] sm:$0xff]  ;;  %10590 = vmatpush3.bf16.msra.mxu1 %v11164_v49 }
  0xe2   : > { %v3033_v59 = vshrl.u32 %v12417_v33, 16  ;;  %v1673_v39 = vrot.slane %v1671_v8, 4  ;;  %v1674_v63 = vrot.slane %v1552_v38, 5  ;;  %v12452_v53 = vrot.slane %v3002_v42, 4  ;;  %v12455_v3 = vld [vmem:[#allocation2 + $0x38] sm:$0x1]  ;;  %2712 = vrot.lane.b32.xlu1 %v2607_v9, %s11422_s10 }
  0xe3   : > { %v2617_v10 = vrot.slane %v12413_v31, 5  ;;  %v12457_v5 = vrot.slane %v3020_v34, 4  ;;  %v12459_v6 = vrot.slane %v3023_v27, 5  ;;  %1788 = vst.msk [vmem:[#allocation3 + $0xcc] sm:$0xf] %vm197_vm0, %v1672_v58  ;;  %v11145_v7 = vld [vmem:[%s15873_s1 + $0x110] sm:$0xff]   ;;  %v3012_v22 = vor.u32 %v12442_v55, %v12440_v52  ;;  %v1893_v34 = vpop.permute.xlu1 %1892 }
  0xe4   : > { %v12470_v15 = vrot.slane %v3015_v48, 5  ;;  %v10044_v16 = vrot.slane %v12423_v0, 9  ;;  %v3746_v61 = vld [vmem:[#allocation3 + $0x64] sm:$0xff]  ;;  %v1675_v21 = vsel %vm12111_vm15, %v1673_v39, %v1674_v63  ;;  %v11167_v24 = vld [vmem:[%s15873_s1 + $0xc8] sm:$0xff]   ;;  %1512 = vst.msk [vmem:[#allocation3 + $0xb4] sm:$0xf] %vm308_vm9, %v1426_v11  ;;  %v3008_v2 = vsel %vm11630_vm10, %v12452_v53, %v12440_v52  ;;  %10973 = vmatprep.subr.bf16.mxu0 %v11145_v7  ;;  %v1428_v11 = vpop.permute.xlu0 %1427 }
  0xe5   : > { %v11121_v20 = vld [vmem:[#allocation3 + $0x54] ss:$20 sps:$4 sm:$0xff]   ;;  %1978 = vst.msk [vmem:[#allocation3 + $0xa4] sm:$0xf] %vm308_vm9, %v1891_v30  ;;  %v10084_v41 = vcombine.low %v3743_v46, %v3746_v61  ;;  %v12482_v36 = vrot.slane %v2617_v10, 4  ;;  %v12495_v26 = vrot.slane %v3029_v56, 5  ;;  %v3026_v28 = vor.u32 %v12459_v6, %v12457_v5  ;;  %10591 = vmatprep.subr.bf16.mxu1 %v11167_v24  ;;  %10974 = vmatpush3.bf16.msra.mxu0 %v11145_v7 }
  0xe6   : > { %v2910_v14 = vld [vmem:[#allocation2 + $0x44] sm:$0x1]  ;;  %1789 = vst.msk [vmem:[#allocation3 + $0xe0] sm:$0xf] %vm197_vm0, %v1675_v21  ;;  %v921_v13 = vld [vmem:[#allocation2 + $0x4c] sm:$0xf]  ;;  %4615 = vmatprep.mubr.bf16.mxu0 %v11121_v20  ;;  %v2994_v0 = vsel %vm11630_vm10, %v12437_v50, %v12410_v23  ;;  %v2614_v23 = vsel %vm12111_vm15, %v12431_v47, %v2613_v29  ;;  %v2618_v37 = vsel %vm12111_vm15, %v10044_v16, %v2617_v10 }
  0xe7   : > { %v12489_v17 = vld [vmem:[%s15873_s1 + $0x108] sm:$0xff]   ;;  %v12497_v18 = vrot.slane %v3033_v59, 4  ;;  %953 = vst.msk [vmem:[#allocation3 + $0x104] sm:$0xf] %vm197_vm0, %v921_v13  ;;  %4616 = vmatmul.mubr.bf16.gmra.mxu0 %v10084_v41  ;;  %v12507_v31 = vld [vmem:[#allocation2 + $0x40] sm:$0xf]  ;;  %3339 = vrot.lane.b32.xlu0 %v3008_v2, %s11422_s10 }
  0xe8   : > { %v11168_v25 = vld [vmem:[%s15873_s1 + $0x88] sm:$0xff]   ;;  %v2620_v27 = vrot.slane %v12455_v3, 5  ;;  %v3039_v40 = vshll.u32 %v2910_v14, 16  ;;  %v12516_v43 = vld [vmem:[#allocation2 + $0x44] sm:$0x1]  ;;  %v12528_v8 = vrot.slane %v3012_v22, 4  ;;  %3337 = vrot.lane.b32.xlu1 %v2994_v0, %s11422_s10  ;;  %10975 = vmatprep.subr.bf16.mxu0 %v12489_v17  ;;  %v1430_v22 = vpop.permute.xlu1 %1429 }
  0xe9   : > { %v1553_v19 = vld [vmem:[#allocation2 + $0x48] sm:$0xe]  ;;  %v1554_v60 = vld [vmem:[#allocation2 + $0x4c] sm:$0xf]  ;;  %v12518_v44 = vld [vmem:[#allocation2 + $0x3c] sm:$0xe]  ;;  %10592 = vmatpush3.bf16.msra.mxu1 %v11168_v25  ;;  %v3036_v39 = vor.u32 %v12497_v18, %v12495_v26  ;;  %10976 = vmatpush3.bf16.msra.mxu0 %v12489_v17 }
  0xea   : > { %v10031_v32 = vrot.slane %v1553_v19, 9  ;;  %v1678_v33 = vrot.slane %v1554_v60, 5  ;;  %v2912_v42 = vld [vmem:[#allocation2 + $0x4c] sm:$0xf]  ;;  %v12514_v35 = vld [vmem:[#allocation3 + $0x8c] sm:$0xff]  ;;  %v3027_v59 = vrot.slane %v3026_v28, 4 }
  0xeb   : > { %v11123_v38 = vld [vmem:[#allocation3 + $0x7c] ss:$20 sps:$4 sm:$0xff]   ;;  %v11169_v48 = vld [vmem:[%s15873_s1 + $0xc0] sm:$0xff]   ;;  %1979 = vst.msk [vmem:[#allocation3 + $0xb8] sm:$0xf] %vm308_vm9, %v1893_v34  ;;  %v3053_v29 = vshll.u32 %v2912_v42, 16  ;;  %2718 = vrot.lane.b32.xlu0 %v2618_v37, %s11422_s10 }
  0xec   : > { %v1679_v49 = vsel %vm12111_vm15, %v10031_v32, %v1678_v33  ;;  %v2911_v50 = vld [vmem:[#allocation2 + $0x48] sm:$0xf]  ;;  %v1555_v52 = vld [vmem:[#allocation2 + $0x50] sm:$0x1]  ;;  %v11170_v54 = vld [vmem:[%s15873_s1 + $0x80] sm:$0xff]   ;;  %4623 = vmatprep.mubr.bf16.mxu0 %v11123_v38  ;;  %v3057_v47 = vshrl.u32 %v2912_v42, 16  ;;  %10593 = vmatprep.subr.bf16.mxu1 %v11169_v48  ;;  %v3032_v17 = vsel %vm11630_vm10, %v3027_v59, %v12495_v26  ;;  %v1895_v26 = vpop.permute.xlu0 %1894  ;;  %v1897_v48 = vpop.permute.xlu1 %1896 }
  0xed   : > { %1790 = vst.msk [vmem:[#allocation3 + $0xf4] sm:$0xf] %vm197_vm0, %v1679_v49  ;;  %v3044_v55 = vshrl.u32 %v2911_v50, 16  ;;  %v3047_v56 = vshll.u32 %v2911_v50, 16  ;;  %v922_v58 = vld [vmem:[#allocation2 + $0x54] sm:$0xf]  ;;  %10594 = vmatpush3.bf16.msra.mxu1 %v11170_v54  ;;  %2716 = vrot.lane.b32.xlu1 %v2614_v23, %s11422_s10 }
  0xee   : > { %v1680_v63 = vrot.slane %v1678_v33, 4  ;;  %v1681_v53 = vrot.slane %v1555_v52, 5  ;;  %954 = vst.msk [vmem:[#allocation3 + $0x118] sm:$0xf] %vm197_vm0, %v922_v58  ;;  %v11171_v10 = vld [vmem:[%s15873_s1 + $0x100] sm:$0xff]   ;;  %v3749_v46 = vld [vmem:[#allocation3 + $0x78] sm:$0xff] }
  0xef   : > { %v12548_v5 = vrot.slane %v3039_v40, 5  ;;  %v2624_v6 = vrot.slane %v12507_v31, 5  ;;  %v3046_v7 = vrot.slane %v3044_v55, 4  ;;  %v3049_v9 = vrot.slane %v3047_v56, 5  ;;  %v12554_v20 = vld [vmem:[#allocation2 + $0x50] sm:$0x1]  ;;  %10977 = vmatprep.subr.bf16.mxu0 %v11171_v10  ;;  %3343 = vrot.lane.b32.xlu0 %v3032_v17, %s11422_s10 }
  0xf0   : > { %v10089_v30 = vcombine.low %v3749_v46, %v12514_v35  ;;  %v2627_v16 = vrot.slane %v12516_v43, 5  ;;  %v10045_v61 = vrot.slane %v12518_v44, 9  ;;  %v1682_v21 = vsel %vm12111_vm15, %v1680_v63, %v1681_v53  ;;  %v923_v24 = vld [vmem:[#allocation2 + $0x58] sm:$0xf]  ;;  %1513 = vst.msk [vmem:[#allocation3 + $0xc8] sm:$0xf] %vm308_vm9, %v1428_v11  ;;  %10978 = vmatpush3.bf16.msra.mxu0 %v11171_v10  ;;  %v1432_v56 = vpop.permute.xlu0 %1431  ;;  %v1434_v53 = vpop.permute.xlu1 %1433 }
  0xf1   : > { %v12561_v41 = vrot.slane %v3053_v29, 5  ;;  %v3059_v14 = vrot.slane %v3057_v47, 4  ;;  %v3050_v13 = vor.u32 %v3049_v9, %v3046_v7  ;;  %1791 = vst.msk [vmem:[#allocation3 + $0x108] sm:$0xf] %vm197_vm0, %v1682_v21  ;;  %955 = vst.msk [vmem:[#allocation3 + $0x12c] sm:$0xf] %vm197_vm0, %v923_v24  ;;  %v3018_v31 = vsel %vm11630_vm10, %v12528_v8, %v12470_v15 }
  0xf2   : > { %v1556_v25 = vld [vmem:[#allocation2 + $0x54] sm:$0xe]  ;;  %v1557_v18 = vld [vmem:[#allocation2 + $0x58] sm:$0xf]  ;;  %1514 = vst.msk [vmem:[#allocation3 + $0xdc] sm:$0xf] %vm308_vm9, %v1430_v22  ;;  %4624 = vmatmul.mubr.bf16.gmra.mxu0 %v10089_v30  ;;  %v2621_v15 = vsel %vm12111_vm15, %v12482_v36, %v2620_v27  ;;  %v2625_v23 = vsel %vm12111_vm15, %v10045_v61, %v2624_v6  ;;  %3341 = vrot.lane.b32.xlu1 %v3018_v31, %s11422_s10 }
  0xf3   : > { %v12570_v19 = vrot.slane %v3036_v39, 4  ;;  %v12572_v60 = vld [vmem:[#allocation2 + $0x4c] sm:$0xf]  ;;  %v10032_v2 = vrot.slane %v1556_v25, 9  ;;  %v1685_v28 = vrot.slane %v1557_v18, 5  ;;  %v3063_v42 = vshll.u32 %v12554_v20, 16  ;;  %2722 = vrot.lane.b32.xlu0 %v2625_v23, %s11422_s10 }
  0xf4   : > { %v3758_v32 = vld [vmem:[#allocation3 + $0xb4] sm:$0xff]  ;;  %v2915_v0 = vld [vmem:[#allocation2 + $0x58] sm:$0xf]  ;;  %v2914_v38 = vld [vmem:[#allocation2 + $0x54] sm:$0xf]  ;;  %v3060_v37 = vor.u32 %v3059_v14, %v12561_v41  ;;  %v3051_v49 = vrot.slane %v3050_v13, 4  ;;  %v1899_v18 = vpop.permute.xlu0 %1898 }
  0xf5   : > { %v11126_v33 = vld [vmem:[#allocation3 + $0xa4] ss:$20 sps:$4 sm:$0xff]   ;;  %v1686_v35 = vsel %vm12111_vm15, %v10032_v2, %v1685_v28  ;;  %v924_v44 = vld [vmem:[#allocation2 + $0x60] sm:$0xf]  ;;  %1980 = vst.msk [vmem:[#allocation3 + $0xcc] sm:$0xf] %vm308_vm9, %v1895_v26  ;;  %v3042_v11 = vsel %vm11630_vm10, %v12570_v19, %v12548_v5  ;;  %v1901_v2 = vpop.permute.xlu1 %1900 }
  0xf6   : > { %v12579_v34 = vld [vmem:[#allocation2 + $0x50] sm:$0x1]  ;;  %v1558_v40 = vld [vmem:[#allocation2 + $0x5c] sm:$0x1]  ;;  %4631 = vmatprep.mubr.bf16.mxu0 %v11126_v33  ;;  %v2513_v50 = vld [vmem:[#allocation2 + $0x48] sm:$0xe]  ;;  %2720 = vrot.lane.b32.xlu1 %v2621_v15, %s11422_s10  ;;  %v3056_v30 = vsel %vm11630_vm10, %v3051_v49, %v12561_v41 }
  0xf7   : > { %v3755_v8 = vld [vmem:[#allocation3 + $0xa0] sm:$0xff]  ;;  %1792 = vst.msk [vmem:[#allocation3 + $0x11c] sm:$0xf] %vm197_vm0, %v1686_v35  ;;  %956 = vst.msk [vmem:[#allocation3 + $0x140] sm:$0xf] %vm197_vm0, %v924_v44  ;;  %v3068_v3 = vshrl.u32 %v2914_v38, 16  ;;  %3347 = vrot.lane.b32.xlu0 %v3056_v30, %s11422_s10 }
  0xf8   : > { %1981 = vst.msk [vmem:[#allocation3 + $0xe0] sm:$0xf] %vm308_vm9, %v1897_v48  ;;  %v3071_v36 = vshll.u32 %v2914_v38, 16  ;;  %v1687_v27 = vrot.slane %v1685_v28, 4  ;;  %v1688_v52 = vrot.slane %v1558_v40, 5  ;;  %v2626_v54 = vrot.slane %v2624_v6, 4 }
  0xf9   : > { %v10094_v29 = vcombine.low %v3755_v8, %v3758_v32  ;;  %v2631_v47 = vrot.slane %v12572_v60, 5  ;;  %v3077_v55 = vshll.u32 %v2915_v0, 16  ;;  %v3081_v58 = vshrl.u32 %v2915_v0, 16  ;;  %1515 = vst.msk [vmem:[#allocation3 + $0xf0] sm:$0xf] %vm308_vm9, %v1432_v56 }
  0xfa   : > { %v3070_v59 = vrot.slane %v3068_v3, 4  ;;  %v3073_v39 = vrot.slane %v3071_v36, 5  ;;  %v1689_v63 = vsel %vm12111_vm15, %v1687_v27, %v1688_v52  ;;  %v12602_v10 = vrot.slane %v3060_v37, 4  ;;  %v925_v9 = vld [vmem:[#allocation2 + $0x64] sm:$0xf]  ;;  %3345 = vrot.lane.b32.xlu1 %v3042_v11, %s11422_s10  ;;  %v1436_v37 = vpop.permute.xlu0 %1435  ;;  %v1438_v52 = vpop.permute.xlu1 %1437 }
  0xfb   : > { %v12604_v46 = vrot.slane %v3063_v42, 5  ;;  %v2634_v6 = vrot.slane %v12579_v34, 5  ;;  %v10046_v7 = vrot.slane %v2513_v50, 9  ;;  %1793 = vst.msk [vmem:[#allocation3 + $0x130] sm:$0xf] %vm197_vm0, %v1689_v63  ;;  %4632 = vmatmul.mubr.bf16.gmra.mxu0 %v10094_v29  ;;  %v12618_v22 = vrot.slane %v2631_v47, 4 }
  0xfc   : > { %1516 = vst.msk [vmem:[#allocation3 + $0x104] sm:$0xf] %vm308_vm9, %v1434_v53  ;;  %v2916_v61 = vld [vmem:[#allocation2 + $0x5c] sm:$0x1]  ;;  %v3074_v20 = vor.u32 %v3073_v39, %v3070_v59  ;;  %v1559_v21 = vld [vmem:[#allocation2 + $0x60] sm:$0xe]  ;;  %v2628_v0 = vsel %vm12111_vm15, %v2626_v54, %v2627_v16 }
  0xfd   : > { %957 = vst.msk [vmem:[#allocation3 + $0x154] sm:$0xf] %vm197_vm0, %v925_v9  ;;  %v1560_v24 = vld [vmem:[#allocation2 + $0x64] sm:$0xf]  ;;  %v12620_v14 = vrot.slane %v3077_v55, 5  ;;  %v10033_v13 = vrot.slane %v1559_v21, 9  ;;  %v2632_v26 = vsel %vm12111_vm15, %v10046_v7, %v2631_v47  ;;  %v3066_v15 = vsel %vm11630_vm10, %v12602_v10, %v12604_v46 }
  0xfe   : > { %v1692_v25 = vrot.slane %v1560_v24, 5  ;;  %v2918_v5 = vld [vmem:[#allocation2 + $0x64] sm:$0xf]  ;;  %v12622_v17 = vrot.slane %v3081_v58, 4  ;;  %v12624_v19 = vrot.slane %v3074_v20, 4  ;;  %v3087_v48 = vshll.u32 %v2916_v61, 16  ;;  %2726 = vrot.lane.b32.xlu0 %v2632_v26, %s11422_s10  ;;  %2724 = vrot.lane.b32.xlu1 %v2628_v0, %s11422_s10  ;;  %v1903_v30 = vpop.permute.xlu0 %1902 }
  0xff   : > { %v12626_v41 = vld [vmem:[#allocation2 + $0x58] sm:$0xf]  ;;  %v12628_v60 = vld [vmem:[#allocation2 + $0x54] sm:$0xe]  ;;  %1982 = vst.msk [vmem:[#allocation3 + $0xf4] sm:$0xf] %vm308_vm9, %v1899_v18 }
 0x100   : > { %v3764_v28 = vld [vmem:[#allocation3 + $0xdc] sm:$0xff]  ;;  %v1693_v32 = vsel %vm12111_vm15, %v10033_v13, %v1692_v25  ;;  %v12634_v33 = vld [vmem:[#allocation2 + $0x68] sm:$0x1]  ;;  %v3101_v42 = vshll.u32 %v2918_v5, 16  ;;  %1983 = vst.msk [vmem:[#allocation3 + $0x108] sm:$0xf] %vm308_vm9, %v1901_v2  ;;  %v3084_v49 = vor.u32 %v12622_v17, %v12620_v14  ;;  %v3080_v56 = vsel %vm11630_vm10, %v12624_v19, %v12620_v14 }
 0x101   : > { %v11128_v31 = vld [vmem:[#allocation3 + $0xcc] ss:$20 sps:$4 sm:$0xff]   ;;  %1794 = vst.msk [vmem:[#allocation3 + $0x144] sm:$0xf] %vm197_vm0, %v1693_v32  ;;  %v3105_v35 = vshrl.u32 %v2918_v5, 16  ;;  %v1694_v44 = vrot.slane %v1692_v25, 4  ;;  %v1905_v25 = vpop.permute.xlu1 %1904 }
 0x102   : > { %v2917_v38 = vld [vmem:[#allocation2 + $0x60] sm:$0xf]  ;;  %v1561_v40 = vld [vmem:[#allocation2 + $0x68] sm:$0x1]  ;;  %4639 = vmatprep.mubr.bf16.mxu0 %v11128_v31  ;;  %v926_v8 = vld [vmem:[#allocation2 + $0x6c] sm:$0xf]  ;;  %3351 = vrot.lane.b32.xlu0 %v3080_v56, %s11422_s10 }
 0x103   : > { %v3761_v43 = vld [vmem:[#allocation3 + $0xc8] sm:$0xff]  ;;  %v3092_v16 = vshrl.u32 %v2917_v38, 16  ;;  %v3095_v23 = vshll.u32 %v2917_v38, 16  ;;  %v12651_v3 = vld [vmem:[#allocation2 + $0x5c] sm:$0x1]  ;;  %v2638_v36 = vrot.slane %v12626_v41, 5  ;;  %3349 = vrot.lane.b32.xlu1 %v3066_v15, %s11422_s10 }
 0x104   : > { %v10099_v50 = vcombine.low %v3761_v43, %v3764_v28  ;;  %v1695_v27 = vrot.slane %v1561_v40, 5  ;;  %958 = vst.msk [vmem:[#allocation3 + $0x168] sm:$0xf] %vm197_vm0, %v926_v8  ;;  %v10047_v54 = vrot.slane %v12628_v60, 9  ;;  %v3111_v29 = vshll.u32 %v12634_v33, 16 }
 0x105   : > { %1517 = vst.msk [vmem:[#allocation3 + $0x118] sm:$0xf] %vm308_vm9, %v1436_v37  ;;  %v3094_v47 = vrot.slane %v3092_v16, 4  ;;  %v3097_v55 = vrot.slane %v3095_v23, 5  ;;  %1518 = vst.msk [vmem:[#allocation3 + $0x12c] sm:$0xf] %vm308_vm9, %v1438_v52  ;;  %v1442_v34 = vpop.permute.xlu1 %1441 }
 0x106   : > { %4640 = vmatmul.mubr.bf16.gmra.mxu0 %v10099_v50  ;;  %v12665_v58 = vrot.slane %v3101_v42, 5  ;;  %v3107_v59 = vrot.slane %v3105_v35, 4  ;;  %v1696_v39 = vsel %vm12111_vm15, %v1694_v44, %v1695_v27  ;;  %v927_v63 = vld [vmem:[#allocation2 + $0x70] sm:$0xf]  ;;  %v1562_v53 = vld [vmem:[#allocation2 + $0x6c] sm:$0xe]  ;;  %v2639_v5 = vsel %vm12111_vm15, %v10047_v54, %v2638_v36  ;;  %v1440_v44 = vpop.permute.xlu0 %1439 }
 0x107   : > { %v12669_v10 = vrot.slane %v3087_v48, 5  ;;  %v2641_v46 = vrot.slane %v12651_v3, 5  ;;  %v3098_v7 = vor.u32 %v3097_v55, %v3094_v47  ;;  %1795 = vst.msk [vmem:[#allocation3 + $0x158] sm:$0xf] %vm197_vm0, %v1696_v39  ;;  %959 = vst.msk [vmem:[#allocation3 + $0x17c] sm:$0xf] %vm197_vm0, %v927_v63  ;;  %v2635_v42 = vsel %vm12111_vm15, %v12618_v22, %v2634_v6  ;;  %2730 = vrot.lane.b32.xlu0 %v2639_v5, %s11422_s10 }
 0x108   : > { %v1563_v9 = vld [vmem:[#allocation2 + $0x70] sm:$0xf]  ;;  %v10034_v11 = vrot.slane %v1562_v53, 9  ;;  %v12674_v61 = vrot.slane %v2638_v36, 4  ;;  %v12676_v20 = vld [vmem:[#allocation2 + $0x64] sm:$0xf]  ;;  %v3108_v41 = vor.u32 %v3107_v59, %v12665_v58  ;;  %2728 = vrot.lane.b32.xlu1 %v2635_v42, %s11422_s10 }
 0x109   : > { %v12678_v21 = vld [vmem:[#allocation2 + $0x68] sm:$0x1]  ;;  %v1699_v24 = vrot.slane %v1563_v9, 5  ;;  %v2921_v14 = vld [vmem:[#allocation2 + $0x70] sm:$0xf]  ;;  %v12681_v13 = vrot.slane %v3084_v49, 4  ;;  %v1909_v53 = vpop.permute.xlu1 %1908 }
 0x10a   : > { %1984 = vst.msk [vmem:[#allocation3 + $0x11c] sm:$0xf] %vm308_vm9, %v1903_v30  ;;  %v3770_v18 = vld [vmem:[#allocation3 + $0x104] sm:$0xff]  ;;  %1985 = vst.msk [vmem:[#allocation3 + $0x130] sm:$0xf] %vm308_vm9, %v1905_v25  ;;  %v12691_v60 = vrot.slane %v3111_v29, 5  ;;  %v1907_v56 = vpop.permute.xlu0 %1906  ;;  %v2642_v30 = vsel %vm12111_vm15, %v12674_v61, %v2641_v46 }
 0x10b   : > { %v11131_v17 = vld [vmem:[#allocation3 + $0xf4] ss:$20 sps:$4 sm:$0xff]   ;;  %v3099_v2 = vrot.slane %v3098_v7, 4  ;;  %v1700_v28 = vsel %vm12111_vm15, %v10034_v11, %v1699_v24  ;;  %v12695_v31 = vld [vmem:[#allocation2 + $0x74] sm:$0x1]  ;;  %v3125_v26 = vshll.u32 %v2921_v14, 16  ;;  %v3090_v27 = vsel %vm11630_vm10, %v12681_v13, %v12669_v10 }
 0x10c   : > { %v12686_v19 = vld [vmem:[#allocation2 + $0x60] sm:$0xe]  ;;  %v2920_v32 = vld [vmem:[#allocation2 + $0x6c] sm:$0xf]  ;;  %v1564_v33 = vld [vmem:[#allocation2 + $0x74] sm:$0x1]  ;;  %4647 = vmatprep.mubr.bf16.mxu0 %v11131_v17  ;;  %3353 = vrot.lane.b32.xlu1 %v3090_v27, %s11422_s10 }
 0x10d   : > { %v3767_v0 = vld [vmem:[#allocation3 + $0xf0] sm:$0xff]  ;;  %1796 = vst.msk [vmem:[#allocation3 + $0x16c] sm:$0xf] %vm197_vm0, %v1700_v28  ;;  %v3116_v35 = vshrl.u32 %v2920_v32, 16  ;;  %v3119_v38 = vshll.u32 %v2920_v32, 16  ;;  %v3129_v43 = vshrl.u32 %v2921_v14, 16  ;;  %v3104_v49 = vsel %vm11630_vm10, %v3099_v2, %v12665_v58 }
 0x10e   : > { %v928_v40 = vld [vmem:[#allocation2 + $0x78] sm:$0xf]  ;;  %v10104_v15 = vcombine.low %v3767_v0, %v3770_v18  ;;  %v1701_v48 = vrot.slane %v1699_v24, 4  ;;  %v1702_v16 = vrot.slane %v1564_v33, 5  ;;  %1519 = vst.msk [vmem:[#allocation3 + $0x140] sm:$0xf] %vm308_vm9, %v1440_v44  ;;  %3355 = vrot.lane.b32.xlu0 %v3104_v49, %s11422_s10  ;;  %v1444_v2 = vpop.permute.xlu0 %1443 }
 0x10f   : > { %960 = vst.msk [vmem:[#allocation3 + $0x190] sm:$0xf] %vm197_vm0, %v928_v40  ;;  %v2645_v6 = vrot.slane %v12676_v20, 5  ;;  %v2648_v22 = vrot.slane %v12678_v21, 5  ;;  %v3118_v23 = vrot.slane %v3116_v35, 4  ;;  %v3121_v8 = vrot.slane %v3119_v38, 5 }
 0x110   : > { %1520 = vst.msk [vmem:[#allocation3 + $0x154] sm:$0xf] %vm308_vm9, %v1442_v34  ;;  %v12710_v37 = vrot.slane %v3108_v41, 4  ;;  %4648 = vmatmul.mubr.bf16.gmra.mxu0 %v10104_v15  ;;  %v10048_v50 = vrot.slane %v12686_v19, 9  ;;  %v1703_v36 = vsel %vm12111_vm15, %v1701_v48, %v1702_v16  ;;  %v12722_v52 = vrot.slane %v3125_v26, 5  ;;  %2732 = vrot.lane.b32.xlu1 %v2642_v30, %s11422_s10 }
 0x111   : > { %v3135_v54 = vshll.u32 %v12695_v31, 16  ;;  %v3122_v29 = vor.u32 %v3121_v8, %v3118_v23  ;;  %1797 = vst.msk [vmem:[#allocation3 + $0x180] sm:$0xf] %vm197_vm0, %v1703_v36  ;;  %v929_v47 = vld [vmem:[#allocation2 + $0x7c] sm:$0xf]  ;;  %v12726_v58 = vrot.slane %v3129_v43, 4  ;;  %v1446_v43 = vpop.permute.xlu1 %1445 }
 0x112   : > { %v1565_v55 = vld [vmem:[#allocation2 + $0x78] sm:$0xe]  ;;  %v12728_v59 = vld [vmem:[#allocation2 + $0x70] sm:$0xf]  ;;  %961 = vst.msk [vmem:[#allocation3 + $0x1a4] sm:$0xf] %vm197_vm0, %v929_v47  ;;  %v2646_v20 = vsel %vm12111_vm15, %v10048_v50, %v2645_v6  ;;  %v3114_v15 = vsel %vm11630_vm10, %v12710_v37, %v12691_v60  ;;  %v1911_v23 = vpop.permute.xlu0 %1910 }
 0x113   : > { %v1566_v39 = vld [vmem:[#allocation2 + $0x7c] sm:$0xf]  ;;  %v10035_v63 = vrot.slane %v1565_v55, 9  ;;  %1986 = vst.msk [vmem:[#allocation3 + $0x144] sm:$0xf] %vm308_vm9, %v1907_v56  ;;  %v3776_v10 = vld [vmem:[#allocation3 + $0x12c] sm:$0xff]  ;;  %2734 = vrot.lane.b32.xlu0 %v2646_v20, %s11422_s10  ;;  %v3132_v32 = vor.u32 %v12726_v58, %v12722_v52 }
 0x114   : > { %v11133_v7 = vld [vmem:[#allocation3 + $0x11c] ss:$20 sps:$4 sm:$0xff]   ;;  %v2522_v9 = vld [vmem:[#allocation2 + $0x6c] sm:$0xe]  ;;  %v1706_v11 = vrot.slane %v1566_v39, 5  ;;  %v3123_v14 = vrot.slane %v3122_v29, 4  ;;  %3357 = vrot.lane.b32.xlu1 %v3114_v15, %s11422_s10 }
 0x115   : > { %1987 = vst.msk [vmem:[#allocation3 + $0x158] sm:$0xf] %vm308_vm9, %v1909_v53  ;;  %v3773_v24 = vld [vmem:[#allocation3 + $0x118] sm:$0xff]  ;;  %v2924_v13 = vld [vmem:[#allocation2 + $0x7c] sm:$0xf]  ;;  %v2647_v5 = vrot.slane %v2645_v6, 4  ;;  %4655 = vmatprep.mubr.bf16.mxu0 %v11133_v7  ;;  %v1913_v53 = vpop.permute.xlu1 %1912 }
 0x116   : > { %v2923_v25 = vld [vmem:[#allocation2 + $0x78] sm:$0xf]  ;;  %v10109_v18 = vcombine.low %v3773_v24, %v3776_v10  ;;  %v1707_v17 = vsel %vm12111_vm15, %v10035_v63, %v1706_v11  ;;  %v3149_v3 = vshll.u32 %v2924_v13, 16  ;;  %v1567_v19 = vld [vmem:[#allocation2 + $0x80] sm:$0x1]  ;;  %v3153_v46 = vshrl.u32 %v2924_v13, 16  ;;  %v1448_v20 = vpop.permute.xlu0 %1447 }
 0x117   : > { %v930_v41 = vld [vmem:[#allocation2 + $0x84] sm:$0xf]  ;;  %1798 = vst.msk [vmem:[#allocation3 + $0x194] sm:$0xf] %vm197_vm0, %v1707_v17  ;;  %v3140_v61 = vshrl.u32 %v2923_v25, 16  ;;  %v3143_v28 = vshll.u32 %v2923_v25, 16  ;;  %v3128_v26 = vsel %vm11630_vm10, %v3123_v14, %v12722_v52  ;;  %v2649_v63 = vsel %vm12111_vm15, %v2647_v5, %v2648_v22 }
 0x118   : > { %v1708_v31 = vrot.slane %v1706_v11, 4  ;;  %962 = vst.msk [vmem:[#allocation3 + $0x1b8] sm:$0xf] %vm197_vm0, %v930_v41  ;;  %v12750_v33 = vrot.slane %v3135_v54, 5  ;;  %v2652_v42 = vrot.slane %v12728_v59, 5  ;;  %v1709_v0 = vrot.slane %v1567_v19, 5  ;;  %4656 = vmatmul.mubr.bf16.gmra.mxu0 %v10109_v18  ;;  %3359 = vrot.lane.b32.xlu0 %v3128_v26, %s11422_s10 }
 0x119   : > { %1521 = vst.msk [vmem:[#allocation3 + $0x168] sm:$0xf] %vm308_vm9, %v1444_v2  ;;  %v12757_v35 = vld [vmem:[#allocation2 + $0x74] sm:$0x1]  ;;  %v10049_v38 = vrot.slane %v2522_v9, 9  ;;  %v3142_v40 = vrot.slane %v3140_v61, 4  ;;  %2736 = vrot.lane.b32.xlu1 %v2649_v63, %s11422_s10  ;;  %v1450_v61 = vpop.permute.xlu1 %1449 }
 0x11a   : > { %v3145_v44 = vrot.slane %v3143_v28, 5  ;;  %v2925_v48 = vld [vmem:[#allocation2 + $0x80] sm:$0x1]  ;;  %v1710_v16 = vsel %vm12111_vm15, %v1708_v31, %v1709_v0  ;;  %v931_v34 = vld [vmem:[#allocation2 + $0x88] sm:$0xf]  ;;  %v12766_v8 = vrot.slane %v3149_v3, 5  ;;  %v1915_v0 = vpop.permute.xlu0 %1914 }
 0x11b   : > { %v1568_v6 = vld [vmem:[#allocation2 + $0x84] sm:$0xe]  ;;  %1522 = vst.msk [vmem:[#allocation3 + $0x17c] sm:$0xf] %vm308_vm9, %v1446_v43  ;;  %v3155_v49 = vrot.slane %v3153_v46, 4  ;;  %v12771_v37 = vrot.slane %v3132_v32, 4  ;;  %v2653_v47 = vsel %vm12111_vm15, %v10049_v38, %v2652_v42 }
 0x11c   : > { %v3146_v50 = vor.u32 %v3145_v44, %v3142_v40  ;;  %1799 = vst.msk [vmem:[#allocation3 + $0x1a8] sm:$0xf] %vm197_vm0, %v1710_v16  ;;  %963 = vst.msk [vmem:[#allocation3 + $0x1cc] sm:$0xf] %vm197_vm0, %v931_v34  ;;  %v1569_v36 = vld [vmem:[#allocation2 + $0x88] sm:$0xf]  ;;  %2738 = vrot.lane.b32.xlu0 %v2653_v47, %s11422_s10 }
 0x11d   : > { %v10036_v60 = vrot.slane %v1568_v6, 9  ;;  %1988 = vst.msk [vmem:[#allocation3 + $0x16c] sm:$0xf] %vm308_vm9, %v1911_v23  ;;  %v2655_v27 = vrot.slane %v12757_v35, 5  ;;  %v3782_v52 = vld [vmem:[#allocation3 + $0x154] sm:$0xff]  ;;  %v1713_v29 = vrot.slane %v1569_v36, 5  ;;  %v3156_v14 = vor.u32 %v3155_v49, %v12766_v8 }
 0x11e   : > { %v11136_v54 = vld [vmem:[#allocation3 + $0x144] ss:$20 sps:$4 sm:$0xff]   ;;  %v3159_v55 = vshll.u32 %v2925_v48, 16  ;;  %v3147_v56 = vrot.slane %v3146_v50, 4  ;;  %v2525_v59 = vld [vmem:[#allocation2 + $0x78] sm:$0xe]  ;;  %v3138_v19 = vsel %vm11630_vm10, %v12771_v37, %v12750_v33 }
 0x11f   : > { %v12778_v58 = vld [vmem:[#allocation2 + $0x7c] sm:$0xf]  ;;  %v2927_v39 = vld [vmem:[#allocation2 + $0x88] sm:$0xf]  ;;  %4663 = vmatprep.mubr.bf16.mxu0 %v11136_v54  ;;  %v1714_v7 = vsel %vm12111_vm15, %v10036_v60, %v1713_v29  ;;  %v2926_v9 = vld [vmem:[#allocation2 + $0x84] sm:$0xf]  ;;  %3361 = vrot.lane.b32.xlu1 %v3138_v19, %s11422_s10  ;;  %v1917_v60 = vpop.permute.xlu1 %1916 }
 0x120   : > { %v3779_v10 = vld [vmem:[#allocation3 + $0x140] sm:$0xff]  ;;  %v1570_v11 = vld [vmem:[#allocation2 + $0x8c] sm:$0x1]  ;;  %v1715_v30 = vrot.slane %v1713_v29, 4  ;;  %1989 = vst.msk [vmem:[#allocation3 + $0x180] sm:$0xf] %vm308_vm9, %v1913_v53  ;;  %v3152_v41 = vsel %vm11630_vm10, %v3147_v56, %v12766_v8 }
 0x121   : > { %v2654_v24 = vrot.slane %v2652_v42, 4  ;;  %v10114_v13 = vcombine.low %v3779_v10, %v3782_v52  ;;  %v12788_v21 = vld [vmem:[#allocation2 + $0x80] sm:$0x1]  ;;  %1800 = vst.msk [vmem:[#allocation3 + $0x1bc] sm:$0xf] %vm197_vm0, %v1714_v7  ;;  %v3164_v22 = vshrl.u32 %v2926_v9, 16  ;;  %3363 = vrot.lane.b32.xlu0 %v3152_v41, %s11422_s10 }
 0x122   : > { %v932_v25 = vld [vmem:[#allocation2 + $0x90] sm:$0xf]  ;;  %1523 = vst.msk [vmem:[#allocation3 + $0x190] sm:$0xf] %vm308_vm9, %v1448_v20  ;;  %v3173_v5 = vshll.u32 %v2927_v39, 16  ;;  %v3177_v18 = vshrl.u32 %v2927_v39, 16 }
 0x123   : > { %v3167_v17 = vshll.u32 %v2926_v9, 16  ;;  %v1716_v3 = vrot.slane %v1570_v11, 5  ;;  %964 = vst.msk [vmem:[#allocation3 + $0x1e0] sm:$0xf] %vm197_vm0, %v932_v25  ;;  %4664 = vmatmul.mubr.bf16.gmra.mxu0 %v10114_v13  ;;  %v10050_v2 = vrot.slane %v2525_v59, 9  ;;  %v3166_v46 = vrot.slane %v3164_v22, 4  ;;  %v1454_v13 = vpop.permute.xlu1 %1453 }
 0x124   : > { %v12802_v28 = vrot.slane %v3159_v55, 5  ;;  %v2659_v31 = vrot.slane %v12778_v58, 5  ;;  %1524 = vst.msk [vmem:[#allocation3 + $0x1a4] sm:$0xf] %vm308_vm9, %v1450_v61  ;;  %v12808_v33 = vrot.slane %v3156_v14, 4  ;;  %v2662_v26 = vrot.slane %v12788_v21, 5  ;;  %v1452_v55 = vpop.permute.xlu0 %1451 }
 0x125   : > { %v3169_v32 = vrot.slane %v3167_v17, 5  ;;  %v1717_v42 = vsel %vm12111_vm15, %v1715_v30, %v1716_v3  ;;  %v12811_v38 = vld [vmem:[#allocation2 + $0x8c] sm:$0x1]  ;;  %v933_v40 = vld [vmem:[#allocation2 + $0x94] sm:$0xf]  ;;  %v3175_v44 = vrot.slane %v3173_v5, 5  ;;  %v2656_v36 = vsel %vm12111_vm15, %v2654_v24, %v2655_v27 }
 0x126   : > { %1801 = vst.msk [vmem:[#allocation3 + $0x1d0] sm:$0xf] %vm197_vm0, %v1717_v42  ;;  %v3179_v15 = vrot.slane %v3177_v18, 4  ;;  %965 = vst.msk [vmem:[#allocation3 + $0x1f4] sm:$0xf] %vm197_vm0, %v933_v40  ;;  %v2660_v34 = vsel %vm12111_vm15, %v10050_v2, %v2659_v31  ;;  %v3785_v37 = vld [vmem:[#allocation3 + $0x168] sm:$0xff]  ;;  %2740 = vrot.lane.b32.xlu1 %v2656_v36, %s11422_s10  ;;  %v3162_v14 = vsel %vm11630_vm10, %v12808_v33, %v12802_v28 }
 0x127   : > { %1990 = vst.msk [vmem:[#allocation3 + $0x194] sm:$0xf] %vm308_vm9, %v1915_v0  ;;  %v3170_v43 = vor.u32 %v3169_v32, %v3166_v46  ;;  %v1571_v48 = vld [vmem:[#allocation2 + $0x90] sm:$0xe]  ;;  %v1572_v16 = vld [vmem:[#allocation2 + $0x94] sm:$0xf]  ;;  %2742 = vrot.lane.b32.xlu0 %v2660_v34, %s11422_s10 }
 0x128   : > { %v12820_v6 = vld [vmem:[#allocation2 + $0x88] sm:$0xf]  ;;  %v2528_v23 = vld [vmem:[#allocation2 + $0x84] sm:$0xe]  ;;  %v10037_v8 = vrot.slane %v1571_v48, 9  ;;  %v1720_v49 = vrot.slane %v1572_v16, 5  ;;  %v3180_v53 = vor.u32 %v3179_v15, %v3175_v44  ;;  %v1919_v17 = vpop.permute.xlu0 %1918 }
 0x129   : > { %v2930_v50 = vld [vmem:[#allocation2 + $0x94] sm:$0xf]  ;;  %v11138_v54 = vld [vmem:[#allocation3 + $0x16c] ss:$20 sps:$4 sm:$0xff]   ;;  %v3171_v29 = vrot.slane %v3170_v43, 4  ;;  %v2661_v27 = vrot.slane %v2659_v31, 4  ;;  %v1921_v43 = vpop.permute.xlu1 %1920 }
 0x12a   : > { %v3788_v52 = vld [vmem:[#allocation3 + $0x17c] sm:$0xff]  ;;  %v3197_v47 = vshll.u32 %v2930_v50, 16  ;;  %1991 = vst.msk [vmem:[#allocation3 + $0x1a8] sm:$0xf] %vm308_vm9, %v1917_v60  ;;  %v1721_v58 = vsel %vm12111_vm15, %v10037_v8, %v1720_v49  ;;  %v3201_v59 = vshrl.u32 %v2930_v50, 16  ;;  %v1722_v35 = vrot.slane %v1720_v49, 4  ;;  %4671 = vmatprep.mubr.bf16.mxu0 %v11138_v54  ;;  %3365 = vrot.lane.b32.xlu1 %v3162_v14, %s11422_s10 }
 0x12b   : > { %v10119_v56 = vcombine.low %v3785_v37, %v3788_v52  ;;  %v2929_v39 = vld [vmem:[#allocation2 + $0x90] sm:$0xf]  ;;  %v1573_v63 = vld [vmem:[#allocation2 + $0x98] sm:$0x1]  ;;  %1525 = vst.msk [vmem:[#allocation3 + $0x1b8] sm:$0xf] %vm308_vm9, %v1452_v55  ;;  %v3176_v11 = vsel %vm11630_vm10, %v3171_v29, %v3175_v44  ;;  %v2663_v15 = vsel %vm12111_vm15, %v2661_v27, %v2662_v26 }
 0x12c   : > { %v3183_v10 = vshll.u32 %v12811_v38, 16  ;;  %1802 = vst.msk [vmem:[#allocation3 + $0x1e4] sm:$0xf] %vm197_vm0, %v1721_v58  ;;  %v3188_v7 = vshrl.u32 %v2929_v39, 16  ;;  %v934_v9 = vld [vmem:[#allocation2 + $0x9c] sm:$0xf]  ;;  %3367 = vrot.lane.b32.xlu0 %v3176_v11, %s11422_s10  ;;  %v1456_v50 = vpop.permute.xlu0 %1455 }
 0x12d   : > { %4672 = vmatmul.mubr.bf16.gmra.mxu0 %v10119_v56  ;;  %v10051_v30 = vrot.slane %v2528_v23, 9  ;;  %v3191_v20 = vshll.u32 %v2929_v39, 16  ;;  %v1723_v24 = vrot.slane %v1573_v63, 5  ;;  %966 = vst.msk [vmem:[#allocation3 + $0x208] sm:$0xf] %vm197_vm0, %v934_v9  ;;  %v2666_v25 = vrot.slane %v12820_v6, 5 }
 0x12e   : > { %v12841_v22 = vld [vmem:[#allocation2 + $0x8c] sm:$0x1]  ;;  %v12844_v5 = vld [vmem:[#allocation2 + $0x98] sm:$0x1]  ;;  %v3190_v18 = vrot.slane %v3188_v7, 4  ;;  %v12847_v3 = vrot.slane %v3197_v47, 5  ;;  %2744 = vrot.lane.b32.xlu1 %v2663_v15, %s11422_s10 }
 0x12f   : > { %1526 = vst.msk [vmem:[#allocation3 + $0x1cc] sm:$0xf] %vm308_vm9, %v1454_v13  ;;  %v12849_v19 = vrot.slane %v3201_v59, 4  ;;  %v3193_v41 = vrot.slane %v3191_v20, 5  ;;  %v1724_v2 = vsel %vm12111_vm15, %v1722_v35, %v1723_v24  ;;  %v935_v46 = vld [vmem:[#allocation2 + $0xa0] sm:$0xf]  ;;  %v2667_v42 = vsel %vm12111_vm15, %v10051_v30, %v2666_v25 }
 0x130   : > { %1992 = vst.msk [vmem:[#allocation3 + $0x1bc] sm:$0xf] %vm308_vm9, %v1919_v17  ;;  %v12854_v61 = vrot.slane %v3180_v53, 4  ;;  %v12856_v28 = vrot.slane %v3183_v10, 5  ;;  %v1574_v31 = vld [vmem:[#allocation2 + $0x9c] sm:$0xe]  ;;  %2746 = vrot.lane.b32.xlu0 %v2667_v42, %s11422_s10  ;;  %v1458_v53 = vpop.permute.xlu1 %1457  ;;  %v1923_v9 = vpop.permute.xlu0 %1922 }
 0x131   : > { %1803 = vst.msk [vmem:[#allocation3 + $0x1f8] sm:$0xf] %vm197_vm0, %v1724_v2  ;;  %967 = vst.msk [vmem:[#allocation3 + $0x21c] sm:$0xf] %vm197_vm0, %v935_v46  ;;  %v1575_v32 = vld [vmem:[#allocation2 + $0xa0] sm:$0xf]  ;;  %v3194_v0 = vor.u32 %v3193_v41, %v3190_v18  ;;  %v3204_v21 = vor.u32 %v12849_v19, %v12847_v3 }
 0x132   : > { %v2531_v33 = vld [vmem:[#allocation2 + $0x90] sm:$0xe]  ;;  %v10038_v38 = vrot.slane %v1574_v31, 9  ;;  %v1727_v40 = vrot.slane %v1575_v32, 5  ;;  %v2933_v44 = vld [vmem:[#allocation2 + $0xa0] sm:$0xf]  ;;  %v3186_v35 = vsel %vm11630_vm10, %v12854_v61, %v12856_v28 }
 0x133   : > { %v2669_v48 = vrot.slane %v12841_v22, 5  ;;  %v3791_v16 = vld [vmem:[#allocation3 + $0x190] sm:$0xff]  ;;  %v3794_v34 = vld [vmem:[#allocation3 + $0x1a4] sm:$0xff]  ;;  %v3207_v23 = vshll.u32 %v12844_v5, 16  ;;  %v2532_v8 = vld [vmem:[#allocation2 + $0x94] sm:$0xf]  ;;  %3369 = vrot.lane.b32.xlu1 %v3186_v35, %s11422_s10 }
 0x134   : > { %v11141_v6 = vld [vmem:[#allocation3 + $0x194] ss:$20 sps:$4 sm:$0xff]   ;;  %v12870_v49 = vld [vmem:[#allocation2 + $0x98] sm:$0x1]  ;;  %1993 = vst.msk [vmem:[#allocation3 + $0x1d0] sm:$0xf] %vm308_vm9, %v1921_v43  ;;  %v10124_v60 = vcombine.low %v3791_v16, %v3794_v34  ;;  %v1728_v26 = vsel %vm12111_vm15, %v10038_v38, %v1727_v40  ;;  %v1925_v2 = vpop.permute.xlu1 %1924  ;;  %v1460_v42 = vpop.permute.xlu0 %1459 }
 0x135   : > { %v3195_v36 = vrot.slane %v3194_v0, 4  ;;  %v2932_v37 = vld [vmem:[#allocation2 + $0x9c] sm:$0xf]  ;;  %v1576_v52 = vld [vmem:[#allocation2 + $0xa4] sm:$0x1]  ;;  %4679 = vmatprep.mubr.bf16.mxu0 %v11141_v6  ;;  %v3221_v54 = vshll.u32 %v2933_v44, 16 }
 0x136   : > { %1527 = vst.msk [vmem:[#allocation3 + $0x1e0] sm:$0xf] %vm308_vm9, %v1456_v50  ;;  %v3225_v29 = vshrl.u32 %v2933_v44, 16  ;;  %v3212_v47 = vshrl.u32 %v2932_v37, 16  ;;  %v3215_v55 = vshll.u32 %v2932_v37, 16  ;;  %4680 = vmatmul.mubr.bf16.gmra.mxu0 %v10124_v60  ;;  %v10052_v59 = vrot.slane %v2531_v33, 9 }
 0x137   : > { %1804 = vst.msk [vmem:[#allocation3 + $0x20c] sm:$0xf] %vm197_vm0, %v1728_v26  ;;  %v936_v56 = vld [vmem:[#allocation2 + $0xa8] sm:$0xf]  ;;  %v3200_v58 = vsel %vm11630_vm10, %v3195_v36, %v12847_v3  ;;  %v1729_v39 = vrot.slane %v1727_v40, 4  ;;  %v1730_v63 = vrot.slane %v1576_v52, 5 }
 0x138   : > { %968 = vst.msk [vmem:[#allocation3 + $0x230] sm:$0xf] %vm197_vm0, %v936_v56  ;;  %v2668_v27 = vrot.slane %v2666_v25, 4  ;;  %v3214_v10 = vrot.slane %v3212_v47, 4  ;;  %v3217_v7 = vrot.slane %v3215_v55, 5  ;;  %v12890_v11 = vrot.slane %v3207_v23, 5  ;;  %3371 = vrot.lane.b32.xlu0 %v3200_v58, %s11422_s10  ;;  %v1927_v52 = vpop.permute.xlu0 %1926 }
 0x139   : > { %1528 = vst.msk [vmem:[#allocation3 + $0x1f4] sm:$0xf] %vm308_vm9, %v1458_v53  ;;  %v2673_v30 = vrot.slane %v2532_v8, 5  ;;  %v2676_v20 = vrot.slane %v12870_v49, 5  ;;  %v2934_v24 = vld [vmem:[#allocation2 + $0xa4] sm:$0x1]  ;;  %v1731_v14 = vsel %vm12111_vm15, %v1729_v39, %v1730_v63 }
 0x13a   : > { %1994 = vst.msk [vmem:[#allocation3 + $0x1e4] sm:$0xf] %vm308_vm9, %v1923_v9  ;;  %v3205_v13 = vrot.slane %v3204_v21, 4  ;;  %v3797_v22 = vld [vmem:[#allocation3 + $0x1b8] sm:$0xff]  ;;  %v3223_v25 = vrot.slane %v3221_v54, 5  ;;  %v3227_v5 = vrot.slane %v3225_v29, 4  ;;  %v3218_v18 = vor.u32 %v3217_v7, %v3214_v10  ;;  %v1462_v21 = vpop.permute.xlu1 %1461 }
 0x13b   : > { %1805 = vst.msk [vmem:[#allocation3 + $0x220] sm:$0xf] %vm197_vm0, %v1731_v14  ;;  %v2674_v17 = vsel %vm12111_vm15, %v10052_v59, %v2673_v30  ;;  %v2534_v3 = vld [vmem:[#allocation2 + $0x9c] sm:$0xe]  ;;  %v937_v19 = vld [vmem:[#allocation2 + $0xac] sm:$0xf]  ;;  %v2670_v41 = vsel %vm12111_vm15, %v2668_v27, %v2669_v48 }
 0x13c   : > { %v3800_v46 = vld [vmem:[#allocation3 + $0x1cc] sm:$0xff]  ;;  %v3219_v28 = vrot.slane %v3218_v18, 4  ;;  %v12903_v31 = vld [vmem:[#allocation2 + $0xa0] sm:$0xf]  ;;  %969 = vst.msk [vmem:[#allocation3 + $0x244] sm:$0xf] %vm197_vm0, %v937_v19  ;;  %2750 = vrot.lane.b32.xlu0 %v2674_v17, %s11422_s10  ;;  %v3228_v44 = vor.u32 %v3227_v5, %v3223_v25  ;;  %2748 = vrot.lane.b32.xlu1 %v2670_v41, %s11422_s10  ;;  %v3210_v50 = vsel %vm11630_vm10, %v3205_v13, %v12890_v11 }
 0x13d   : > { %v11143_v61 = vld [vmem:[#allocation3 + $0x1bc] ss:$20 sps:$4 sm:$0xff]   ;;  %1995 = vst.msk [vmem:[#allocation3 + $0x1f8] sm:$0xf] %vm308_vm9, %v1925_v2  ;;  %v2675_v0 = vrot.slane %v2673_v30, 4  ;;  %v10129_v33 = vcombine.low %v3797_v22, %v3800_v46  ;;  %v3231_v15 = vshll.u32 %v2934_v24, 16 }
 0x13e   : > { %v1577_v32 = vld [vmem:[#allocation2 + $0xa8] sm:$0xe]  ;;  %v1578_v38 = vld [vmem:[#allocation2 + $0xac] sm:$0xf]  ;;  %1529 = vst.msk [vmem:[#allocation3 + $0x208] sm:$0xf] %vm308_vm9, %v1460_v42  ;;  %4687 = vmatprep.mubr.bf16.mxu0 %v11143_v61  ;;  %v3224_v16 = vsel %vm11630_vm10, %v3219_v28, %v3223_v25  ;;  %v1929_v11 = vpop.permute.xlu1 %1928  ;;  %v1464_v25 = vpop.permute.xlu0 %1463 }
 0x13f   : > { %v10039_v40 = vrot.slane %v1577_v32, 9  ;;  %v1734_v43 = vrot.slane %v1578_v38, 5  ;;  %v2936_v48 = vld [vmem:[#allocation2 + $0xac] sm:$0xf]  ;;  %4688 = vmatmul.mubr.bf16.gmra.mxu0 %v10129_v33  ;;  %v10053_v34 = vrot.slane %v2534_v3, 9  ;;  %v2680_v29 = vrot.slane %v12903_v31, 5 }
 0x140   : > { %v3245_v6 = vshll.u32 %v2936_v48, 16  ;;  %v3249_v23 = vshrl.u32 %v2936_v48, 16  ;;  %v2935_v8 = vld [vmem:[#allocation2 + $0xa8] sm:$0xf]  ;;  %v2937_v60 = vld [vmem:[#allocation2 + $0xb0] sm:$0x1]  ;;  %3375 = vrot.lane.b32.xlu0 %v3224_v16, %s11422_s10  ;;  %3373 = vrot.lane.b32.xlu1 %v3210_v50, %s11422_s10  ;;  %v2677_v9 = vsel %vm12111_vm15, %v2675_v0, %v2676_v20 }
 0x141   : > { %v1735_v36 = vsel %vm12111_vm15, %v10039_v40, %v1734_v43  ;;  %v3236_v26 = vshrl.u32 %v2935_v8, 16  ;;  %v3239_v37 = vshll.u32 %v2935_v8, 16  ;;  %1530 = vst.msk [vmem:[#allocation3 + $0x21c] sm:$0xf] %vm308_vm9, %v1462_v21  ;;  %v12918_v54 = vld [vmem:[#allocation2 + $0xa4] sm:$0x1]  ;;  %v2681_v27 = vsel %vm12111_vm15, %v10053_v34, %v2680_v29 }
 0x142   : > { %1806 = vst.msk [vmem:[#allocation3 + $0x234] sm:$0xf] %vm197_vm0, %v1735_v36  ;;  %v3247_v47 = vrot.slane %v3245_v6, 5  ;;  %v3251_v55 = vrot.slane %v3249_v23, 4  ;;  %v1736_v56 = vrot.slane %v1734_v43, 4  ;;  %v3229_v58 = vrot.slane %v3228_v44, 4  ;;  %v1466_v46 = vpop.permute.xlu1 %1465  ;;  %v1931_v0 = vpop.permute.xlu0 %1930 }
 0x143   : > { %1996 = vst.msk [vmem:[#allocation3 + $0x20c] sm:$0xf] %vm308_vm9, %v1927_v52  ;;  %v3233_v59 = vrot.slane %v3231_v15, 5  ;;  %v3238_v39 = vrot.slane %v3236_v26, 4  ;;  %v3241_v63 = vrot.slane %v3239_v37, 5  ;;  %v3803_v53 = vld [vmem:[#allocation3 + $0x1e0] sm:$0xff] }
 0x144   : > { %v1579_v35 = vld [vmem:[#allocation2 + $0xb0] sm:$0x1]  ;;  %v938_v7 = vld [vmem:[#allocation2 + $0xb4] sm:$0xf]  ;;  %v3252_v14 = vor.u32 %v3251_v55, %v3247_v47  ;;  %v3255_v13 = vshll.u32 %v2937_v60, 16  ;;  %v2683_v49 = vrot.slane %v12918_v54, 5  ;;  %2754 = vrot.lane.b32.xlu0 %v2681_v27, %s11422_s10  ;;  %2752 = vrot.lane.b32.xlu1 %v2677_v9, %s11422_s10 }
 0x145   : > { %v1737_v10 = vrot.slane %v1579_v35, 5  ;;  %v3806_v30 = vld [vmem:[#allocation3 + $0x1f4] sm:$0xff]  ;;  %v3242_v22 = vor.u32 %v3241_v63, %v3238_v39  ;;  %970 = vst.msk [vmem:[#allocation3 + $0x258] sm:$0xf] %vm197_vm0, %v938_v7  ;;  %v2537_v3 = vld [vmem:[#allocation2 + $0xa8] sm:$0xe]  ;;  %v3234_v2 = vsel %vm11630_vm10, %v3229_v58, %v3233_v59 }
 0x146   : > { %v11146_v24 = vld [vmem:[#allocation3 + $0x1e4] ss:$20 sps:$4 sm:$0xff]   ;;  %1997 = vst.msk [vmem:[#allocation3 + $0x220] sm:$0xf] %vm308_vm9, %v1929_v11  ;;  %v10134_v18 = vcombine.low %v3803_v53, %v3806_v30  ;;  %1531 = vst.msk [vmem:[#allocation3 + $0x230] sm:$0xf] %vm308_vm9, %v1464_v25  ;;  %v1933_v21 = vpop.permute.xlu1 %1932 }
 0x147   : > { %v1738_v5 = vsel %vm12111_vm15, %v1736_v56, %v1737_v10  ;;  %4695 = vmatprep.mubr.bf16.mxu0 %v11146_v24  ;;  %v3243_v20 = vrot.slane %v3242_v22, 4  ;;  %v2538_v17 = vld [vmem:[#allocation2 + $0xac] sm:$0xf]  ;;  %v2682_v19 = vrot.slane %v2680_v29, 4  ;;  %v10054_v41 = vrot.slane %v2537_v3, 9  ;;  %v1468_v56 = vpop.permute.xlu0 %1467 }
 0x148   : > { %1807 = vst.msk [vmem:[#allocation3 + $0x248] sm:$0xf] %vm197_vm0, %v1738_v5  ;;  %4696 = vmatmul.mubr.bf16.gmra.mxu0 %v10134_v18  ;;  %v12942_v61 = vrot.slane %v3252_v14, 4  ;;  %v12944_v28 = vrot.slane %v3255_v13, 5  ;;  %v939_v32 = vld [vmem:[#allocation2 + $0xb8] sm:$0xf]  ;;  %3377 = vrot.lane.b32.xlu1 %v3234_v2, %s11422_s10 }
 0x149   : > { %v3248_v31 = vsel %vm11630_vm10, %v3243_v20, %v3247_v47  ;;  %v1580_v42 = vld [vmem:[#allocation2 + $0xb4] sm:$0xe]  ;;  %1532 = vst.msk [vmem:[#allocation3 + $0x244] sm:$0xf] %vm308_vm9, %v1466_v46  ;;  %v2539_v33 = vld [vmem:[#allocation2 + $0xb0] sm:$0x1]  ;;  %v2684_v16 = vsel %vm12111_vm15, %v2682_v19, %v2683_v49 }
 0x14a   : > { %v2687_v38 = vrot.slane %v2538_v17, 5  ;;  %971 = vst.msk [vmem:[#allocation3 + $0x26c] sm:$0xf] %vm197_vm0, %v939_v32  ;;  %v1581_v40 = vld [vmem:[#allocation2 + $0xb8] sm:$0xf]  ;;  %v10040_v44 = vrot.slane %v1580_v42, 9  ;;  %3379 = vrot.lane.b32.xlu0 %v3248_v31, %s11422_s10  ;;  %v3258_v27 = vsel %vm11630_vm10, %v12942_v61, %v12944_v28 }
 0x14b   : > { %1998 = vst.msk [vmem:[#allocation3 + $0x234] sm:$0xf] %vm308_vm9, %v1931_v0  ;;  %v3809_v15 = vld [vmem:[#allocation3 + $0x208] sm:$0xff]  ;;  %v1741_v43 = vrot.slane %v1581_v40, 5  ;;  %v2939_v48 = vld [vmem:[#allocation2 + $0xb8] sm:$0xf]  ;;  %v1935_v46 = vpop.permute.xlu0 %1934 }
 0x14c   : > { %v2688_v34 = vsel %vm12111_vm15, %v10054_v41, %v2687_v38  ;;  %v2940_v6 = vld [vmem:[#allocation2 + $0xbc] sm:$0x1]  ;;  %v3269_v23 = vshll.u32 %v2939_v48, 16  ;;  %v3273_v8 = vshrl.u32 %v2939_v48, 16  ;;  %v2938_v50 = vld [vmem:[#allocation2 + $0xb4] sm:$0xf]  ;;  %2756 = vrot.lane.b32.xlu1 %v2684_v16, %s11422_s10 }
 0x14d   : > { %v3812_v36 = vld [vmem:[#allocation3 + $0x21c] sm:$0xff]  ;;  %v1742_v26 = vsel %vm12111_vm15, %v10040_v44, %v1741_v43  ;;  %v3279_v37 = vshll.u32 %v2940_v6, 16  ;;  %v3260_v52 = vshrl.u32 %v2938_v50, 16  ;;  %v3263_v54 = vshll.u32 %v2938_v50, 16  ;;  %1999 = vst.msk [vmem:[#allocation3 + $0x248] sm:$0xf] %vm308_vm9, %v1933_v21 }
 0x14e   : > { %v11152_v60 = vld [vmem:[#allocation3 + $0x20c] ss:$20 sps:$4 sm:$0xff]   ;;  %1808 = vst.msk [vmem:[#allocation3 + $0x25c] sm:$0xf] %vm197_vm0, %v1742_v26  ;;  %v3271_v29 = vrot.slane %v3269_v23, 5  ;;  %v3275_v47 = vrot.slane %v3273_v8, 4  ;;  %v10139_v55 = vcombine.low %v3809_v15, %v3812_v36  ;;  %2758 = vrot.lane.b32.xlu0 %v2688_v34, %s11422_s10 }
 0x14f   : > { %v2690_v58 = vrot.slane %v2539_v33, 5  ;;  %4703 = vmatprep.mubr.bf16.mxu0 %v11152_v60  ;;  %v3262_v59 = vrot.slane %v3260_v52, 4  ;;  %v3265_v39 = vrot.slane %v3263_v54, 5  ;;  %v1582_v63 = vld [vmem:[#allocation2 + $0xbc] sm:$0x1]  ;;  %v1743_v35 = vrot.slane %v1741_v43, 4  ;;  %v2707_v21 = vpop.permute.xlu0 %2706 }
 0x150   : > { %1533 = vst.msk [vmem:[#allocation3 + $0x258] sm:$0xf] %vm308_vm9, %v1468_v56  ;;  %v2689_v53 = vrot.slane %v2687_v38, 4  ;;  %v3276_v10 = vor.u32 %v3275_v47, %v3271_v29  ;;  %v1744_v7 = vrot.slane %v1582_v63, 5  ;;  %v2002_v9 = vld [vmem:[#allocation2 + $0xc] sm:$0xf]  ;;  %4704 = vmatmul.mubr.bf16.gmra.mxu0 %v10139_v55  ;;  %3381 = vrot.lane.b32.xlu1 %v3258_v27, %s11422_s10 }
 0x151   : > { %v2003_v11 = vld [vmem:[#allocation2 + $0x10] sm:$0xf]  ;;  %v3266_v30 = vor.u32 %v3265_v39, %v3262_v59  ;;  %v2051_v24 = vshrl.u32 %v2002_v9, 16  ;;  %v2054_v14 = vshll.u32 %v2002_v9, 16  ;;  %v3281_v25 = vrot.slane %v3279_v37, 5  ;;  %v1470_v37 = vpop.permute.xlu1 %1469 }
 0x152   : > { %v2060_v13 = vshll.u32 %v2003_v11, 16  ;;  %v3277_v22 = vrot.slane %v3276_v10, 4  ;;  %v1745_v5 = vsel %vm12111_vm15, %v1743_v35, %v1744_v7  ;;  %v2691_v3 = vsel %vm12111_vm15, %v2689_v53, %v2690_v58  ;;  %v2541_v19 = vld [vmem:[#allocation2 + $0xb8] sm:$0xf]  ;;  %v2542_v41 = vld [vmem:[#allocation2 + $0xbc] sm:$0x1] }
 0x153   : > { %v3267_v18 = vrot.slane %v3266_v30, 4  ;;  %1809 = vst.msk [vmem:[#allocation3 + $0x270] sm:$0xf] %vm197_vm0, %v1745_v5  ;;  %v2053_v49 = vrot.slane %v2051_v24, 4  ;;  %v2056_v20 = vrot.slane %v2054_v14, 5  ;;  %v2694_v31 = vrot.slane %v2541_v19, 5  ;;  %v3332_v4 = vpop.permute.xlu0 %3331 }
 0x154   : > { %v2062_v17 = vrot.slane %v2060_v13, 5  ;;  %v2540_v2 = vld [vmem:[#allocation2 + $0xb4] sm:$0xe]  ;;  %v2697_v32 = vrot.slane %v2542_v41, 5  ;;  %v3815_v42 = vld [vmem:[#allocation3 + $0x230] sm:$0xff]  ;;  %v3818_v0 = vld [vmem:[#allocation3 + $0x244] sm:$0xff]  ;;  %2760 = vrot.lane.b32.xlu1 %v2691_v3, %s11422_s10  ;;  %v3282_v8 = vsel %vm11630_vm10, %v3277_v22, %v3281_v25 }
 0x155   : > { %v3272_v61 = vsel %vm11630_vm10, %v3267_v18, %v3271_v29  ;;  %v2057_v28 = vor.u32 %v2056_v20, %v2053_v49  ;;  %v11159_v33 = vld [vmem:[#allocation3 + $0x234] ss:$20 sps:$4 sm:$0xff]   ;;  %2000 = vst.msk [vmem:[#allocation3 + $0x25c] sm:$0xf] %vm308_vm9, %v1935_v46  ;;  %v10055_v38 = vrot.slane %v2540_v2, 9  ;;  %v2064_v40 = vshrl.u32 %v2003_v11, 16  ;;  %v1937_v30 = vpop.permute.xlu1 %1936 }
 0x156   : > { %3383 = vrot.lane.b32.xlu0 %v3272_v61, %s11422_s10  ;;  %v10144_v44 = vcombine.low %v3815_v42, %v3818_v0  ;;  %v2696_v43 = vrot.slane %v2694_v31, 4  ;;  %4711 = vmatprep.mubr.bf16.mxu0 %v11159_v33  ;;  %v2004_v48 = vld [vmem:[#allocation2 + $0x14] sm:$0x1]  ;;  %v2835_v16 = vld [vmem:[#allocation2 + $0x18] sm:$0xf]  ;;  %v745_v22 = vrot.slane %v12215_v45, 4 }
 0x157   : > { %v2058_v15 = vrot.slane %v2057_v28, 4  ;;  %v2695_v34 = vsel %vm12111_vm15, %v10055_v38, %v2694_v31  ;;  %v2066_v6 = vrot.slane %v2064_v40, 4  ;;  %v2070_v23 = vshll.u32 %v2004_v48, 16  ;;  %2867 = vst.msk [vmem:[#allocation3 + $0xc] sm:$0xf] %vm197_vm0, %v2835_v16  ;;  %v2711_v41 = vpop.permute.xlu0 %2710 }
 0x158   : > { %4712 = vmatmul.mubr.bf16.gmra.mxu0 %v10144_v44  ;;  %v305_v36 = vld [vmem:[#allocation2 + $0xc8] sm:$0x1]  ;;  %v2942_v60 = vld [vmem:[#allocation2 + $0xc4] sm:$0xf]  ;;  %v2941_v26 = vld [vmem:[#allocation2 + $0xc0] sm:$0xf]  ;;  %3385 = vrot.lane.b32.xlu1 %v3282_v8, %s11422_s10  ;;  %v2698_v59 = vsel %vm12111_vm15, %v2696_v43, %v2697_v32 }
 0x159   : > { %v2063_v50 = vsel %vm11630_vm10, %v2058_v15, %v2062_v17  ;;  %v2067_v52 = vor.u32 %v2066_v6, %v2062_v17  ;;  %v2072_v54 = vrot.slane %v2070_v23, 5  ;;  %v306_v29 = vsel %vm11516_vm7, 0, %v305_v36  ;;  %1534 = vst.msk [vmem:[#allocation3 + $0x26c] sm:$0xf] %vm308_vm9, %v1470_v37  ;;  %v2836_v35 = vld [vmem:[#allocation2 + $0x1c] sm:$0xf]  ;;  %v2709_v61 = vpop.permute.xlu1 %2708 }
 0x15a   : > { %2466 = vst.msk [vmem:[#allocation3 + $0x8] sm:$0xf] %vm197_vm0, %v2063_v50  ;;  %2762 = vrot.lane.b32.xlu0 %v2695_v34, %s11422_s10  ;;  %v3293_v47 = vshll.u32 %v2942_v60, 16  ;;  %307 = vst [vmem:[#allocation2 + $0xc8] sm:$0x1] %v306_v29  ;;  %v3297_v55 = vshrl.u32 %v2942_v60, 16 }
 0x15b   : > { %2802 = vst.msk [vmem:[#allocation3 + $0x8] sm:$0xf] %vm308_vm9, %v2707_v21  ;;  %v3284_v56 = vshrl.u32 %v2941_v26, 16  ;;  %v3287_v58 = vshll.u32 %v2941_v26, 16  ;;  %v2068_v39 = vrot.slane %v2067_v52, 4  ;;  %v3336_v6 = vpop.permute.xlu0 %3335 }
 0x15c   : > { %v3295_v63 = vrot.slane %v3293_v47, 5  ;;  %v2005_v27 = vld [vmem:[#allocation2 + $0x18] sm:$0xf]  ;;  %v3299_v53 = vrot.slane %v3297_v55, 4  ;;  %2868 = vst.msk [vmem:[#allocation3 + $0x20] sm:$0xf] %vm197_vm0, %v2836_v35  ;;  %2764 = vrot.lane.b32.xlu1 %v2698_v59, %s11422_s10 }
 0x15d   : > { %v3286_v10 = vrot.slane %v3284_v56, 4  ;;  %v3289_v7 = vrot.slane %v3287_v58, 5  ;;  %v2006_v9 = vld [vmem:[#allocation2 + $0x1c] sm:$0xf]  ;;  %v2075_v11 = vshrl.u32 %v2005_v27, 16  ;;  %v2073_v24 = vsel %vm11630_vm10, %v2068_v39, %v2072_v54  ;;  %v3334_v21 = vpop.permute.xlu1 %3333  ;;  %v3821_v60 = vld [vmem:[#allocation3 + $0x258] sm:$0xff] }
 0x15e   : > { %3427 = vst.msk [vmem:[#allocation3 + $0xc] sm:$0xf] %vm308_vm9, %v3332_v4  ;;  %v2078_v14 = vshll.u32 %v2005_v27, 16  ;;  %v2084_v13 = vshll.u32 %v2006_v9, 16  ;;  %2001 = vst.msk [vmem:[#allocation3 + $0x270] sm:$0xf] %vm308_vm9, %v1937_v30  ;;  %v3300_v25 = vor.u32 %v3299_v53, %v3295_v63 }
 0x15f   : > { %2467 = vst.msk [vmem:[#allocation3 + $0x1c] sm:$0xf] %vm197_vm0, %v2073_v24  ;;  %v3290_v5 = vor.u32 %v3289_v7, %v3286_v10  ;;  %v2077_v18 = vrot.slane %v2075_v11, 4  ;;  %v2544_v49 = vld [vmem:[#allocation2 + $0xc4] sm:$0xf]  ;;  %v2088_v32 = vshrl.u32 %v2006_v9, 16  ;;  %v13023_v7 = vpop.permute.xlu0 %2714 }
 0x160   : > { %v2543_v20 = vld [vmem:[#allocation2 + $0xc0] sm:$0xe]  ;;  %v2080_v17 = vrot.slane %v2078_v14, 5  ;;  %v2086_v3 = vrot.slane %v2084_v13, 5  ;;  %v2007_v46 = vld [vmem:[#allocation2 + $0x20] sm:$0x1] }
 0x161   : > { %v3291_v19 = vrot.slane %v3290_v5, 4  ;;  %v10056_v2 = vrot.slane %v2543_v20, 9  ;;  %v905_v28 = vld [vmem:[#allocation2 + $0xc8] sm:$0x1]  ;;  %v2701_v31 = vrot.slane %v2544_v49, 5  ;;  %v13006_v33 = vrot.slane %v3300_v25, 4  ;;  %v2713_v11 = vpop.permute.xlu1 %2712 }
 0x162   : > { %v2081_v45 = vor.u32 %v2080_v17, %v2077_v18  ;;  %v2837_v42 = vld [vmem:[#allocation2 + $0x24] sm:$0xf]  ;;  %2803 = vst.msk [vmem:[#allocation3 + $0x1c] sm:$0xf] %vm308_vm9, %v2709_v61  ;;  %v906_v0 = vsel %vm11509_vm4, %v745_v22, %v905_v28  ;;  %v2094_v40 = vshll.u32 %v2007_v46, 16  ;;  %v2090_v15 = vrot.slane %v2088_v32, 4 }
 0x163   : > { %v3296_v38 = vsel %vm11630_vm10, %v3291_v19, %v3295_v63  ;;  %2869 = vst.msk [vmem:[#allocation3 + $0x34] sm:$0xf] %vm197_vm0, %v2837_v42  ;;  %907 = vst [vmem:[#allocation2 + $0xc8] sm:$0x1] %v906_v0  ;;  %v2945_v43 = vld [vmem:[#allocation2 + $0xd0] sm:$0xf]  ;;  %v2702_v16 = vsel %vm12111_vm15, %v10056_v2, %v2701_v31  ;;  %v3340_v46 = vpop.permute.xlu0 %3339 }
 0x164   : > { %3387 = vrot.lane.b32.xlu0 %v3296_v38, %s11422_s10  ;;  %v2082_v44 = vrot.slane %v2081_v45, 4  ;;  %v2946_v48 = vld [vmem:[#allocation2 + $0xd4] sm:$0x1]  ;;  %v2096_v34 = vrot.slane %v2094_v40, 5  ;;  %v3317_v23 = vshll.u32 %v2945_v43, 16  ;;  %v3321_v8 = vshrl.u32 %v2945_v43, 16 }
 0x165   : > { %v2944_v50 = vld [vmem:[#allocation2 + $0xcc] sm:$0xf]  ;;  %v3824_v26 = vld [vmem:[#allocation3 + $0x26c] sm:$0xff]  ;;  %v2091_v52 = vor.u32 %v2090_v15, %v2086_v3  ;;  %3429 = vst.msk [vmem:[#allocation3 + $0x34] sm:$0xf] %vm308_vm9, %v3336_v6  ;;  %v3327_v56 = vshll.u32 %v2946_v48, 16  ;;  %v3338_v45 = vpop.permute.xlu1 %3337 }
 0x166   : > { %v2087_v36 = vsel %vm11630_vm10, %v2082_v44, %v2086_v3  ;;  %v11165_v37 = vld [vmem:[#allocation3 + $0x25c] ss:$20 sps:$4 sm:$0xff]   ;;  %v3308_v54 = vshrl.u32 %v2944_v50, 16  ;;  %v3311_v29 = vshll.u32 %v2944_v50, 16  ;;  %3428 = vst.msk [vmem:[#allocation3 + $0x20] sm:$0xf] %vm308_vm9, %v3334_v21  ;;  %v10149_v58 = vcombine.low %v3821_v60, %v3824_v26 }
 0x167   : > { %2468 = vst.msk [vmem:[#allocation3 + $0x30] sm:$0xf] %vm197_vm0, %v2087_v36  ;;  %v3319_v47 = vrot.slane %v3317_v23, 5  ;;  %v3323_v55 = vrot.slane %v3321_v8, 4  ;;  %v13020_v59 = vrot.slane %v2701_v31, 4  ;;  %4719 = vmatprep.mubr.bf16.mxu0 %v11165_v37  ;;  %v2092_v39 = vrot.slane %v2091_v52, 4  ;;  %v13044_v26 = vpop.permute.xlu0 %2718 }
 0x168   : > { %2804 = vst.msk [vmem:[#allocation3 + $0x30] sm:$0xf] %vm308_vm9, %v2711_v41  ;;  %2766 = vrot.lane.b32.xlu0 %v2702_v16, %s11422_s10  ;;  %v3310_v63 = vrot.slane %v3308_v54, 4  ;;  %v3313_v35 = vrot.slane %v3311_v29, 5  ;;  %v2838_v4 = vld [vmem:[#allocation2 + $0x28] sm:$0xf]  ;;  %4720 = vmatmul.mubr.bf16.gmra.mxu0 %v10149_v58 }
 0x169   : > { %v3324_v27 = vor.u32 %v3323_v55, %v3319_v47  ;;  %v2008_v53 = vld [vmem:[#allocation2 + $0x24] sm:$0xf]  ;;  %v2009_v10 = vld [vmem:[#allocation2 + $0x28] sm:$0xf]  ;;  %v2097_v9 = vsel %vm11630_vm10, %v2092_v39, %v2096_v34  ;;  %2870 = vst.msk [vmem:[#allocation3 + $0x48] sm:$0xf] %vm197_vm0, %v2838_v4  ;;  %v2717_v54 = vpop.permute.xlu1 %2716 }
 0x16a   : > { %v3314_v30 = vor.u32 %v3313_v35, %v3310_v63  ;;  %v2099_v24 = vshrl.u32 %v2008_v53, 16  ;;  %v2102_v14 = vshll.u32 %v2008_v53, 16  ;;  %v2943_v13 = vld [vmem:[#allocation2 + $0xc8] sm:$0x1]  ;;  %2469 = vst.msk [vmem:[#allocation3 + $0x44] sm:$0xf] %vm197_vm0, %v2097_v9 }
 0x16b   : > { %v2545_v22 = vld [vmem:[#allocation2 + $0xc8] sm:$0x1]  ;;  %v13029_v25 = vrot.slane %v3327_v56, 5  ;;  %v2108_v5 = vshll.u32 %v2009_v10, 16  ;;  %v3303_v18 = vshll.u32 %v2943_v13, 16  ;;  %v13032_v49 = vrot.slane %v3324_v27, 4 }
 0x16c   : > { %2805 = vst.msk [vmem:[#allocation3 + $0x44] sm:$0xf] %vm308_vm9, %v2713_v11  ;;  %v3315_v20 = vrot.slane %v3314_v30, 4  ;;  %v2101_v17 = vrot.slane %v2099_v24, 4  ;;  %v3732_v3 = vld [vmem:[#allocation3 + $0x8] sm:$0xff]  ;;  %v2704_v19 = vrot.slane %v2545_v22, 5 }
 0x16d   : > { %v2104_v41 = vrot.slane %v2102_v14, 5  ;;  %v2010_v2 = vld [vmem:[#allocation2 + $0x2c] sm:$0x1]  ;;  %v3305_v61 = vrot.slane %v3303_v18, 5  ;;  %v2110_v31 = vrot.slane %v2108_v5, 5  ;;  %v3735_v32 = vld [vmem:[#allocation3 + $0x1c] sm:$0xff]  ;;  %v3330_v37 = vsel %vm11630_vm10, %v13032_v49, %v13029_v25  ;;  %v3344_v25 = vpop.permute.xlu0 %3343  ;;  %v3342_v18 = vpop.permute.xlu1 %3341 }
 0x16e   : > { %v3320_v28 = vsel %vm11630_vm10, %v3315_v20, %v3319_v47  ;;  %v11172_v42 = vld [vmem:[#allocation3 + $0xc] ss:$20 sps:$4 sm:$0xff]   ;;  %v2112_v0 = vshrl.u32 %v2009_v10, 16  ;;  %3430 = vst.msk [vmem:[#allocation3 + $0x48] sm:$0xf] %vm308_vm9, %v3338_v45  ;;  %v2118_v40 = vshll.u32 %v2010_v2, 16  ;;  %v10076_v44 = vcombine.low %v3732_v3, %v3735_v32 }
 0x16f   : > { %3391 = vrot.lane.b32.xlu0 %v3320_v28, %s11422_s10  ;;  %v2105_v38 = vor.u32 %v2104_v41, %v2101_v17  ;;  %v2839_v15 = vld [vmem:[#allocation2 + $0x30] sm:$0xf]  ;;  %v3459_v43 = vld [vmem:[#allocation2 + $0x18] sm:$0xe]  ;;  %v3306_v48 = vsel %vm11630_vm10, %v13006_v33, %v3305_v61  ;;  %4760 = vmatprep.mubr.bf16.mxu1 %v11172_v42  ;;  %v3460_v34 = vld [vmem:[#allocation2 + $0x1c] sm:$0xf]  ;;  %v2705_v33 = vsel %vm12111_vm15, %v13020_v59, %v2704_v19 }
 0x170   : > { %v2114_v16 = vrot.slane %v2112_v0, 4  ;;  %2871 = vst.msk [vmem:[#allocation3 + $0x5c] sm:$0xf] %vm197_vm0, %v2839_v15  ;;  %v3461_v6 = vld [vmem:[#allocation2 + $0x20] sm:$0x1]  ;;  %v10057_v23 = vrot.slane %v3459_v43, 9  ;;  %3389 = vrot.lane.b32.xlu1 %v3306_v48, %s11422_s10  ;;  %4761 = vmatmul.mubr.bf16.vlgmr.msra.gmra.mxu1 %v10076_v44 }
 0x171   : > { %v2106_v8 = vrot.slane %v2105_v38, 4  ;;  %v2120_v50 = vrot.slane %v2118_v40, 5  ;;  %3431 = vst.msk [vmem:[#allocation3 + $0x5c] sm:$0xf] %vm308_vm9, %v3340_v46  ;;  %v3557_v21 = vrot.slane %v3460_v34, 5  ;;  %v3560_v36 = vrot.slane %v3461_v6, 5  ;;  %v13080_v43 = vpop.permute.xlu0 %2722  ;;  %v2721_v6 = vpop.permute.xlu1 %2720 }
 0x172   : > { %v2840_v60 = vld [vmem:[#allocation2 + $0x34] sm:$0xf]  ;;  %v2115_v52 = vor.u32 %v2114_v16, %v2110_v31  ;;  %v2011_v29 = vld [vmem:[#allocation2 + $0x30] sm:$0xf]  ;;  %v3462_v55 = vld [vmem:[#allocation2 + $0x24] sm:$0xe] }
 0x173   : > { %2872 = vst.msk [vmem:[#allocation3 + $0x70] sm:$0xf] %vm197_vm0, %v2840_v60  ;;  %v2012_v47 = vld [vmem:[#allocation2 + $0x34] sm:$0xf]  ;;  %v2111_v56 = vsel %vm11630_vm10, %v2106_v8, %v2110_v31  ;;  %v3558_v58 = vsel %vm12111_vm15, %v10057_v23, %v3557_v21  ;;  %v3559_v39 = vrot.slane %v3557_v21, 4  ;;  %v2123_v59 = vshrl.u32 %v2011_v29, 16 }
 0x174   : > { %v3463_v63 = vld [vmem:[#allocation2 + $0x28] sm:$0xf]  ;;  %v3464_v35 = vld [vmem:[#allocation2 + $0x2c] sm:$0x1]  ;;  %2470 = vst.msk [vmem:[#allocation3 + $0x58] sm:$0xf] %vm197_vm0, %v2111_v56  ;;  %2768 = vrot.lane.b32.xlu1 %v2705_v33, %s11422_s10 }
 0x175   : > { %v2116_v27 = vrot.slane %v2115_v52, 4  ;;  %3699 = vst.msk [vmem:[#allocation3 + $0x10] sm:$0xf] %vm197_vm0, %v3558_v58  ;;  %v2126_v4 = vshll.u32 %v2011_v29, 16  ;;  %v2132_v53 = vshll.u32 %v2012_v47, 16  ;;  %v10058_v10 = vrot.slane %v3462_v55, 9 }
 0x176   : > { %v2013_v9 = vld [vmem:[#allocation2 + $0x38] sm:$0x1]  ;;  %2806 = vst.msk [vmem:[#allocation3 + $0x58] sm:$0xf] %vm308_vm9, %v13023_v7  ;;  %v3561_v11 = vsel %vm12111_vm15, %v3559_v39, %v3560_v36  ;;  %v2125_v30 = vrot.slane %v2123_v59, 4  ;;  %v3564_v24 = vrot.slane %v3463_v63, 5  ;;  %v3348_v59 = vpop.permute.xlu0 %3347 }
 0x177   : > { %v3567_v14 = vrot.slane %v3464_v35, 5  ;;  %v3738_v13 = vld [vmem:[#allocation3 + $0x30] sm:$0xff]  ;;  %v2841_v22 = vld [vmem:[#allocation2 + $0x3c] sm:$0xf]  ;;  %v2121_v5 = vsel %vm11630_vm10, %v2116_v27, %v2120_v50  ;;  %3700 = vst.msk [vmem:[#allocation3 + $0x24] sm:$0xf] %vm197_vm0, %v3561_v11  ;;  %v3346_v35 = vpop.permute.xlu1 %3345 }
 0x178   : > { %v2128_v49 = vrot.slane %v2126_v4, 5  ;;  %v2134_v20 = vrot.slane %v2132_v53, 5  ;;  %v3741_v17 = vld [vmem:[#allocation3 + $0x44] sm:$0xff]  ;;  %v2136_v7 = vshrl.u32 %v2012_v47, 16  ;;  %2873 = vst.msk [vmem:[#allocation3 + $0x84] sm:$0xf] %vm197_vm0, %v2841_v22  ;;  %v3565_v19 = vsel %vm12111_vm15, %v10058_v10, %v3564_v24  ;;  %3393 = vrot.lane.b32.xlu1 %v3330_v37, %s11422_s10 }
 0x179   : > { %v11176_v3 = vld [vmem:[#allocation3 + $0x34] ss:$20 sps:$4 sm:$0xff]   ;;  %2471 = vst.msk [vmem:[#allocation3 + $0x6c] sm:$0xf] %vm197_vm0, %v2121_v5  ;;  %v3566_v41 = vrot.slane %v3564_v24, 4  ;;  %v2142_v2 = vshll.u32 %v2013_v9, 16  ;;  %v10081_v46 = vcombine.low %v3738_v13, %v3741_v17 }
 0x17a   : > { %3432 = vst.msk [vmem:[#allocation3 + $0x70] sm:$0xf] %vm308_vm9, %v3342_v18  ;;  %3433 = vst.msk [vmem:[#allocation3 + $0x84] sm:$0xf] %vm308_vm9, %v3344_v25  ;;  %v2842_v61 = vld [vmem:[#allocation2 + $0x40] sm:$0xf]  ;;  %v2129_v45 = vor.u32 %v2128_v49, %v2125_v30  ;;  %4768 = vmatprep.mubr.bf16.mxu1 %v11176_v3  ;;  %v13107_v3 = vpop.permute.xlu0 %2726 }
 0x17b   : > { %v2015_v28 = vld [vmem:[#allocation2 + $0x40] sm:$0xf]  ;;  %2807 = vst.msk [vmem:[#allocation3 + $0x6c] sm:$0xf] %vm308_vm9, %v2717_v54  ;;  %v2138_v31 = vrot.slane %v2136_v7, 4  ;;  %v3568_v38 = vsel %vm12111_vm15, %v3566_v41, %v3567_v14  ;;  %v2144_v40 = vrot.slane %v2142_v2, 5  ;;  %4769 = vmatmul.mubr.bf16.gmra.mxu1 %v10081_v46  ;;  %v2725_v7 = vpop.permute.xlu1 %2724 }
 0x17c   : > { %3701 = vst.msk [vmem:[#allocation3 + $0x38] sm:$0xf] %vm197_vm0, %v3565_v19  ;;  %2874 = vst.msk [vmem:[#allocation3 + $0x98] sm:$0xf] %vm197_vm0, %v2842_v61  ;;  %v2016_v32 = vld [vmem:[#allocation2 + $0x44] sm:$0x1] }
 0x17d   : > { %v2156_v42 = vshll.u32 %v2015_v28, 16  ;;  %v2160_v0 = vshrl.u32 %v2015_v28, 16  ;;  %v2166_v44 = vshll.u32 %v2016_v32, 16  ;;  %v2014_v15 = vld [vmem:[#allocation2 + $0x3c] sm:$0xf]  ;;  %v2130_v16 = vrot.slane %v2129_v45, 4 }
 0x17e   : > { %v3465_v48 = vld [vmem:[#allocation2 + $0x30] sm:$0xe]  ;;  %3702 = vst.msk [vmem:[#allocation3 + $0x4c] sm:$0xf] %vm197_vm0, %v3568_v38  ;;  %v2139_v34 = vor.u32 %v2138_v31, %v2134_v20  ;;  %v3466_v50 = vld [vmem:[#allocation2 + $0x34] sm:$0xf] }
 0x17f   : > { %v13083_v23 = vrot.slane %v2156_v42, 5  ;;  %v2162_v8 = vrot.slane %v2160_v0, 4  ;;  %v2168_v21 = vrot.slane %v2166_v44, 5  ;;  %v2147_v36 = vshrl.u32 %v2014_v15, 16  ;;  %v3467_v29 = vld [vmem:[#allocation2 + $0x38] sm:$0x1] }
 0x180   : > { %v2150_v60 = vshll.u32 %v2014_v15, 16  ;;  %v10059_v33 = vrot.slane %v3465_v48, 9  ;;  %v2135_v37 = vsel %vm11630_vm10, %v2130_v16, %v2134_v20  ;;  %v2140_v52 = vrot.slane %v2139_v34, 4  ;;  %v11174_v55 = vld [vmem:[#allocation3 + $0x10] ss:$20 sps:$4 sm:$0xff]   ;;  %v3744_v56 = vld [vmem:[#allocation3 + $0x58] sm:$0xff] }
 0x181   : > { %v2163_v54 = vor.u32 %v2162_v8, %v13083_v23  ;;  %v3571_v47 = vrot.slane %v3466_v50, 5  ;;  %2472 = vst.msk [vmem:[#allocation3 + $0x80] sm:$0xf] %vm197_vm0, %v2135_v37  ;;  %v2149_v58 = vrot.slane %v2147_v36, 4  ;;  %v2844_v10 = vld [vmem:[#allocation2 + $0x4c] sm:$0xf]  ;;  %10979 = vmatprep.mubr.bf16.mxu0 %v11174_v55  ;;  %v3350_v8 = vpop.permute.xlu1 %3349 }
 0x182   : > { %v2152_v39 = vrot.slane %v2150_v60, 5  ;;  %2808 = vst.msk [vmem:[#allocation3 + $0x80] sm:$0xf] %vm308_vm9, %v13044_v26  ;;  %v2145_v63 = vsel %vm11630_vm10, %v2140_v52, %v2144_v40  ;;  %v2843_v9 = vld [vmem:[#allocation2 + $0x48] sm:$0xf]  ;;  %v3574_v26 = vrot.slane %v3467_v29, 5 }
 0x183   : > { %v2164_v27 = vrot.slane %v2163_v54, 4  ;;  %v3572_v4 = vsel %vm12111_vm15, %v10059_v33, %v3571_v47  ;;  %v3573_v53 = vrot.slane %v3571_v47, 4  ;;  %2473 = vst.msk [vmem:[#allocation3 + $0x94] sm:$0xf] %vm197_vm0, %v2145_v63  ;;  %v3747_v11 = vld [vmem:[#allocation3 + $0x6c] sm:$0xff] }
 0x184   : > { %3434 = vst.msk [vmem:[#allocation3 + $0x98] sm:$0xf] %vm308_vm9, %v3346_v35  ;;  %v11178_v30 = vld [vmem:[#allocation3 + $0x5c] ss:$20 sps:$4 sm:$0xff]   ;;  %v2153_v24 = vor.u32 %v2152_v39, %v2149_v58  ;;  %2809 = vst.msk [vmem:[#allocation3 + $0x94] sm:$0xf] %vm308_vm9, %v2721_v6  ;;  %v10086_v13 = vcombine.low %v3744_v56, %v3747_v11 }
 0x185   : > { %3703 = vst.msk [vmem:[#allocation3 + $0x60] sm:$0xf] %vm197_vm0, %v3572_v4  ;;  %2876 = vst.msk [vmem:[#allocation3 + $0xc0] sm:$0xf] %vm197_vm0, %v2844_v10  ;;  %v2169_v14 = vsel %vm11630_vm10, %v2164_v27, %v2168_v21  ;;  %v3468_v22 = vld [vmem:[#allocation2 + $0x3c] sm:$0xe]  ;;  %4776 = vmatprep.mubr.bf16.mxu1 %v11178_v30  ;;  %v3575_v20 = vsel %vm12111_vm15, %v3573_v53, %v3574_v26  ;;  %v2729_v4 = vpop.permute.xlu1 %2728 }
 0x186   : > { %2875 = vst.msk [vmem:[#allocation3 + $0xac] sm:$0xf] %vm197_vm0, %v2843_v9  ;;  %v3469_v25 = vld [vmem:[#allocation2 + $0x40] sm:$0xf]  ;;  %v3470_v5 = vld [vmem:[#allocation2 + $0x44] sm:$0x1]  ;;  %4777 = vmatmul.mubr.bf16.gmra.mxu1 %v10086_v13 }
 0x187   : > { %3435 = vst.msk [vmem:[#allocation3 + $0xac] sm:$0xf] %vm308_vm9, %v3348_v59  ;;  %v11175_v18 = vld [vmem:[#allocation3 + $0x38] ss:$20 sps:$4 sm:$0xff]   ;;  %v2154_v49 = vrot.slane %v2153_v24, 4  ;;  %v10060_v17 = vrot.slane %v3468_v22, 9 }
 0x188   : > { %2475 = vst.msk [vmem:[#allocation3 + $0xbc] sm:$0xf] %vm197_vm0, %v2169_v14  ;;  %3704 = vst.msk [vmem:[#allocation3 + $0x74] sm:$0xf] %vm197_vm0, %v3575_v20  ;;  %v3578_v19 = vrot.slane %v3469_v25, 5  ;;  %v3581_v41 = vrot.slane %v3470_v5, 5  ;;  %10980 = vmatmul.mubr.bf16.vlgmr.msra.gmra.mxu0 %v11175_v18 }
 0x189   : > { %v2018_v2 = vld [vmem:[#allocation2 + $0x4c] sm:$0xf]  ;;  %v2019_v46 = vld [vmem:[#allocation2 + $0x50] sm:$0x1]  ;;  %2811 = vst.msk [vmem:[#allocation3 + $0xbc] sm:$0xf] %vm308_vm9, %v2725_v7  ;;  %v2159_v61 = vsel %vm11630_vm10, %v2154_v49, %v13083_v23  ;;  %v3352_v23 = vpop.permute.xlu0 %3351 }
 0x18a   : > { %v2180_v28 = vshll.u32 %v2018_v2, 16  ;;  %v2184_v45 = vshrl.u32 %v2018_v2, 16  ;;  %v2190_v31 = vshll.u32 %v2019_v46, 16  ;;  %v2017_v32 = vld [vmem:[#allocation2 + $0x48] sm:$0xf]  ;;  %v3579_v42 = vsel %vm12111_vm15, %v10060_v17, %v3578_v19  ;;  %v3750_v15 = vld [vmem:[#allocation3 + $0x80] sm:$0xff] }
 0x18b   : > { %2474 = vst.msk [vmem:[#allocation3 + $0xa8] sm:$0xf] %vm197_vm0, %v2159_v61  ;;  %v3580_v0 = vrot.slane %v3578_v19, 4  ;;  %v2171_v38 = vshrl.u32 %v2017_v32, 16  ;;  %v2174_v40 = vshll.u32 %v2017_v32, 16 }
 0x18c   : > { %v2846_v44 = vld [vmem:[#allocation2 + $0x58] sm:$0xf]  ;;  %2810 = vst.msk [vmem:[#allocation3 + $0xa8] sm:$0xf] %vm308_vm9, %v13080_v43  ;;  %v2182_v48 = vrot.slane %v2180_v28, 5  ;;  %v2186_v16 = vrot.slane %v2184_v45, 4  ;;  %v3354_v28 = vpop.permute.xlu1 %3353 }
 0x18d   : > { %3705 = vst.msk [vmem:[#allocation3 + $0x88] sm:$0xf] %vm197_vm0, %v3579_v42  ;;  %v2192_v34 = vrot.slane %v2190_v31, 5  ;;  %2878 = vst.msk [vmem:[#allocation3 + $0xe8] sm:$0xf] %vm197_vm0, %v2846_v44  ;;  %v3582_v50 = vsel %vm12111_vm15, %v3580_v0, %v3581_v41  ;;  %v2173_v21 = vrot.slane %v2171_v38, 4  ;;  %v13129_v27 = vpop.permute.xlu0 %2730 }
 0x18e   : > { %v2845_v6 = vld [vmem:[#allocation2 + $0x54] sm:$0xf]  ;;  %v2176_v36 = vrot.slane %v2174_v40, 5  ;;  %v2021_v60 = vld [vmem:[#allocation2 + $0x58] sm:$0xf]  ;;  %v3753_v43 = vld [vmem:[#allocation3 + $0x94] sm:$0xff]  ;;  %v2187_v37 = vor.u32 %v2186_v16, %v2182_v48 }
 0x18f   : > { %2877 = vst.msk [vmem:[#allocation3 + $0xd4] sm:$0xf] %vm197_vm0, %v2845_v6  ;;  %3706 = vst.msk [vmem:[#allocation3 + $0x9c] sm:$0xf] %vm197_vm0, %v3582_v50  ;;  %v11182_v33 = vld [vmem:[#allocation3 + $0x84] ss:$20 sps:$4 sm:$0xff]   ;;  %v10091_v29 = vcombine.low %v3750_v15, %v3753_v43 }
 0x190   : > { %3436 = vst.msk [vmem:[#allocation3 + $0xc0] sm:$0xf] %vm308_vm9, %v3350_v8  ;;  %3437 = vst.msk [vmem:[#allocation3 + $0xd4] sm:$0xf] %vm308_vm9, %v3352_v23  ;;  %v2022_v52 = vld [vmem:[#allocation2 + $0x5c] sm:$0x1]  ;;  %v2177_v47 = vor.u32 %v2176_v36, %v2173_v21  ;;  %4784 = vmatprep.mubr.bf16.mxu1 %v11182_v33 }
 0x191   : > { %v2204_v54 = vshll.u32 %v2021_v60, 16  ;;  %v2208_v55 = vshrl.u32 %v2021_v60, 16  ;;  %v2214_v56 = vshll.u32 %v2022_v52, 16  ;;  %v2020_v58 = vld [vmem:[#allocation2 + $0x54] sm:$0xf]  ;;  %v2188_v63 = vrot.slane %v2187_v37, 4  ;;  %4785 = vmatmul.mubr.bf16.gmra.mxu1 %v10091_v29  ;;  %v3356_v46 = vpop.permute.xlu0 %3355  ;;  %v2733_v60 = vpop.permute.xlu1 %2732 }
 0x192   : > { %v3471_v39 = vld [vmem:[#allocation2 + $0x48] sm:$0xe]  ;;  %v11180_v59 = vld [vmem:[#allocation3 + $0x60] ss:$20 sps:$4 sm:$0xff]   ;;  %v2178_v53 = vrot.slane %v2177_v47, 4  ;;  %v2195_v11 = vshrl.u32 %v2020_v58, 16 }
 0x193   : > { %v13127_v35 = vrot.slane %v2204_v54, 5  ;;  %v2210_v10 = vrot.slane %v2208_v55, 4  ;;  %v2216_v9 = vrot.slane %v2214_v56, 5  ;;  %v3472_v30 = vld [vmem:[#allocation2 + $0x4c] sm:$0xf]  ;;  %10983 = vmatprep.mubr.bf16.mxu0 %v11180_v59  ;;  %v2193_v24 = vsel %vm11630_vm10, %v2188_v63, %v2192_v34  ;;  %v3756_v5 = vld [vmem:[#allocation3 + $0xa8] sm:$0xff] }
 0x194   : > { %v2198_v26 = vshll.u32 %v2020_v58, 16  ;;  %v3473_v14 = vld [vmem:[#allocation2 + $0x50] sm:$0x1]  ;;  %v10061_v13 = vrot.slane %v3471_v39, 9  ;;  %v3585_v22 = vrot.slane %v3472_v30, 5  ;;  %v2183_v25 = vsel %vm11630_vm10, %v2178_v53, %v2182_v48 }
 0x195   : > { %2477 = vst.msk [vmem:[#allocation3 + $0xe4] sm:$0xf] %vm197_vm0, %v2193_v24  ;;  %v2211_v18 = vor.u32 %v2210_v10, %v13127_v35  ;;  %v2197_v49 = vrot.slane %v2195_v11, 4  ;;  %v3588_v20 = vrot.slane %v3473_v14, 5  ;;  %2476 = vst.msk [vmem:[#allocation3 + $0xd0] sm:$0xf] %vm197_vm0, %v2183_v25  ;;  %v13154_v36 = vpop.permute.xlu0 %2734 }
 0x196   : > { %2813 = vst.msk [vmem:[#allocation3 + $0xe4] sm:$0xf] %vm308_vm9, %v2729_v4  ;;  %v2200_v17 = vrot.slane %v2198_v26, 5  ;;  %v3586_v7 = vsel %vm12111_vm15, %v10061_v13, %v3585_v22  ;;  %v3587_v19 = vrot.slane %v3585_v22, 4  ;;  %v2848_v41 = vld [vmem:[#allocation2 + $0x64] sm:$0xf]  ;;  %v3358_v26 = vpop.permute.xlu1 %3357 }
 0x197   : > { %v2847_v2 = vld [vmem:[#allocation2 + $0x60] sm:$0xf]  ;;  %2812 = vst.msk [vmem:[#allocation3 + $0xd0] sm:$0xf] %vm308_vm9, %v13107_v3  ;;  %v3759_v45 = vld [vmem:[#allocation3 + $0xbc] sm:$0xff]  ;;  %v2212_v31 = vrot.slane %v2211_v18, 4 }
 0x198   : > { %v11181_v61 = vld [vmem:[#allocation3 + $0x88] ss:$20 sps:$4 sm:$0xff]   ;;  %3707 = vst.msk [vmem:[#allocation3 + $0xb0] sm:$0xf] %vm197_vm0, %v3586_v7  ;;  %2880 = vst.msk [vmem:[#allocation3 + $0x110] sm:$0xf] %vm197_vm0, %v2848_v41  ;;  %v10096_v42 = vcombine.low %v3756_v5, %v3759_v45  ;;  %v2201_v0 = vor.u32 %v2200_v17, %v2197_v49  ;;  %v3589_v38 = vsel %vm12111_vm15, %v3587_v19, %v3588_v20 }
 0x199   : > { %2879 = vst.msk [vmem:[#allocation3 + $0xfc] sm:$0xf] %vm197_vm0, %v2847_v2  ;;  %v11184_v32 = vld [vmem:[#allocation3 + $0xac] ss:$20 sps:$4 sm:$0xff]   ;;  %v3474_v3 = vld [vmem:[#allocation2 + $0x54] sm:$0xe]  ;;  %10984 = vmatmul.mubr.bf16.gmra.mxu0 %v11181_v61  ;;  %v2217_v44 = vsel %vm11630_vm10, %v2212_v31, %v2216_v9  ;;  %v3360_v11 = vpop.permute.xlu0 %3359 }
 0x19a   : > { %3438 = vst.msk [vmem:[#allocation3 + $0xe8] sm:$0xf] %vm308_vm9, %v3354_v28  ;;  %3439 = vst.msk [vmem:[#allocation3 + $0xfc] sm:$0xf] %vm308_vm9, %v3356_v46  ;;  %v3475_v40 = vld [vmem:[#allocation2 + $0x58] sm:$0xf]  ;;  %4792 = vmatprep.mubr.bf16.mxu1 %v11184_v32  ;;  %v2737_v32 = vpop.permute.xlu1 %2736 }
 0x19b   : > { %3708 = vst.msk [vmem:[#allocation3 + $0xc4] sm:$0xf] %vm197_vm0, %v3589_v38  ;;  %v3476_v15 = vld [vmem:[#allocation2 + $0x5c] sm:$0x1]  ;;  %v10062_v48 = vrot.slane %v3474_v3, 9  ;;  %v3592_v16 = vrot.slane %v3475_v40, 5  ;;  %4793 = vmatmul.mubr.bf16.gmra.mxu1 %v10096_v42 }
 0x19c   : > { %v2024_v34 = vld [vmem:[#allocation2 + $0x64] sm:$0xf]  ;;  %2479 = vst.msk [vmem:[#allocation3 + $0x10c] sm:$0xf] %vm197_vm0, %v2217_v44  ;;  %v2202_v6 = vrot.slane %v2201_v0, 4  ;;  %v3595_v23 = vrot.slane %v3476_v15, 5 }
 0x19d   : > { %v2025_v8 = vld [vmem:[#allocation2 + $0x68] sm:$0x1]  ;;  %v2228_v50 = vshll.u32 %v2024_v34, 16  ;;  %v2232_v21 = vshrl.u32 %v2024_v34, 16  ;;  %v3593_v43 = vsel %vm12111_vm15, %v10062_v48, %v3592_v16  ;;  %v3594_v33 = vrot.slane %v3592_v16, 4  ;;  %v13180_v28 = vpop.permute.xlu0 %2738 }
 0x19e   : > { %v2238_v37 = vshll.u32 %v2025_v8, 16  ;;  %v2023_v52 = vld [vmem:[#allocation2 + $0x60] sm:$0xf]  ;;  %v2850_v54 = vld [vmem:[#allocation2 + $0x70] sm:$0xf]  ;;  %v2207_v29 = vsel %vm11630_vm10, %v2202_v6, %v13127_v35  ;;  %v3762_v53 = vld [vmem:[#allocation3 + $0xd0] sm:$0xff] }
 0x19f   : > { %2815 = vst.msk [vmem:[#allocation3 + $0x10c] sm:$0xf] %vm308_vm9, %v2733_v60  ;;  %v13163_v47 = vrot.slane %v2228_v50, 5  ;;  %v2234_v55 = vrot.slane %v2232_v21, 4  ;;  %v2219_v56 = vshrl.u32 %v2023_v52, 16  ;;  %v3596_v39 = vsel %vm12111_vm15, %v3594_v33, %v3595_v23 }
 0x1a0   : > { %3709 = vst.msk [vmem:[#allocation3 + $0xd8] sm:$0xf] %vm197_vm0, %v3593_v43  ;;  %2882 = vst.msk [vmem:[#allocation3 + $0x138] sm:$0xf] %vm197_vm0, %v2850_v54  ;;  %v2849_v58 = vld [vmem:[#allocation2 + $0x6c] sm:$0xf] }
 0x1a1   : > { %2478 = vst.msk [vmem:[#allocation3 + $0xf8] sm:$0xf] %vm197_vm0, %v2207_v29  ;;  %v2240_v59 = vrot.slane %v2238_v37, 5  ;;  %v2222_v63 = vshll.u32 %v2023_v52, 16  ;;  %2881 = vst.msk [vmem:[#allocation3 + $0x124] sm:$0xf] %vm197_vm0, %v2849_v58  ;;  %v2235_v10 = vor.u32 %v2234_v55, %v13163_v47  ;;  %v3364_v43 = vpop.permute.xlu0 %3363  ;;  %v3362_v37 = vpop.permute.xlu1 %3361 }
 0x1a2   : > { %v2027_v4 = vld [vmem:[#allocation2 + $0x70] sm:$0xf]  ;;  %v2028_v35 = vld [vmem:[#allocation2 + $0x74] sm:$0x1]  ;;  %2814 = vst.msk [vmem:[#allocation3 + $0xf8] sm:$0xf] %vm308_vm9, %v13129_v27 }
 0x1a3   : > { %3710 = vst.msk [vmem:[#allocation3 + $0xec] sm:$0xf] %vm197_vm0, %v3596_v39  ;;  %v2221_v9 = vrot.slane %v2219_v56, 4  ;;  %v2252_v30 = vshll.u32 %v2027_v4, 16  ;;  %v2256_v24 = vshrl.u32 %v2027_v4, 16  ;;  %v3765_v14 = vld [vmem:[#allocation3 + $0xe4] sm:$0xff] }
 0x1a4   : > { %v11188_v13 = vld [vmem:[#allocation3 + $0xd4] ss:$20 sps:$4 sm:$0xff]   ;;  %v2224_v22 = vrot.slane %v2222_v63, 5  ;;  %3441 = vst.msk [vmem:[#allocation3 + $0x124] sm:$0xf] %vm308_vm9, %v3360_v11  ;;  %v2262_v25 = vshll.u32 %v2028_v35, 16  ;;  %v10101_v18 = vcombine.low %v3762_v53, %v3765_v14 }
 0x1a5   : > { %v11186_v5 = vld [vmem:[#allocation3 + $0xb0] ss:$20 sps:$4 sm:$0xff]   ;;  %3440 = vst.msk [vmem:[#allocation3 + $0x110] sm:$0xf] %vm308_vm9, %v3358_v26  ;;  %v2236_v27 = vrot.slane %v2235_v10, 4  ;;  %v13176_v49 = vrot.slane %v2252_v30, 5  ;;  %4800 = vmatprep.mubr.bf16.mxu1 %v11188_v13  ;;  %v13209_v14 = vpop.permute.xlu0 %2742 }
 0x1a6   : > { %v2225_v20 = vor.u32 %v2224_v22, %v2221_v9  ;;  %v2258_v17 = vrot.slane %v2256_v24, 4  ;;  %v2264_v7 = vrot.slane %v2262_v25, 5  ;;  %v2026_v19 = vld [vmem:[#allocation2 + $0x6c] sm:$0xf]  ;;  %v3477_v41 = vld [vmem:[#allocation2 + $0x60] sm:$0xe]  ;;  %10987 = vmatprep.mubr.bf16.mxu0 %v11186_v5  ;;  %4801 = vmatmul.mubr.bf16.gmra.mxu1 %v10101_v18  ;;  %v2741_v22 = vpop.permute.xlu1 %2740 }
 0x1a7   : > { %v2241_v2 = vsel %vm11630_vm10, %v2236_v27, %v2240_v59  ;;  %v2243_v46 = vshrl.u32 %v2026_v19, 16  ;;  %v2246_v61 = vshll.u32 %v2026_v19, 16  ;;  %v3478_v45 = vld [vmem:[#allocation2 + $0x64] sm:$0xf]  ;;  %v3479_v31 = vld [vmem:[#allocation2 + $0x68] sm:$0x1] }
 0x1a8   : > { %2481 = vst.msk [vmem:[#allocation3 + $0x134] sm:$0xf] %vm197_vm0, %v2241_v2  ;;  %v2226_v42 = vrot.slane %v2225_v20, 4  ;;  %v2259_v0 = vor.u32 %v2258_v17, %v13176_v49  ;;  %v10063_v38 = vrot.slane %v3477_v41, 9  ;;  %v3599_v3 = vrot.slane %v3478_v45, 5 }
 0x1a9   : > { %2817 = vst.msk [vmem:[#allocation3 + $0x134] sm:$0xf] %vm308_vm9, %v2737_v32  ;;  %v2245_v40 = vrot.slane %v2243_v46, 4  ;;  %v2248_v44 = vrot.slane %v2246_v61, 5  ;;  %v3602_v15 = vrot.slane %v3479_v31, 5  ;;  %v3768_v6 = vld [vmem:[#allocation3 + $0xf8] sm:$0xff]  ;;  %v3368_v31 = vpop.permute.xlu0 %3367  ;;  %v10483_v32 = vpop.f32.mrf.mxu0 }
 0x1aa   : > { %v2852_v48 = vld [vmem:[#allocation2 + $0x7c] sm:$0xf]  ;;  %v11187_v16 = vld [vmem:[#allocation3 + $0xd8] ss:$20 sps:$4 sm:$0xff]   ;;  %v2231_v34 = vsel %vm11630_vm10, %v2226_v42, %v13163_v47  ;;  %v2260_v23 = vrot.slane %v2259_v0, 4  ;;  %v3600_v8 = vsel %vm12111_vm15, %v10063_v38, %v3599_v3  ;;  %v3601_v21 = vrot.slane %v3599_v3, 4  ;;  %v3366_v38 = vpop.permute.xlu1 %3365 }
 0x1ab   : > { %2884 = vst.msk [vmem:[#allocation3 + $0x160] sm:$0xf] %vm197_vm0, %v2852_v48  ;;  %2480 = vst.msk [vmem:[#allocation3 + $0x120] sm:$0xf] %vm197_vm0, %v2231_v34  ;;  %v2249_v50 = vor.u32 %v2248_v44, %v2245_v40  ;;  %v2851_v60 = vld [vmem:[#allocation2 + $0x78] sm:$0xf]  ;;  %10988 = vmatmul.mubr.bf16.gmra.mxu0 %v11187_v16 }
 0x1ac   : > { %3711 = vst.msk [vmem:[#allocation3 + $0x100] sm:$0xf] %vm197_vm0, %v3600_v8  ;;  %v3480_v33 = vld [vmem:[#allocation2 + $0x6c] sm:$0xe]  ;;  %v3771_v52 = vld [vmem:[#allocation3 + $0x10c] sm:$0xff]  ;;  %v2265_v29 = vsel %vm11630_vm10, %v2260_v23, %v2264_v7  ;;  %v3603_v39 = vsel %vm12111_vm15, %v3601_v21, %v3602_v15 }
 0x1ad   : > { %2816 = vst.msk [vmem:[#allocation3 + $0x120] sm:$0xf] %vm308_vm9, %v13154_v36  ;;  %v11190_v54 = vld [vmem:[#allocation3 + $0xfc] ss:$20 sps:$4 sm:$0xff]   ;;  %v3481_v47 = vld [vmem:[#allocation2 + $0x70] sm:$0xf]  ;;  %v10106_v56 = vcombine.low %v3768_v6, %v3771_v52  ;;  %v13229_v52 = vpop.permute.xlu0 %2746 }
 0x1ae   : > { %2883 = vst.msk [vmem:[#allocation3 + $0x14c] sm:$0xf] %vm197_vm0, %v2851_v60  ;;  %v10064_v55 = vrot.slane %v3480_v33, 9  ;;  %2483 = vst.msk [vmem:[#allocation3 + $0x15c] sm:$0xf] %vm197_vm0, %v2265_v29  ;;  %v2250_v58 = vrot.slane %v2249_v50, 4  ;;  %4808 = vmatprep.mubr.bf16.mxu1 %v11190_v54  ;;  %v10484_v50 = vpop.f32.mrf.mxu0 }
 0x1af   : > { %3442 = vst.msk [vmem:[#allocation3 + $0x138] sm:$0xf] %vm308_vm9, %v3362_v37  ;;  %3443 = vst.msk [vmem:[#allocation3 + $0x14c] sm:$0xf] %vm308_vm9, %v3364_v43  ;;  %v3482_v36 = vld [vmem:[#allocation2 + $0x74] sm:$0x1]  ;;  %4809 = vmatmul.mubr.bf16.gmra.mxu1 %v10106_v56  ;;  %v13231_v54 = vadd.f32 %v10484_v50, %v10483_v32 }
 0x1b0   : > { %v3606_v59 = vrot.slane %v3481_v47, 5  ;;  %v2030_v63 = vld [vmem:[#allocation2 + $0x7c] sm:$0xf]  ;;  %3712 = vst.msk [vmem:[#allocation3 + $0x114] sm:$0xf] %vm197_vm0, %v3603_v39  ;;  %v3609_v4 = vrot.slane %v3482_v36, 5  ;;  %v2255_v9 = vsel %vm11630_vm10, %v2250_v58, %v13176_v49 }
 0x1b1   : > { %v2031_v35 = vld [vmem:[#allocation2 + $0x80] sm:$0x1]  ;;  %v2276_v53 = vshll.u32 %v2030_v63, 16  ;;  %v2280_v10 = vshrl.u32 %v2030_v63, 16  ;;  %v2029_v26 = vld [vmem:[#allocation2 + $0x78] sm:$0xf]  ;;  %v13235_v63 = vpop.f32.mrf.mxu0 }
 0x1b2   : > { %v3607_v11 = vsel %vm12111_vm15, %v10064_v55, %v3606_v59  ;;  %v3608_v30 = vrot.slane %v3606_v59, 4  ;;  %v2286_v24 = vshll.u32 %v2031_v35, 16  ;;  %v2854_v13 = vld [vmem:[#allocation2 + $0x88] sm:$0xf]  ;;  %2482 = vst.msk [vmem:[#allocation3 + $0x148] sm:$0xf] %vm197_vm0, %v2255_v9  ;;  %v2745_v55 = vpop.permute.xlu1 %2744 }
 0x1b3   : > { %3713 = vst.msk [vmem:[#allocation3 + $0x128] sm:$0xf] %vm197_vm0, %v3607_v11  ;;  %v2278_v25 = vrot.slane %v2276_v53, 5  ;;  %v2282_v5 = vrot.slane %v2280_v10, 4  ;;  %v2267_v27 = vshrl.u32 %v2029_v26, 16  ;;  %v2270_v18 = vshll.u32 %v2029_v26, 16 }
 0x1b4   : > { %2886 = vst.msk [vmem:[#allocation3 + $0x188] sm:$0xf] %vm197_vm0, %v2854_v13  ;;  %v2853_v49 = vld [vmem:[#allocation2 + $0x84] sm:$0xf]  ;;  %v3610_v20 = vsel %vm12111_vm15, %v3608_v30, %v3609_v4  ;;  %v2288_v17 = vrot.slane %v2286_v24, 5  ;;  %v3774_v45 = vld [vmem:[#allocation3 + $0x120] sm:$0xff] }
 0x1b5   : > { %2819 = vst.msk [vmem:[#allocation3 + $0x15c] sm:$0xf] %vm308_vm9, %v2741_v22  ;;  %2818 = vst.msk [vmem:[#allocation3 + $0x148] sm:$0xf] %vm308_vm9, %v13180_v28  ;;  %v2033_v7 = vld [vmem:[#allocation2 + $0x88] sm:$0xf]  ;;  %v2283_v41 = vor.u32 %v2282_v5, %v2278_v25  ;;  %v3372_v22 = vpop.permute.xlu0 %3371 }
 0x1b6   : > { %2885 = vst.msk [vmem:[#allocation3 + $0x174] sm:$0xf] %vm197_vm0, %v2853_v49  ;;  %v2034_v19 = vld [vmem:[#allocation2 + $0x8c] sm:$0x1]  ;;  %3714 = vst.msk [vmem:[#allocation3 + $0x13c] sm:$0xf] %vm197_vm0, %v3610_v20 }
 0x1b7   : > { %v2269_v2 = vrot.slane %v2267_v27, 4  ;;  %v2272_v46 = vrot.slane %v2270_v18, 5  ;;  %v2300_v61 = vshll.u32 %v2033_v7, 16  ;;  %v2304_v42 = vshrl.u32 %v2033_v7, 16  ;;  %v2032_v28 = vld [vmem:[#allocation2 + $0x84] sm:$0xf]  ;;  %v3370_v27 = vpop.permute.xlu1 %3369 }
 0x1b8   : > { %v2310_v0 = vshll.u32 %v2034_v19, 16  ;;  %v3777_v3 = vld [vmem:[#allocation3 + $0x134] sm:$0xff]  ;;  %v2284_v44 = vrot.slane %v2283_v41, 4  ;;  %3445 = vst.msk [vmem:[#allocation3 + $0x174] sm:$0xf] %vm308_vm9, %v3368_v31  ;;  %v2291_v16 = vshrl.u32 %v2032_v28, 16  ;;  %v13252_v41 = vpop.f32.mrf.mxu0 }
 0x1b9   : > { %v11194_v40 = vld [vmem:[#allocation3 + $0x124] ss:$20 sps:$4 sm:$0xff]   ;;  %v2273_v15 = vor.u32 %v2272_v46, %v2269_v2  ;;  %v13222_v48 = vrot.slane %v2300_v61, 5  ;;  %v11192_v34 = vld [vmem:[#allocation3 + $0x100] ss:$20 sps:$4 sm:$0xff]   ;;  %v10111_v6 = vcombine.low %v3774_v45, %v3777_v3  ;;  %v2306_v23 = vrot.slane %v2304_v42, 4 }
 0x1ba   : > { %3444 = vst.msk [vmem:[#allocation3 + $0x160] sm:$0xf] %vm308_vm9, %v3366_v38  ;;  %v2312_v8 = vrot.slane %v2310_v0, 5  ;;  %4816 = vmatprep.mubr.bf16.mxu1 %v11194_v40  ;;  %v2289_v21 = vsel %vm11630_vm10, %v2284_v44, %v2288_v17  ;;  %v2293_v43 = vrot.slane %v2291_v16, 4  ;;  %v2294_v33 = vshll.u32 %v2032_v28, 16  ;;  %10991 = vmatprep.mubr.bf16.mxu0 %v11192_v34  ;;  %v10489_v3 = vpop.f32.mrf.mxu0  ;;  %v13263_v34 = vpop.permute.xlu0 %2750 }
 0x1bb   : > { %v2274_v60 = vrot.slane %v2273_v15, 4  ;;  %2485 = vst.msk [vmem:[#allocation3 + $0x184] sm:$0xf] %vm197_vm0, %v2289_v21  ;;  %v2307_v37 = vor.u32 %v2306_v23, %v13222_v48  ;;  %v3483_v29 = vld [vmem:[#allocation2 + $0x78] sm:$0xe]  ;;  %4817 = vmatmul.mubr.bf16.gmra.mxu1 %v10111_v6  ;;  %v2749_v6 = vpop.permute.xlu1 %2748 }
 0x1bc   : > { %v3484_v47 = vld [vmem:[#allocation2 + $0x7c] sm:$0xf]  ;;  %v2296_v58 = vrot.slane %v2294_v33, 5  ;;  %v3485_v39 = vld [vmem:[#allocation2 + $0x80] sm:$0x1]  ;;  %v10065_v36 = vrot.slane %v3483_v29, 9  ;;  %v10490_v50 = vpop.f32.mrf.mxu0 }
 0x1bd   : > { %v2279_v56 = vsel %vm11630_vm10, %v2274_v60, %v2278_v25  ;;  %v3613_v59 = vrot.slane %v3484_v47, 5  ;;  %v11193_v4 = vld [vmem:[#allocation3 + $0x128] ss:$20 sps:$4 sm:$0xff]   ;;  %2821 = vst.msk [vmem:[#allocation3 + $0x184] sm:$0xf] %vm308_vm9, %v2745_v55  ;;  %v2308_v35 = vrot.slane %v2307_v37, 4  ;;  %v13273_v47 = vadd.f32 %v10490_v50, %v10489_v3 }
 0x1be   : > { %2484 = vst.msk [vmem:[#allocation3 + $0x170] sm:$0xf] %vm197_vm0, %v2279_v56  ;;  %v3616_v53 = vrot.slane %v3485_v39, 5  ;;  %v3780_v10 = vld [vmem:[#allocation3 + $0x148] sm:$0xff]  ;;  %v2297_v9 = vor.u32 %v2296_v58, %v2293_v43  ;;  %v2856_v24 = vld [vmem:[#allocation2 + $0x94] sm:$0xf]  ;;  %10992 = vmatmul.mubr.bf16.gmra.mxu0 %v11193_v4  ;;  %v13275_v58 = vpop.f32.mrf.mxu0  ;;  %v3376_v4 = vpop.permute.xlu0 %3375 }
 0x1bf   : > { %2820 = vst.msk [vmem:[#allocation3 + $0x170] sm:$0xf] %vm308_vm9, %v13209_v14  ;;  %v3614_v11 = vsel %vm12111_vm15, %v10065_v36, %v3613_v59  ;;  %v3615_v30 = vrot.slane %v3613_v59, 4  ;;  %v2855_v26 = vld [vmem:[#allocation2 + $0x90] sm:$0xf]  ;;  %v2313_v13 = vsel %vm11630_vm10, %v2308_v35, %v2312_v8 }
 0x1c0   : > { %3715 = vst.msk [vmem:[#allocation3 + $0x150] sm:$0xf] %vm197_vm0, %v3614_v11  ;;  %2888 = vst.msk [vmem:[#allocation3 + $0x1b0] sm:$0xf] %vm197_vm0, %v2856_v24  ;;  %v3486_v14 = vld [vmem:[#allocation2 + $0x84] sm:$0xe]  ;;  %v13280_v24 = vpop.f32.mrf.mxu0 }
 0x1c1   : > { %2887 = vst.msk [vmem:[#allocation3 + $0x19c] sm:$0xf] %vm197_vm0, %v2855_v26  ;;  %v3487_v25 = vld [vmem:[#allocation2 + $0x88] sm:$0xf]  ;;  %v3488_v5 = vld [vmem:[#allocation2 + $0x8c] sm:$0x1]  ;;  %v3617_v17 = vsel %vm12111_vm15, %v3615_v30, %v3616_v53 }
 0x1c2   : > { %v3783_v18 = vld [vmem:[#allocation3 + $0x15c] sm:$0xff]  ;;  %2487 = vst.msk [vmem:[#allocation3 + $0x1ac] sm:$0xf] %vm197_vm0, %v2313_v13  ;;  %v2298_v20 = vrot.slane %v2297_v9, 4  ;;  %v10066_v7 = vrot.slane %v3486_v14, 9  ;;  %v3620_v19 = vrot.slane %v3487_v25, 5  ;;  %v3374_v9 = vpop.permute.xlu1 %3373 }
 0x1c3   : > { %v11196_v49 = vld [vmem:[#allocation3 + $0x14c] ss:$20 sps:$4 sm:$0xff]   ;;  %3447 = vst.msk [vmem:[#allocation3 + $0x19c] sm:$0xf] %vm308_vm9, %v3372_v22  ;;  %3446 = vst.msk [vmem:[#allocation3 + $0x188] sm:$0xf] %vm308_vm9, %v3370_v27  ;;  %v10116_v2 = vcombine.low %v3780_v10, %v3783_v18 }
 0x1c4   : > { %3716 = vst.msk [vmem:[#allocation3 + $0x164] sm:$0xf] %vm197_vm0, %v3617_v17  ;;  %v3623_v46 = vrot.slane %v3488_v5, 5  ;;  %v2036_v61 = vld [vmem:[#allocation2 + $0x94] sm:$0xf]  ;;  %4824 = vmatprep.mubr.bf16.mxu1 %v11196_v49  ;;  %v2303_v31 = vsel %vm11630_vm10, %v2298_v20, %v13222_v48  ;;  %v3621_v32 = vsel %vm12111_vm15, %v10066_v7, %v3620_v19  ;;  %v3622_v42 = vrot.slane %v3620_v19, 4  ;;  %v10495_v20 = vpop.f32.mrf.mxu0 }
 0x1c5   : > { %v2037_v45 = vld [vmem:[#allocation2 + $0x98] sm:$0x1]  ;;  %v2324_v0 = vshll.u32 %v2036_v61, 16  ;;  %v2035_v28 = vld [vmem:[#allocation2 + $0x90] sm:$0xf]  ;;  %v2328_v40 = vshrl.u32 %v2036_v61, 16  ;;  %4825 = vmatmul.mubr.bf16.gmra.mxu1 %v10116_v2  ;;  %v13288_v2 = vpop.permute.xlu0 %2754 }
 0x1c6   : > { %v2858_v38 = vld [vmem:[#allocation2 + $0xa0] sm:$0xf]  ;;  %2486 = vst.msk [vmem:[#allocation3 + $0x198] sm:$0xf] %vm197_vm0, %v2303_v31  ;;  %3717 = vst.msk [vmem:[#allocation3 + $0x178] sm:$0xf] %vm197_vm0, %v3621_v32  ;;  %v3624_v23 = vsel %vm12111_vm15, %v3622_v42, %v3623_v46  ;;  %v2753_v32 = vpop.permute.xlu1 %2752 }
 0x1c7   : > { %v2334_v44 = vshll.u32 %v2037_v45, 16  ;;  %v2315_v15 = vshrl.u32 %v2035_v28, 16  ;;  %v2318_v16 = vshll.u32 %v2035_v28, 16  ;;  %2890 = vst.msk [vmem:[#allocation3 + $0x1d8] sm:$0xf] %vm197_vm0, %v2858_v38  ;;  %v2326_v8 = vrot.slane %v2324_v0, 5  ;;  %v10496_v28 = vpop.f32.mrf.mxu0 }
 0x1c8   : > { %v2857_v48 = vld [vmem:[#allocation2 + $0x9c] sm:$0xf]  ;;  %2822 = vst.msk [vmem:[#allocation3 + $0x198] sm:$0xf] %vm308_vm9, %v13229_v52  ;;  %v2039_v21 = vld [vmem:[#allocation2 + $0xa0] sm:$0xf] }
 0x1c9   : > { %2889 = vst.msk [vmem:[#allocation3 + $0x1c4] sm:$0xf] %vm197_vm0, %v2857_v48  ;;  %v2040_v60 = vld [vmem:[#allocation2 + $0xa4] sm:$0x1]  ;;  %3718 = vst.msk [vmem:[#allocation3 + $0x18c] sm:$0xf] %vm197_vm0, %v3624_v23  ;;  %v13299_v50 = vpop.f32.mrf.mxu0 }
 0x1ca   : > { %2823 = vst.msk [vmem:[#allocation3 + $0x1ac] sm:$0xf] %vm308_vm9, %v2749_v6  ;;  %v2330_v43 = vrot.slane %v2328_v40, 4  ;;  %v2317_v33 = vrot.slane %v2315_v15, 4  ;;  %v2320_v37 = vrot.slane %v2318_v16, 5  ;;  %v3786_v29 = vld [vmem:[#allocation3 + $0x170] sm:$0xff]  ;;  %v13296_v16 = vadd.f32 %v10496_v28, %v10495_v20 }
 0x1cb   : > { %v2348_v52 = vshll.u32 %v2039_v21, 16  ;;  %v2352_v55 = vshrl.u32 %v2039_v21, 16  ;;  %v2358_v56 = vshll.u32 %v2040_v60, 16  ;;  %v2336_v36 = vrot.slane %v2334_v44, 5  ;;  %v2038_v35 = vld [vmem:[#allocation2 + $0x9c] sm:$0xf] }
 0x1cc   : > { %v2331_v39 = vor.u32 %v2330_v43, %v2326_v8  ;;  %v2321_v59 = vor.u32 %v2320_v37, %v2317_v33  ;;  %v3489_v53 = vld [vmem:[#allocation2 + $0x90] sm:$0xe]  ;;  %v11198_v10 = vld [vmem:[#allocation3 + $0x150] ss:$20 sps:$4 sm:$0xff]   ;;  %3449 = vst.msk [vmem:[#allocation3 + $0x1c4] sm:$0xf] %vm308_vm9, %v3376_v4  ;;  %v3380_v43 = vpop.permute.xlu0 %3379  ;;  %v13308_v4 = vpop.f32.mrf.mxu0 }
 0x1cd   : > { %v3789_v11 = vld [vmem:[#allocation3 + $0x184] sm:$0xff]  ;;  %v13278_v30 = vrot.slane %v2348_v52, 5  ;;  %v3490_v26 = vld [vmem:[#allocation2 + $0x94] sm:$0xf]  ;;  %3448 = vst.msk [vmem:[#allocation3 + $0x1b0] sm:$0xf] %vm308_vm9, %v3374_v9  ;;  %10995 = vmatprep.mubr.bf16.mxu0 %v11198_v10  ;;  %v3378_v52 = vpop.permute.xlu1 %3377 }
 0x1ce   : > { %v11200_v13 = vld [vmem:[#allocation3 + $0x174] ss:$20 sps:$4 sm:$0xff]   ;;  %v2332_v22 = vrot.slane %v2331_v39, 4  ;;  %v10121_v14 = vcombine.low %v3786_v29, %v3789_v11  ;;  %v2322_v25 = vrot.slane %v2321_v59, 4  ;;  %v2354_v5 = vrot.slane %v2352_v55, 4 }
 0x1cf   : > { %v2360_v27 = vrot.slane %v2358_v56, 5  ;;  %v2339_v18 = vshrl.u32 %v2038_v35, 16  ;;  %v2342_v49 = vshll.u32 %v2038_v35, 16  ;;  %4832 = vmatprep.mubr.bf16.mxu1 %v11200_v13  ;;  %v3491_v46 = vld [vmem:[#allocation2 + $0x98] sm:$0x1]  ;;  %v10067_v61 = vrot.slane %v3489_v53, 9 }
 0x1d0   : > { %v2337_v17 = vsel %vm11630_vm10, %v2332_v22, %v2336_v36  ;;  %v2327_v7 = vsel %vm11630_vm10, %v2322_v25, %v2326_v8  ;;  %v2355_v19 = vor.u32 %v2354_v5, %v13278_v30  ;;  %v2860_v45 = vld [vmem:[#allocation2 + $0xac] sm:$0xf]  ;;  %v11199_v31 = vld [vmem:[#allocation3 + $0x178] ss:$20 sps:$4 sm:$0xff]   ;;  %4833 = vmatmul.mubr.bf16.gmra.mxu1 %v10121_v14  ;;  %v3627_v40 = vrot.slane %v3490_v26, 5 }
 0x1d1   : > { %2489 = vst.msk [vmem:[#allocation3 + $0x1d4] sm:$0xf] %vm197_vm0, %v2337_v17  ;;  %2488 = vst.msk [vmem:[#allocation3 + $0x1c0] sm:$0xf] %vm197_vm0, %v2327_v7  ;;  %v2341_v42 = vrot.slane %v2339_v18, 4  ;;  %v2344_v0 = vrot.slane %v2342_v49, 5  ;;  %10996 = vmatmul.mubr.bf16.gmra.mxu0 %v11199_v31  ;;  %v13324_v7 = vpop.permute.xlu0 %2758 }
 0x1d2   : > { %2892 = vst.msk [vmem:[#allocation3 + $0x200] sm:$0xf] %vm197_vm0, %v2860_v45  ;;  %v3792_v38 = vld [vmem:[#allocation3 + $0x198] sm:$0xff]  ;;  %v2356_v3 = vrot.slane %v2355_v19, 4  ;;  %v3630_v44 = vrot.slane %v3491_v46, 5  ;;  %v3629_v60 = vrot.slane %v3627_v40, 4  ;;  %v2757_v46 = vpop.permute.xlu1 %2756 }
 0x1d3   : > { %2825 = vst.msk [vmem:[#allocation3 + $0x1d4] sm:$0xf] %vm308_vm9, %v2753_v32  ;;  %2824 = vst.msk [vmem:[#allocation3 + $0x1c0] sm:$0xf] %vm308_vm9, %v13263_v34  ;;  %v2859_v15 = vld [vmem:[#allocation2 + $0xa8] sm:$0xf]  ;;  %v2345_v48 = vor.u32 %v2344_v0, %v2341_v42  ;;  %v3628_v34 = vsel %vm12111_vm15, %v10067_v61, %v3627_v40 }
 0x1d4   : > { %2891 = vst.msk [vmem:[#allocation3 + $0x1ec] sm:$0xf] %vm197_vm0, %v2859_v15  ;;  %v3492_v6 = vld [vmem:[#allocation2 + $0x9c] sm:$0xe]  ;;  %v3493_v23 = vld [vmem:[#allocation2 + $0xa0] sm:$0xf]  ;;  %v2361_v21 = vsel %vm11630_vm10, %v2356_v3, %v2360_v27  ;;  %v3631_v53 = vsel %vm12111_vm15, %v3629_v60, %v3630_v44  ;;  %v10501_v27 = vpop.f32.mrf.mxu0 }
 0x1d5   : > { %v3494_v8 = vld [vmem:[#allocation2 + $0xa4] sm:$0x1]  ;;  %v10068_v33 = vrot.slane %v3492_v6, 9  ;;  %v2042_v37 = vld [vmem:[#allocation2 + $0xac] sm:$0xf]  ;;  %v2346_v39 = vrot.slane %v2345_v48, 4 }
 0x1d6   : > { %v2043_v29 = vld [vmem:[#allocation2 + $0xb0] sm:$0x1]  ;;  %v3795_v55 = vld [vmem:[#allocation3 + $0x1ac] sm:$0xff]  ;;  %2491 = vst.msk [vmem:[#allocation3 + $0x1fc] sm:$0xf] %vm197_vm0, %v2361_v21  ;;  %v3634_v36 = vrot.slane %v3493_v23, 5  ;;  %v10502_v31 = vpop.f32.mrf.mxu0 }
 0x1d7   : > { %v11202_v56 = vld [vmem:[#allocation3 + $0x19c] ss:$20 sps:$4 sm:$0xff]   ;;  %3719 = vst.msk [vmem:[#allocation3 + $0x1a0] sm:$0xf] %vm197_vm0, %v3628_v34  ;;  %v3637_v59 = vrot.slane %v3494_v8, 5  ;;  %v10126_v35 = vcombine.low %v3792_v38, %v3795_v55  ;;  %v2372_v10 = vshll.u32 %v2042_v37, 16  ;;  %v2351_v13 = vsel %vm11630_vm10, %v2346_v39, %v13278_v30 }
 0x1d8   : > { %3451 = vst.msk [vmem:[#allocation3 + $0x1ec] sm:$0xf] %vm308_vm9, %v3380_v43  ;;  %3450 = vst.msk [vmem:[#allocation3 + $0x1d8] sm:$0xf] %vm308_vm9, %v3378_v52  ;;  %v2376_v9 = vshrl.u32 %v2042_v37, 16  ;;  %4840 = vmatprep.mubr.bf16.mxu1 %v11202_v56  ;;  %v3635_v22 = vsel %vm12111_vm15, %v10068_v33, %v3634_v36  ;;  %v3636_v14 = vrot.slane %v3634_v36, 4  ;;  %v13334_v3 = vadd.f32 %v10502_v31, %v10501_v27  ;;  %v13338_v6 = vpop.f32.mrf.mxu0  ;;  %v3382_v33 = vpop.permute.xlu1 %3381 }
 0x1d9   : > { %v2041_v11 = vld [vmem:[#allocation2 + $0xa8] sm:$0xf]  ;;  %v2862_v26 = vld [vmem:[#allocation2 + $0xb8] sm:$0xf]  ;;  %3720 = vst.msk [vmem:[#allocation3 + $0x1b4] sm:$0xf] %vm197_vm0, %v3631_v53  ;;  %4841 = vmatmul.mubr.bf16.gmra.mxu1 %v10126_v35 }
 0x1da   : > { %v2382_v25 = vshll.u32 %v2043_v29, 16  ;;  %2894 = vst.msk [vmem:[#allocation3 + $0x228] sm:$0xf] %vm197_vm0, %v2862_v26  ;;  %v2861_v5 = vld [vmem:[#allocation2 + $0xb4] sm:$0xf]  ;;  %v13322_v49 = vrot.slane %v2372_v10, 5  ;;  %v3638_v61 = vsel %vm12111_vm15, %v3636_v14, %v3637_v59  ;;  %v13340_v39 = vpop.f32.mrf.mxu0 }
 0x1db   : > { %v2045_v18 = vld [vmem:[#allocation2 + $0xb8] sm:$0xf]  ;;  %2490 = vst.msk [vmem:[#allocation3 + $0x1e8] sm:$0xf] %vm197_vm0, %v2351_v13  ;;  %3721 = vst.msk [vmem:[#allocation3 + $0x1c8] sm:$0xf] %vm197_vm0, %v3635_v22 }
 0x1dc   : > { %v2378_v20 = vrot.slane %v2376_v9, 4  ;;  %v2363_v30 = vshrl.u32 %v2041_v11, 16  ;;  %v2366_v17 = vshll.u32 %v2041_v11, 16  ;;  %2893 = vst.msk [vmem:[#allocation3 + $0x214] sm:$0xf] %vm197_vm0, %v2861_v5  ;;  %v2384_v45 = vrot.slane %v2382_v25, 5  ;;  %v3384_v9 = vpop.permute.xlu0 %3383  ;;  %v10507_v14 = vpop.f32.mrf.mxu0 }
 0x1dd   : > { %v2046_v19 = vld [vmem:[#allocation2 + $0xbc] sm:$0x1]  ;;  %2826 = vst.msk [vmem:[#allocation3 + $0x1e8] sm:$0xf] %vm308_vm9, %v13288_v2  ;;  %v2396_v32 = vshll.u32 %v2045_v18, 16  ;;  %v2400_v15 = vshrl.u32 %v2045_v18, 16 }
 0x1de   : > { %v2044_v42 = vld [vmem:[#allocation2 + $0xb4] sm:$0xf]  ;;  %2827 = vst.msk [vmem:[#allocation3 + $0x1fc] sm:$0xf] %vm308_vm9, %v2757_v46  ;;  %v2379_v0 = vor.u32 %v2378_v20, %v13322_v49  ;;  %v2365_v28 = vrot.slane %v2363_v30, 4  ;;  %v2368_v38 = vrot.slane %v2366_v17, 5  ;;  %v2761_v30 = vpop.permute.xlu1 %2760 }
 0x1df   : > { %3722 = vst.msk [vmem:[#allocation3 + $0x1dc] sm:$0xf] %vm197_vm0, %v3638_v61  ;;  %v3495_v40 = vld [vmem:[#allocation2 + $0xa8] sm:$0xe]  ;;  %v3798_v44 = vld [vmem:[#allocation3 + $0x1c0] sm:$0xff]  ;;  %v13336_v2 = vrot.slane %v2396_v32, 5  ;;  %v10508_v61 = vpop.f32.mrf.mxu0 }
 0x1e0   : > { %v2406_v48 = vshll.u32 %v2046_v19, 16  ;;  %v3496_v23 = vld [vmem:[#allocation2 + $0xac] sm:$0xf]  ;;  %v3497_v8 = vld [vmem:[#allocation2 + $0xb0] sm:$0x1]  ;;  %v2380_v21 = vrot.slane %v2379_v0, 4  ;;  %v2369_v34 = vor.u32 %v2368_v38, %v2365_v28 }
 0x1e1   : > { %v2387_v60 = vshrl.u32 %v2044_v42, 16  ;;  %v2864_v43 = vld [vmem:[#allocation2 + $0xc4] sm:$0xf]  ;;  %v3801_v37 = vld [vmem:[#allocation3 + $0x1d4] sm:$0xff]  ;;  %v2402_v52 = vrot.slane %v2400_v15, 4  ;;  %v2390_v56 = vshll.u32 %v2044_v42, 16  ;;  %v13359_v42 = vadd.f32 %v10508_v61, %v10507_v14 }
 0x1e2   : > { %v11206_v29 = vld [vmem:[#allocation3 + $0x1c4] ss:$20 sps:$4 sm:$0xff]   ;;  %v2408_v55 = vrot.slane %v2406_v48, 5  ;;  %2896 = vst.msk [vmem:[#allocation3 + $0x250] sm:$0xf] %vm197_vm0, %v2864_v43  ;;  %v2385_v59 = vsel %vm11630_vm10, %v2380_v21, %v2384_v45  ;;  %v10131_v35 = vcombine.low %v3798_v44, %v3801_v37  ;;  %v2370_v53 = vrot.slane %v2369_v34, 4 }
 0x1e3   : > { %v11204_v36 = vld [vmem:[#allocation3 + $0x1a0] ss:$20 sps:$4 sm:$0xff]   ;;  %3452 = vst.msk [vmem:[#allocation3 + $0x200] sm:$0xf] %vm308_vm9, %v3382_v33  ;;  %v2389_v10 = vrot.slane %v2387_v60, 4  ;;  %4848 = vmatprep.mubr.bf16.mxu1 %v11206_v29  ;;  %v2403_v11 = vor.u32 %v2402_v52, %v13336_v2  ;;  %v2392_v26 = vrot.slane %v2390_v56, 5  ;;  %v3386_v60 = vpop.permute.xlu1 %3385 }
 0x1e4   : > { %2493 = vst.msk [vmem:[#allocation3 + $0x224] sm:$0xf] %vm197_vm0, %v2385_v59  ;;  %v10069_v13 = vrot.slane %v3495_v40, 9  ;;  %v2863_v22 = vld [vmem:[#allocation2 + $0xc0] sm:$0xf]  ;;  %10999 = vmatprep.mubr.bf16.mxu0 %v11204_v36  ;;  %v2375_v25 = vsel %vm11630_vm10, %v2370_v53, %v13322_v49  ;;  %v3641_v5 = vrot.slane %v3496_v23, 5  ;;  %4849 = vmatmul.mubr.bf16.gmra.mxu1 %v10131_v35  ;;  %v2763_v59 = vpop.permute.xlu0 %2762 }
 0x1e5   : > { %3453 = vst.msk [vmem:[#allocation3 + $0x214] sm:$0xf] %vm308_vm9, %v3384_v9  ;;  %v3644_v27 = vrot.slane %v3497_v8, 5  ;;  %v3498_v18 = vld [vmem:[#allocation2 + $0xb4] sm:$0xe]  ;;  %v2404_v17 = vrot.slane %v2403_v11, 4  ;;  %v2393_v19 = vor.u32 %v2392_v26, %v2389_v10 }
 0x1e6   : > { %2895 = vst.msk [vmem:[#allocation3 + $0x23c] sm:$0xf] %vm197_vm0, %v2863_v22  ;;  %v11205_v20 = vld [vmem:[#allocation3 + $0x1c8] ss:$20 sps:$4 sm:$0xff]   ;;  %2492 = vst.msk [vmem:[#allocation3 + $0x210] sm:$0xf] %vm197_vm0, %v2375_v25  ;;  %v3642_v49 = vsel %vm12111_vm15, %v10069_v13, %v3641_v5 }
 0x1e7   : > { %v10070_v46 = vrot.slane %v3498_v18, 9  ;;  %2829 = vst.msk [vmem:[#allocation3 + $0x224] sm:$0xf] %vm308_vm9, %v2761_v30  ;;  %2828 = vst.msk [vmem:[#allocation3 + $0x210] sm:$0xf] %vm308_vm9, %v13324_v7  ;;  %v3643_v45 = vrot.slane %v3641_v5, 4  ;;  %11000 = vmatmul.mubr.bf16.gmra.mxu0 %v11205_v20  ;;  %v2409_v28 = vsel %vm11630_vm10, %v2404_v17, %v2408_v55  ;;  %v13364_v7 = vpop.f32.mrf.mxu0 }
 0x1e8   : > { %v3499_v31 = vld [vmem:[#allocation2 + $0xb8] sm:$0xf]  ;;  %v3500_v32 = vld [vmem:[#allocation2 + $0xbc] sm:$0x1]  ;;  %v3804_v0 = vld [vmem:[#allocation3 + $0x1e8] sm:$0xff]  ;;  %v2394_v38 = vrot.slane %v2393_v19, 4 }
 0x1e9   : > { %3723 = vst.msk [vmem:[#allocation3 + $0x1f0] sm:$0xf] %vm197_vm0, %v3642_v49  ;;  %v3648_v40 = vrot.slane %v3499_v31, 5  ;;  %v3651_v44 = vrot.slane %v3500_v32, 5  ;;  %v2048_v15 = vld [vmem:[#allocation2 + $0xc4] sm:$0xf]  ;;  %v3645_v48 = vsel %vm12111_vm15, %v3643_v45, %v3644_v27  ;;  %v13375_v56 = vpop.f32.mrf.mxu0  ;;  %v2765_v27 = vpop.permute.xlu1 %2764 }
 0x1ea   : > { %2495 = vst.msk [vmem:[#allocation3 + $0x24c] sm:$0xf] %vm197_vm0, %v2409_v28  ;;  %v2049_v23 = vld [vmem:[#allocation2 + $0xc8] sm:$0x1]  ;;  %v2420_v8 = vshll.u32 %v2048_v15, 16  ;;  %v2424_v21 = vshrl.u32 %v2048_v15, 16  ;;  %v2399_v37 = vsel %vm11630_vm10, %v2394_v38, %v13336_v2 }
 0x1eb   : > { %v2047_v34 = vld [vmem:[#allocation2 + $0xc0] sm:$0xf]  ;;  %v3807_v43 = vld [vmem:[#allocation3 + $0x1fc] sm:$0xff]  ;;  %3724 = vst.msk [vmem:[#allocation3 + $0x204] sm:$0xf] %vm197_vm0, %v3645_v48  ;;  %v3649_v29 = vsel %vm12111_vm15, %v10070_v46, %v3648_v40  ;;  %v3650_v52 = vrot.slane %v3648_v40, 4  ;;  %v10513_v13 = vpop.f32.mrf.mxu0 }
 0x1ec   : > { %v11208_v33 = vld [vmem:[#allocation3 + $0x1ec] ss:$20 sps:$4 sm:$0xff]   ;;  %v2430_v55 = vshll.u32 %v2049_v23, 16  ;;  %3454 = vst.msk [vmem:[#allocation3 + $0x228] sm:$0xf] %vm308_vm9, %v3386_v60  ;;  %v10136_v36 = vcombine.low %v3804_v0, %v3807_v43  ;;  %v2422_v35 = vrot.slane %v2420_v8, 5  ;;  %v3388_v23 = vpop.permute.xlu0 %3387 }
 0x1ed   : > { %2494 = vst.msk [vmem:[#allocation3 + $0x238] sm:$0xf] %vm197_vm0, %v2399_v37  ;;  %3725 = vst.msk [vmem:[#allocation3 + $0x218] sm:$0xf] %vm197_vm0, %v3649_v29  ;;  %v2426_v53 = vrot.slane %v2424_v21, 4  ;;  %v2411_v2 = vshrl.u32 %v2047_v34, 16  ;;  %4856 = vmatprep.mubr.bf16.mxu1 %v11208_v33  ;;  %v3652_v9 = vsel %vm12111_vm15, %v3650_v52, %v3651_v44  ;;  %v10514_v20 = vpop.f32.mrf.mxu0 }
 0x1ee   : > { %v2866_v10 = vld [vmem:[#allocation2 + $0xd0] sm:$0xf]  ;;  %2830 = vst.msk [vmem:[#allocation3 + $0x238] sm:$0xf] %vm308_vm9, %v2763_v59  ;;  %v2414_v11 = vshll.u32 %v2047_v34, 16  ;;  %v2432_v14 = vrot.slane %v2430_v55, 5  ;;  %4857 = vmatmul.mubr.bf16.gmra.mxu1 %v10136_v36  ;;  %v13387_v46 = vadd.f32 %v10514_v20, %v10513_v13 }
 0x1ef   : > { %2898 = vst.msk [vmem:[#allocation3 + $0x278] sm:$0xf] %vm197_vm0, %v2866_v10  ;;  %v2865_v26 = vld [vmem:[#allocation2 + $0xcc] sm:$0xf]  ;;  %3726 = vst.msk [vmem:[#allocation3 + $0x22c] sm:$0xf] %vm197_vm0, %v3652_v9  ;;  %v2427_v22 = vor.u32 %v2426_v53, %v2422_v35  ;;  %v13389_v32 = vpop.f32.mrf.mxu0 }
 0x1f0   : > { %v2413_v25 = vrot.slane %v2411_v2, 4  ;;  %2897 = vst.msk [vmem:[#allocation3 + $0x264] sm:$0xf] %vm197_vm0, %v2865_v26  ;;  %v3501_v5 = vld [vmem:[#allocation2 + $0xc0] sm:$0xe]  ;;  %v2416_v18 = vrot.slane %v2414_v11, 5  ;;  %v2767_v9 = vpop.permute.xlu0 %2766 }
 0x1f1   : > { %v3502_v30 = vld [vmem:[#allocation2 + $0xc4] sm:$0xf]  ;;  %v3503_v17 = vld [vmem:[#allocation2 + $0xc8] sm:$0x1]  ;;  %2831 = vst.msk [vmem:[#allocation3 + $0x24c] sm:$0xf] %vm308_vm9, %v2765_v27  ;;  %v13396_v60 = vpop.f32.mrf.mxu0 }
 0x1f2   : > { %v2428_v19 = vrot.slane %v2427_v22, 4  ;;  %v10071_v61 = vrot.slane %v3501_v5, 9  ;;  %v3655_v49 = vrot.slane %v3502_v30, 5  ;;  %v3810_v45 = vld [vmem:[#allocation3 + $0x210] sm:$0xff]  ;;  %v2417_v31 = vor.u32 %v2416_v18, %v2413_v25  ;;  %v3505_v38 = vld [vmem:[#allocation2 + $0xd0] sm:$0xf] }
 0x1f3   : > { %v3658_v0 = vrot.slane %v3503_v17, 5  ;;  %v3504_v28 = vld [vmem:[#allocation2 + $0xcc] sm:$0xe]  ;;  %v11210_v40 = vld [vmem:[#allocation3 + $0x1f0] ss:$20 sps:$4 sm:$0xff]   ;;  %v10519_v36 = vpop.f32.mrf.mxu0  ;;  %v3662_v59 = vrot.slane %v3505_v38, 5 }
 0x1f4   : > { %v2433_v44 = vsel %vm11630_vm10, %v2428_v19, %v2432_v14  ;;  %v3656_v15 = vsel %vm12111_vm15, %v10071_v61, %v3655_v49  ;;  %v3657_v48 = vrot.slane %v3655_v49, 4  ;;  %v3813_v8 = vld [vmem:[#allocation3 + $0x224] sm:$0xff]  ;;  %v2418_v34 = vrot.slane %v2417_v31, 4  ;;  %11003 = vmatprep.mubr.bf16.mxu0 %v11210_v40  ;;  %3455 = vst.msk [vmem:[#allocation3 + $0x23c] sm:$0xf] %vm308_vm9, %v3388_v23  ;;  %v3392_v23 = vpop.permute.xlu0 %3391 }
 0x1f5   : > { %v11212_v21 = vld [vmem:[#allocation3 + $0x214] ss:$20 sps:$4 sm:$0xff]   ;;  %2497 = vst.msk [vmem:[#allocation3 + $0x274] sm:$0xf] %vm197_vm0, %v2433_v44  ;;  %3727 = vst.msk [vmem:[#allocation3 + $0x240] sm:$0xf] %vm197_vm0, %v3656_v15  ;;  %v10141_v43 = vcombine.low %v3810_v45, %v3813_v8  ;;  %v10520_v22 = vpop.f32.mrf.mxu0 }
 0x1f6   : > { %v3659_v33 = vsel %vm12111_vm15, %v3657_v48, %v3658_v0  ;;  %v3506_v37 = vld [vmem:[#allocation2 + $0xd4] sm:$0x1]  ;;  %v10072_v29 = vrot.slane %v3504_v28, 9  ;;  %v11211_v52 = vld [vmem:[#allocation3 + $0x218] ss:$20 sps:$4 sm:$0xff]   ;;  %4864 = vmatprep.mubr.bf16.mxu1 %v11212_v21  ;;  %v2423_v55 = vsel %vm11630_vm10, %v2418_v34, %v2422_v35  ;;  %v3664_v26 = vrot.slane %v3662_v59, 4 }
 0x1f7   : > { %3728 = vst.msk [vmem:[#allocation3 + $0x254] sm:$0xf] %vm197_vm0, %v3659_v33  ;;  %v3665_v53 = vrot.slane %v3506_v37, 5  ;;  %2496 = vst.msk [vmem:[#allocation3 + $0x260] sm:$0xf] %vm197_vm0, %v2423_v55  ;;  %11004 = vmatmul.mubr.bf16.gmra.mxu0 %v11211_v52  ;;  %4865 = vmatmul.mubr.bf16.gmra.mxu1 %v10141_v43  ;;  %v13410_v14 = vadd.f32 %v10520_v22, %v10519_v36  ;;  %v13414_v27 = vpop.f32.mrf.mxu0 }
 0x1f8   : > { %v8267_v2 = vld [vmem:[#allocation2 + $0xcc] sm:$0xe]  ;;  %v8268_v10 = vld [vmem:[#allocation2 + $0xd0] sm:$0xf]  ;;  %v3663_v11 = vsel %vm12111_vm15, %v10072_v29, %v3662_v59  ;;  %2832 = vst.msk [vmem:[#allocation3 + $0x260] sm:$0xf] %vm308_vm9, %v2767_v9  ;;  %v3390_v29 = vpop.permute.xlu1 %3389 }
 0x1f9   : > { %v8425_v13 = vrot.slane %v8268_v10, 5  ;;  %3729 = vst.msk [vmem:[#allocation3 + $0x268] sm:$0xf] %vm197_vm0, %v3663_v11  ;;  %v8269_v35 = vld [vmem:[#allocation2 + $0xd4] sm:$0x1]  ;;  %v3666_v25 = vsel %vm12111_vm15, %v3664_v26, %v3665_v53  ;;  %v10274_v5 = vrot.slane %v8267_v2, 9  ;;  %v13417_v49 = vpop.f32.mrf.mxu0 }
 0x1fa   : > { %v5742_v18 = vld [vmem:[#allocation2] sm:$0xf]  ;;  %3730 = vst.msk [vmem:[#allocation3 + $0x27c] sm:$0xf] %vm197_vm0, %v3666_v25  ;;  %v5743_v20 = vld [vmem:[#allocation2 + $0x4] sm:$0xf] }
 0x1fb   : > { %v5791_v30 = vshrl.u32 %v5742_v18, 16  ;;  %v5794_v17 = vshll.u32 %v5742_v18, 16  ;;  %v8427_v19 = vrot.slane %v8425_v13, 4  ;;  %v8428_v61 = vrot.slane %v8269_v35, 5  ;;  %v10525_v40 = vpop.f32.mrf.mxu0  ;;  %v5744_v15 = vld [vmem:[#allocation2 + $0x8] sm:$0x1] }
 0x1fc   : > { %v5800_v45 = vshll.u32 %v5743_v20, 16  ;;  %v5804_v31 = vshrl.u32 %v5743_v20, 16  ;;  %v5810_v21 = vshll.u32 %v5744_v15, 16  ;;  %3457 = vst.msk [vmem:[#allocation3 + $0x264] sm:$0xf] %vm308_vm9, %v3392_v23  ;;  %v8426_v34 = vsel %vm12111_vm15, %v10274_v5, %v8425_v13  ;;  %v2769_v13 = vpop.permute.xlu1 %2768 }
 0x1fd   : > { %v5793_v28 = vrot.slane %v5791_v30, 4  ;;  %v5796_v38 = vrot.slane %v5794_v17, 5  ;;  %v8429_v43 = vsel %vm12111_vm15, %v8427_v19, %v8428_v61  ;;  %v10526_v33 = vpop.f32.mrf.mxu0  ;;  %3456 = vst.msk [vmem:[#allocation3 + $0x250] sm:$0xf] %vm308_vm9, %v3390_v29  ;;  %v7628_v9 = vld [vmem:[#allocation2 + $0xcc] sm:$0xf] }
 0x1fe   : > { %v11217_v0 = vld [vmem:[#allocation3 + $0x240] ss:$20 sps:$4 sm:$0xff]   ;;  %v5802_v44 = vrot.slane %v5800_v45, 5  ;;  %v5806_v48 = vrot.slane %v5804_v31, 4  ;;  %v13424_v52 = vadd.f32 %v10526_v33, %v10525_v40  ;;  %v5812_v36 = vrot.slane %v5810_v21, 5 }
 0x1ff   : > { %11007 = vmatprep.mubr.bf16.mxu0 %v11217_v0  ;;  %v5797_v8 = vor.u32 %v5796_v38, %v5793_v28  ;;  %v13427_v53 = vpop.f32.mrf.mxu0  ;;  %2833 = vst.msk [vmem:[#allocation3 + $0x274] sm:$0xf] %vm308_vm9, %v2769_v13  ;;  %v11216_v20 = vld [vmem:[#allocation3 + $0x238] ss:$20 sps:$4 sm:$0xff]  }
 0x200   : > { %v5807_v37 = vor.u32 %v5806_v48, %v5802_v44  ;;  %v3394_v5 = vpop.permute.xlu1 %3393  ;;  %v7629_v61 = vld [vmem:[#allocation2 + $0xd0] sm:$0xf] }
 0x201   : > { %v5798_v55 = vrot.slane %v5797_v8, 4  ;;  %v11218_v59 = vld [vmem:[#allocation3 + $0x268] ss:$20 sps:$4 sm:$0xff]   ;;  %v13433_v11 = vpop.f32.mrf.mxu0  ;;  %3458 = vst.msk [vmem:[#allocation3 + $0x278] sm:$0xf] %vm308_vm9, %v3394_v5 }
 0x202   : > { %v5808_v2 = vrot.slane %v5807_v37, 4  ;;  %8492 = vst.msk [vmem:[#allocation3 + $0x268] sm:$0xf] %vm197_vm0, %v8426_v34  ;;  %8493 = vst.msk [vmem:[#allocation3 + $0x27c] sm:$0xf] %vm197_vm0, %v8429_v43  ;;  %11008 = vmatmul.mubr.bf16.gmra.mxu0 %v11218_v59 }
 0x203   : > { %v5803_v10 = vsel %vm11630_vm10, %v5798_v55, %v5802_v44  ;;  %v10531_v22 = vpop.f32.mrf.mxu0  ;;  %v3822_v35 = vld [vmem:[#allocation3 + $0x260] sm:$0xff] }
 0x204   : > { %6174 = vrot.lane.b32.xlu0 %v5803_v10, %s11422_s10  ;;  %v5813_v26 = vsel %vm11630_vm10, %v5808_v2, %v5812_v36  ;;  %7660 = vst.msk [vmem:[#allocation3 + $0x264] sm:$0xf] %vm197_vm0, %v7628_v9  ;;  %v11214_v18 = vld [vmem:[#allocation3 + $0x23c] ss:$20 sps:$4 sm:$0xff]  }
 0x205   : > { %6176 = vrot.lane.b32.xlu1 %v5813_v26, %s11422_s10  ;;  %v10532_v25 = vpop.f32.mrf.mxu0  ;;  %4872 = vmatprep.mubr.bf16.mxu1 %v11214_v18 }
 0x206   : > { %v13441_v30 = vadd.f32 %v10532_v25, %v10531_v22  ;;  %4873 = vmatmul.mubr.bf16.gmra.mxu1 %v11216_v20 }
 0x207   : > { %v13444_v17 = vpop.f32.mrf.mxu0 }
 0x208   : > { %v3825_v0 = vld [vmem:[#allocation3 + $0x274] sm:$0xff] }
 0x209   : > { %v13446_v19 = vpop.f32.mrf.mxu0  ;;  %7661 = vst.msk [vmem:[#allocation3 + $0x278] sm:$0xf] %vm197_vm0, %v7629_v61  ;;  %v10152_v38 = vcombine.high %v3822_v35, %v3825_v0  ;;  %v10151_v40 = vcombine.low %v3822_v35, %v3825_v0 }
 0x20b   : > { %v10537_v45 = vpop.f32.mrf.mxu0  ;;  %4880 = vmatprep.mubr.bf16.mxu1 %v10152_v38 }
 0x20d   : > { %v10538_v31 = vpop.f32.mrf.mxu0 }
 0x20e   : > { %v13448_v28 = vadd.f32 %v10538_v31, %v10537_v45  ;;  %4881 = vmatmul.mubr.bf16.gmra.mxu1 %v10151_v40 }
 0x20f   : > { %v13451_v44 = vpop.f32.mrf.mxu0 }
 0x211   : > { %v13453_v15 = vpop.f32.mrf.mxu0 }
 0x213   : > { %v10543_v48 = vpop.f32.mrf.mxu0 }
 0x215   : > { %v10544_v23 = vpop.f32.mrf.mxu0 }
 0x216   : > { %v13455_v8 = vadd.f32 %v10544_v23, %v10543_v48 }
 0x217   : > { %v13457_v21 = vpop.f32.mrf.mxu0 }
 0x219   : > { %v13459_v34 = vpop.f32.mrf.mxu0 }
 0x21b   : > { %v10549_v43 = vpop.f32.mrf.mxu0 }
 0x21d   : > { %v10550_v33 = vpop.f32.mrf.mxu0 }
 0x21e   : > { %v13461_v37 = vadd.f32 %v10550_v33, %v10549_v43 }
 0x21f   : > { %v13463_v29 = vpop.f32.mrf.mxu0 }
 0x221   : > { %v13465_v55 = vpop.f32.mrf.mxu0 }
 0x223   : > { %v10555_v36 = vpop.f32.mrf.mxu0 }
 0x225   : > { %v10556_v59 = vpop.f32.mrf.mxu0 }
 0x226   : > { %v13467_v2 = vadd.f32 %v10556_v59, %v10555_v36 }
 0x227   : > { %v10558_v10 = vpop.f32.mrf.mxu0 }
 0x229   : > { %v10559_v9 = vpop.f32.mrf.mxu0 }
 0x22a   : > { %v13469_v26 = vadd.f32 %v10559_v9, %v10558_v10 }
 0x22b   : > { %v10561_v13 = vpop.f32.mrf.mxu0 }
 0x22d   : > { %v10562_v22 = vpop.f32.mrf.mxu0 }
 0x22e   : > { %v13471_v35 = vadd.f32 %v10562_v22, %v10561_v13  ;;  %v13486_v22 = vld [vmem:[%s15875_s3] ss:$0 sm:$0xff] }
 0x22f   : > { %v10564_v25 = vpop.f32.mrf.mxu0 }
 0x230   : > { %v10595_v59 = vpop.f32.mrf.mxu1 }
 0x231   : > { %v10565_v5 = vpop.f32.mrf.mxu0 }
 0x232   : > { %v13473_v18 = vadd.f32 %v10565_v5, %v10564_v25  ;;  %v10596_v10 = vpop.f32.mrf.mxu1  ;;  %v10488_v25 = vadd.f32 %v13252_v41, %v13235_v63  ;;  %v10494_v5 = vadd.f32 %v13280_v24, %v13275_v58  ;;  %v4610_v63 = vadd.f32 %v13273_v47, %v13486_v22 }
 0x233   : > { %v10567_v20 = vpop.f32.mrf.mxu0  ;;  %v10512_v58 = vadd.f32 %v13375_v56, %v13364_v7  ;;  %v13515_v47 = vadd.f32 %v13334_v3, %v13486_v22  ;;  %v10524_v7 = vadd.f32 %v13417_v49, %v13414_v27  ;;  %v10542_v27 = vadd.f32 %v13453_v15, %v13451_v44 }
 0x234   : > { %v10598_v9 = vpop.f32.mrf.mxu1  ;;  %v4613_v41 = vadd.f32 %v10494_v5, %v13486_v22  ;;  %v10548_v49 = vadd.f32 %v13459_v34, %v13457_v21  ;;  %v10554_v15 = vadd.f32 %v13465_v55, %v13463_v29  ;;  %v13576_v29 = vadd.f32 %v13455_v8, %v13486_v22  ;;  %v13584_v55 = vld [vmem:[%s15875_s3 + $0x2] ss:$0 sm:$0xff] }
 0x235   : > { %v10568_v61 = vpop.f32.mrf.mxu0 }
 0x236   : > { %v13475_v45 = vadd.f32 %v10568_v61, %v10567_v20  ;;  %v10599_v13 = vpop.f32.mrf.mxu1  ;;  %v10500_v61 = vadd.f32 %v13308_v4, %v13299_v50  ;;  %v13506_v50 = vadd.f32 %v13296_v16, %v13486_v22  ;;  %v10530_v16 = vadd.f32 %v13433_v11, %v13427_v53 }
 0x237   : > { %v10570_v31 = vpop.f32.mrf.mxu0  ;;  %v13546_v53 = vadd.f32 %v13410_v14, %v13486_v22  ;;  %v10600_v11 = vadd.f32 %v10599_v13, %v10598_v9  ;;  %v13562_v14 = vadd.f32 %v13441_v30, %v13486_v22  ;;  %v13579_v30 = vadd.f32 %v10548_v49, %v13486_v22 }
 0x238   : > { %v13509_v4 = vadd.f32 %v10500_v61, %v13486_v22  ;;  %v13556_v44 = vadd.f32 %v10530_v16, %v13486_v22  ;;  %v13592_v8 = vadd.f32 %v10554_v15, %v13486_v22 }
 0x239   : > { %v10571_v0 = vpop.f32.mrf.mxu0 }
 0x23a   : > { %v13477_v38 = vadd.f32 %v10571_v0, %v10570_v31  ;;  %v10506_v31 = vadd.f32 %v13340_v39, %v13338_v6  ;;  %v10597_v6 = vadd.f32 %v10596_v10, %v10595_v59  ;;  %v13531_v59 = vadd.f32 %v10512_v58, %v13486_v22 }
 0x23b   : > { %v10573_v40 = vpop.f32.mrf.mxu0  ;;  %v10601_v20 = vpop.f32.mrf.mxu1  ;;  %v13535_v10 = vadd.f32 %v13387_v46, %v13486_v22  ;;  %v13553_v46 = vadd.f32 %v13424_v52, %v13486_v22  ;;  %v13569_v52 = vadd.f32 %v13448_v28, %v13486_v22 }
 0x23c   : > { %v13518_v39 = vadd.f32 %v10506_v31, %v13486_v22 }
 0x23d   : > { %v10574_v48 = vpop.f32.mrf.mxu0  ;;  %v10602_v0 = vpop.f32.mrf.mxu1 }
 0x23e   : > { %v13479_v23 = vadd.f32 %v10574_v48, %v10573_v40  ;;  %v4602_v40 = vadd.f32 %v13231_v54, %v13486_v22  ;;  %v10603_v48 = vadd.f32 %v10602_v0, %v10601_v20  ;;  %v10518_v54 = vadd.f32 %v13396_v60, %v13389_v32 }
 0x23f   : > { %v10576_v43 = vpop.f32.mrf.mxu0  ;;  %v10604_v24 = vpop.f32.mrf.mxu1  ;;  %v10536_v32 = vadd.f32 %v13446_v19, %v13444_v17  ;;  %v13572_v20 = vadd.f32 %v10542_v27, %v13486_v22  ;;  %v13614_v27 = vadd.f32 %v13475_v45, %v13486_v22 }
 0x240   : > { %v4771_v60 = vadd.f32 %v10603_v48, %v4610_v63  ;;  %v4763_v17 = vadd.f32 %v10597_v6, %v4602_v40  ;;  %v13589_v48 = vadd.f32 %v13461_v37, %v13486_v22  ;;  %v13596_v63 = vadd.f32 %v13467_v2, %v13486_v22 }
 0x241   : > { %v10577_v33 = vpop.f32.mrf.mxu0  ;;  %v10605_v56 = vpop.f32.mrf.mxu1  ;;  %v13565_v34 = vadd.f32 %v10536_v32, %v13486_v22  ;;  %v13605_v37 = vadd.f32 %v13471_v35, %v13486_v22  ;;  %v13618_v35 = vadd.f32 %v13477_v38, %v13486_v22 }
 0x242   : > { %v13481_v36 = vadd.f32 %v10577_v33, %v10576_v43  ;;  %v4605_v43 = vadd.f32 %v10488_v25, %v13486_v22  ;;  %v13526_v33 = vadd.f32 %v13359_v42, %v13486_v22  ;;  %v10606_v3 = vadd.f32 %v10605_v56, %v10604_v24 }
 0x243   : > { %v13542_v42 = vadd.f32 %v10518_v54, %v13486_v22  ;;  %v13549_v25 = vadd.f32 %v10524_v7, %v13486_v22  ;;  %v13609_v7 = vadd.f32 %v13473_v18, %v13486_v22 }
 0x244   : > { %v4774_v13 = vadd.f32 %v10606_v3, %v4613_v41  ;;  %v4766_v0 = vadd.f32 %v10600_v11, %v4605_v43  ;;  %v13600_v41 = vadd.f32 %v13469_v26, %v13486_v22  ;;  %v11219_v11 = vld [vmem:[%s15874_s2 + $0x78] sm:$0xff]  }
 0x245   : > { %10715 = vmatprep.subr.bf16.mxu1 %v11219_v11 }
 0x246   : > { %v10607_v19 = vpop.f32.mrf.mxu1 }
 0x248   : > { %v10981_v21 = vpop.f32.mrf.mxu0  ;;  %v10608_v5 = vpop.f32.mrf.mxu1 }
 0x249   : > { %v4932_v9 = vadd.f32 %v10981_v21, %v4771_v60  ;;  %v10609_v56 = vadd.f32 %v10608_v5, %v10607_v19 }
 0x24a   : > { %v4923_v61 = vpop.f32.mrf.mxu0  ;;  %v10610_v40 = vpop.f32.mrf.mxu1 }
 0x24b   : > { %v4924_v31 = vadd.f32 %v4923_v61, %v4763_v17  ;;  %vm5052_vm1 = vcmp.gt.f32.partialorder %v4932_v9, 0.0  ;;  %v5088_v28 = vmul.f32 %v13584_v55, %v4932_v9  ;;  %v11220_v17 = vld [vmem:[%s15874_s2 + $0x38] sm:$0xff]   ;;  %v13629_v61 = vadd.f32 %v13479_v23, %v13486_v22 }
 0x24c   : > { %v10982_v58 = vpop.f32.mrf.mxu0  ;;  %v10611_v6 = vpop.f32.mrf.mxu1  ;;  %10716 = vmatpush3.bf16.msra.mxu1 %v11220_v17 }
 0x24d   : > { %vm5050_vm2 = vcmp.gt.f32.partialorder %v4924_v31, 0.0  ;;  %v5086_v43 = vmul.f32 %v13584_v55, %v4924_v31  ;;  %v5120_v24 = vsel %vm5052_vm1, %v4932_v9, %v5088_v28  ;;  %v4935_v54 = vadd.f32 %v10982_v58, %v4774_v13 }
 0x24e   : > { %v10436_v2 = vpack.c.bf16 %v5120_v24, %v5120_v24  ;;  %v4926_v16 = vpop.f32.mrf.mxu0  ;;  %v10612_v45 = vadd.f32 %v10611_v6, %v10610_v40 }
 0x24f   : > { %v5118_v26 = vsel %vm5050_vm2, %v4924_v31, %v5086_v43  ;;  %v4927_v32 = vadd.f32 %v4926_v16, %v4766_v0  ;;  %vm5053_vm3 = vcmp.gt.f32.partialorder %v4935_v54, 0.0  ;;  %v5089_v60 = vmul.f32 %v13584_v55, %v4935_v54  ;;  %v5573_v31 = vld [vmem:[#allocation2 + $0x18] sm:$0xf]  ;;  %v5566_v16 = vld [vmem:[#allocation2 + $0xc] sm:$0xf] }
 0x250   : > { %v10434_v49 = vpack.c.bf16 %v5118_v26, %v5118_v26  ;;  %v5264_v18 = vshrl.u32 %v10436_v2, 16  ;;  %v5267_v38 = vshll.u32 %v10436_v2, 16  ;;  %v4779_v0 = vadd.f32 %v10609_v56, %v13506_v50 }
 0x251   : > { %v10613_v3 = vpop.f32.mrf.mxu1  ;;  %vm5051_vm5 = vcmp.gt.f32.partialorder %v4927_v32, 0.0  ;;  %v5087_v19 = vmul.f32 %v13584_v55, %v4927_v32  ;;  %v5121_v15 = vsel %vm5053_vm3, %v4935_v54, %v5089_v60  ;;  %v4782_v23 = vadd.f32 %v10612_v45, %v13509_v4  ;;  %v5577_v4 = vld [vmem:[#allocation2 + $0x20] sm:$0x1] }
 0x252   : > { %v5247_v9 = vshrl.u32 %v10434_v49, 16  ;;  %v5266_v13 = vrot.slane %v5264_v18, 7  ;;  %v10437_v5 = vpack.c.bf16 %v5121_v15, %v5121_v15  ;;  %v5250_v54 = vshll.u32 %v10434_v49, 16 }
 0x253   : > { %v10614_v21 = vpop.f32.mrf.mxu1  ;;  %v5119_v28 = vsel %vm5051_vm5, %v4927_v32, %v5087_v19 }
 0x254   : > { %v10615_v58 = vadd.f32 %v10614_v21, %v10613_v3  ;;  %v5249_v24 = vrot.slane %v5247_v9, 7  ;;  %v5269_v40 = vor.u32 %v5267_v38, %v5266_v13  ;;  %v10435_v6 = vpack.c.bf16 %v5119_v28, %v5119_v28  ;;  %v5570_v28 = vld [vmem:[#allocation2 + $0x14] sm:$0x1] }
 0x255   : > { %v10616_v43 = vpop.f32.mrf.mxu1  ;;  %v5270_v26 = vrot.slane %v5266_v13, 4  ;;  %v5272_v2 = vshrl.u32 %v10437_v5, 16  ;;  %v5275_v32 = vshll.u32 %v10437_v5, 16 }
 0x256   : > { %v4787_v18 = vadd.f32 %v10615_v58, %v13515_v47  ;;  %v5252_v15 = vor.u32 %v5250_v54, %v5249_v24  ;;  %v5574_v50 = vsel %vm11636_vm11, %v5269_v40, %v5573_v31  ;;  %v5255_v56 = vshrl.u32 %v10435_v6, 16 }
 0x257   : > { %v10617_v11 = vpop.f32.mrf.mxu1  ;;  %v5253_v3 = vrot.slane %v5249_v24, 4  ;;  %5575 = vst [vmem:[#allocation2 + $0x18] sm:$0xf] %v5574_v50  ;;  %v5274_v49 = vrot.slane %v5272_v2, 7  ;;  %v5258_v38 = vshll.u32 %v10435_v6, 16 }
 0x258   : > { %v10618_v21 = vadd.f32 %v10617_v11, %v10616_v43  ;;  %v5567_v13 = vsel %vm11636_vm11, %v5252_v15, %v5566_v16  ;;  %v5257_v47 = vrot.slane %v5255_v56, 7 }
 0x259   : > { %v10985_v60 = vpop.f32.mrf.mxu0  ;;  %5568 = vst [vmem:[#allocation2 + $0xc] sm:$0xf] %v5567_v13  ;;  %v5277_v58 = vor.u32 %v5275_v32, %v5274_v49  ;;  %v5279_v31 = vrot.slane %v5274_v49, 4 }
 0x25a   : > { %v4948_v19 = vadd.f32 %v10985_v60, %v4787_v18  ;;  %v5260_v40 = vor.u32 %v5258_v38, %v5257_v47  ;;  %v5262_v2 = vrot.slane %v5257_v47, 4  ;;  %v4790_v18 = vadd.f32 %v10618_v21, %v13518_v39 }
 0x25b   : > { %v4939_v17 = vpop.f32.mrf.mxu0  ;;  %v10619_v9 = vpop.f32.mrf.mxu1  ;;  %v5278_v16 = vsel %vm11651_vm12, %v5270_v26, %v5277_v58  ;;  %v13653_v21 = vadd.f32 %v13481_v36, %v13486_v22 }
 0x25c   : > { %v4940_v45 = vadd.f32 %v4939_v17, %v4779_v0  ;;  %vm5056_vm6 = vcmp.gt.f32.partialorder %v4948_v19, 0.0  ;;  %v5092_v5 = vmul.f32 %v13584_v55, %v4948_v19  ;;  %v5578_v0 = vsel %vm11509_vm4, %v5279_v31, %v5577_v4  ;;  %5576 = vst.msk [vmem:[#allocation2 + $0x1c] sm:$0xf] %vm197_vm0, %v5278_v16 }
 0x25d   : > { %v10986_v54 = vpop.f32.mrf.mxu0  ;;  %v10620_v24 = vpop.f32.mrf.mxu1  ;;  %v5261_v15 = vsel %vm11651_vm12, %v5253_v3, %v5260_v40  ;;  %v5571_v50 = vsel %vm11509_vm4, %v5262_v2, %v5570_v28  ;;  %5579 = vst [vmem:[#allocation2 + $0x20] sm:$0x1] %v5578_v0 }
 0x25e   : > { %vm5054_vm7 = vcmp.gt.f32.partialorder %v4940_v45, 0.0  ;;  %v5090_v43 = vmul.f32 %v13584_v55, %v4940_v45  ;;  %v5124_v6 = vsel %vm5056_vm6, %v4948_v19, %v5092_v5  ;;  %5569 = vst.msk [vmem:[#allocation2 + $0x10] sm:$0xf] %vm197_vm0, %v5261_v15  ;;  %5572 = vst [vmem:[#allocation2 + $0x14] sm:$0x1] %v5571_v50  ;;  %v4951_v17 = vadd.f32 %v10986_v54, %v4790_v18 }
 0x25f   : > { %v4942_v60 = vpop.f32.mrf.mxu0  ;;  %v10622_v11 = vpop.f32.mrf.mxu1  ;;  %v10440_v32 = vpack.c.bf16 %v5124_v6, %v5124_v6  ;;  %v10621_v19 = vadd.f32 %v10620_v24, %v10619_v9  ;;  %v6576_v47 = vld [vmem:[#allocation2 + $0x18] sm:$0xf]  ;;  %v5587_v54 = vld [vmem:[#allocation2 + $0x30] sm:$0xf] }
 0x260   : > { %v5122_v56 = vsel %vm5054_vm7, %v4940_v45, %v5090_v43  ;;  %v4943_v49 = vadd.f32 %v4942_v60, %v4782_v23  ;;  %v7265_v4 = vld [vmem:[#allocation2 + $0x18] sm:$0xe]  ;;  %6642 = vrot.lane.b32.xlu0 %v6576_v47, %s11422_s10  ;;  %vm5057_vm13 = vcmp.gt.f32.partialorder %v4951_v17, 0.0  ;;  %v5093_v9 = vmul.f32 %v13584_v55, %v4951_v17  ;;  %v5580_v43 = vld [vmem:[#allocation2 + $0x24] sm:$0xf] }
 0x261   : > { %v10438_v26 = vpack.c.bf16 %v5122_v56, %v5122_v56  ;;  %v10623_v39 = vpop.f32.mrf.mxu1  ;;  %v5298_v3 = vshrl.u32 %v10440_v32, 16  ;;  %v5301_v13 = vshll.u32 %v10440_v32, 16  ;;  %v4795_v36 = vadd.f32 %v10621_v19, %v13526_v33  ;;  %v6574_v18 = vld [vmem:[#allocation2 + $0xc] sm:$0xf] }
 0x262   : > { %v10624_v38 = vadd.f32 %v10623_v39, %v10622_v11  ;;  %vm5055_vm8 = vcmp.gt.f32.partialorder %v4943_v49, 0.0  ;;  %v5091_v58 = vmul.f32 %v13584_v55, %v4943_v49  ;;  %v10244_v2 = vrot.slane %v7265_v4, 9 }
 0x263   : > { %v5281_v28 = vshrl.u32 %v10438_v26, 16  ;;  %v5284_v45 = vshll.u32 %v10438_v26, 16  ;;  %v13657_v31 = vrot.slane %v5298_v3, 7  ;;  %v5125_v60 = vsel %vm5057_vm13, %v4951_v17, %v5093_v9  ;;  %v6577_v56 = vld [vmem:[#allocation2 + $0x1c] sm:$0xf]  ;;  %v11221_v3 = vld [vmem:[%s15874_s2 + $0x70] sm:$0xff]  }
 0x264   : > { %v5123_v5 = vsel %vm5055_vm8, %v4943_v49, %v5091_v58  ;;  %v13664_v40 = vadd.f32 %v10624_v38, %v13531_v59  ;;  %v10441_v15 = vpack.c.bf16 %v5125_v60, %v5125_v60  ;;  %6638 = vrot.lane.b32.xlu0 %v6574_v18, %s11422_s10  ;;  %v7266_v26 = vld [vmem:[#allocation2 + $0x1c] sm:$0xf]  ;;  %6644 = vrot.lane.b32.xlu1 %v6577_v56, %s11422_s10  ;;  %v7267_v58 = vld [vmem:[#allocation2 + $0x20] sm:$0x1]  ;;  %v5584_v9 = vld [vmem:[#allocation2 + $0x2c] sm:$0x1] }
 0x265   : > { %v13661_v22 = vrot.slane %v5281_v28, 7  ;;  %v5303_v16 = vor.u32 %v5301_v13, %v13657_v31  ;;  %v5304_v0 = vrot.slane %v13657_v31, 4  ;;  %v10439_v6 = vpack.c.bf16 %v5123_v5, %v5123_v5  ;;  %10717 = vmatprep.subr.bf16.mxu1 %v11221_v3  ;;  %v6575_v60 = vld [vmem:[#allocation2 + $0x10] sm:$0xf]  ;;  %v5591_v56 = vld [vmem:[#allocation2 + $0x38] sm:$0x1] }
 0x266   : > { %v10625_v23 = vpop.f32.mrf.mxu1  ;;  %v7367_v17 = vrot.slane %v7266_v26, 5  ;;  %v5306_v47 = vshrl.u32 %v10441_v15, 16  ;;  %v5309_v38 = vshll.u32 %v10441_v15, 16 }
 0x267   : > { %v5286_v11 = vor.u32 %v5284_v45, %v13661_v22  ;;  %v5287_v33 = vrot.slane %v13661_v22, 4  ;;  %v5588_v49 = vsel %vm11636_vm11, %v5303_v16, %v5587_v54  ;;  %v5289_v19 = vshrl.u32 %v10439_v6, 16 }
 0x268   : > { %v10626_v24 = vpop.f32.mrf.mxu1  ;;  %v5292_v39 = vshll.u32 %v10439_v6, 16  ;;  %5589 = vst [vmem:[#allocation2 + $0x30] sm:$0xf] %v5588_v49  ;;  %v7368_v54 = vsel %vm12111_vm15, %v10244_v2, %v7367_v17  ;;  %v7369_v18 = vrot.slane %v7367_v17, 4  ;;  %6640 = vrot.lane.b32.xlu1 %v6575_v60, %s11422_s10 }
 0x269   : > { %v10627_v59 = vadd.f32 %v10626_v24, %v10625_v23  ;;  %v5581_v13 = vsel %vm11636_vm11, %v5286_v11, %v5580_v43  ;;  %v5291_v23 = vrot.slane %v5289_v19, 7  ;;  %v11222_v24 = vld [vmem:[%s15874_s2 + $0x30] sm:$0xff]   ;;  %v5308_v43 = vrot.slane %v5306_v47, 7  ;;  %7474 = vrot.lane.b32.xlu0 %v7368_v54, %s11422_s10 }
 0x26a   : > { %v10628_v32 = vpop.f32.mrf.mxu1  ;;  %5582 = vst [vmem:[#allocation2 + $0x24] sm:$0xf] %v5581_v13  ;;  %v7370_v11 = vrot.slane %v7267_v58, 5  ;;  %10718 = vmatpush3.bf16.msra.mxu1 %v11222_v24  ;;  %v7264_v58 = vld [vmem:[#allocation2 + $0x14] sm:$0x1] }
 0x26b   : > { %v10989_v50 = vpop.f32.mrf.mxu0  ;;  %v4803_v28 = vadd.f32 %v10627_v59, %v13535_v10  ;;  %v5294_v15 = vor.u32 %v5292_v39, %v5291_v23  ;;  %v5311_v59 = vor.u32 %v5309_v38, %v5308_v43 }
 0x26c   : > { %v10629_v45 = vpop.f32.mrf.mxu1 }
 0x26d   : > { %v4955_v4 = vpop.f32.mrf.mxu0  ;;  %v10630_v5 = vadd.f32 %v10629_v45, %v10628_v32  ;;  %v4964_v6 = vadd.f32 %v10989_v50, %v4803_v28  ;;  %v5313_v32 = vrot.slane %v5308_v43, 4  ;;  %v5295_v19 = vsel %vm11651_vm12, %v5287_v33, %v5294_v15  ;;  %v13701_v28 = vld [vmem:[#allocation2 + $0x10] sm:$0xf] }
 0x26e   : > { %v4956_v22 = vadd.f32 %v4955_v4, %v4795_v36  ;;  %v5296_v36 = vrot.slane %v5291_v23, 4  ;;  %5583 = vst.msk [vmem:[#allocation2 + $0x28] sm:$0xf] %vm197_vm0, %v5295_v19  ;;  %v5312_v13 = vsel %vm11651_vm12, %v5304_v0, %v5311_v59 }
 0x26f   : > { %v10990_v16 = vpop.f32.mrf.mxu0  ;;  %v10631_v10 = vpop.f32.mrf.mxu1  ;;  %vm5060_vm1 = vcmp.gt.f32.partialorder %v4964_v6, 0.0  ;;  %v5096_v50 = vmul.f32 %v13584_v55, %v4964_v6  ;;  %v5592_v47 = vsel %vm11509_vm4, %v5313_v32, %v5591_v56  ;;  %5590 = vst.msk [vmem:[#allocation2 + $0x34] sm:$0xf] %vm197_vm0, %v5312_v13  ;;  %v4806_v31 = vadd.f32 %v10630_v5, %v13542_v42  ;;  %v6580_v23 = vld [vmem:[#allocation2 + $0x30] sm:$0xf] }
 0x270   : > { %vm5058_vm14 = vcmp.gt.f32.partialorder %v4956_v22, 0.0  ;;  %v5094_v2 = vmul.f32 %v13584_v55, %v4956_v22  ;;  %v5585_v39 = vsel %vm11509_vm4, %v5296_v36, %v5584_v9  ;;  %5593 = vst [vmem:[#allocation2 + $0x38] sm:$0x1] %v5592_v47  ;;  %6650 = vrot.lane.b32.xlu0 %v6580_v23, %s11422_s10  ;;  %v5594_v56 = vld [vmem:[#allocation2 + $0x3c] sm:$0xf]  ;;  %v7360_v5 = vrot.slane %v13701_v28, 5 }
 0x271   : > { %v4958_v26 = vpop.f32.mrf.mxu0  ;;  %v10632_v49 = vpop.f32.mrf.mxu1  ;;  %5586 = vst [vmem:[#allocation2 + $0x2c] sm:$0x1] %v5585_v39  ;;  %v5128_v4 = vsel %vm5060_vm1, %v4964_v6, %v5096_v50  ;;  %v4967_v15 = vadd.f32 %v10990_v16, %v4806_v31  ;;  %v5748_v50 = vld [vmem:[#allocation2 + $0x18] sm:$0xf]  ;;  %v5749_v23 = vld [vmem:[#allocation2 + $0x1c] sm:$0xf] }
 0x272   : > { %v5126_v17 = vsel %vm5058_vm14, %v4956_v22, %v5094_v2  ;;  %v4959_v3 = vadd.f32 %v4958_v26, %v13664_v40  ;;  %v10444_v40 = vpack.c.bf16 %v5128_v4, %v5128_v4  ;;  %v7371_v22 = vsel %vm12111_vm15, %v7369_v18, %v7370_v11 }
 0x273   : > { %v10442_v38 = vpack.c.bf16 %v5126_v17, %v5126_v17  ;;  %v10634_v33 = vpop.f32.mrf.mxu1  ;;  %v10633_v54 = vadd.f32 %v10632_v49, %v10631_v10  ;;  %7476 = vrot.lane.b32.xlu1 %v7371_v22, %s11422_s10  ;;  %v7363_v2 = vrot.slane %v7264_v58, 5  ;;  %v5601_v10 = vld [vmem:[#allocation2 + $0x48] sm:$0xf]  ;;  %vm5061_vm3 = vcmp.gt.f32.partialorder %v4967_v15, 0.0  ;;  %v5598_v22 = vld [vmem:[#allocation2 + $0x44] sm:$0x1] }
 0x274   : > { %vm5059_vm2 = vcmp.gt.f32.partialorder %v4959_v3, 0.0  ;;  %v5095_v45 = vmul.f32 %v13584_v55, %v4959_v3  ;;  %v5332_v43 = vshrl.u32 %v10444_v40, 16  ;;  %v5335_v6 = vshll.u32 %v10444_v40, 16  ;;  %v11223_v17 = vld [vmem:[%s15874_s2 + $0x68] sm:$0xff]  }
 0x275   : > { %v5315_v0 = vshrl.u32 %v10442_v38, 16  ;;  %v5318_v9 = vshll.u32 %v10442_v38, 16  ;;  %v10635_v24 = vpop.f32.mrf.mxu1  ;;  %v5097_v18 = vmul.f32 %v13584_v55, %v4967_v15  ;;  %v4811_v58 = vadd.f32 %v10633_v54, %v13546_v53  ;;  %10719 = vmatprep.subr.bf16.mxu1 %v11223_v17 }
 0x276   : > { %v5127_v60 = vsel %vm5059_vm2, %v4959_v3, %v5095_v45  ;;  %v13713_v32 = vrot.slane %v5332_v43, 7  ;;  %v10636_v11 = vadd.f32 %v10635_v24, %v10634_v33  ;;  %v11224_v3 = vld [vmem:[%s15874_s2 + $0x28] sm:$0xff]   ;;  %v7362_v33 = vrot.slane %v7360_v5, 4 }
 0x277   : > { %v5317_v36 = vrot.slane %v5315_v0, 7  ;;  %v10443_v42 = vpack.c.bf16 %v5127_v60, %v5127_v60  ;;  %v5129_v38 = vsel %vm5061_vm3, %v4967_v15, %v5097_v18  ;;  %v5842_v60 = vshll.u32 %v5748_v50, 16  ;;  %10720 = vmatpush3.bf16.msra.mxu1 %v11224_v3  ;;  %v5750_v3 = vld [vmem:[#allocation2 + $0x20] sm:$0x1] }
 0x278   : > { %v5337_v13 = vor.u32 %v5335_v6, %v13713_v32  ;;  %v5338_v47 = vrot.slane %v13713_v32, 4  ;;  %v10445_v31 = vpack.c.bf16 %v5129_v38, %v5129_v38  ;;  %v7364_v24 = vsel %vm12111_vm15, %v7362_v33, %v7363_v2  ;;  %v5605_v38 = vld [vmem:[#allocation2 + $0x50] sm:$0x1] }
 0x279   : > { %v5320_v26 = vor.u32 %v5318_v9, %v5317_v36  ;;  %v5321_v16 = vrot.slane %v5317_v36, 4  ;;  %v5323_v49 = vshrl.u32 %v10443_v42, 16  ;;  %v5326_v19 = vshll.u32 %v10443_v42, 16  ;;  %7472 = vrot.lane.b32.xlu1 %v7364_v24, %s11422_s10 }
 0x27a   : > { %v5602_v9 = vsel %vm11636_vm11, %v5337_v13, %v5601_v10  ;;  %v5839_v6 = vshrl.u32 %v5748_v50, 16  ;;  %v5340_v53 = vshrl.u32 %v10445_v31, 16  ;;  %v5343_v54 = vshll.u32 %v10445_v31, 16  ;;  %v6581_v10 = vld [vmem:[#allocation2 + $0x34] sm:$0xf] }
 0x27b   : > { %v13711_v59 = vpop.f32.mrf.mxu1  ;;  %v5595_v40 = vsel %vm11636_vm11, %v5320_v26, %v5594_v56  ;;  %v5325_v45 = vrot.slane %v5323_v49, 7  ;;  %5603 = vst [vmem:[#allocation2 + $0x48] sm:$0xf] %v5602_v9  ;;  %v5844_v26 = vrot.slane %v5842_v60, 5  ;;  %v5848_v49 = vshll.u32 %v5749_v23, 16 }
 0x27c   : > { %5596 = vst [vmem:[#allocation2 + $0x3c] sm:$0xf] %v5595_v40  ;;  %v5841_v18 = vrot.slane %v5839_v6, 4  ;;  %v5852_v17 = vshrl.u32 %v5749_v23, 16  ;;  %v4814_v23 = vadd.f32 %v10636_v11, %v13549_v25  ;;  %v6175_v25 = vpop.permute.xlu0 %6174 }
 0x27d   : > { %v10638_v39 = vpop.f32.mrf.mxu1  ;;  %v5328_v15 = vor.u32 %v5326_v19, %v5325_v45  ;;  %v5330_v36 = vrot.slane %v5325_v45, 4  ;;  %v5342_v19 = vrot.slane %v5340_v53, 7  ;;  %v5850_v45 = vrot.slane %v5848_v49, 5  ;;  %6652 = vrot.lane.b32.xlu1 %v6581_v10, %s11422_s10 }
 0x27e   : > { %v13724_v4 = vpop.f32.mrf.mxu0  ;;  %v5845_v40 = vor.u32 %v5844_v26, %v5841_v18  ;;  %v5854_v60 = vrot.slane %v5852_v17, 4  ;;  %v11225_v17 = vld [vmem:[%s15874_s2 + $0x60] sm:$0xff]  }
 0x27f   : > { %v13731_v0 = vpop.f32.mrf.mxu1  ;;  %v5329_v2 = vsel %vm11651_vm12, %v5321_v16, %v5328_v15  ;;  %v5599_v50 = vsel %vm11509_vm4, %v5330_v36, %v5598_v22  ;;  %v5345_v31 = vor.u32 %v5343_v54, %v5342_v19  ;;  %v10639_v16 = vadd.f32 %v10638_v39, %v13711_v59  ;;  %v7262_v22 = vld [vmem:[#allocation2 + $0xc] sm:$0xe]  ;;  %v5678_v36 = vld [vmem:[#allocation2] sm:$0xf]  ;;  %10721 = vmatprep.subr.bf16.mxu1 %v11225_v17 }
 0x280   : > { %v4971_v43 = vpop.f32.mrf.mxu0  ;;  %5597 = vst.msk [vmem:[#allocation2 + $0x40] sm:$0xf] %vm197_vm0, %v5329_v2  ;;  %5600 = vst [vmem:[#allocation2 + $0x44] sm:$0x1] %v5599_v50  ;;  %v5846_v6 = vrot.slane %v5845_v40, 4  ;;  %v5858_v15 = vshll.u32 %v5750_v3, 16  ;;  %v5855_v18 = vor.u32 %v5854_v60, %v5850_v45 }
 0x281   : > { %v10641_v56 = vpop.f32.mrf.mxu1  ;;  %v4972_v42 = vadd.f32 %v4971_v43, %v4811_v58  ;;  %v5347_v58 = vrot.slane %v5342_v19, 4  ;;  %v5346_v53 = vsel %vm11651_vm12, %v5338_v47, %v5345_v31  ;;  %v4819_v59 = vadd.f32 %v10639_v16, %v13553_v46  ;;  %5710 = vst.msk [vmem:[#allocation3] sm:$0xf] %vm197_vm0, %v5678_v36  ;;  %v7663_v50 = vld [vmem:[#allocation2 + $0x1c] sm:$0xf] }
 0x282   : > { %v13738_v32 = vpop.f32.mrf.mxu0  ;;  %5604 = vst.msk [vmem:[#allocation2 + $0x4c] sm:$0xf] %vm197_vm0, %v5346_v53  ;;  %v5851_v11 = vsel %vm11630_vm10, %v5846_v6, %v5850_v45  ;;  %v5860_v47 = vrot.slane %v5858_v15, 5  ;;  %v10243_v2 = vrot.slane %v7262_v22, 9  ;;  %v11226_v22 = vld [vmem:[%s15874_s2 + $0x20] sm:$0xff]   ;;  %v6177_v15 = vpop.permute.xlu1 %6176 }
 0x283   : > { %vm5062_vm5 = vcmp.gt.f32.partialorder %v4972_v42, 0.0  ;;  %v5098_v33 = vmul.f32 %v13584_v55, %v4972_v42  ;;  %v5606_v54 = vsel %vm11509_vm4, %v5347_v58, %v5605_v38  ;;  %6270 = vst.msk [vmem:[#allocation3] sm:$0xf] %vm308_vm9, %v6175_v25  ;;  %6182 = vrot.lane.b32.xlu0 %v5851_v11, %s11422_s10  ;;  %v4980_v46 = vadd.f32 %v13724_v4, %v4819_v59  ;;  %v5608_v58 = vld [vmem:[#allocation2 + $0x54] sm:$0xf] }
 0x284   : > { %v4974_v9 = vpop.f32.mrf.mxu0  ;;  %5607 = vst [vmem:[#allocation2 + $0x50] sm:$0x1] %v5606_v54  ;;  %v5856_v38 = vrot.slane %v5855_v18, 4  ;;  %v7361_v4 = vsel %vm12111_vm15, %v10243_v2, %v7360_v5  ;;  %v7662_v59 = vld [vmem:[#allocation2 + $0x18] sm:$0xf]  ;;  %10722 = vmatpush3.bf16.msra.mxu1 %v11226_v22 }
 0x285   : > { %v13744_v13 = vpop.f32.mrf.mxu1  ;;  %v5130_v43 = vsel %vm5062_vm5, %v4972_v42, %v5098_v33  ;;  %v4975_v42 = vadd.f32 %v4974_v9, %v4814_v23  ;;  %v10642_v33 = vadd.f32 %v10641_v56, %v13731_v0  ;;  %vm5064_vm7 = vcmp.gt.f32.partialorder %v4980_v46, 0.0  ;;  %v7664_v56 = vld [vmem:[#allocation2 + $0x20] sm:$0x1]  ;;  %v5679_v25 = vld [vmem:[#allocation2 + $0x4] sm:$0xf] }
 0x286   : > { %v10446_v10 = vpack.c.bf16 %v5130_v43, %v5130_v43  ;;  %v5100_v45 = vmul.f32 %v13584_v55, %v4980_v46  ;;  %v5861_v23 = vsel %vm11630_vm10, %v5856_v38, %v5860_v47  ;;  %v7720_v9 = vshll.u32 %v7663_v50, 16  ;;  %5711 = vst.msk [vmem:[#allocation3 + $0x14] sm:$0xf] %vm197_vm0, %v5679_v25 }
 0x287   : > { %v13751_v24 = vpop.f32.mrf.mxu1  ;;  %vm5063_vm6 = vcmp.gt.f32.partialorder %v4975_v42, 0.0  ;;  %v5099_v3 = vmul.f32 %v13584_v55, %v4975_v42  ;;  %v4822_v0 = vadd.f32 %v10642_v33, %v13556_v44  ;;  %6184 = vrot.lane.b32.xlu1 %v5861_v23, %s11422_s10  ;;  %7470 = vrot.lane.b32.xlu0 %v7361_v4, %s11422_s10  ;;  %v11227_v44 = vld [vmem:[%s15874_s2 + $0x58] sm:$0xff]   ;;  %v7730_v47 = vshll.u32 %v7664_v56, 16  ;;  %6271 = vst.msk [vmem:[#allocation3 + $0x14] sm:$0xf] %vm308_vm9, %v6177_v15 }
 0x288   : > { %v5349_v26 = vshrl.u32 %v10446_v10, 16  ;;  %v5352_v49 = vshll.u32 %v10446_v10, 16  ;;  %v5132_v43 = vsel %vm5064_vm7, %v4980_v46, %v5100_v45  ;;  %v13799_v54 = vrot.slane %v7720_v9, 5  ;;  %10723 = vmatprep.subr.bf16.mxu1 %v11227_v44  ;;  %v5612_v4 = vld [vmem:[#allocation2 + $0x5c] sm:$0x1] }
 0x289   : > { %v13758_v39 = vpop.f32.mrf.mxu1  ;;  %v5131_v16 = vsel %vm5063_vm6, %v4975_v42, %v5099_v3  ;;  %v10448_v36 = vpack.c.bf16 %v5132_v43, %v5132_v43  ;;  %v4983_v53 = vadd.f32 %v13738_v32, %v4822_v0  ;;  %v7724_v10 = vshrl.u32 %v7663_v50, 16  ;;  %v11228_v32 = vld [vmem:[%s15874_s2 + $0x18] sm:$0xff]   ;;  %v5615_v0 = vld [vmem:[#allocation2 + $0x60] sm:$0xf] }
 0x28a   : > { %v13774_v40 = vrot.slane %v5349_v26, 7  ;;  %v10447_v6 = vpack.c.bf16 %v5131_v16, %v5131_v16  ;;  %v7732_v38 = vrot.slane %v7730_v47, 5  ;;  %v7711_v33 = vshrl.u32 %v7662_v59, 16  ;;  %10724 = vmatpush3.bf16.msra.mxu1 %v11228_v32  ;;  %v13834_v47 = vld [vmem:[#allocation2 + $0xc] sm:$0xf] }
 0x28b   : > { %v13767_v19 = vpop.f32.mrf.mxu1  ;;  %v5369_v46 = vshll.u32 %v10448_v36, 16  ;;  %vm5065_vm8 = vcmp.gt.f32.partialorder %v4983_v53, 0.0  ;;  %v5101_v2 = vmul.f32 %v13584_v55, %v4983_v53  ;;  %v7726_v3 = vrot.slane %v7724_v10, 4  ;;  %v11230_v10 = vld [vmem:[%s15874_s2 + $0xf8] sm:$0xff]  }
 0x28c   : > { %v5354_v28 = vor.u32 %v5352_v49, %v13774_v40  ;;  %v5355_v5 = vrot.slane %v13774_v40, 4  ;;  %v5357_v42 = vshrl.u32 %v10447_v6, 16  ;;  %v5360_v18 = vshll.u32 %v10447_v6, 16  ;;  %v11229_v6 = vld [vmem:[%s15874_s2 + $0x50] sm:$0xff]   ;;  %10827 = vmatprep.subr.bf16.mxu0 %v11230_v10 }
 0x28d   : > { %v5366_v49 = vshrl.u32 %v10448_v36, 16  ;;  %v7714_v16 = vshll.u32 %v7662_v59, 16  ;;  %v10645_v23 = vadd.f32 %v13751_v24, %v13744_v13  ;;  %v7713_v36 = vrot.slane %v7711_v33, 4  ;;  %v5746_v24 = vld [vmem:[#allocation2 + $0x10] sm:$0xf]  ;;  %10725 = vmatprep.subr.bf16.mxu1 %v11229_v6  ;;  %v11233_v33 = vld [vmem:[%s15874_s2 + $0x48] sm:$0xff]  }
 0x28e   : > { %v5609_v11 = vsel %vm11636_vm11, %v5354_v28, %v5608_v58  ;;  %v5359_v17 = vrot.slane %v5357_v42, 7  ;;  %v5133_v58 = vsel %vm5065_vm8, %v4983_v53, %v5101_v2  ;;  %v7727_v28 = vor.u32 %v7726_v3, %v13799_v54  ;;  %v11232_v3 = vld [vmem:[%s15874_s2 + $0xb8] sm:$0xff]  }
 0x28f   : > { %5610 = vst [vmem:[#allocation2 + $0x54] sm:$0xf] %v5609_v11  ;;  %v13815_v45 = vrot.slane %v5366_v49, 7  ;;  %v10449_v22 = vpack.c.bf16 %v5133_v58, %v5133_v58  ;;  %v7716_v53 = vrot.slane %v7714_v16, 5  ;;  %v5824_v58 = vshll.u32 %v5746_v24, 16  ;;  %10828 = vmatpush3.bf16.msra.mxu0 %v11232_v3  ;;  %v11238_v3 = vld [vmem:[%s15874_s2 + $0xe8] sm:$0xff]  }
 0x290   : > { %v13781_v31 = vpop.f32.mrf.mxu1  ;;  %v5362_v56 = vor.u32 %v5360_v18, %v5359_v17  ;;  %v5364_v9 = vrot.slane %v5359_v17, 4  ;;  %v5747_v18 = vld [vmem:[#allocation2 + $0x14] sm:$0x1]  ;;  %v5828_v16 = vshrl.u32 %v5746_v24, 16  ;;  %v5815_v6 = vshrl.u32 %v13834_v47, 16 }
 0x291   : > { %v13810_v50 = vpop.f32.mrf.mxu0  ;;  %v5371_v15 = vor.u32 %v5369_v46, %v13815_v45  ;;  %v5372_v44 = vrot.slane %v13815_v45, 4  ;;  %v5374_v11 = vshrl.u32 %v10449_v22, 16  ;;  %v5377_v42 = vshll.u32 %v10449_v22, 16  ;;  %v11231_v17 = vld [vmem:[%s15874_s2 + $0x10] sm:$0xff]  }
 0x292   : > { %v13793_v60 = vpop.f32.mrf.mxu1  ;;  %v5363_v59 = vsel %vm11651_vm12, %v5355_v5, %v5362_v56  ;;  %v5613_v25 = vsel %vm11509_vm4, %v5364_v9, %v5612_v4  ;;  %v7728_v46 = vrot.slane %v7727_v28, 4  ;;  %v7717_v2 = vor.u32 %v7716_v53, %v7713_v36  ;;  %10726 = vmatpush3.bf16.msra.mxu1 %v11231_v17  ;;  %v7271_v24 = vld [vmem:[#allocation2 + $0x30] sm:$0xe]  ;;  %v11237_v17 = vld [vmem:[%s15874_s2 + $0x40] sm:$0xff]  }
 0x293   : > { %v4987_v13 = vpop.f32.mrf.mxu0  ;;  %v5616_v49 = vsel %vm11636_vm11, %v5371_v15, %v5615_v0  ;;  %5611 = vst.msk [vmem:[#allocation2 + $0x58] sm:$0xf] %vm197_vm0, %v5363_v59  ;;  %5614 = vst [vmem:[#allocation2 + $0x5c] sm:$0x1] %v5613_v25  ;;  %v10648_v5 = vadd.f32 %v13767_v19, %v13758_v39  ;;  %v5376_v45 = vrot.slane %v5374_v11, 7  ;;  %v4827_v4 = vadd.f32 %v10645_v23, %v13562_v14  ;;  %v11234_v19 = vld [vmem:[%s15874_s2 + $0xf0] sm:$0xff]  }
 0x294   : > { %v13803_v26 = vpop.f32.mrf.mxu1  ;;  %5617 = vst [vmem:[#allocation2 + $0x60] sm:$0xf] %v5616_v49  ;;  %v5619_v0 = vld [vmem:[#allocation2 + $0x68] sm:$0x1]  ;;  %v7733_v56 = vsel %vm11630_vm10, %v7728_v46, %v7732_v38  ;;  %v7718_v9 = vrot.slane %v7717_v2, 4  ;;  %v5834_v28 = vshll.u32 %v5747_v18, 16  ;;  %10727 = vmatprep.subr.bf16.mxu1 %v11233_v33  ;;  %10829 = vmatprep.subr.bf16.mxu0 %v11234_v19 }
 0x295   : > { %v13860_v22 = vpop.f32.mrf.mxu0  ;;  %v11235_v14 = vld [vmem:[%s15874_s2 + $0x8] sm:$0xff]   ;;  %v5379_v23 = vor.u32 %v5377_v42, %v5376_v45  ;;  %v5381_v15 = vrot.slane %v5376_v45, 4  ;;  %8096 = vrot.lane.b32.xlu1 %v7733_v56, %s11422_s10  ;;  %v4988_v36 = vadd.f32 %v4987_v13, %v4827_v4  ;;  %v13867_v53 = vrot.slane %v5824_v58, 5  ;;  %v7272_v38 = vld [vmem:[#allocation2 + $0x34] sm:$0xf]  ;;  %v11239_v19 = vld [vmem:[%s15874_s2] sm:$0xff]  }
 0x296   : > { %v13813_v40 = vpop.f32.mrf.mxu1  ;;  %v7723_v59 = vsel %vm11630_vm10, %v7718_v9, %v13799_v54  ;;  %v5830_v25 = vrot.slane %v5828_v16, 4  ;;  %v5836_v11 = vrot.slane %v5834_v28, 5  ;;  %v5817_v18 = vrot.slane %v5815_v6, 4  ;;  %v7273_v49 = vld [vmem:[#allocation2 + $0x38] sm:$0x1]  ;;  %v11236_v13 = vld [vmem:[%s15874_s2 + $0xb0] sm:$0xff]   ;;  %10728 = vmatpush3.bf16.msra.mxu1 %v11235_v14 }
 0x297   : > { %v5380_v42 = vsel %vm11651_vm12, %v5372_v44, %v5379_v23  ;;  %v5620_v46 = vsel %vm11509_vm4, %v5381_v15, %v5619_v0  ;;  %8094 = vrot.lane.b32.xlu0 %v7723_v59, %s11422_s10  ;;  %vm5066_vm13 = vcmp.gt.f32.partialorder %v4988_v36, 0.0  ;;  %v5102_v54 = vmul.f32 %v13584_v55, %v4988_v36  ;;  %v6579_v44 = vld [vmem:[#allocation2 + $0x28] sm:$0xf]  ;;  %v4990_v16 = vpop.f32.mrf.mxu0  ;;  %10830 = vmatpush3.bf16.msra.mxu0 %v11236_v13  ;;  %v6586_v57 = vld [vmem:[#allocation2 + $0x54] sm:$0xf] }
 0x298   : > { %5618 = vst.msk [vmem:[#allocation2 + $0x64] sm:$0xf] %vm197_vm0, %v5380_v42  ;;  %5621 = vst [vmem:[#allocation2 + $0x68] sm:$0x1] %v5620_v46  ;;  %v5831_v33 = vor.u32 %v5830_v25, %v13867_v53  ;;  %v5818_v45 = vshll.u32 %v13834_v47, 16  ;;  %v10651_v4 = vadd.f32 %v13793_v60, %v13781_v31  ;;  %v4830_v58 = vadd.f32 %v10648_v5, %v13565_v34  ;;  %v11240_v34 = vld [vmem:[%s15874_s2 + $0xa8] sm:$0xff]  }
 0x299   : > { %v13820_v43 = vpop.f32.mrf.mxu1  ;;  %6648 = vrot.lane.b32.xlu1 %v6579_v44, %s11422_s10  ;;  %v5134_v0 = vsel %vm5066_vm13, %v4988_v36, %v5102_v54  ;;  %v7381_v56 = vrot.slane %v7272_v38, 5  ;;  %v7384_v9 = vrot.slane %v7273_v49, 5  ;;  %v10246_v28 = vrot.slane %v7271_v24, 9  ;;  %10729 = vmatprep.subr.bf16.mxu1 %v11237_v17  ;;  %v6578_v31 = vld [vmem:[#allocation2 + $0x24] sm:$0xf] }
 0x29a   : > { %v10450_v60 = vpack.c.bf16 %v5134_v0, %v5134_v0  ;;  %v5832_v5 = vrot.slane %v5831_v33, 4  ;;  %v5820_v6 = vrot.slane %v5818_v45, 5  ;;  %v4835_v14 = vadd.f32 %v10651_v4, %v13569_v52  ;;  %10831 = vmatprep.subr.bf16.mxu0 %v11238_v3  ;;  %v13915_v24 = vld [vmem:[#allocation2 + $0x28] sm:$0xf]  ;;  %v11244_v52 = vld [vmem:[%s15874_s2 + $0xe0] sm:$0xff]   ;;  %10730 = vmatpush3.bf16.msra.mxu1 %v11239_v19 }
 0x29b   : > { %v13836_v32 = vpop.f32.mrf.mxu1  ;;  %6646 = vrot.lane.b32.xlu0 %v6578_v31, %s11422_s10  ;;  %v4991_v23 = vadd.f32 %v4990_v16, %v4830_v58  ;;  %v7383_v15 = vrot.slane %v7381_v56, 4  ;;  %v13911_v36 = vsel %vm12111_vm15, %v10246_v28, %v7381_v56  ;;  %v10654_v38 = vadd.f32 %v13813_v40, %v13803_v26  ;;  %v7270_v46 = vld [vmem:[#allocation2 + $0x2c] sm:$0x1]  ;;  %10832 = vmatpush3.bf16.msra.mxu0 %v11240_v34  ;;  %v11245_v17 = vld [vmem:[%s15874_s2 + $0xa0] sm:$0xff]   ;;  %v11247_v28 = vld [vmem:[%s15874_s2 + $0x98] sm:$0xff]  }
 0x29c   : > { %v5383_v25 = vshrl.u32 %v10450_v60, 16  ;;  %v5386_v49 = vshll.u32 %v10450_v60, 16  ;;  %v5837_v13 = vsel %vm11630_vm10, %v5832_v5, %v5836_v11  ;;  %v5821_v42 = vor.u32 %v5820_v6, %v5817_v18  ;;  %10833 = vmatprep.subr.bf16.mxu0 %v11244_v52  ;;  %v5622_v45 = vld [vmem:[#allocation2 + $0x6c] sm:$0xf]  ;;  %v13957_v60 = vld [vmem:[#allocation2 + $0x34] sm:$0xf] }
 0x29d   : > { %v13853_v39 = vpop.f32.mrf.mxu1  ;;  %6180 = vrot.lane.b32.xlu1 %v5837_v13, %s11422_s10  ;;  %v4996_v26 = vadd.f32 %v13810_v50, %v4835_v14  ;;  %vm5067_vm14 = vcmp.gt.f32.partialorder %v4991_v23, 0.0  ;;  %v5103_v40 = vmul.f32 %v13584_v55, %v4991_v23  ;;  %v7385_v54 = vsel %vm12111_vm15, %v7383_v15, %v7384_v9  ;;  %v11246_v50 = vld [vmem:[%s15874_s2 + $0xd8] sm:$0xff]   ;;  %v5754_v9 = vld [vmem:[#allocation2 + $0x30] sm:$0xf] }
 0x29e   : > { %v13932_v11 = vrot.slane %v5383_v25, 7  ;;  %v5822_v18 = vrot.slane %v5821_v42, 4  ;;  %v4838_v3 = vadd.f32 %v10654_v38, %v13572_v20  ;;  %v7374_v44 = vrot.slane %v13915_v24, 5  ;;  %v5682_v52 = vld [vmem:[#allocation2 + $0x18] sm:$0xf] }
 0x29f   : > { %v13869_v10 = vpop.f32.mrf.mxu1  ;;  %vm5068_vm1 = vcmp.gt.f32.partialorder %v4996_v26, 0.0  ;;  %v5104_v4 = vmul.f32 %v13584_v55, %v4996_v26  ;;  %v5135_v58 = vsel %vm5067_vm14, %v4991_v23, %v5103_v40  ;;  %v7377_v16 = vrot.slane %v7270_v46, 5  ;;  %10834 = vmatpush3.bf16.msra.mxu0 %v11245_v17  ;;  %5714 = vst.msk [vmem:[#allocation3 + $0x50] sm:$0xf] %vm197_vm0, %v5682_v52  ;;  %v5683_v42 = vld [vmem:[#allocation2 + $0x1c] sm:$0xf] }
 0x2a0   : > { %v5388_v19 = vor.u32 %v5386_v49, %v13932_v11  ;;  %v5389_v0 = vrot.slane %v13932_v11, 4  ;;  %v5827_v20 = vsel %vm11630_vm10, %v5822_v18, %v13867_v53  ;;  %v10451_v56 = vpack.c.bf16 %v5135_v58, %v5135_v58  ;;  %10835 = vmatprep.subr.bf16.mxu0 %v11246_v50  ;;  %5715 = vst.msk [vmem:[#allocation3 + $0x64] sm:$0xf] %vm197_vm0, %v5683_v42  ;;  %v7599_v17 = vld [vmem:[#allocation2 + $0x1c] sm:$0xf]  ;;  %v11251_v42 = vld [vmem:[%s15874_s2 + $0x88] sm:$0xff]  }
 0x2a1   : > { %6178 = vrot.lane.b32.xlu0 %v5827_v20, %s11422_s10  ;;  %v5136_v55 = vsel %vm5068_vm1, %v4996_v26, %v5104_v4  ;;  %7484 = vrot.lane.b32.xlu1 %v7385_v54, %s11422_s10  ;;  %v4999_v34 = vadd.f32 %v13860_v22, %v4838_v3  ;;  %v7376_v31 = vrot.slane %v7374_v44, 4  ;;  %v10657_v53 = vadd.f32 %v13836_v32, %v13820_v43  ;;  %v11248_v22 = vld [vmem:[%s15874_s2 + $0xd0] sm:$0xff]   ;;  %v13971_v32 = vld [vmem:[%s15875_s3 + $0x2] ss:$0 sm:$0xff]  ;;  %v5629_v18 = vld [vmem:[#allocation2 + $0x78] sm:$0xf] }
 0x2a2   : > { %v5623_v5 = vsel %vm11636_vm11, %v5388_v19, %v5622_v45  ;;  %v10452_v6 = vpack.c.bf16 %v5136_v55, %v5136_v55  ;;  %v5391_v14 = vshrl.u32 %v10451_v56, 16  ;;  %v5394_v23 = vshll.u32 %v10451_v56, 16  ;;  %v5626_v43 = vld [vmem:[#allocation2 + $0x74] sm:$0x1]  ;;  %v7268_v58 = vld [vmem:[#allocation2 + $0x24] sm:$0xe] }
 0x2a3   : > { %5624 = vst [vmem:[#allocation2 + $0x6c] sm:$0xf] %v5623_v5  ;;  %vm5069_vm2 = vcmp.gt.f32.partialorder %v4999_v34, 0.0  ;;  %v5105_v25 = vmul.f32 %v13971_v32, %v4999_v34  ;;  %v7378_v49 = vsel %vm12111_vm15, %v7376_v31, %v7377_v16  ;;  %v5887_v13 = vshrl.u32 %v5754_v9, 16  ;;  %10836 = vmatpush3.bf16.msra.mxu0 %v11247_v28  ;;  %7631 = vst.msk [vmem:[#allocation3 + $0x20] sm:$0xf] %vm197_vm0, %v7599_v17 }
 0x2a4   : > { %v13883_v2 = vpop.f32.mrf.mxu1  ;;  %v5400_v46 = vshrl.u32 %v10452_v6, 16  ;;  %v5403_v26 = vshll.u32 %v10452_v6, 16  ;;  %v5393_v40 = vrot.slane %v5391_v14, 7  ;;  %v5890_v54 = vshll.u32 %v5754_v9, 16  ;;  %v7598_v16 = vld [vmem:[#allocation2 + $0x18] sm:$0xf]  ;;  %10837 = vmatprep.subr.bf16.mxu0 %v11248_v22 }
 0x2a5   : > { %7482 = vrot.lane.b32.xlu0 %v13911_v36, %s11422_s10  ;;  %v5137_v3 = vsel %vm5069_vm2, %v4999_v34, %v5105_v25  ;;  %7480 = vrot.lane.b32.xlu1 %v7378_v49, %s11422_s10  ;;  %v5889_v50 = vrot.slane %v5887_v13, 4  ;;  %v5896_v45 = vshll.u32 %v13957_v60, 16  ;;  %v5900_v4 = vshrl.u32 %v13957_v60, 16  ;;  %v11249_v19 = vld [vmem:[%s15874_s2 + $0x90] sm:$0xff]   ;;  %v5756_v55 = vld [vmem:[#allocation2 + $0x38] sm:$0x1] }
 0x2a6   : > { %v13902_v47 = vpop.f32.mrf.mxu1  ;;  %v13988_v20 = vrot.slane %v5400_v46, 7  ;;  %v5396_v36 = vor.u32 %v5394_v23, %v5393_v40  ;;  %v5398_v56 = vrot.slane %v5393_v40, 4  ;;  %v10453_v9 = vpack.c.bf16 %v5137_v3, %v5137_v3  ;;  %7630 = vst.msk [vmem:[#allocation3 + $0xc] sm:$0xf] %vm197_vm0, %v7598_v16  ;;  %v11250_v31 = vld [vmem:[%s15874_s2 + $0xc8] sm:$0xff]  }
 0x2a7   : > { %v13961_v15 = vpop.f32.mrf.mxu0  ;;  %v6584_v60 = vld [vmem:[#allocation2 + $0x48] sm:$0xf]  ;;  %v6585_v5 = vld [vmem:[#allocation2 + $0x4c] sm:$0xf]  ;;  %v5892_v6 = vrot.slane %v5890_v54, 5  ;;  %v5898_v14 = vrot.slane %v5896_v45, 5  ;;  %v10660_v23 = vadd.f32 %v13869_v10, %v13853_v39  ;;  %v4843_v52 = vadd.f32 %v10657_v53, %v13576_v29  ;;  %10838 = vmatpush3.bf16.msra.mxu0 %v11249_v19 }
 0x2a8   : > { %v13917_v59 = vpop.f32.mrf.mxu1  ;;  %v5405_v25 = vor.u32 %v5403_v26, %v13988_v20  ;;  %v5406_v49 = vrot.slane %v13988_v20, 4  ;;  %v5397_v22 = vsel %vm11651_vm12, %v5389_v0, %v5396_v36  ;;  %v5627_v13 = vsel %vm11509_vm4, %v5398_v56, %v5626_v43  ;;  %v5681_v39 = vld [vmem:[#allocation2 + $0x10] sm:$0xf]  ;;  %v5680_v10 = vld [vmem:[#allocation2 + $0xc] sm:$0xf]  ;;  %v11252_v43 = vld [vmem:[%s15874_s2 + $0xc0] sm:$0xff]   ;;  %10839 = vmatprep.subr.bf16.mxu0 %v11250_v31 }
 0x2a9   : > { %v5003_v28 = vpop.f32.mrf.mxu0  ;;  %5625 = vst.msk [vmem:[#allocation2 + $0x70] sm:$0xf] %vm197_vm0, %v5397_v22  ;;  %5628 = vst [vmem:[#allocation2 + $0x74] sm:$0x1] %v5627_v13  ;;  %v5408_v29 = vshrl.u32 %v10453_v9, 16  ;;  %v5411_v53 = vshll.u32 %v10453_v9, 16  ;;  %6658 = vrot.lane.b32.xlu0 %v6584_v60, %s11422_s10  ;;  %6660 = vrot.lane.b32.xlu1 %v6585_v5, %s11422_s10  ;;  %v5893_v11 = vor.u32 %v5892_v6, %v5889_v50 }
 0x2aa   : > { %v13936_v33 = vpop.f32.mrf.mxu1  ;;  %v5004_v0 = vadd.f32 %v5003_v28, %v4843_v52  ;;  %5713 = vst.msk [vmem:[#allocation3 + $0x3c] sm:$0xf] %vm197_vm0, %v5681_v39  ;;  %5712 = vst.msk [vmem:[#allocation3 + $0x28] sm:$0xf] %vm197_vm0, %v5680_v10  ;;  %v5630_v46 = vsel %vm11636_vm11, %v5405_v25, %v5629_v18  ;;  %v5902_v40 = vrot.slane %v5900_v4, 4  ;;  %v5906_v54 = vshll.u32 %v5756_v55, 16 }
 0x2ab   : > { %v14020_v26 = vpop.f32.mrf.mxu0  ;;  %v10245_v17 = vrot.slane %v7268_v58, 9  ;;  %5631 = vst [vmem:[#allocation2 + $0x78] sm:$0xf] %v5630_v46  ;;  %v5410_v50 = vrot.slane %v5408_v29, 7  ;;  %v5894_v45 = vrot.slane %v5893_v11, 4  ;;  %v10663_v4 = vadd.f32 %v13902_v47, %v13883_v2  ;;  %10840 = vmatpush3.bf16.msra.mxu0 %v11251_v42  ;;  %v11253_v56 = vld [vmem:[%s15874_s2 + $0x80] sm:$0xff]  }
 0x2ac   : > { %vm5070_vm3 = vcmp.gt.f32.partialorder %v5004_v0, 0.0  ;;  %v5106_v16 = vmul.f32 %v13971_v32, %v5004_v0  ;;  %v5633_v19 = vld [vmem:[#allocation2 + $0x80] sm:$0x1]  ;;  %v5903_v20 = vor.u32 %v5902_v40, %v5898_v14  ;;  %v5908_v36 = vrot.slane %v5906_v54, 5  ;;  %v7669_v58 = vld [vmem:[#allocation2 + $0x34] sm:$0xf]  ;;  %10841 = vmatprep.subr.bf16.mxu0 %v11252_v43 }
 0x2ad   : > { %v7375_v18 = vsel %vm12111_vm15, %v10245_v17, %v7374_v44  ;;  %v5413_v9 = vor.u32 %v5411_v53, %v5410_v50  ;;  %v5415_v28 = vrot.slane %v5410_v50, 4  ;;  %v5899_v55 = vsel %vm11630_vm10, %v5894_v45, %v5898_v14  ;;  %v7670_v60 = vld [vmem:[#allocation2 + $0x38] sm:$0x1]  ;;  %v5006_v5 = vpop.f32.mrf.mxu0  ;;  %v5686_v52 = vld [vmem:[#allocation2 + $0x30] sm:$0xf] }
 0x2ae   : > { %v13963_v38 = vpop.f32.mrf.mxu1  ;;  %v5138_v31 = vsel %vm5070_vm3, %v5004_v0, %v5106_v16  ;;  %6190 = vrot.lane.b32.xlu0 %v5899_v55, %s11422_s10  ;;  %v5904_v44 = vrot.slane %v5903_v20, 4  ;;  %v4851_v2 = vadd.f32 %v10663_v4, %v13589_v48  ;;  %v4846_v47 = vadd.f32 %v10660_v23, %v13579_v30  ;;  %v5687_v25 = vld [vmem:[#allocation2 + $0x34] sm:$0xf]  ;;  %v7668_v39 = vld [vmem:[#allocation2 + $0x30] sm:$0xf] }
 0x2af   : > { %v10454_v24 = vpack.c.bf16 %v5138_v31, %v5138_v31  ;;  %v5414_v22 = vsel %vm11651_vm12, %v5406_v49, %v5413_v9  ;;  %v5634_v14 = vsel %vm11509_vm4, %v5415_v28, %v5633_v19  ;;  %v7768_v13 = vshll.u32 %v7669_v58, 16  ;;  %5718 = vst.msk [vmem:[#allocation3 + $0xa0] sm:$0xf] %vm197_vm0, %v5686_v52  ;;  %5719 = vst.msk [vmem:[#allocation3 + $0xb4] sm:$0xf] %vm197_vm0, %v5687_v25 }
 0x2b0   : > { %v13990_v34 = vpop.f32.mrf.mxu1  ;;  %v7772_v42 = vshrl.u32 %v7669_v58, 16  ;;  %v5685_v48 = vld [vmem:[#allocation2 + $0x28] sm:$0xf]  ;;  %5632 = vst.msk [vmem:[#allocation2 + $0x7c] sm:$0xf] %vm197_vm0, %v5414_v22  ;;  %v5909_v10 = vsel %vm11630_vm10, %v5904_v44, %v5908_v36  ;;  %v5012_v49 = vadd.f32 %v13961_v15, %v4851_v2  ;;  %10842 = vmatpush3.bf16.msra.mxu0 %v11253_v56  ;;  %v5007_v29 = vadd.f32 %v5006_v5, %v4846_v47 }
 0x2b1   : > { %5635 = vst [vmem:[#allocation2 + $0x80] sm:$0x1] %v5634_v14  ;;  %v5417_v30 = vshrl.u32 %v10454_v24, 16  ;;  %v5420_v23 = vshll.u32 %v10454_v24, 16  ;;  %5717 = vst.msk [vmem:[#allocation3 + $0x8c] sm:$0xf] %vm197_vm0, %v5685_v48  ;;  %6192 = vrot.lane.b32.xlu1 %v5909_v10, %s11422_s10  ;;  %v14072_v24 = vadd.f32 %v13990_v34, %v13963_v38 }
 0x2b2   : > { %v14022_v3 = vpop.f32.mrf.mxu1  ;;  %v14053_v53 = vrot.slane %v7768_v13, 5  ;;  %v7774_v11 = vrot.slane %v7772_v42, 4  ;;  %v7778_v0 = vshll.u32 %v7670_v60, 16  ;;  %7478 = vrot.lane.b32.xlu0 %v7375_v18, %s11422_s10  ;;  %vm5072_vm5 = vcmp.gt.f32.partialorder %v5012_v49, 0.0  ;;  %v5636_v15 = vld [vmem:[#allocation2 + $0x84] sm:$0xf] }
 0x2b3   : > { %v14055_v43 = vrot.slane %v5417_v30, 7  ;;  %v5108_v46 = vmul.f32 %v13971_v32, %v5012_v49  ;;  %v7759_v40 = vshrl.u32 %v7668_v39, 16  ;;  %vm5071_vm6 = vcmp.gt.f32.partialorder %v5007_v29, 0.0  ;;  %v7602_v18 = vld [vmem:[#allocation2 + $0x30] sm:$0xf] }
 0x2b4   : > { %v14039_v6 = vpop.f32.mrf.mxu1  ;;  %v5107_v17 = vmul.f32 %v13971_v32, %v5007_v29  ;;  %v7775_v50 = vor.u32 %v7774_v11, %v14053_v53  ;;  %v7780_v45 = vrot.slane %v7778_v0, 5  ;;  %v7762_v9 = vshll.u32 %v7668_v39, 16  ;;  %v5752_v28 = vld [vmem:[#allocation2 + $0x28] sm:$0xf]  ;;  %7634 = vst.msk [vmem:[#allocation3 + $0x5c] sm:$0xf] %vm197_vm0, %v7602_v18 }
 0x2b5   : > { %v5422_v16 = vor.u32 %v5420_v23, %v14055_v43  ;;  %v5423_v19 = vrot.slane %v14055_v43, 4  ;;  %v5140_v20 = vsel %vm5072_vm5, %v5012_v49, %v5108_v46  ;;  %v7761_v36 = vrot.slane %v7759_v40, 4  ;;  %v5753_v44 = vld [vmem:[#allocation2 + $0x2c] sm:$0x1]  ;;  %v7603_v47 = vld [vmem:[#allocation2 + $0x34] sm:$0xf] }
 0x2b6   : > { %v10456_v4 = vpack.c.bf16 %v5140_v20, %v5140_v20  ;;  %v5139_v58 = vsel %vm5071_vm6, %v5007_v29, %v5107_v17  ;;  %v7776_v56 = vrot.slane %v7775_v50, 4  ;;  %v10666_v60 = vadd.f32 %v13936_v33, %v13917_v59  ;;  %v14078_v14 = vld [vmem:[#allocation2 + $0x24] sm:$0xf]  ;;  %7635 = vst.msk [vmem:[#allocation3 + $0x70] sm:$0xf] %vm197_vm0, %v7603_v47 }
 0x2b7   : > { %v14059_v54 = vpop.f32.mrf.mxu1  ;;  %v5637_v55 = vsel %vm11636_vm11, %v5422_v16, %v5636_v15  ;;  %v10455_v31 = vpack.c.bf16 %v5139_v58, %v5139_v58  ;;  %v7764_v22 = vrot.slane %v7762_v9, 5  ;;  %v5872_v34 = vshll.u32 %v5752_v28, 16  ;;  %v5643_v42 = vld [vmem:[#allocation2 + $0x90] sm:$0xf]  ;;  %v5640_v10 = vld [vmem:[#allocation2 + $0x8c] sm:$0x1]  ;;  %v14093_v17 = vpop.f32.mrf.mxu0 }
 0x2b8   : > { %5638 = vst [vmem:[#allocation2 + $0x84] sm:$0xf] %v5637_v55  ;;  %v5434_v5 = vshrl.u32 %v10456_v4, 16  ;;  %v5437_v52 = vshll.u32 %v10456_v4, 16  ;;  %v7781_v25 = vsel %vm11630_vm10, %v7776_v56, %v7780_v45  ;;  %v4854_v38 = vadd.f32 %v10666_v60, %v13592_v8  ;;  %v6583_v15 = vld [vmem:[#allocation2 + $0x40] sm:$0xf] }
 0x2b9   : > { %v14074_v2 = vpop.f32.mrf.mxu1  ;;  %v5425_v59 = vshrl.u32 %v10455_v31, 16  ;;  %v5428_v33 = vshll.u32 %v10455_v31, 16  ;;  %8104 = vrot.lane.b32.xlu1 %v7781_v25, %s11422_s10  ;;  %v7765_v39 = vor.u32 %v7764_v22, %v7761_v36  ;;  %v5876_v48 = vshrl.u32 %v5752_v28, 16  ;;  %v7666_v45 = vld [vmem:[#allocation2 + $0x28] sm:$0xf]  ;;  %v5019_v25 = vpop.f32.mrf.mxu0 }
 0x2ba   : > { %v14083_v13 = vrot.slane %v5434_v5, 7  ;;  %v5882_v30 = vshll.u32 %v5753_v44, 16  ;;  %v5015_v49 = vadd.f32 %v14020_v26, %v4854_v38  ;;  %v14086_v29 = vrot.slane %v5872_v34, 5  ;;  %v7667_v36 = vld [vmem:[#allocation2 + $0x2c] sm:$0x1] }
 0x2bb   : > { %v5427_v23 = vrot.slane %v5425_v59, 7  ;;  %v5863_v11 = vshrl.u32 %v14078_v14, 16  ;;  %v14089_v0 = vpop.f32.mrf.mxu1  ;;  %v7766_v40 = vrot.slane %v7765_v39, 4  ;;  %v5878_v50 = vrot.slane %v5876_v48, 4  ;;  %v5684_v18 = vld [vmem:[#allocation2 + $0x24] sm:$0xf] }
 0x2bc   : > { %v5439_v46 = vor.u32 %v5437_v52, %v14083_v13  ;;  %v5440_v8 = vrot.slane %v14083_v13, 4  ;;  %vm5073_vm7 = vcmp.gt.f32.partialorder %v5015_v49, 0.0  ;;  %v5109_v26 = vmul.f32 %v13971_v32, %v5015_v49  ;;  %5716 = vst.msk [vmem:[#allocation3 + $0x78] sm:$0xf] %vm197_vm0, %v5684_v18  ;;  %v7601_v28 = vld [vmem:[#allocation2 + $0x28] sm:$0xf] }
 0x2bd   : > { %v5430_v16 = vor.u32 %v5428_v33, %v5427_v23  ;;  %v5432_v20 = vrot.slane %v5427_v23, 4  ;;  %6656 = vrot.lane.b32.xlu1 %v6583_v15, %s11422_s10  ;;  %v7771_v58 = vsel %vm11630_vm10, %v7766_v40, %v14053_v53  ;;  %v5879_v56 = vor.u32 %v5878_v50, %v14086_v29  ;;  %v7600_v55 = vld [vmem:[#allocation2 + $0x24] sm:$0xf]  ;;  %v14112_v47 = vpop.f32.mrf.mxu1  ;;  %7633 = vst.msk [vmem:[#allocation3 + $0x48] sm:$0xf] %vm197_vm0, %v7601_v28 }
 0x2be   : > { %v5644_v4 = vsel %vm11636_vm11, %v5439_v46, %v5643_v42  ;;  %v5884_v9 = vrot.slane %v5882_v30, 5  ;;  %8102 = vrot.lane.b32.xlu0 %v7771_v58, %s11422_s10  ;;  %v5141_v53 = vsel %vm5073_vm7, %v5015_v49, %v5109_v26  ;;  %v5865_v44 = vrot.slane %v5863_v11, 4  ;;  %7632 = vst.msk [vmem:[#allocation3 + $0x34] sm:$0xf] %vm197_vm0, %v7600_v55  ;;  %v7665_v34 = vld [vmem:[#allocation2 + $0x24] sm:$0xf]  ;;  %v14130_v11 = vpop.f32.mrf.mxu0 }
 0x2bf   : > { %5645 = vst [vmem:[#allocation2 + $0x90] sm:$0xf] %v5644_v4  ;;  %v5431_v31 = vsel %vm11651_vm12, %v5423_v19, %v5430_v16  ;;  %v5641_v60 = vsel %vm11509_vm4, %v5432_v20, %v5640_v10  ;;  %v10457_v43 = vpack.c.bf16 %v5141_v53, %v5141_v53  ;;  %v5880_v5 = vrot.slane %v5879_v56, 4  ;;  %v6582_v48 = vld [vmem:[#allocation2 + $0x3c] sm:$0xf] }
 0x2c0   : > { %5639 = vst.msk [vmem:[#allocation2 + $0x88] sm:$0xf] %vm197_vm0, %v5431_v31  ;;  %5642 = vst [vmem:[#allocation2 + $0x8c] sm:$0x1] %v5641_v60  ;;  %v5866_v19 = vshll.u32 %v14078_v14, 16  ;;  %v10672_v52 = vadd.f32 %v14039_v6, %v14022_v3  ;;  %v4859_v22 = vadd.f32 %v14072_v24, %v13596_v63  ;;  %v7744_v59 = vshll.u32 %v7666_v45, 16 }
 0x2c1   : > { %v7748_v33 = vshrl.u32 %v7666_v45, 16  ;;  %v7754_v38 = vshll.u32 %v7667_v36, 16  ;;  %v5442_v42 = vshrl.u32 %v10457_v43, 16  ;;  %v5445_v39 = vshll.u32 %v10457_v43, 16  ;;  %v5690_v15 = vld [vmem:[#allocation2 + $0x48] sm:$0xf]  ;;  %v5022_v43 = vpop.f32.mrf.mxu0 }
 0x2c2   : > { %v5885_v30 = vsel %vm11630_vm10, %v5880_v5, %v5884_v9  ;;  %v5868_v23 = vrot.slane %v5866_v19, 5  ;;  %6654 = vrot.lane.b32.xlu0 %v6582_v48, %s11422_s10  ;;  %v5020_v3 = vadd.f32 %v5019_v25, %v4859_v22  ;;  %v14126_v6 = vrot.slane %v7744_v59, 5  ;;  %v5647_v50 = vld [vmem:[#allocation2 + $0x98] sm:$0x1]  ;;  %5722 = vst.msk [vmem:[#allocation3 + $0xf0] sm:$0xf] %vm197_vm0, %v5690_v15 }
 0x2c3   : > { %6188 = vrot.lane.b32.xlu1 %v5885_v30, %s11422_s10  ;;  %v7750_v14 = vrot.slane %v7748_v33, 4  ;;  %v7756_v63 = vrot.slane %v7754_v38, 5  ;;  %v5444_v10 = vrot.slane %v5442_v42, 7  ;;  %v7735_v46 = vshrl.u32 %v7665_v34, 16  ;;  %v7278_v55 = vld [vmem:[#allocation2 + $0x4c] sm:$0xf] }
 0x2c4   : > { %v5869_v49 = vor.u32 %v5868_v23, %v5865_v44  ;;  %v7738_v40 = vshll.u32 %v7665_v34, 16  ;;  %vm5074_vm8 = vcmp.gt.f32.partialorder %v5020_v3, 0.0  ;;  %v5110_v45 = vmul.f32 %v13971_v32, %v5020_v3  ;;  %v7279_v31 = vld [vmem:[#allocation2 + $0x50] sm:$0x1]  ;;  %v7277_v19 = vld [vmem:[#allocation2 + $0x48] sm:$0xe] }
 0x2c5   : > { %v7751_v16 = vor.u32 %v7750_v14, %v14126_v6  ;;  %v10675_v20 = vadd.f32 %v14074_v2, %v14059_v54  ;;  %v5447_v26 = vor.u32 %v5445_v39, %v5444_v10  ;;  %v5449_v36 = vrot.slane %v5444_v10, 4  ;;  %v5650_v33 = vld [vmem:[#allocation2 + $0x9c] sm:$0xf]  ;;  %v5691_v48 = vld [vmem:[#allocation2 + $0x4c] sm:$0xf] }
 0x2c6   : > { %v14128_v24 = vpop.f32.mrf.mxu1  ;;  %v5870_v18 = vrot.slane %v5869_v49, 4  ;;  %v7737_v4 = vrot.slane %v7735_v46, 4  ;;  %v5142_v58 = vsel %vm5074_vm8, %v5020_v3, %v5110_v45  ;;  %v7740_v9 = vrot.slane %v7738_v40, 5  ;;  %v14163_v23 = vld [vmem:[#allocation2 + $0x40] sm:$0xf] }
 0x2c7   : > { %v7752_v56 = vrot.slane %v7751_v16, 4  ;;  %v4867_v28 = vadd.f32 %v10675_v20, %v13605_v37  ;;  %v5448_v54 = vsel %vm11651_vm12, %v5440_v8, %v5447_v26  ;;  %v5648_v2 = vsel %vm11509_vm4, %v5449_v36, %v5647_v50  ;;  %5723 = vst.msk [vmem:[#allocation3 + $0x104] sm:$0xf] %vm197_vm0, %v5691_v48  ;;  %v5688_v10 = vld [vmem:[#allocation2 + $0x3c] sm:$0xf]  ;;  %v14175_v50 = vpop.f32.mrf.mxu0 }
 0x2c8   : > { %v14138_v60 = vpop.f32.mrf.mxu1  ;;  %v5875_v53 = vsel %vm11630_vm10, %v5870_v18, %v14086_v29  ;;  %v10458_v44 = vpack.c.bf16 %v5142_v58, %v5142_v58  ;;  %5646 = vst.msk [vmem:[#allocation2 + $0x94] sm:$0xf] %vm197_vm0, %v5448_v54  ;;  %5649 = vst [vmem:[#allocation2 + $0x98] sm:$0x1] %v5648_v2  ;;  %v7741_v13 = vor.u32 %v7740_v9, %v7737_v4  ;;  %v7395_v29 = vrot.slane %v7278_v55, 5 }
 0x2c9   : > { %6186 = vrot.lane.b32.xlu0 %v5875_v53, %s11422_s10  ;;  %v7757_v37 = vsel %vm11630_vm10, %v7752_v56, %v7756_v63  ;;  %v5028_v8 = vadd.f32 %v14093_v17, %v4867_v28  ;;  %v4862_v5 = vadd.f32 %v10672_v52, %v13600_v41  ;;  %v7398_v59 = vrot.slane %v7279_v31, 5  ;;  %v7604_v49 = vld [vmem:[#allocation2 + $0x3c] sm:$0xf]  ;;  %v7276_v15 = vld [vmem:[#allocation2 + $0x44] sm:$0x1] }
 0x2ca   : > { %v5451_v25 = vshrl.u32 %v10458_v44, 16  ;;  %v5454_v22 = vshll.u32 %v10458_v44, 16  ;;  %8100 = vrot.lane.b32.xlu1 %v7757_v37, %s11422_s10  ;;  %v7742_v38 = vrot.slane %v7741_v13, 4  ;;  %v14157_v39 = vpop.f32.mrf.mxu1  ;;  %v7397_v17 = vrot.slane %v7395_v29, 4  ;;  %5720 = vst.msk [vmem:[#allocation3 + $0xc8] sm:$0xf] %vm197_vm0, %v5688_v10  ;;  %v5035_v37 = vpop.f32.mrf.mxu0 }
 0x2cb   : > { %vm5076_vm13 = vcmp.gt.f32.partialorder %v5028_v8, 0.0  ;;  %v5112_v34 = vmul.f32 %v13971_v32, %v5028_v8  ;;  %v5023_v42 = vadd.f32 %v5022_v43, %v4862_v5  ;;  %v10248_v41 = vrot.slane %v7277_v19, 9  ;;  %7636 = vst.msk [vmem:[#allocation3 + $0x84] sm:$0xf] %vm197_vm0, %v7604_v49  ;;  %v5760_v26 = vld [vmem:[#allocation2 + $0x48] sm:$0xf] }
 0x2cc   : > { %v14159_v30 = vrot.slane %v5451_v25, 7  ;;  %v10678_v52 = vadd.f32 %v14112_v47, %v14089_v0  ;;  %v7747_v3 = vsel %vm11630_vm10, %v7742_v38, %v14126_v6  ;;  %v7399_v47 = vsel %vm12111_vm15, %v7397_v17, %v7398_v59  ;;  %v10683_v36 = vpop.f32.mrf.mxu1  ;;  %v5657_v9 = vld [vmem:[#allocation2 + $0xa8] sm:$0xf]  ;;  %v5761_v44 = vld [vmem:[#allocation2 + $0x4c] sm:$0xf] }
 0x2cd   : > { %v5144_v14 = vsel %vm5076_vm13, %v5028_v8, %v5112_v34  ;;  %vm5075_vm14 = vcmp.gt.f32.partialorder %v5023_v42, 0.0  ;;  %v5111_v63 = vmul.f32 %v13971_v32, %v5023_v42  ;;  %8098 = vrot.lane.b32.xlu0 %v7747_v3, %s11422_s10  ;;  %v7396_v45 = vsel %vm12111_vm15, %v10248_v41, %v7395_v29  ;;  %v5654_v13 = vld [vmem:[#allocation2 + $0xa4] sm:$0x1]  ;;  %v6588_v5 = vld [vmem:[#allocation2 + $0x60] sm:$0xf] }
 0x2ce   : > { %v5456_v46 = vor.u32 %v5454_v22, %v14159_v30  ;;  %v5457_v40 = vrot.slane %v14159_v30, 4  ;;  %v10460_v0 = vpack.c.bf16 %v5144_v14, %v5144_v14  ;;  %7492 = vrot.lane.b32.xlu1 %v7399_v47, %s11422_s10  ;;  %v4870_v16 = vadd.f32 %v10678_v52, %v13609_v7  ;;  %v10685_v25 = vpop.f32.mrf.mxu1  ;;  %v7605_v17 = vld [vmem:[#allocation2 + $0x40] sm:$0xf]  ;;  %v5762_v10 = vld [vmem:[#allocation2 + $0x50] sm:$0x1] }
 0x2cf   : > { %v5143_v6 = vsel %vm5075_vm14, %v5023_v42, %v5111_v63  ;;  %v7388_v20 = vrot.slane %v14163_v23, 5  ;;  %v7391_v31 = vrot.slane %v7276_v15, 5  ;;  %v10681_v7 = vadd.f32 %v14138_v60, %v14128_v24  ;;  %v7606_v24 = vld [vmem:[#allocation2 + $0x48] sm:$0xf]  ;;  %v14205_v63 = vpop.f32.mrf.mxu0  ;;  %v7274_v49 = vld [vmem:[#allocation2 + $0x3c] sm:$0xe] }
 0x2d0   : > { %v5651_v18 = vsel %vm11636_vm11, %v5456_v46, %v5650_v33  ;;  %v5468_v4 = vshrl.u32 %v10460_v0, 16  ;;  %v5471_v58 = vshll.u32 %v10460_v0, 16  ;;  %v10459_v56 = vpack.c.bf16 %v5143_v6, %v5143_v6  ;;  %7638 = vst.msk [vmem:[#allocation3 + $0xac] sm:$0xf] %vm197_vm0, %v7606_v24  ;;  %v5689_v33 = vld [vmem:[#allocation2 + $0x40] sm:$0xf] }
 0x2d1   : > { %5652 = vst [vmem:[#allocation2 + $0x9c] sm:$0xf] %v5651_v18  ;;  %v5031_v28 = vadd.f32 %v14130_v11, %v4870_v16  ;;  %v7390_v55 = vrot.slane %v7388_v20, 4  ;;  %7490 = vrot.lane.b32.xlu0 %v7396_v45, %s11422_s10  ;;  %v5935_v43 = vshrl.u32 %v5760_v26, 16  ;;  %v5938_v19 = vshll.u32 %v5760_v26, 16  ;;  %v10686_v45 = vpop.f32.mrf.mxu1 }
 0x2d2   : > { %v14191_v54 = vrot.slane %v5468_v4, 7  ;;  %v5459_v2 = vshrl.u32 %v10459_v56, 16  ;;  %v5462_v53 = vshll.u32 %v10459_v56, 16  ;;  %v5944_v42 = vshll.u32 %v5761_v44, 16  ;;  %5721 = vst.msk [vmem:[#allocation3 + $0xdc] sm:$0xf] %vm197_vm0, %v5689_v33 }
 0x2d3   : > { %vm5077_vm1 = vcmp.gt.f32.partialorder %v5031_v28, 0.0  ;;  %v5113_v11 = vmul.f32 %v13971_v32, %v5031_v28  ;;  %v7392_v8 = vsel %vm12111_vm15, %v7390_v55, %v7391_v31  ;;  %v5937_v59 = vrot.slane %v5935_v43, 4  ;;  %7637 = vst.msk [vmem:[#allocation3 + $0x98] sm:$0xf] %vm197_vm0, %v7605_v17  ;;  %v6589_v46 = vld [vmem:[#allocation2 + $0x64] sm:$0xf]  ;;  %v5038_v55 = vpop.f32.mrf.mxu0  ;;  %v14220_v31 = vpop.permute.xlu0 %6642 }
 0x2d4   : > { %v5473_v60 = vor.u32 %v5471_v58, %v14191_v54  ;;  %v5474_v22 = vrot.slane %v14191_v54, 4  ;;  %v5461_v29 = vrot.slane %v5459_v2, 7  ;;  %7488 = vrot.lane.b32.xlu1 %v7392_v8, %s11422_s10  ;;  %v5940_v34 = vrot.slane %v5938_v19, 5  ;;  %v7607_v16 = vld [vmem:[#allocation2 + $0x4c] sm:$0xf] }
 0x2d5   : > { %v5145_v38 = vsel %vm5077_vm1, %v5031_v28, %v5113_v11  ;;  %v5948_v48 = vshrl.u32 %v5761_v44, 16  ;;  %6666 = vrot.lane.b32.xlu0 %v6588_v5, %s11422_s10  ;;  %v5946_v47 = vrot.slane %v5944_v42, 5  ;;  %v10684_v15 = vadd.f32 %v10683_v36, %v14157_v39  ;;  %7639 = vst.msk [vmem:[#allocation3 + $0xc0] sm:$0xf] %vm197_vm0, %v7607_v16  ;;  %v5661_v2 = vld [vmem:[#allocation2 + $0xb0] sm:$0x1]  ;;  %v10688_v5 = vpop.f32.mrf.mxu1 }
 0x2d6   : > { %v5658_v41 = vsel %vm11636_vm11, %v5473_v60, %v5657_v9  ;;  %v5464_v52 = vor.u32 %v5462_v53, %v5461_v29  ;;  %v5466_v3 = vrot.slane %v5461_v29, 4  ;;  %v10461_v14 = vpack.c.bf16 %v5145_v38, %v5145_v38  ;;  %v7676_v33 = vld [vmem:[#allocation2 + $0x50] sm:$0x1]  ;;  %v7674_v42 = vld [vmem:[#allocation2 + $0x48] sm:$0xf] }
 0x2d7   : > { %5659 = vst [vmem:[#allocation2 + $0xa8] sm:$0xf] %v5658_v41  ;;  %v5941_v0 = vor.u32 %v5940_v34, %v5937_v59  ;;  %v4875_v6 = vadd.f32 %v10681_v7, %v13614_v27  ;;  %v5950_v36 = vrot.slane %v5948_v48, 4  ;;  %v5954_v56 = vshll.u32 %v5762_v10, 16  ;;  %v14225_v7 = vld [vmem:[%s15874_s2 + $0x138] sm:$0xff]  }
 0x2d8   : > { %v5465_v26 = vsel %vm11651_vm12, %v5457_v40, %v5464_v52  ;;  %v5655_v18 = vsel %vm11509_vm4, %v5466_v3, %v5654_v13  ;;  %v5476_v4 = vshrl.u32 %v10461_v14, 16  ;;  %v5479_v58 = vshll.u32 %v10461_v14, 16  ;;  %6668 = vrot.lane.b32.xlu1 %v6589_v46, %s11422_s10  ;;  %11011 = vmatprep.subr.bf16.mxu1 %v14225_v7  ;;  %v10689_v3 = vpop.f32.mrf.mxu1 }
 0x2d9   : > { %5653 = vst.msk [vmem:[#allocation2 + $0xa0] sm:$0xf] %vm197_vm0, %v5465_v26  ;;  %5656 = vst [vmem:[#allocation2 + $0xa4] sm:$0x1] %v5655_v18  ;;  %v5942_v27 = vrot.slane %v5941_v0, 4  ;;  %v5036_v39 = vadd.f32 %v5035_v37, %v4875_v6  ;;  %v10247_v9 = vrot.slane %v7274_v49, 9  ;;  %v10687_v28 = vadd.f32 %v10686_v45, %v10685_v25 }
 0x2da   : > { %v5478_v30 = vrot.slane %v5476_v4, 7  ;;  %v4878_v40 = vadd.f32 %v10684_v15, %v13618_v35  ;;  %v5951_v43 = vor.u32 %v5950_v36, %v5946_v47  ;;  %v7675_v37 = vld [vmem:[#allocation2 + $0x4c] sm:$0xf]  ;;  %v5956_v35 = vrot.slane %v5954_v56, 5  ;;  %v5664_v15 = vld [vmem:[#allocation2 + $0xb4] sm:$0xf] }
 0x2db   : > { %v5947_v53 = vsel %vm11630_vm10, %v5942_v27, %v5946_v47  ;;  %vm5078_vm2 = vcmp.gt.f32.partialorder %v5036_v39, 0.0  ;;  %v5114_v44 = vmul.f32 %v13971_v32, %v5036_v39  ;;  %v7389_v8 = vsel %vm12111_vm15, %v10247_v9, %v7388_v20  ;;  %v6639_v20 = vpop.permute.xlu0 %6638  ;;  %v5758_v36 = vld [vmem:[#allocation2 + $0x40] sm:$0xf] }
 0x2dc   : > { %v5481_v13 = vor.u32 %v5479_v58, %v5478_v30  ;;  %v5483_v11 = vrot.slane %v5478_v30, 4  ;;  %6198 = vrot.lane.b32.xlu0 %v5947_v53, %s11422_s10  ;;  %v5952_v25 = vrot.slane %v5951_v43, 4  ;;  %v4883_v24 = vadd.f32 %v10687_v28, %v13629_v61  ;;  %6734 = vst.msk [vmem:[#allocation3 + $0x4] sm:$0xf] %vm308_vm9, %v6639_v20  ;;  %v5668_v43 = vld [vmem:[#allocation2 + $0xbc] sm:$0x1] }
 0x2dd   : > { %v5146_v19 = vsel %vm5078_vm2, %v5036_v39, %v5114_v44  ;;  %v5039_v60 = vadd.f32 %v5038_v55, %v4878_v40  ;;  %v7816_v38 = vshll.u32 %v7675_v37, 16  ;;  %v7820_v52 = vshrl.u32 %v7675_v37, 16  ;;  %v5671_v44 = vld [vmem:[#allocation2 + $0xc0] sm:$0xf] }
 0x2de   : > { %v5482_v29 = vsel %vm11651_vm12, %v5474_v22, %v5481_v13  ;;  %v5662_v59 = vsel %vm11509_vm4, %v5483_v11, %v5661_v2  ;;  %v10462_v23 = vpack.c.bf16 %v5146_v19, %v5146_v19  ;;  %v5957_v34 = vsel %vm11630_vm10, %v5952_v25, %v5956_v35  ;;  %v14248_v22 = vpop.permute.xlu1 %6644 }
 0x2df   : > { %5660 = vst.msk [vmem:[#allocation2 + $0xac] sm:$0xf] %vm197_vm0, %v5482_v29  ;;  %5663 = vst [vmem:[#allocation2 + $0xb0] sm:$0x1] %v5662_v59  ;;  %v5044_v61 = vadd.f32 %v14175_v50, %v4883_v24  ;;  %vm5079_vm3 = vcmp.gt.f32.partialorder %v5039_v60, 0.0  ;;  %v5115_v54 = vmul.f32 %v13971_v32, %v5039_v60  ;;  %6200 = vrot.lane.b32.xlu1 %v5957_v34, %s11422_s10  ;;  %v14253_v41 = vrot.slane %v7816_v38, 5 }
 0x2e0   : > { %v5485_v48 = vshrl.u32 %v10462_v23, 16  ;;  %v5488_v17 = vshll.u32 %v10462_v23, 16  ;;  %7486 = vrot.lane.b32.xlu0 %v7389_v8, %s11422_s10  ;;  %v7826_v10 = vshll.u32 %v7676_v33, 16  ;;  %v7822_v0 = vrot.slane %v7820_v52, 4  ;;  %v5757_v24 = vld [vmem:[#allocation2 + $0x3c] sm:$0xf] }
 0x2e1   : > { %vm5080_vm5 = vcmp.gt.f32.partialorder %v5044_v61, 0.0  ;;  %v5116_v50 = vmul.f32 %v13971_v32, %v5044_v61  ;;  %v5147_v14 = vsel %vm5079_vm3, %v5039_v60, %v5115_v54  ;;  %v7807_v47 = vshrl.u32 %v7674_v42, 16  ;;  %v5759_v23 = vld [vmem:[#allocation2 + $0x44] sm:$0x1]  ;;  %v7672_v38 = vld [vmem:[#allocation2 + $0x40] sm:$0xf] }
 0x2e2   : > { %v5487_v49 = vrot.slane %v5485_v48, 7  ;;  %v10463_v46 = vpack.c.bf16 %v5147_v14, %v5147_v14  ;;  %v7828_v45 = vrot.slane %v7826_v10, 5  ;;  %v7810_v16 = vshll.u32 %v7674_v42, 16  ;;  %v6641_v18 = vpop.permute.xlu1 %6640  ;;  %v5694_v42 = vld [vmem:[#allocation2 + $0x60] sm:$0xf] }
 0x2e3   : > { %v5148_v6 = vsel %vm5080_vm5, %v5044_v61, %v5116_v50  ;;  %v10690_v26 = vadd.f32 %v10689_v3, %v10688_v5  ;;  %6735 = vst.msk [vmem:[#allocation3 + $0x18] sm:$0xf] %vm308_vm9, %v6641_v18  ;;  %v7823_v30 = vor.u32 %v7822_v0, %v14253_v41  ;;  %v7809_v9 = vrot.slane %v7807_v47, 4  ;;  %v14274_v61 = vld [vmem:[#allocation2 + $0x44] sm:$0x1] }
 0x2e4   : > { %v5490_v4 = vor.u32 %v5488_v17, %v5487_v49  ;;  %v5491_v58 = vrot.slane %v5487_v49, 4  ;;  %v10464_v27 = vpack.c.bf16 %v5148_v6, %v5148_v6  ;;  %v5493_v39 = vshrl.u32 %v10463_v46, 16  ;;  %v7671_v3 = vld [vmem:[#allocation2 + $0x3c] sm:$0xf]  ;;  %v11241_v50 = vld [vmem:[#allocation3] ss:$20 sps:$4 sm:$0xff]  }
 0x2e5   : > { %v5496_v56 = vshll.u32 %v10463_v46, 16  ;;  %v7812_v28 = vrot.slane %v7810_v16, 5  ;;  %v7824_v37 = vrot.slane %v7823_v30, 4  ;;  %v4886_v11 = vadd.f32 %v10690_v26, %v13653_v21  ;;  %5726 = vst.msk [vmem:[#allocation3 + $0x140] sm:$0xf] %vm197_vm0, %v5694_v42 }
 0x2e6   : > { %v5665_v40 = vsel %vm11636_vm11, %v5490_v4, %v5664_v15  ;;  %v5502_v55 = vshrl.u32 %v10464_v27, 16  ;;  %v5505_v2 = vshll.u32 %v10464_v27, 16  ;;  %v5495_v53 = vrot.slane %v5493_v39, 7  ;;  %v14276_v54 = vpop.permute.xlu1 %7476  ;;  %v6587_v47 = vld [vmem:[#allocation2 + $0x58] sm:$0xf] }
 0x2e7   : > { %5666 = vst [vmem:[#allocation2 + $0xb4] sm:$0xf] %v5665_v40  ;;  %v7813_v13 = vor.u32 %v7812_v28, %v7809_v9  ;;  %v5920_v35 = vshll.u32 %v5758_v36, 16  ;;  %v5924_v25 = vshrl.u32 %v5758_v36, 16  ;;  %v7829_v60 = vsel %vm11630_vm10, %v7824_v37, %v7828_v45  ;;  %v11270_v45 = vld [vmem:[%s15874_s2 + $0x130] sm:$0xff]  }
 0x2e8   : > { %v14261_v8 = vrot.slane %v5502_v55, 7  ;;  %v5498_v5 = vor.u32 %v5496_v56, %v5495_v53  ;;  %v5500_v19 = vrot.slane %v5495_v53, 4  ;;  %v5047_v59 = vadd.f32 %v14205_v63, %v4886_v11  ;;  %8112 = vrot.lane.b32.xlu1 %v7829_v60, %s11422_s10  ;;  %v5695_v63 = vld [vmem:[#allocation2 + $0x64] sm:$0xf]  ;;  %v14298_v30 = vld [vmem:[#allocation2 + $0x58] sm:$0xf] }
 0x2e9   : > { %v7814_v29 = vrot.slane %v7813_v13, 4  ;;  %v14266_v33 = vrot.slane %v5920_v35, 5  ;;  %v5926_v52 = vrot.slane %v5924_v25, 4  ;;  %5727 = vst.msk [vmem:[#allocation3 + $0x154] sm:$0xf] %vm197_vm0, %v5695_v63  ;;  %v5930_v10 = vshll.u32 %v5759_v23, 16 }
 0x2ea   : > { %v5507_v20 = vor.u32 %v5505_v2, %v14261_v8  ;;  %v5499_v21 = vsel %vm11651_vm12, %v5491_v58, %v5498_v5  ;;  %v5669_v34 = vsel %vm11509_vm4, %v5500_v19, %v5668_v43  ;;  %vm5081_vm6 = vcmp.gt.f32.partialorder %v5047_v59, 0.0  ;;  %v11243_v0 = vld [vmem:[#allocation3 + $0x4] ss:$20 sps:$4 sm:$0xff]   ;;  %v14293_v58 = vpop.permute.xlu0 %7474  ;;  %v5766_v2 = vld [vmem:[#allocation2 + $0x60] sm:$0xf] }
 0x2eb   : > { %5667 = vst.msk [vmem:[#allocation2 + $0xb8] sm:$0xf] %vm197_vm0, %v5499_v21  ;;  %5670 = vst [vmem:[#allocation2 + $0xbc] sm:$0x1] %v5669_v34  ;;  %v7819_v48 = vsel %vm11630_vm10, %v7814_v29, %v14253_v41  ;;  %v5117_v17 = vmul.f32 %v13971_v32, %v5047_v59  ;;  %v5911_v49 = vshrl.u32 %v5757_v24, 16  ;;  %v5914_v46 = vshll.u32 %v5757_v24, 16  ;;  %9362 = vmatprep.mubr.bf16.mxu1 %v11243_v0  ;;  %v14302_v53 = vpop.permute.xlu1 %7472 }
 0x2ec   : > { %v5672_v14 = vsel %vm11636_vm11, %v5507_v20, %v5671_v44  ;;  %8110 = vrot.lane.b32.xlu0 %v7819_v48, %s11422_s10  ;;  %v5927_v32 = vor.u32 %v5926_v52, %v14266_v33  ;;  %v7792_v15 = vshll.u32 %v7672_v38, 16  ;;  %v7796_v6 = vshrl.u32 %v7672_v38, 16  ;;  %6664 = vrot.lane.b32.xlu1 %v6587_v47, %s11422_s10  ;;  %v5675_v43 = vld [vmem:[#allocation2 + $0xc8] sm:$0x1]  ;;  %v7282_v19 = vld [vmem:[#allocation2 + $0x5c] sm:$0x1] }
 0x2ed   : > { %5673 = vst [vmem:[#allocation2 + $0xc0] sm:$0xf] %v5672_v14  ;;  %v5149_v41 = vsel %vm5081_vm6, %v5047_v59, %v5117_v17  ;;  %v5932_v26 = vrot.slane %v5930_v10, 5  ;;  %v5913_v18 = vrot.slane %v5911_v49, 4  ;;  %v5916_v4 = vrot.slane %v5914_v46, 5  ;;  %9363 = vmatmul.mubr.bf16.vlgmr.msra.gmra.mxu1 %v11241_v50 }
 0x2ee   : > { %v10465_v16 = vpack.c.bf16 %v5149_v41, %v5149_v41  ;;  %v5928_v27 = vrot.slane %v5927_v32, 4  ;;  %v14295_v39 = vrot.slane %v7792_v15, 5  ;;  %v7798_v36 = vrot.slane %v7796_v6, 4  ;;  %11012 = vmatpush3.bf16.msra.mxu1 %v14225_v7  ;;  %v14310_v24 = vpop.permute.xlu0 %6650  ;;  %v5767_v59 = vld [vmem:[#allocation2 + $0x64] sm:$0xf] }
 0x2ef   : > { %v7802_v56 = vshll.u32 %v14274_v61, 16  ;;  %v5508_v9 = vrot.slane %v14261_v8, 4  ;;  %v5917_v40 = vor.u32 %v5916_v4, %v5913_v18  ;;  %v7783_v55 = vshrl.u32 %v7671_v3, 16  ;;  %11013 = vmatprep.subr.bf16.mxu1 %v11270_v45  ;;  %v5768_v61 = vld [vmem:[#allocation2 + $0x68] sm:$0x1]  ;;  %v14325_v46 = vpop.permute.xlu1 %6652 }
 0x2f0   : > { %v5510_v28 = vshrl.u32 %v10465_v16, 16  ;;  %6662 = vrot.lane.b32.xlu0 %v6586_v57, %s11422_s10  ;;  %v5513_v44 = vshll.u32 %v10465_v16, 16  ;;  %v5933_v37 = vsel %vm11630_vm10, %v5928_v27, %v5932_v26  ;;  %v7799_v13 = vor.u32 %v7798_v36, %v14295_v39  ;;  %v6305_v52 = vld [vmem:[#allocation2 + $0xc] sm:$0xe]  ;;  %v7280_v49 = vld [vmem:[#allocation2 + $0x54] sm:$0xe] }
 0x2f1   : > { %v7786_v11 = vshll.u32 %v7671_v3, 16  ;;  %6196 = vrot.lane.b32.xlu1 %v5933_v37, %s11422_s10  ;;  %v5918_v8 = vrot.slane %v5917_v40, 4  ;;  %v7785_v5 = vrot.slane %v7783_v55, 4  ;;  %v7402_v25 = vrot.slane %v14298_v30, 5  ;;  %v6306_v3 = vld [vmem:[#allocation2 + $0x10] sm:$0xf] }
 0x2f2   : > { %v5512_v35 = vrot.slane %v5510_v28, 7  ;;  %v7800_v7 = vrot.slane %v7799_v13, 4  ;;  %v7804_v60 = vrot.slane %v7802_v56, 5  ;;  %v5983_v23 = vshrl.u32 %v5766_v2, 16  ;;  %11014 = vmatpush3.bf16.msra.mxu1 %v11270_v45  ;;  %v7681_v15 = vld [vmem:[#allocation2 + $0x64] sm:$0xf] }
 0x2f3   : > { %v7788_v29 = vrot.slane %v7786_v11, 5  ;;  %v5923_v21 = vsel %vm11630_vm10, %v5918_v8, %v14266_v33  ;;  %v7404_v34 = vrot.slane %v7402_v25, 4  ;;  %v5986_v17 = vshll.u32 %v5766_v2, 16  ;;  %v7680_v45 = vld [vmem:[#allocation2 + $0x60] sm:$0xf]  ;;  %v11280_v11 = vld [vmem:[%s15874_s2 + $0x128] sm:$0xff]  }
 0x2f4   : > { %v5515_v38 = vor.u32 %v5513_v44, %v5512_v35  ;;  %v5517_v20 = vrot.slane %v5512_v35, 4  ;;  %6194 = vrot.lane.b32.xlu0 %v5923_v21, %s11422_s10  ;;  %v7805_v42 = vsel %vm11630_vm10, %v7800_v7, %v7804_v60  ;;  %v5985_v48 = vrot.slane %v5983_v23, 4  ;;  %v6307_v27 = vld [vmem:[#allocation2 + $0x14] sm:$0x1]  ;;  %v6769_v36 = vld [vmem:[#allocation2 + $0x18] sm:$0xf]  ;;  %11015 = vmatprep.subr.bf16.mxu1 %v11280_v11 }
 0x2f5   : > { %v7789_v63 = vor.u32 %v7788_v29, %v7785_v5  ;;  %8108 = vrot.lane.b32.xlu1 %v7805_v42, %s11422_s10  ;;  %v7405_v14 = vrot.slane %v7282_v19, 5  ;;  %v5992_v10 = vshll.u32 %v5767_v59, 16  ;;  %v5988_v41 = vrot.slane %v5986_v17, 5  ;;  %v6183_v16 = vpop.permute.xlu0 %6182  ;;  %v7682_v28 = vld [vmem:[#allocation2 + $0x68] sm:$0x1] }
 0x2f6   : > { %v5516_v50 = vsel %vm11651_vm12, %v5508_v9, %v5515_v38  ;;  %v5676_v33 = vsel %vm11509_vm4, %v5517_v20, %v5675_v43  ;;  %v5996_v47 = vshrl.u32 %v5767_v59, 16  ;;  %v6002_v32 = vshll.u32 %v5768_v61, 16  ;;  %6274 = vst.msk [vmem:[#allocation3 + $0x50] sm:$0xf] %vm308_vm9, %v6183_v16  ;;  %v14340_v55 = vld [vmem:[#allocation2 + $0x1c] sm:$0xf]  ;;  %11016 = vmatpush3.bf16.msra.mxu1 %v11280_v11 }
 0x2f7   : > { %5677 = vst [vmem:[#allocation2 + $0xc8] sm:$0x1] %v5676_v33  ;;  %5674 = vst.msk [vmem:[#allocation2 + $0xc4] sm:$0xf] %vm197_vm0, %v5516_v50  ;;  %v7790_v0 = vrot.slane %v7789_v63, 4  ;;  %v14328_v12 = vrot.slane %v5992_v10, 5  ;;  %v7406_v26 = vsel %vm12111_vm15, %v7404_v34, %v7405_v14  ;;  %v5989_v18 = vor.u32 %v5988_v41, %v5985_v48 }
 0x2f8   : > { %v10228_v6 = vrot.slane %v6305_v52, 9  ;;  %v6407_v1 = vrot.slane %v6306_v3, 5  ;;  %v5998_v4 = vrot.slane %v5996_v47, 4  ;;  %v10249_v56 = vrot.slane %v7280_v49, 9  ;;  %v6592_v2 = vld [vmem:[#allocation2 + $0x78] sm:$0xf] }
 0x2f9   : > { %v7795_v57 = vsel %vm11630_vm10, %v7790_v0, %v14295_v39  ;;  %7496 = vrot.lane.b32.xlu1 %v7406_v26, %s11422_s10  ;;  %v7864_v40 = vshll.u32 %v7681_v15, 16  ;;  %v7868_v39 = vshrl.u32 %v7681_v15, 16  ;;  %v5990_v44 = vrot.slane %v5989_v18, 4  ;;  %v7611_v35 = vld [vmem:[#allocation2 + $0x64] sm:$0xf]  ;;  %v6185_v60 = vpop.permute.xlu1 %6184 }
 0x2fa   : > { %8106 = vrot.lane.b32.xlu0 %v7795_v57, %s11422_s10  ;;  %v6408_v9 = vsel %vm12111_vm15, %v10228_v6, %v6407_v1  ;;  %v5999_v43 = vor.u32 %v5998_v4, %v14328_v12  ;;  %v6004_v37 = vrot.slane %v6002_v32, 5  ;;  %v7855_v13 = vshrl.u32 %v7680_v45, 16  ;;  %7643 = vst.msk [vmem:[#allocation3 + $0x110] sm:$0xf] %vm197_vm0, %v7611_v35  ;;  %v7610_v29 = vld [vmem:[#allocation2 + $0x60] sm:$0xf] }
 0x2fb   : > { %6544 = vst.msk [vmem:[#allocation3 + $0x2c] sm:$0xf] %vm197_vm0, %v6408_v9  ;;  %v14349_v8 = vrot.slane %v7864_v40, 5  ;;  %v7870_v5 = vrot.slane %v7868_v39, 4  ;;  %v7858_v19 = vshll.u32 %v7680_v45, 16  ;;  %v6409_v7 = vrot.slane %v6407_v1, 4 }
 0x2fc   : > { %6736 = vst.msk [vmem:[#allocation3 + $0x2c] sm:$0xf] %vm308_vm9, %v14220_v31  ;;  %v6593_v59 = vld [vmem:[#allocation2 + $0x7c] sm:$0xf]  ;;  %v6000_v23 = vrot.slane %v5999_v43, 4  ;;  %v7403_v38 = vsel %vm12111_vm15, %v10249_v56, %v7402_v25  ;;  %v7874_v20 = vshll.u32 %v7682_v28, 16  ;;  %v5995_v25 = vsel %vm11630_vm10, %v5990_v44, %v14328_v12  ;;  %v14379_v28 = vpop.permute.xlu0 %7470 }
 0x2fd   : > { %v7857_v21 = vrot.slane %v7855_v13, 4  ;;  %6275 = vst.msk [vmem:[#allocation3 + $0x64] sm:$0xf] %vm308_vm9, %v6185_v60  ;;  %6676 = vrot.lane.b32.xlu1 %v6593_v59, %s11422_s10  ;;  %v7871_v31 = vor.u32 %v7870_v5, %v14349_v8  ;;  %v7860_v34 = vrot.slane %v7858_v19, 5  ;;  %v6410_v61 = vrot.slane %v6307_v27, 5 }
 0x2fe   : > { %7642 = vst.msk [vmem:[#allocation3 + $0xfc] sm:$0xf] %vm197_vm0, %v7610_v29  ;;  %6674 = vrot.lane.b32.xlu0 %v6592_v2, %s11422_s10  ;;  %v6839_v42 = vshrl.u32 %v6769_v36, 16  ;;  %v5764_v30 = vld [vmem:[#allocation2 + $0x58] sm:$0xf]  ;;  %v6842_v63 = vshll.u32 %v6769_v36, 16  ;;  %v6005_v10 = vsel %vm11630_vm10, %v6000_v23, %v6004_v37 }
 0x2ff   : > { %v6848_v48 = vshll.u32 %v14340_v55, 16  ;;  %v6852_v17 = vshrl.u32 %v14340_v55, 16  ;;  %v5763_v52 = vld [vmem:[#allocation2 + $0x54] sm:$0xf]  ;;  %v7872_v3 = vrot.slane %v7871_v31, 4  ;;  %v7861_v50 = vor.u32 %v7860_v34, %v7857_v21 }
 0x300   : > { %v6411_v33 = vsel %vm12111_vm15, %v6409_v7, %v6410_v61  ;;  %v6841_v14 = vrot.slane %v6839_v42, 4  ;;  %v6844_v49 = vrot.slane %v6842_v63, 5  ;;  %v5765_v0 = vld [vmem:[#allocation2 + $0x5c] sm:$0x1]  ;;  %v5968_v41 = vshll.u32 %v5764_v30, 16 }
 0x301   : > { %6545 = vst.msk [vmem:[#allocation3 + $0x40] sm:$0xf] %vm197_vm0, %v6411_v33  ;;  %v5972_v47 = vshrl.u32 %v5764_v30, 16  ;;  %6208 = vrot.lane.b32.xlu1 %v6005_v10, %s11422_s10  ;;  %v7876_v32 = vrot.slane %v7874_v20, 5  ;;  %v7862_v15 = vrot.slane %v7861_v50, 4  ;;  %v6850_v12 = vrot.slane %v6848_v48, 5 }
 0x302   : > { %6206 = vrot.lane.b32.xlu0 %v5995_v25, %s11422_s10  ;;  %6737 = vst.msk [vmem:[#allocation3 + $0x40] sm:$0xf] %vm308_vm9, %v14248_v22  ;;  %v5959_v6 = vshrl.u32 %v5763_v52, 16  ;;  %v6771_v1 = vld [vmem:[#allocation2 + $0x20] sm:$0x1]  ;;  %v6845_v45 = vor.u32 %v6844_v49, %v6841_v14  ;;  %v14375_v16 = vrot.slane %v5968_v41, 5 }
 0x303   : > { %v5974_v57 = vrot.slane %v5972_v47, 4  ;;  %v5962_v26 = vshll.u32 %v5763_v52, 16  ;;  %v7678_v18 = vld [vmem:[#allocation2 + $0x58] sm:$0xf]  ;;  %v7877_v4 = vsel %vm11630_vm10, %v7872_v3, %v7876_v32  ;;  %v5978_v27 = vshll.u32 %v5765_v0, 16  ;;  %v11281_v47 = vld [vmem:[%s15874_s2 + $0x120] sm:$0xff]  }
 0x304   : > { %v5961_v36 = vrot.slane %v5959_v6, 4  ;;  %v6854_v56 = vrot.slane %v6852_v17, 4  ;;  %v7679_v9 = vld [vmem:[#allocation2 + $0x5c] sm:$0x1]  ;;  %v6846_v40 = vrot.slane %v6845_v45, 4  ;;  %v6858_v55 = vshll.u32 %v6771_v1, 16  ;;  %11017 = vmatprep.subr.bf16.mxu1 %v11281_v47 }
 0x305   : > { %v5975_v22 = vor.u32 %v5974_v57, %v14375_v16  ;;  %v5964_v39 = vrot.slane %v5962_v26, 5  ;;  %v7677_v2 = vld [vmem:[#allocation2 + $0x54] sm:$0xf]  ;;  %8120 = vrot.lane.b32.xlu1 %v7877_v4, %s11422_s10  ;;  %v7867_v44 = vsel %vm11630_vm10, %v7862_v15, %v14349_v8  ;;  %v7840_v37 = vshll.u32 %v7678_v18, 16  ;;  %v6767_v11 = vld [vmem:[#allocation2 + $0x10] sm:$0xf]  ;;  %11018 = vmatpush3.bf16.msra.mxu1 %v11281_v47 }
 0x306   : > { %7494 = vrot.lane.b32.xlu0 %v7403_v38, %s11422_s10  ;;  %v6855_v43 = vor.u32 %v6854_v56, %v6850_v12  ;;  %v7844_v13 = vshrl.u32 %v7678_v18, 16  ;;  %v5693_v35 = vld [vmem:[#allocation2 + $0x58] sm:$0xf]  ;;  %v6851_v5 = vsel %vm11630_vm10, %v6846_v40, %v6850_v12  ;;  %v7850_v60 = vshll.u32 %v7679_v9, 16  ;;  %v6768_v29 = vld [vmem:[#allocation2 + $0x14] sm:$0x1] }
 0x307   : > { %v5976_v19 = vrot.slane %v5975_v22, 4  ;;  %v5965_v7 = vor.u32 %v5964_v39, %v5961_v36  ;;  %5725 = vst.msk [vmem:[#allocation3 + $0x12c] sm:$0xf] %vm197_vm0, %v5693_v35  ;;  %v5692_v59 = vld [vmem:[#allocation2 + $0x54] sm:$0xf]  ;;  %v6860_v8 = vrot.slane %v6858_v55, 5  ;;  %v8097_v61 = vpop.permute.xlu1 %8096 }
 0x308   : > { %v6591_v23 = vld [vmem:[#allocation2 + $0x70] sm:$0xf]  ;;  %7232 = vst.msk [vmem:[#allocation3 + $0x30] sm:$0xf] %vm197_vm0, %v6851_v5  ;;  %v6856_v38 = vrot.slane %v6855_v43, 4  ;;  %v14391_v20 = vrot.slane %v7840_v37, 5 }
 0x309   : > { %v7846_v21 = vrot.slane %v7844_v13, 4  ;;  %v6311_v31 = vld [vmem:[#allocation2 + $0x24] sm:$0xe]  ;;  %v6312_v34 = vld [vmem:[#allocation2 + $0x28] sm:$0xf]  ;;  %v5980_v42 = vrot.slane %v5978_v27, 5  ;;  %6672 = vrot.lane.b32.xlu1 %v6591_v23, %s11422_s10 }
 0x30a   : > { %5724 = vst.msk [vmem:[#allocation3 + $0x118] sm:$0xf] %vm197_vm0, %v5692_v59  ;;  %v14396_v30 = vrot.slane %v5965_v7, 4  ;;  %v7831_v25 = vshrl.u32 %v7677_v2, 16  ;;  %v7834_v63 = vshll.u32 %v7677_v2, 16  ;;  %8118 = vrot.lane.b32.xlu0 %v7867_v44, %s11422_s10  ;;  %v6861_v17 = vsel %vm11630_vm10, %v6856_v38, %v6860_v8 }
 0x30b   : > { %7568 = vst.msk [vmem:[#allocation3 + $0x30] sm:$0xf] %vm308_vm9, %v14293_v58  ;;  %v5773_v48 = vld [vmem:[#allocation2 + $0x7c] sm:$0xf]  ;;  %8191 = vst.msk [vmem:[#allocation3 + $0x20] sm:$0xf] %vm308_vm9, %v8097_v61  ;;  %v7847_v52 = vor.u32 %v7846_v21, %v14391_v20  ;;  %v8095_v58 = vpop.permute.xlu0 %8094  ;;  %v5981_v15 = vsel %vm11630_vm10, %v5976_v19, %v5980_v42  ;;  %v14421_v57 = vpop.permute.xlu1 %6648 }
 0x30c   : > { %v6824_v3 = vshll.u32 %v6767_v11, 16  ;;  %v6828_v50 = vshrl.u32 %v6767_v11, 16  ;;  %v7609_v33 = vld [vmem:[#allocation2 + $0x58] sm:$0xf]  ;;  %v7608_v14 = vld [vmem:[#allocation2 + $0x54] sm:$0xf]  ;;  %v5971_v12 = vsel %vm11630_vm10, %v14396_v30, %v14375_v16 }
 0x30d   : > { %7233 = vst.msk [vmem:[#allocation3 + $0x44] sm:$0xf] %vm197_vm0, %v6861_v17  ;;  %v7852_v10 = vrot.slane %v7850_v60, 5  ;;  %v7833_v49 = vrot.slane %v7831_v25, 4  ;;  %v7836_v0 = vrot.slane %v7834_v63, 5  ;;  %v6834_v41 = vshll.u32 %v6768_v29, 16  ;;  %6204 = vrot.lane.b32.xlu1 %v5981_v15, %s11422_s10 }
 0x30e   : > { %8190 = vst.msk [vmem:[#allocation3 + $0xc] sm:$0xf] %vm308_vm9, %v8095_v58  ;;  %v6590_v32 = vld [vmem:[#allocation2 + $0x6c] sm:$0xf]  ;;  %7569 = vst.msk [vmem:[#allocation3 + $0x44] sm:$0xf] %vm308_vm9, %v14276_v54 }
 0x30f   : > { %7641 = vst.msk [vmem:[#allocation3 + $0xe8] sm:$0xf] %vm197_vm0, %v7609_v33  ;;  %7640 = vst.msk [vmem:[#allocation3 + $0xd4] sm:$0xf] %vm197_vm0, %v7608_v14  ;;  %v14419_v6 = vrot.slane %v6824_v3, 5  ;;  %v6830_v1 = vrot.slane %v6828_v50, 4  ;;  %v7837_v18 = vor.u32 %v7836_v0, %v7833_v49  ;;  %6670 = vrot.lane.b32.xlu0 %v6590_v32, %s11422_s10  ;;  %v14426_v22 = vpop.permute.xlu0 %6646  ;;  %v6181_v19 = vpop.permute.xlu1 %6180 }
 0x310   : > { %v6313_v45 = vld [vmem:[#allocation2 + $0x2c] sm:$0x1]  ;;  %v7848_v26 = vrot.slane %v7847_v52, 4  ;;  %v10230_v4 = vrot.slane %v6311_v31, 9  ;;  %v6421_v27 = vrot.slane %v6312_v34, 5  ;;  %v6836_v56 = vrot.slane %v6834_v41, 5 }
 0x311   : > { %v5772_v36 = vld [vmem:[#allocation2 + $0x78] sm:$0xf]  ;;  %v6831_v16 = vor.u32 %v6830_v1, %v14419_v6  ;;  %v5774_v54 = vld [vmem:[#allocation2 + $0x80] sm:$0x1]  ;;  %v6040_v9 = vshll.u32 %v5773_v48, 16  ;;  %v6044_v40 = vshrl.u32 %v5773_v48, 16 }
 0x312   : > { %v7838_v39 = vrot.slane %v7837_v18, 4  ;;  %v6422_v55 = vsel %vm12111_vm15, %v10230_v4, %v6421_v27  ;;  %v6423_v2 = vrot.slane %v6421_v27, 4  ;;  %v6424_v44 = vrot.slane %v6313_v45, 5  ;;  %v6766_v43 = vld [vmem:[#allocation2 + $0xc] sm:$0xf] }
 0x313   : > { %v6832_v37 = vrot.slane %v6831_v16, 4  ;;  %6548 = vst.msk [vmem:[#allocation3 + $0x7c] sm:$0xf] %vm197_vm0, %v6422_v55  ;;  %v14431_v13 = vrot.slane %v6040_v9, 5  ;;  %v6046_v11 = vrot.slane %v6044_v40, 4  ;;  %v6031_v35 = vshrl.u32 %v5772_v36, 16  ;;  %6202 = vrot.lane.b32.xlu0 %v5971_v12, %s11422_s10  ;;  %v6179_v14 = vpop.permute.xlu0 %6178 }
 0x314   : > { %v5770_v5 = vld [vmem:[#allocation2 + $0x70] sm:$0xf]  ;;  %v7853_v7 = vsel %vm11630_vm10, %v7848_v26, %v7852_v10  ;;  %6740 = vst.msk [vmem:[#allocation3 + $0x7c] sm:$0xf] %vm308_vm9, %v14310_v24  ;;  %v6425_v60 = vsel %vm12111_vm15, %v6423_v2, %v6424_v44  ;;  %v6050_v29 = vshll.u32 %v5774_v54, 16  ;;  %v6034_v59 = vshll.u32 %v5772_v36, 16  ;;  %v14456_v10 = vpop.permute.xlu1 %7484 }
 0x315   : > { %v5769_v23 = vld [vmem:[#allocation2 + $0x6c] sm:$0xf]  ;;  %6273 = vst.msk [vmem:[#allocation3 + $0x3c] sm:$0xf] %vm308_vm9, %v6181_v19  ;;  %8116 = vrot.lane.b32.xlu1 %v7853_v7, %s11422_s10  ;;  %v6837_v38 = vsel %vm11630_vm10, %v6832_v37, %v6836_v56  ;;  %v6047_v8 = vor.u32 %v6046_v11, %v14431_v13  ;;  %v6033_v24 = vrot.slane %v6031_v35, 4  ;;  %v6815_v21 = vshrl.u32 %v6766_v43, 16 }
 0x316   : > { %6549 = vst.msk [vmem:[#allocation3 + $0x90] sm:$0xf] %vm197_vm0, %v6425_v60  ;;  %v6309_v31 = vld [vmem:[#allocation2 + $0x1c] sm:$0xf]  ;;  %v5698_v61 = vld [vmem:[#allocation2 + $0x78] sm:$0xf]  ;;  %v7843_v3 = vsel %vm11630_vm10, %v7838_v39, %v14391_v20 }
 0x317   : > { %v5699_v34 = vld [vmem:[#allocation2 + $0x7c] sm:$0xf]  ;;  %7231 = vst.msk [vmem:[#allocation3 + $0x1c] sm:$0xf] %vm197_vm0, %v6837_v38  ;;  %v6036_v42 = vrot.slane %v6034_v59, 5  ;;  %v6818_v30 = vshll.u32 %v6766_v43, 16  ;;  %8114 = vrot.lane.b32.xlu0 %v7843_v3, %s11422_s10  ;;  %v14464_v39 = vpop.permute.xlu0 %7482 }
 0x318   : > { %6741 = vst.msk [vmem:[#allocation3 + $0x90] sm:$0xf] %vm308_vm9, %v14325_v46  ;;  %v5771_v25 = vld [vmem:[#allocation2 + $0x74] sm:$0x1]  ;;  %v6016_v63 = vshll.u32 %v5770_v5, 16  ;;  %v6020_v48 = vshrl.u32 %v5770_v5, 16  ;;  %v14466_v55 = vpop.permute.xlu1 %7480 }
 0x319   : > { %v6310_v17 = vld [vmem:[#allocation2 + $0x20] sm:$0x1]  ;;  %v6308_v52 = vld [vmem:[#allocation2 + $0x18] sm:$0xe]  ;;  %5731 = vst.msk [vmem:[#allocation3 + $0x1a4] sm:$0xf] %vm197_vm0, %v5699_v34  ;;  %v6037_v49 = vor.u32 %v6036_v42, %v6033_v24 }
 0x31a   : > { %5730 = vst.msk [vmem:[#allocation3 + $0x190] sm:$0xf] %vm197_vm0, %v5698_v61  ;;  %v6597_v50 = vld [vmem:[#allocation2 + $0x94] sm:$0xf]  ;;  %v6048_v46 = vrot.slane %v6047_v8, 4  ;;  %v6817_v58 = vrot.slane %v6815_v21, 4 }
 0x31b   : > { %7567 = vst.msk [vmem:[#allocation3 + $0x1c] sm:$0xf] %vm308_vm9, %v14302_v53  ;;  %v6007_v33 = vshrl.u32 %v5769_v23, 16  ;;  %v6820_v0 = vrot.slane %v6818_v30, 5  ;;  %v14458_v41 = vrot.slane %v6016_v63, 5  ;;  %v6022_v47 = vrot.slane %v6020_v48, 4  ;;  %6684 = vrot.lane.b32.xlu1 %v6597_v50, %s11422_s10  ;;  %v14498_v63 = vpop.permute.xlu0 %6658 }
 0x31c   : > { %6272 = vst.msk [vmem:[#allocation3 + $0x28] sm:$0xf] %vm308_vm9, %v6179_v14  ;;  %v5779_v32 = vld [vmem:[#allocation2 + $0x94] sm:$0xf]  ;;  %v6052_v53 = vrot.slane %v6050_v29, 5  ;;  %v6026_v20 = vshll.u32 %v5771_v25, 16 }
 0x31d   : > { %v6009_v15 = vrot.slane %v6007_v33, 4  ;;  %v6010_v12 = vshll.u32 %v5769_v23, 16  ;;  %v6596_v1 = vld [vmem:[#allocation2 + $0x90] sm:$0xf]  ;;  %v6038_v45 = vrot.slane %v6037_v49, 4  ;;  %v6821_v26 = vor.u32 %v6820_v0, %v6817_v58  ;;  %v11292_v35 = vld [vmem:[%s15874_s2 + $0x118] sm:$0xff]   ;;  %v14514_v33 = vpop.permute.xlu1 %6660 }
 0x31e   : > { %v6023_v18 = vor.u32 %v6022_v47, %v14458_v41  ;;  %v6414_v4 = vrot.slane %v6309_v31, 5  ;;  %v5778_v27 = vld [vmem:[#allocation2 + $0x90] sm:$0xf]  ;;  %v6417_v16 = vrot.slane %v6310_v17, 5  ;;  %v10229_v56 = vrot.slane %v6308_v52, 9  ;;  %6682 = vrot.lane.b32.xlu0 %v6596_v1, %s11422_s10  ;;  %11019 = vmatprep.subr.bf16.mxu1 %v11292_v35 }
 0x31f   : > { %v6012_v36 = vrot.slane %v6010_v12, 5  ;;  %v5780_v54 = vld [vmem:[#allocation2 + $0x98] sm:$0x1]  ;;  %v6088_v9 = vshll.u32 %v5779_v32, 16  ;;  %v6776_v40 = vld [vmem:[#allocation2 + $0x34] sm:$0xf]  ;;  %v6053_v2 = vsel %vm11630_vm10, %v6048_v46, %v6052_v53  ;;  %v6043_v34 = vsel %vm11630_vm10, %v6038_v45, %v14431_v13  ;;  %11020 = vmatpush3.bf16.msra.mxu1 %v11292_v35 }
 0x320   : > { %v6822_v44 = vrot.slane %v6821_v26, 4  ;;  %v14470_v43 = vrot.slane %v6023_v18, 4  ;;  %v6416_v37 = vrot.slane %v6414_v4, 4  ;;  %v5697_v11 = vld [vmem:[#allocation2 + $0x70] sm:$0xf]  ;;  %6216 = vrot.lane.b32.xlu1 %v6053_v2, %s11422_s10  ;;  %v6415_v19 = vsel %vm12111_vm15, %v10229_v56, %v6414_v4  ;;  %v8503_v56 = vld [vmem:[#allocation3 + $0x3c] sm:$0xff] }
 0x321   : > { %v6013_v5 = vor.u32 %v6012_v36, %v6009_v15  ;;  %v14479_v7 = vrot.slane %v6088_v9, 5  ;;  %v6092_v60 = vshrl.u32 %v5779_v32, 16  ;;  %v6777_v29 = vld [vmem:[#allocation2 + $0x38] sm:$0x1]  ;;  %v14481_v59 = vld [vmem:[#allocation2 + $0x30] sm:$0xf] }
 0x322   : > { %5729 = vst.msk [vmem:[#allocation3 + $0x17c] sm:$0xf] %vm197_vm0, %v5697_v11  ;;  %v5696_v23 = vld [vmem:[#allocation2 + $0x6c] sm:$0xf]  ;;  %v6827_v38 = vsel %vm11630_vm10, %v6822_v44, %v14419_v6  ;;  %v6028_v8 = vrot.slane %v6026_v20, 5  ;;  %v6418_v24 = vsel %vm12111_vm15, %v6416_v37, %v6417_v16  ;;  %v6098_v21 = vshll.u32 %v5780_v54, 16  ;;  %6214 = vrot.lane.b32.xlu0 %v6043_v34, %s11422_s10  ;;  %v6191_v54 = vpop.permute.xlu0 %6190 }
 0x323   : > { %6546 = vst.msk [vmem:[#allocation3 + $0x54] sm:$0xf] %vm197_vm0, %v6415_v19  ;;  %v6773_v31 = vld [vmem:[#allocation2 + $0x28] sm:$0xf]  ;;  %5728 = vst.msk [vmem:[#allocation3 + $0x168] sm:$0xf] %vm197_vm0, %v5696_v23 }
 0x324   : > { %7230 = vst.msk [vmem:[#allocation3 + $0x8] sm:$0xf] %vm197_vm0, %v6827_v38  ;;  %v6595_v61 = vld [vmem:[#allocation2 + $0x88] sm:$0xf]  ;;  %6547 = vst.msk [vmem:[#allocation3 + $0x68] sm:$0xf] %vm197_vm0, %v6418_v24 }
 0x325   : > { %6738 = vst.msk [vmem:[#allocation3 + $0x54] sm:$0xf] %vm308_vm9, %v14426_v22  ;;  %v6094_v6 = vrot.slane %v6092_v60, 4  ;;  %v6079_v42 = vshrl.u32 %v5778_v27, 16  ;;  %v6082_v30 = vshll.u32 %v5778_v27, 16  ;;  %v14502_v48 = vrot.slane %v6013_v5, 4  ;;  %6680 = vrot.lane.b32.xlu1 %v6595_v61, %s11422_s10 }
 0x326   : > { %v6774_v25 = vld [vmem:[#allocation2 + $0x2c] sm:$0x1]  ;;  %7566 = vst.msk [vmem:[#allocation3 + $0x8] sm:$0xf] %vm308_vm9, %v14379_v28  ;;  %6739 = vst.msk [vmem:[#allocation3 + $0x68] sm:$0xf] %vm308_vm9, %v14421_v57  ;;  %v6029_v22 = vsel %vm11630_vm10, %v14470_v43, %v6028_v8 }
 0x327   : > { %v6896_v13 = vshll.u32 %v6776_v40, 16  ;;  %v6900_v17 = vshrl.u32 %v6776_v40, 16  ;;  %v6906_v52 = vshll.u32 %v6777_v29, 16  ;;  %v11257_v3 = vld [vmem:[#allocation3 + $0x2c] ss:$20 sps:$4 sm:$0xff]   ;;  %v6095_v50 = vor.u32 %v6094_v6, %v14479_v7 }
 0x328   : > { %v6081_v28 = vrot.slane %v6079_v42, 4  ;;  %v6084_v46 = vrot.slane %v6082_v30, 5  ;;  %v14512_v58 = vld [vmem:[#allocation2 + $0x3c] sm:$0xe]  ;;  %v5703_v57 = vld [vmem:[#allocation2 + $0x94] sm:$0xf]  ;;  %9370 = vmatprep.mubr.bf16.mxu1 %v11257_v3  ;;  %v6019_v60 = vsel %vm11630_vm10, %v14502_v48, %v14458_v41 }
 0x329   : > { %v5702_v14 = vld [vmem:[#allocation2 + $0x90] sm:$0xf]  ;;  %v6594_v49 = vld [vmem:[#allocation2 + $0x84] sm:$0xf]  ;;  %v14516_v0 = vrot.slane %v6098_v21, 5  ;;  %v14518_v47 = vrot.slane %v6896_v13, 5  ;;  %6212 = vrot.lane.b32.xlu1 %v6029_v22, %s11422_s10  ;;  %v6193_v21 = vpop.permute.xlu1 %6192 }
 0x32a   : > { %v6902_v32 = vrot.slane %v6900_v17, 4  ;;  %v6887_v53 = vshrl.u32 %v14481_v59, 16  ;;  %v14521_v20 = vld [vmem:[#allocation2 + $0x40] sm:$0xf]  ;;  %5735 = vst.msk [vmem:[#allocation3 + $0x1f4] sm:$0xf] %vm197_vm0, %v5703_v57  ;;  %v6085_v15 = vor.u32 %v6084_v46, %v6081_v28  ;;  %6678 = vrot.lane.b32.xlu0 %v6594_v49, %s11422_s10 }
 0x32b   : > { %5734 = vst.msk [vmem:[#allocation3 + $0x1e0] sm:$0xf] %vm197_vm0, %v5702_v14  ;;  %v6908_v12 = vrot.slane %v6906_v52, 5  ;;  %v6890_v1 = vshll.u32 %v14481_v59, 16  ;;  %v6872_v45 = vshll.u32 %v6773_v31, 16  ;;  %v6876_v27 = vshrl.u32 %v6773_v31, 16 }
 0x32c   : > { %v5776_v26 = vld [vmem:[#allocation2 + $0x88] sm:$0xf]  ;;  %v6903_v18 = vor.u32 %v6902_v32, %v14518_v47  ;;  %v6889_v4 = vrot.slane %v6887_v53, 4  ;;  %v6882_v36 = vshll.u32 %v6774_v25, 16  ;;  %v8500_v16 = vld [vmem:[#allocation3 + $0x28] sm:$0xff]  ;;  %v14529_v9 = vrot.slane %v6095_v50, 4 }
 0x32d   : > { %v14531_v40 = vrot.slane %v6085_v15, 4  ;;  %v6892_v2 = vrot.slane %v6890_v1, 5  ;;  %v14533_v44 = vrot.slane %v6872_v45, 5  ;;  %6278 = vst.msk [vmem:[#allocation3 + $0xa0] sm:$0xf] %vm308_vm9, %v6191_v54  ;;  %v6878_v11 = vrot.slane %v6876_v27, 4 }
 0x32e   : > { %v5701_v43 = vld [vmem:[#allocation2 + $0x88] sm:$0xf]  ;;  %v6904_v37 = vrot.slane %v6903_v18, 4  ;;  %v6884_v35 = vrot.slane %v6882_v36, 5  ;;  %v10232_v5 = vrot.slane %v14512_v58, 9  ;;  %v6435_v38 = vrot.slane %v14521_v20, 5  ;;  %6210 = vrot.lane.b32.xlu0 %v6019_v60, %s11422_s10 }
 0x32f   : > { %v5775_v19 = vld [vmem:[#allocation2 + $0x84] sm:$0xf]  ;;  %5733 = vst.msk [vmem:[#allocation3 + $0x1cc] sm:$0xf] %vm197_vm0, %v5701_v43  ;;  %v11254_v29 = vld [vmem:[#allocation3 + $0x8] ss:$20 sps:$4 sm:$0xff]   ;;  %v6893_v23 = vor.u32 %v6892_v2, %v6889_v4  ;;  %v10281_v24 = vcombine.low %v8500_v16, %v8503_v56  ;;  %v6879_v61 = vor.u32 %v6878_v11, %v14533_v44  ;;  %v6101_v48 = vsel %vm11630_vm10, %v14529_v9, %v14516_v0 }
 0x330   : > { %v11256_v59 = vld [vmem:[#allocation3 + $0xc] ss:$20 sps:$4 sm:$0xff]   ;;  %v6601_v31 = vld [vmem:[#allocation2 + $0xac] sm:$0xf]  ;;  %v6909_v34 = vsel %vm11630_vm10, %v6904_v37, %v6908_v12  ;;  %v6064_v42 = vshll.u32 %v5776_v26, 16  ;;  %v6068_v30 = vshrl.u32 %v5776_v26, 16  ;;  %v6436_v17 = vsel %vm12111_vm15, %v10232_v5, %v6435_v38 }
 0x331   : > { %v6319_v8 = vld [vmem:[#allocation2 + $0x44] sm:$0x1]  ;;  %v14546_v6 = vld [vmem:[#allocation2 + $0x8c] sm:$0x1]  ;;  %6279 = vst.msk [vmem:[#allocation3 + $0xb4] sm:$0xf] %vm308_vm9, %v6193_v21  ;;  %6692 = vrot.lane.b32.xlu1 %v6601_v31, %s11422_s10  ;;  %9523 = vmatprep.mubr.bf16.mxu0 %v11256_v59  ;;  %v6091_v45 = vsel %vm11630_vm10, %v14531_v40, %v14479_v7  ;;  %v8105_v40 = vpop.permute.xlu1 %8104 }
 0x332   : > { %v14548_v25 = vld [vmem:[#allocation2 + $0x64] sm:$0xf]  ;;  %7237 = vst.msk [vmem:[#allocation3 + $0x94] sm:$0xf] %vm197_vm0, %v6909_v34  ;;  %v6894_v13 = vrot.slane %v6893_v23, 4  ;;  %v6055_v52 = vshrl.u32 %v5775_v19, 16  ;;  %9371 = vmatmul.mubr.bf16.gmra.mxu1 %v10281_v24  ;;  %9524 = vmatmul.mubr.bf16.vlgmr.msra.gmra.mxu0 %v11254_v29 }
 0x333   : > { %v14551_v41 = vld [vmem:[#allocation2 + $0x24] sm:$0xf]  ;;  %v11259_v3 = vld [vmem:[#allocation3 + $0x54] ss:$20 sps:$4 sm:$0xff]   ;;  %7573 = vst.msk [vmem:[#allocation3 + $0x94] sm:$0xf] %vm308_vm9, %v14456_v10 }
 0x334   : > { %v5700_v22 = vld [vmem:[#allocation2 + $0x84] sm:$0xf]  ;;  %v6880_v50 = vrot.slane %v6879_v61, 4  ;;  %6552 = vst.msk [vmem:[#allocation3 + $0xcc] sm:$0xf] %vm197_vm0, %v6436_v17  ;;  %v14565_v28 = vrot.slane %v6064_v42, 5  ;;  %v6899_v49 = vsel %vm11630_vm10, %v6894_v13, %v14518_v47  ;;  %9378 = vmatprep.mubr.bf16.mxu1 %v11259_v3 }
 0x335   : > { %v6070_v46 = vrot.slane %v6068_v30, 4  ;;  %v6058_v58 = vshll.u32 %v5775_v19, 16  ;;  %v14567_v57 = vld [vmem:[#allocation2 + $0x60] sm:$0xe]  ;;  %5732 = vst.msk [vmem:[#allocation3 + $0x1b8] sm:$0xf] %vm197_vm0, %v5700_v22  ;;  %6224 = vrot.lane.b32.xlu1 %v6101_v48, %s11422_s10  ;;  %v6657_v17 = vpop.permute.xlu1 %6656 }
 0x336   : > { %v6600_v14 = vld [vmem:[#allocation2 + $0xa8] sm:$0xf]  ;;  %6744 = vst.msk [vmem:[#allocation3 + $0xcc] sm:$0xf] %vm308_vm9, %v14498_v63  ;;  %v6074_v10 = vshll.u32 %v14546_v6, 16  ;;  %v6057_v0 = vrot.slane %v6055_v52, 4  ;;  %v6885_v20 = vsel %vm11630_vm10, %v6880_v50, %v6884_v35 }
 0x337   : > { %v6437_v32 = vrot.slane %v6435_v38, 4  ;;  %v14576_v53 = vld [vmem:[#allocation2 + $0x68] sm:$0x1]  ;;  %7236 = vst.msk [vmem:[#allocation3 + $0x80] sm:$0xf] %vm197_vm0, %v6899_v49  ;;  %v6071_v15 = vor.u32 %v6070_v46, %v14565_v28  ;;  %v6060_v12 = vrot.slane %v6058_v58, 5  ;;  %6690 = vrot.lane.b32.xlu0 %v6600_v14, %s11422_s10 }
 0x338   : > { %v6438_v1 = vrot.slane %v6319_v8, 5  ;;  %v5785_v47 = vld [vmem:[#allocation2 + $0xac] sm:$0xf]  ;;  %v11297_v63 = vld [vmem:[%s15874_s2 + $0x110] sm:$0xff]   ;;  %7572 = vst.msk [vmem:[#allocation3 + $0x80] sm:$0xf] %vm308_vm9, %v14464_v39  ;;  %v14601_v39 = vpop.permute.xlu0 %7478 }
 0x339   : > { %7235 = vst.msk [vmem:[#allocation3 + $0x6c] sm:$0xf] %vm197_vm0, %v6885_v20  ;;  %v7409_v26 = vrot.slane %v14548_v25, 5  ;;  %v6863_v18 = vshrl.u32 %v14551_v41, 16  ;;  %v5784_v4 = vld [vmem:[#allocation2 + $0xa8] sm:$0xf]  ;;  %v6061_v56 = vor.u32 %v6060_v12, %v6057_v0  ;;  %11021 = vmatprep.subr.bf16.mxu1 %v11297_v63 }
 0x33a   : > { %v7613_v27 = vld [vmem:[#allocation2 + $0x70] sm:$0xf]  ;;  %v6599_v36 = vld [vmem:[#allocation2 + $0xa0] sm:$0xf]  ;;  %7571 = vst.msk [vmem:[#allocation3 + $0x6c] sm:$0xf] %vm308_vm9, %v14466_v55  ;;  %v6439_v7 = vsel %vm12111_vm15, %v6437_v32, %v6438_v1  ;;  %11022 = vmatpush3.bf16.msra.mxu1 %v11297_v63 }
 0x33b   : > { %v6072_v16 = vrot.slane %v6071_v15, 4  ;;  %v6866_v54 = vshll.u32 %v14551_v41, 16  ;;  %v14603_v9 = vld [vmem:[#allocation2 + $0xb0] sm:$0x1]  ;;  %v14605_v2 = vld [vmem:[#allocation2 + $0x34] sm:$0xf]  ;;  %6222 = vrot.lane.b32.xlu0 %v6091_v45, %s11422_s10  ;;  %6688 = vrot.lane.b32.xlu1 %v6599_v36, %s11422_s10 }
 0x33c   : > { %7645 = vst.msk [vmem:[#allocation3 + $0x138] sm:$0xf] %vm197_vm0, %v7613_v27  ;;  %v7612_v43 = vld [vmem:[#allocation2 + $0x6c] sm:$0xf]  ;;  %v6076_v37 = vrot.slane %v6074_v10, 5  ;;  %v8509_v11 = vld [vmem:[#allocation3 + $0x64] sm:$0xff]  ;;  %v8103_v10 = vpop.permute.xlu0 %8102 }
 0x33d   : > { %6553 = vst.msk [vmem:[#allocation3 + $0xe0] sm:$0xf] %vm197_vm0, %v6439_v7  ;;  %v8506_v55 = vld [vmem:[#allocation3 + $0x50] sm:$0xff]  ;;  %v10250_v35 = vrot.slane %v14567_v57, 9  ;;  %v6865_v5 = vrot.slane %v6863_v18, 4  ;;  %v6136_v19 = vshll.u32 %v5785_v47, 16 }
 0x33e   : > { %8195 = vst.msk [vmem:[#allocation3 + $0x70] sm:$0xf] %vm308_vm9, %v8105_v40  ;;  %v6316_v60 = vld [vmem:[#allocation2 + $0x38] sm:$0x1]  ;;  %6745 = vst.msk [vmem:[#allocation3 + $0xe0] sm:$0xf] %vm308_vm9, %v14514_v33  ;;  %v6077_v31 = vsel %vm11630_vm10, %v6072_v16, %v6076_v37  ;;  %v10286_v50 = vcombine.low %v8506_v55, %v8509_v11 }
 0x33f   : > { %7644 = vst.msk [vmem:[#allocation3 + $0x124] sm:$0xf] %vm197_vm0, %v7612_v43  ;;  %v7411_v29 = vrot.slane %v7409_v26, 4  ;;  %v7412_v59 = vrot.slane %v14576_v53, 5  ;;  %v6868_v23 = vrot.slane %v6866_v54, 5  ;;  %v6140_v38 = vshrl.u32 %v5785_v47, 16  ;;  %6220 = vrot.lane.b32.xlu1 %v6077_v31, %s11422_s10  ;;  %v6189_v43 = vpop.permute.xlu1 %6188 }
 0x340   : > { %v6314_v8 = vld [vmem:[#allocation2 + $0x30] sm:$0xe]  ;;  %v5782_v24 = vld [vmem:[#allocation2 + $0xa0] sm:$0xf]  ;;  %v5707_v21 = vld [vmem:[#allocation2 + $0xac] sm:$0xf]  ;;  %v14621_v34 = vsel %vm12111_vm15, %v10250_v35, %v7409_v26  ;;  %9379 = vmatmul.mubr.bf16.gmra.mxu1 %v10286_v50  ;;  %v6655_v40 = vpop.permute.xlu0 %6654 }
 0x341   : > { %v14623_v33 = vrot.slane %v6136_v19, 5  ;;  %v6127_v61 = vshrl.u32 %v5784_v4, 16  ;;  %v14625_v6 = vld [vmem:[#allocation2 + $0xa4] sm:$0x1]  ;;  %5739 = vst.msk [vmem:[#allocation3 + $0x244] sm:$0xf] %vm197_vm0, %v5707_v21  ;;  %v6869_v41 = vor.u32 %v6868_v23, %v6865_v5  ;;  %v7413_v54 = vsel %vm12111_vm15, %v7411_v29, %v7412_v59 }
 0x342   : > { %v5706_v42 = vld [vmem:[#allocation2 + $0xa8] sm:$0xf]  ;;  %v6598_v30 = vld [vmem:[#allocation2 + $0x9c] sm:$0xf]  ;;  %v6062_v25 = vrot.slane %v6061_v56, 4  ;;  %v6142_v48 = vrot.slane %v6140_v38, 4 }
 0x343   : > { %v6130_v13 = vshll.u32 %v5784_v4, 16  ;;  %5738 = vst.msk [vmem:[#allocation3 + $0x230] sm:$0xf] %vm197_vm0, %v5706_v42  ;;  %v5704_v52 = vld [vmem:[#allocation2 + $0x9c] sm:$0xf]  ;;  %v6146_v3 = vshll.u32 %v14603_v9, 16  ;;  %6686 = vrot.lane.b32.xlu0 %v6598_v30, %s11422_s10  ;;  %7500 = vrot.lane.b32.xlu1 %v7413_v54, %s11422_s10 }
 0x344   : > { %v6129_v22 = vrot.slane %v6127_v61, 4  ;;  %v6428_v46 = vrot.slane %v14605_v2, 5  ;;  %5736 = vst.msk [vmem:[#allocation3 + $0x208] sm:$0xf] %vm197_vm0, %v5704_v52  ;;  %v7615_v58 = vld [vmem:[#allocation2 + $0x7c] sm:$0xf]  ;;  %v6143_v14 = vor.u32 %v6142_v48, %v14623_v33 }
 0x345   : > { %v6870_v57 = vrot.slane %v6869_v41, 4  ;;  %v6132_v49 = vrot.slane %v6130_v13, 5  ;;  %v6431_v0 = vrot.slane %v6316_v60, 5  ;;  %7647 = vst.msk [vmem:[#allocation3 + $0x160] sm:$0xf] %vm197_vm0, %v7615_v58  ;;  %v10231_v20 = vrot.slane %v6314_v8, 9 }
 0x346   : > { %v7614_v32 = vld [vmem:[#allocation2 + $0x78] sm:$0xf]  ;;  %8194 = vst.msk [vmem:[#allocation3 + $0x5c] sm:$0xf] %vm308_vm9, %v8103_v10  ;;  %v6430_v53 = vrot.slane %v6428_v46, 4  ;;  %v6112_v15 = vshll.u32 %v5782_v24, 16  ;;  %v8101_v10 = vpop.permute.xlu1 %8100 }
 0x347   : > { %v6116_v12 = vshrl.u32 %v5782_v24, 16  ;;  %v5781_v1 = vld [vmem:[#allocation2 + $0x9c] sm:$0xf]  ;;  %7646 = vst.msk [vmem:[#allocation3 + $0x14c] sm:$0xf] %vm197_vm0, %v7614_v32  ;;  %v6875_v47 = vsel %vm11630_vm10, %v6870_v57, %v14533_v44  ;;  %v6144_v63 = vrot.slane %v6143_v14, 4  ;;  %v6133_v45 = vor.u32 %v6132_v49, %v6129_v22  ;;  %v6187_v22 = vpop.permute.xlu0 %6186 }
 0x348   : > { %v6122_v26 = vshll.u32 %v14625_v6, 16  ;;  %v7684_v18 = vld [vmem:[#allocation2 + $0x70] sm:$0xf]  ;;  %7234 = vst.msk [vmem:[#allocation3 + $0x58] sm:$0xf] %vm197_vm0, %v6875_v47  ;;  %v6432_v4 = vsel %vm12111_vm15, %v6430_v53, %v6431_v0  ;;  %v6429_v27 = vsel %vm12111_vm15, %v10231_v20, %v6428_v46  ;;  %v14647_v36 = vrot.slane %v6112_v15, 5 }
 0x349   : > { %v6118_v16 = vrot.slane %v6116_v12, 4  ;;  %v7683_v56 = vld [vmem:[#allocation2 + $0x6c] sm:$0xf]  ;;  %v5705_v7 = vld [vmem:[#allocation2 + $0xa0] sm:$0xf]  ;;  %v6067_v44 = vsel %vm11630_vm10, %v6062_v25, %v14565_v28  ;;  %v6148_v9 = vrot.slane %v6146_v3, 5 }
 0x34a   : > { %7570 = vst.msk [vmem:[#allocation3 + $0x58] sm:$0xf] %vm308_vm9, %v14601_v39  ;;  %v6103_v2 = vshrl.u32 %v5781_v1, 16  ;;  %v14658_v37 = vld [vmem:[#allocation2 + $0x74] sm:$0x1]  ;;  %6218 = vrot.lane.b32.xlu0 %v6067_v44, %s11422_s10  ;;  %v6106_v39 = vshll.u32 %v5781_v1, 16 }
 0x34b   : > { %6551 = vst.msk [vmem:[#allocation3 + $0xb8] sm:$0xf] %vm197_vm0, %v6432_v4  ;;  %6550 = vst.msk [vmem:[#allocation3 + $0xa4] sm:$0xf] %vm197_vm0, %v6429_v27  ;;  %v6119_v28 = vor.u32 %v6118_v16, %v14647_v36  ;;  %v7888_v55 = vshll.u32 %v7684_v18, 16  ;;  %v7892_v11 = vshrl.u32 %v7684_v18, 16  ;;  %v6149_v19 = vsel %vm11630_vm10, %v6144_v63, %v6148_v9 }
 0x34c   : > { %5737 = vst.msk [vmem:[#allocation3 + $0x21c] sm:$0xf] %vm197_vm0, %v5705_v7  ;;  %v6782_v35 = vld [vmem:[#allocation2 + $0x4c] sm:$0xf]  ;;  %v6781_v5 = vld [vmem:[#allocation2 + $0x48] sm:$0xf]  ;;  %6232 = vrot.lane.b32.xlu1 %v6149_v19, %s11422_s10 }
 0x34d   : > { %6743 = vst.msk [vmem:[#allocation3 + $0xb8] sm:$0xf] %vm308_vm9, %v6657_v17  ;;  %6742 = vst.msk [vmem:[#allocation3 + $0xa4] sm:$0xf] %vm308_vm9, %v6655_v40  ;;  %v6134_v60 = vrot.slane %v6133_v45, 4  ;;  %v6105_v29 = vrot.slane %v6103_v2, 4  ;;  %v8099_v40 = vpop.permute.xlu0 %8098 }
 0x34e   : > { %6277 = vst.msk [vmem:[#allocation3 + $0x8c] sm:$0xf] %vm308_vm9, %v6189_v43  ;;  %v7879_v59 = vshrl.u32 %v7683_v56, 16  ;;  %v6783_v23 = vld [vmem:[#allocation2 + $0x50] sm:$0x1]  ;;  %v14669_v38 = vrot.slane %v6122_v26, 5  ;;  %7498 = vrot.lane.b32.xlu0 %v14621_v34, %s11422_s10 }
 0x34f   : > { %v6108_v8 = vrot.slane %v6106_v39, 5  ;;  %v14671_v24 = vrot.slane %v7888_v55, 5  ;;  %v7894_v21 = vrot.slane %v7892_v11, 4  ;;  %v7617_v31 = vld [vmem:[#allocation2 + $0x88] sm:$0xf]  ;;  %v7898_v61 = vshll.u32 %v14658_v37, 16 }
 0x350   : > { %v7881_v6 = vrot.slane %v7879_v59, 4  ;;  %v7882_v42 = vshll.u32 %v7683_v56, 16  ;;  %v6944_v30 = vshll.u32 %v6782_v35, 16  ;;  %v11303_v25 = vld [vmem:[%s15874_s2 + $0x108] sm:$0xff]   ;;  %7649 = vst.msk [vmem:[#allocation3 + $0x188] sm:$0xf] %vm197_vm0, %v7617_v31  ;;  %v6139_v34 = vsel %vm11630_vm10, %v6134_v60, %v14623_v33 }
 0x351   : > { %v6120_v41 = vrot.slane %v6119_v28, 4  ;;  %v6109_v48 = vor.u32 %v6108_v8, %v6105_v29  ;;  %v7895_v13 = vor.u32 %v7894_v21, %v14671_v24  ;;  %v6948_v17 = vshrl.u32 %v6782_v35, 16  ;;  %v14682_v52 = vld [vmem:[#allocation2 + $0x70] sm:$0xf]  ;;  %v7616_v3 = vld [vmem:[#allocation2 + $0x84] sm:$0xf]  ;;  %11023 = vmatprep.subr.bf16.mxu1 %v11303_v25 }
 0x352   : > { %v7884_v50 = vrot.slane %v7882_v42, 5  ;;  %v14684_v46 = vrot.slane %v6944_v30, 5  ;;  %v6954_v58 = vshll.u32 %v6783_v23, 16  ;;  %v6935_v57 = vshrl.u32 %v6781_v5, 16  ;;  %v6779_v14 = vld [vmem:[#allocation2 + $0x40] sm:$0xf]  ;;  %11024 = vmatpush3.bf16.msra.mxu1 %v11303_v25  ;;  %6230 = vrot.lane.b32.xlu0 %v6139_v34, %s11422_s10 }
 0x353   : > { %7648 = vst.msk [vmem:[#allocation3 + $0x174] sm:$0xf] %vm197_vm0, %v7616_v3  ;;  %v14690_v49 = vrot.slane %v6109_v48, 4  ;;  %v6950_v0 = vrot.slane %v6948_v17, 4  ;;  %v6938_v32 = vshll.u32 %v6781_v5, 16  ;;  %v14695_v12 = vrot.slane %v7895_v13, 4  ;;  %v7491_v13 = vpop.permute.xlu0 %7490 }
 0x354   : > { %6276 = vst.msk [vmem:[#allocation3 + $0x78] sm:$0xf] %vm308_vm9, %v6187_v22  ;;  %v7288_v53 = vld [vmem:[#allocation2 + $0x74] sm:$0x1]  ;;  %v14693_v20 = vld [vmem:[#allocation2 + $0x44] sm:$0x1]  ;;  %v7885_v1 = vor.u32 %v7884_v50, %v7881_v6  ;;  %v6125_v63 = vsel %vm11630_vm10, %v6120_v41, %v14669_v38 }
 0x355   : > { %v6603_v15 = vld [vmem:[#allocation2 + $0xb8] sm:$0xf]  ;;  %8193 = vst.msk [vmem:[#allocation3 + $0x48] sm:$0xf] %vm308_vm9, %v8101_v10  ;;  %v6937_v47 = vrot.slane %v6935_v57, 4  ;;  %v7416_v33 = vrot.slane %v14682_v52, 5  ;;  %v6951_v26 = vor.u32 %v6950_v0, %v14684_v46  ;;  %v6115_v7 = vsel %vm11630_vm10, %v14690_v49, %v14647_v36  ;;  %v7493_v36 = vpop.permute.xlu1 %7492 }
 0x356   : > { %6696 = vrot.lane.b32.xlu1 %v6603_v15, %s11422_s10  ;;  %v7900_v45 = vrot.slane %v7898_v61, 5  ;;  %v6940_v18 = vrot.slane %v6938_v32, 5  ;;  %v14705_v4 = vld [vmem:[#allocation2 + $0x6c] sm:$0xe]  ;;  %v6323_v27 = vld [vmem:[#allocation2 + $0x54] sm:$0xe] }
 0x357   : > { %v14707_v16 = vld [vmem:[#allocation2 + $0x58] sm:$0xf]  ;;  %v6602_v56 = vld [vmem:[#allocation2 + $0xb4] sm:$0xf]  ;;  %v14713_v44 = vrot.slane %v7885_v1, 4  ;;  %v6956_v54 = vrot.slane %v6954_v58, 5 }
 0x358   : > { %v7418_v9 = vrot.slane %v7416_v33, 4  ;;  %v6952_v2 = vrot.slane %v6951_v26, 4  ;;  %v6941_v43 = vor.u32 %v6940_v18, %v6937_v47  ;;  %v6920_v37 = vshll.u32 %v6779_v14, 16  ;;  %v5788_v39 = vld [vmem:[#allocation2 + $0xb8] sm:$0xf]  ;;  %v8515_v19 = vld [vmem:[#allocation3 + $0x8c] sm:$0xff]  ;;  %6694 = vrot.lane.b32.xlu0 %v6602_v56, %s11422_s10  ;;  %v6667_v56 = vpop.permute.xlu0 %6666 }
 0x359   : > { %v6924_v28 = vshrl.u32 %v6779_v14, 16  ;;  %v14717_v55 = vld [vmem:[#allocation2 + $0xb4] sm:$0xf]  ;;  %v7901_v11 = vsel %vm11630_vm10, %v14695_v12, %v7900_v45  ;;  %8192 = vst.msk [vmem:[#allocation3 + $0x34] sm:$0xf] %vm308_vm9, %v8099_v40  ;;  %v7419_v35 = vrot.slane %v7288_v53, 5  ;;  %v7891_v61 = vsel %vm11630_vm10, %v14713_v44, %v14671_v24  ;;  %v7489_v32 = vpop.permute.xlu1 %7488 }
 0x35a   : > { %v10251_v5 = vrot.slane %v14705_v4, 9  ;;  %v6930_v60 = vshll.u32 %v14693_v20, 16  ;;  %v5708_v29 = vld [vmem:[#allocation2 + $0xb4] sm:$0xf]  ;;  %6228 = vrot.lane.b32.xlu1 %v6125_v63, %s11422_s10  ;;  %v6957_v59 = vsel %vm11630_vm10, %v6952_v2, %v6956_v54  ;;  %v6942_v23 = vrot.slane %v6941_v43, 4  ;;  %v14767_v47 = vld [vmem:[#allocation3 + $0xa0] sm:$0xff] }
 0x35b   : > { %v14729_v38 = vrot.slane %v6920_v37, 5  ;;  %v6926_v8 = vrot.slane %v6924_v28, 4  ;;  %v6325_v21 = vld [vmem:[#allocation2 + $0x5c] sm:$0x1]  ;;  %v5709_v31 = vld [vmem:[#allocation2 + $0xb8] sm:$0xf]  ;;  %v14739_v6 = vsel %vm12111_vm15, %v7418_v9, %v7419_v35 }
 0x35c   : > { %5740 = vst.msk [vmem:[#allocation3 + $0x258] sm:$0xf] %vm197_vm0, %v5708_v29  ;;  %7241 = vst.msk [vmem:[#allocation3 + $0xe4] sm:$0xf] %vm197_vm0, %v6957_v59  ;;  %v8512_v42 = vld [vmem:[#allocation3 + $0x78] sm:$0xff]  ;;  %v10234_v25 = vrot.slane %v6323_v27, 9  ;;  %v6947_v24 = vsel %vm11630_vm10, %v6942_v23, %v14684_v46  ;;  %6226 = vrot.lane.b32.xlu0 %v6115_v7, %s11422_s10 }
 0x35d   : > { %v11261_v30 = vld [vmem:[#allocation3 + $0x7c] ss:$20 sps:$4 sm:$0xff]   ;;  %v6449_v41 = vrot.slane %v14707_v16, 5  ;;  %v7687_v48 = vld [vmem:[#allocation2 + $0x7c] sm:$0xf]  ;;  %v6927_v17 = vor.u32 %v6926_v8, %v14729_v38  ;;  %v10291_v3 = vcombine.low %v8512_v42, %v8515_v19  ;;  %v6160_v50 = vshll.u32 %v5788_v39, 16 }
 0x35e   : > { %5741 = vst.msk [vmem:[#allocation3 + $0x26c] sm:$0xf] %vm197_vm0, %v5709_v31  ;;  %v14748_v22 = vld [vmem:[#allocation2 + $0xbc] sm:$0x1]  ;;  %v14750_v58 = vld [vmem:[#allocation2 + $0x80] sm:$0x1]  ;;  %9386 = vmatprep.mubr.bf16.mxu1 %v11261_v30  ;;  %8124 = vrot.lane.b32.xlu1 %v7901_v11, %s11422_s10 }
 0x35f   : > { %7577 = vst.msk [vmem:[#allocation3 + $0xe4] sm:$0xf] %vm308_vm9, %v7493_v36  ;;  %v6932_v57 = vrot.slane %v6930_v60, 5  ;;  %v6450_v14 = vsel %vm12111_vm15, %v10234_v25, %v6449_v41  ;;  %v11263_v34 = vld [vmem:[#allocation3 + $0xa4] ss:$20 sps:$4 sm:$0xff]   ;;  %v6164_v49 = vshrl.u32 %v5788_v39, 16  ;;  %9387 = vmatmul.mubr.bf16.gmra.mxu1 %v10291_v3  ;;  %v6669_v36 = vpop.permute.xlu1 %6668 }
 0x360   : > { %7240 = vst.msk [vmem:[#allocation3 + $0xd0] sm:$0xf] %vm197_vm0, %v6947_v24  ;;  %v6151_v46 = vshrl.u32 %v14717_v55, 16  ;;  %v14756_v10 = vld [vmem:[#allocation2 + $0x78] sm:$0xf]  ;;  %v6928_v0 = vrot.slane %v6927_v17, 4  ;;  %9394 = vmatprep.mubr.bf16.mxu1 %v11263_v34  ;;  %8122 = vrot.lane.b32.xlu0 %v7891_v61, %s11422_s10 }
 0x361   : > { %7576 = vst.msk [vmem:[#allocation3 + $0xd0] sm:$0xf] %vm308_vm9, %v7491_v13  ;;  %v14762_v53 = vrot.slane %v6160_v50, 5  ;;  %v6154_v20 = vshll.u32 %v14717_v55, 16  ;;  %v8504_v15 = vld [vmem:[#allocation3 + $0x44] sm:$0xff]  ;;  %v6451_v12 = vrot.slane %v6449_v41, 4  ;;  %v7417_v50 = vsel %vm12111_vm15, %v10251_v5, %v7416_v33 }
 0x362   : > { %6556 = vst.msk [vmem:[#allocation3 + $0x11c] sm:$0xf] %vm197_vm0, %v6450_v14  ;;  %v14765_v1 = vld [vmem:[#allocation2 + $0x3c] sm:$0xf]  ;;  %v14769_v63 = vld [vmem:[#allocation3 + $0xb4] sm:$0xff]  ;;  %v6166_v45 = vrot.slane %v6164_v49, 4  ;;  %v6933_v16 = vsel %vm11630_vm10, %v6928_v0, %v6932_v57 }
 0x363   : > { %v6170_v26 = vshll.u32 %v14748_v22, 16  ;;  %v6153_v18 = vrot.slane %v6151_v46, 4  ;;  %v6452_v27 = vrot.slane %v6325_v21, 5  ;;  %v6156_v7 = vrot.slane %v6154_v20, 5  ;;  %v8501_v44 = vld [vmem:[#allocation3 + $0x30] sm:$0xff]  ;;  %v11313_v55 = vld [vmem:[%s15874_s2 + $0x100] sm:$0xff]  }
 0x364   : > { %v11265_v54 = vld [vmem:[#allocation3 + $0x34] ss:$20 sps:$4 sm:$0xff]   ;;  %v7912_v9 = vshll.u32 %v7687_v48, 16  ;;  %v7916_v40 = vshrl.u32 %v7687_v48, 16  ;;  %v6605_v2 = vld [vmem:[#allocation2 + $0xc4] sm:$0xf]  ;;  %v6167_v43 = vor.u32 %v6166_v45, %v14762_v53  ;;  %v10283_v28 = vcombine.low %v8501_v44, %v8504_v15  ;;  %11025 = vmatprep.subr.bf16.mxu1 %v11313_v55 }
 0x365   : > { %7239 = vst.msk [vmem:[#allocation3 + $0xbc] sm:$0xf] %vm197_vm0, %v6933_v16  ;;  %v6453_v37 = vsel %vm12111_vm15, %v6451_v12, %v6452_v27  ;;  %v7922_v39 = vshll.u32 %v14750_v58, 16  ;;  %6700 = vrot.lane.b32.xlu1 %v6605_v2, %s11422_s10  ;;  %v6157_v11 = vor.u32 %v6156_v7, %v6153_v18  ;;  %v7903_v60 = vshrl.u32 %v14756_v10, 16  ;;  %v14790_v29 = vld [vmem:[#allocation2 + $0x7c] sm:$0xf]  ;;  %9531 = vmatprep.mubr.bf16.mxu0 %v11265_v54  ;;  %v6199_v58 = vpop.permute.xlu0 %6198  ;;  %v6201_v18 = vpop.permute.xlu1 %6200 }
 0x366   : > { %6748 = vst.msk [vmem:[#allocation3 + $0x11c] sm:$0xf] %vm308_vm9, %v6667_v56  ;;  %7575 = vst.msk [vmem:[#allocation3 + $0xbc] sm:$0xf] %vm308_vm9, %v7489_v32  ;;  %v14787_v35 = vrot.slane %v7912_v9, 5  ;;  %v7918_v19 = vrot.slane %v7916_v40, 4  ;;  %v10296_v31 = vcombine.low %v14767_v47, %v14769_v63  ;;  %9532 = vmatmul.mubr.bf16.gmra.mxu0 %v10283_v28  ;;  %11026 = vmatpush3.bf16.msra.mxu1 %v11313_v55 }
 0x367   : > { %6557 = vst.msk [vmem:[#allocation3 + $0x130] sm:$0xf] %vm197_vm0, %v6453_v37  ;;  %v6168_v59 = vrot.slane %v6167_v43, 4  ;;  %v11267_v23 = vld [vmem:[#allocation3 + $0x5c] ss:$20 sps:$4 sm:$0xff]   ;;  %v7906_v8 = vshll.u32 %v14756_v10, 16 }
 0x368   : > { %6749 = vst.msk [vmem:[#allocation3 + $0x130] sm:$0xf] %vm308_vm9, %v6669_v36  ;;  %v6911_v21 = vshrl.u32 %v14765_v1, 16  ;;  %v14797_v61 = vld [vmem:[#allocation2 + $0x80] sm:$0x1]  ;;  %v14799_v42 = vrot.slane %v6157_v11, 4  ;;  %v7919_v30 = vor.u32 %v7918_v19, %v14787_v35  ;;  %9539 = vmatprep.mubr.bf16.mxu0 %v11267_v23  ;;  %9395 = vmatmul.mubr.bf16.gmra.mxu1 %v10296_v31 }
 0x369   : > { %v7905_v25 = vrot.slane %v7903_v60, 4  ;;  %v6914_v41 = vshll.u32 %v14765_v1, 16  ;;  %v7690_v48 = vld [vmem:[#allocation2 + $0x88] sm:$0xf]  ;;  %v6604_v24 = vld [vmem:[#allocation2 + $0xc0] sm:$0xf]  ;;  %7504 = vrot.lane.b32.xlu1 %v14739_v6, %s11422_s10  ;;  %v7487_v9 = vpop.permute.xlu0 %7486 }
 0x36a   : > { %v6172_v13 = vrot.slane %v6170_v26, 5  ;;  %v7908_v17 = vrot.slane %v7906_v8, 5  ;;  %v6913_v3 = vrot.slane %v6911_v21, 4  ;;  %v7423_v22 = vrot.slane %v14790_v29, 5  ;;  %6698 = vrot.lane.b32.xlu0 %v6604_v24, %s11422_s10  ;;  %v8507_v57 = vld [vmem:[#allocation3 + $0x58] sm:$0xff]  ;;  %v8510_v14 = vld [vmem:[#allocation3 + $0x6c] sm:$0xff] }
 0x36b   : > { %v7924_v34 = vrot.slane %v7922_v39, 5  ;;  %v6916_v49 = vrot.slane %v6914_v41, 5  ;;  %v14813_v46 = vld [vmem:[#allocation2 + $0x78] sm:$0xe]  ;;  %v6163_v52 = vsel %vm11630_vm10, %v14799_v42, %v14762_v53  ;;  %6282 = vst.msk [vmem:[#allocation3 + $0xf0] sm:$0xf] %vm308_vm9, %v6199_v58  ;;  %v10288_v45 = vcombine.low %v8507_v57, %v8510_v14 }
 0x36c   : > { %v6173_v10 = vsel %vm11630_vm10, %v6168_v59, %v6172_v13  ;;  %v7920_v4 = vrot.slane %v7919_v30, 4  ;;  %v7909_v6 = vor.u32 %v7908_v17, %v7905_v25  ;;  %v7689_v33 = vld [vmem:[#allocation2 + $0x84] sm:$0xf]  ;;  %v6321_v5 = vld [vmem:[#allocation2 + $0x4c] sm:$0xf]  ;;  %v7426_v32 = vrot.slane %v14797_v61, 5 }
 0x36d   : > { %v6917_v0 = vor.u32 %v6916_v49, %v6913_v3  ;;  %v7691_v20 = vld [vmem:[#allocation2 + $0x8c] sm:$0x1]  ;;  %v7936_v15 = vshll.u32 %v7690_v48, 16  ;;  %v7940_v12 = vshrl.u32 %v7690_v48, 16  ;;  %v6320_v1 = vld [vmem:[#allocation2 + $0x48] sm:$0xe]  ;;  %6236 = vrot.lane.b32.xlu1 %v6173_v10, %s11422_s10 }
 0x36e   : > { %v7910_v47 = vrot.slane %v7909_v6, 4  ;;  %v7425_v63 = vrot.slane %v7423_v22, 4  ;;  %v10252_v53 = vrot.slane %v14813_v46, 9  ;;  %v6322_v26 = vld [vmem:[#allocation2 + $0x50] sm:$0x1]  ;;  %7502 = vrot.lane.b32.xlu0 %v7417_v50, %s11422_s10  ;;  %v7927_v7 = vshrl.u32 %v7689_v33, 16  ;;  %9540 = vmatmul.mubr.bf16.gmra.mxu0 %v10288_v45 }
 0x36f   : > { %v6918_v27 = vrot.slane %v6917_v0, 4  ;;  %v14828_v16 = vrot.slane %v7936_v15, 5  ;;  %v7942_v56 = vrot.slane %v7940_v12, 4  ;;  %v7293_v44 = vld [vmem:[#allocation2 + $0x88] sm:$0xf]  ;;  %v7925_v54 = vsel %vm11630_vm10, %v7920_v4, %v7924_v34 }
 0x370   : > { %6283 = vst.msk [vmem:[#allocation3 + $0x104] sm:$0xf] %vm308_vm9, %v6201_v18  ;;  %v7946_v40 = vshll.u32 %v7691_v20, 16  ;;  %v7930_v2 = vshll.u32 %v7689_v33, 16  ;;  %v6442_v43 = vrot.slane %v6321_v5, 5  ;;  %v7929_v55 = vrot.slane %v7927_v7, 4 }
 0x371   : > { %v7693_v37 = vld [vmem:[#allocation2 + $0x94] sm:$0xf]  ;;  %v6923_v28 = vsel %vm11630_vm10, %v6918_v27, %v14729_v38  ;;  %v7943_v39 = vor.u32 %v7942_v56, %v14828_v16  ;;  %v6445_v11 = vrot.slane %v6322_v26, 5  ;;  %v7294_v36 = vld [vmem:[#allocation2 + $0x8c] sm:$0x1]  ;;  %v10233_v59 = vrot.slane %v6320_v1, 9  ;;  %8128 = vrot.lane.b32.xlu1 %v7925_v54, %s11422_s10 }
 0x372   : > { %7238 = vst.msk [vmem:[#allocation3 + $0xa8] sm:$0xf] %vm197_vm0, %v6923_v28  ;;  %v7932_v19 = vrot.slane %v7930_v2, 5  ;;  %v6444_v60 = vrot.slane %v6442_v43, 4  ;;  %v7430_v23 = vrot.slane %v7293_v44, 5  ;;  %6234 = vrot.lane.b32.xlu0 %v6163_v52, %s11422_s10  ;;  %v7915_v38 = vsel %vm11630_vm10, %v7910_v47, %v14787_v35 }
 0x373   : > { %v7292_v8 = vld [vmem:[#allocation2 + $0x84] sm:$0xe]  ;;  %7574 = vst.msk [vmem:[#allocation3 + $0xa8] sm:$0xf] %vm308_vm9, %v7487_v9  ;;  %v7427_v21 = vsel %vm12111_vm15, %v7425_v63, %v7426_v32  ;;  %v7944_v31 = vrot.slane %v7943_v39, 4  ;;  %v7960_v42 = vshll.u32 %v7693_v37, 16  ;;  %v6443_v48 = vsel %vm12111_vm15, %v10233_v59, %v6442_v43  ;;  %v8111_v9 = vpop.permute.xlu0 %8110 }
 0x374   : > { %v7694_v61 = vld [vmem:[#allocation2 + $0x98] sm:$0x1]  ;;  %v7692_v30 = vld [vmem:[#allocation2 + $0x90] sm:$0xf]  ;;  %v7933_v25 = vor.u32 %v7932_v19, %v7929_v55  ;;  %v6446_v41 = vsel %vm12111_vm15, %v6444_v60, %v6445_v11  ;;  %v7432_v24 = vrot.slane %v7430_v23, 4  ;;  %v7948_v35 = vrot.slane %v7946_v40, 5 }
 0x375   : > { %v7296_v13 = vld [vmem:[#allocation2 + $0x94] sm:$0xf]  ;;  %v6785_v17 = vld [vmem:[#allocation2 + $0x58] sm:$0xf]  ;;  %6555 = vst.msk [vmem:[#allocation3 + $0x108] sm:$0xf] %vm197_vm0, %v6446_v41  ;;  %7508 = vrot.lane.b32.xlu1 %v7427_v21, %s11422_s10  ;;  %v7424_v6 = vsel %vm12111_vm15, %v10252_v53, %v7423_v22  ;;  %v8113_v22 = vpop.permute.xlu1 %8112 }
 0x376   : > { %6554 = vst.msk [vmem:[#allocation3 + $0xf4] sm:$0xf] %vm197_vm0, %v6443_v48  ;;  %v7433_v3 = vrot.slane %v7294_v36, 5  ;;  %v14852_v50 = vrot.slane %v7960_v42, 5  ;;  %v7964_v58 = vshrl.u32 %v7693_v37, 16  ;;  %v7934_v34 = vrot.slane %v7933_v25, 4  ;;  %8126 = vrot.lane.b32.xlu0 %v7915_v38, %s11422_s10 }
 0x377   : > { %v14854_v57 = vld [vmem:[#allocation2 + $0x98] sm:$0x1]  ;;  %v6786_v14 = vld [vmem:[#allocation2 + $0x5c] sm:$0x1]  ;;  %v10253_v49 = vrot.slane %v7292_v8, 9  ;;  %v7970_v46 = vshll.u32 %v7694_v61, 16  ;;  %v7949_v20 = vsel %vm11630_vm10, %v7944_v31, %v7948_v35  ;;  %v6663_v41 = vpop.permute.xlu0 %6662 }
 0x378   : > { %v7951_v10 = vshrl.u32 %v7692_v30, 16  ;;  %v7295_v52 = vld [vmem:[#allocation2 + $0x90] sm:$0xe]  ;;  %v7619_v4 = vld [vmem:[#allocation2 + $0x94] sm:$0xf]  ;;  %v7966_v33 = vrot.slane %v7964_v58, 4  ;;  %v7434_v15 = vsel %vm12111_vm15, %v7432_v24, %v7433_v3  ;;  %v7939_v27 = vsel %vm11630_vm10, %v7934_v34, %v14828_v16 }
 0x379   : > { %v7954_v5 = vshll.u32 %v7692_v30, 16  ;;  %v7437_v0 = vrot.slane %v7296_v13, 5  ;;  %7651 = vst.msk [vmem:[#allocation3 + $0x1b0] sm:$0xf] %vm197_vm0, %v7619_v4  ;;  %v7618_v32 = vld [vmem:[#allocation2 + $0x90] sm:$0xf]  ;;  %v14869_v12 = vsel %vm12111_vm15, %v10253_v49, %v7430_v23  ;;  %8132 = vrot.lane.b32.xlu1 %v7949_v20, %s11422_s10  ;;  %v6665_v19 = vpop.permute.xlu1 %6664 }
 0x37a   : > { %v7953_v29 = vrot.slane %v7951_v10, 4  ;;  %v6329_v1 = vld [vmem:[#allocation2 + $0x6c] sm:$0xe]  ;;  %v6330_v47 = vld [vmem:[#allocation2 + $0x70] sm:$0xf]  ;;  %v7967_v63 = vor.u32 %v7966_v33, %v14852_v50  ;;  %v7440_v45 = vrot.slane %v14854_v57, 5  ;;  %7506 = vrot.lane.b32.xlu0 %v7424_v6, %s11422_s10 }
 0x37b   : > { %7650 = vst.msk [vmem:[#allocation3 + $0x19c] sm:$0xf] %vm197_vm0, %v7618_v32  ;;  %v7956_v53 = vrot.slane %v7954_v5, 5  ;;  %v6968_v26 = vshll.u32 %v6785_v17, 16  ;;  %v7696_v18 = vld [vmem:[#allocation2 + $0xa0] sm:$0xf] }
 0x37c   : > { %8199 = vst.msk [vmem:[#allocation3 + $0xc0] sm:$0xf] %vm308_vm9, %v8113_v22  ;;  %v7972_v56 = vrot.slane %v7970_v46, 5  ;;  %v6972_v7 = vshrl.u32 %v6785_v17, 16  ;;  %v6978_v44 = vshll.u32 %v6786_v14, 16  ;;  %v7439_v2 = vrot.slane %v7437_v0, 4 }
 0x37d   : > { %v14878_v54 = vld [vmem:[#allocation2 + $0xa4] sm:$0x1]  ;;  %v7957_v40 = vor.u32 %v7956_v53, %v7953_v29  ;;  %v10254_v43 = vrot.slane %v7295_v52, 9  ;;  %v14882_v37 = vrot.slane %v6968_v26, 5  ;;  %v7695_v28 = vld [vmem:[#allocation2 + $0x9c] sm:$0xf]  ;;  %7512 = vrot.lane.b32.xlu1 %v7434_v15, %s11422_s10  ;;  %v6197_v49 = vpop.permute.xlu1 %6196  ;;  %v6195_v53 = vpop.permute.xlu0 %6194 }
 0x37e   : > { %8198 = vst.msk [vmem:[#allocation3 + $0xac] sm:$0xf] %vm308_vm9, %v8111_v9  ;;  %v6974_v39 = vrot.slane %v6972_v7, 4  ;;  %v10236_v16 = vrot.slane %v6329_v1, 9  ;;  %v6463_v55 = vrot.slane %v6330_v47, 5  ;;  %v7984_v11 = vshll.u32 %v7696_v18, 16  ;;  %8130 = vrot.lane.b32.xlu0 %v7939_v27, %s11422_s10 }
 0x37f   : > { %v6331_v36 = vld [vmem:[#allocation2 + $0x74] sm:$0x1]  ;;  %v7968_v60 = vrot.slane %v7967_v63, 4  ;;  %v14887_v59 = vsel %vm12111_vm15, %v10254_v43, %v7437_v0  ;;  %v6980_v23 = vrot.slane %v6978_v44, 5  ;;  %v7988_v8 = vshrl.u32 %v7696_v18, 16 }
 0x380   : > { %v14889_v38 = vld [vmem:[#allocation2 + $0xa0] sm:$0xf]  ;;  %6747 = vst.msk [vmem:[#allocation3 + $0x108] sm:$0xf] %vm308_vm9, %v6665_v19  ;;  %v6975_v21 = vor.u32 %v6974_v39, %v14882_v37  ;;  %v6464_v31 = vsel %vm12111_vm15, %v10236_v16, %v6463_v55  ;;  %v14895_v61 = vrot.slane %v7984_v11, 5  ;;  %v7975_v42 = vshrl.u32 %v7695_v28, 16 }
 0x381   : > { %v7621_v30 = vld [vmem:[#allocation2 + $0xa0] sm:$0xf]  ;;  %v7620_v25 = vld [vmem:[#allocation2 + $0x9c] sm:$0xf]  ;;  %v7958_v48 = vrot.slane %v7957_v40, 4  ;;  %v7990_v24 = vrot.slane %v7988_v8, 4  ;;  %v7441_v46 = vsel %vm12111_vm15, %v7439_v2, %v7440_v45  ;;  %v7973_v33 = vsel %vm11630_vm10, %v7968_v60, %v7972_v56  ;;  %v8109_v56 = vpop.permute.xlu1 %8108 }
 0x382   : > { %6560 = vst.msk [vmem:[#allocation3 + $0x16c] sm:$0xf] %vm197_vm0, %v6464_v31  ;;  %v7994_v13 = vshll.u32 %v14878_v54, 16  ;;  %v7978_v17 = vshll.u32 %v7695_v28, 16  ;;  %v6784_v35 = vld [vmem:[#allocation2 + $0x54] sm:$0xf]  ;;  %7510 = vrot.lane.b32.xlu0 %v14869_v12, %s11422_s10  ;;  %8136 = vrot.lane.b32.xlu1 %v7973_v33, %s11422_s10 }
 0x383   : > { %7653 = vst.msk [vmem:[#allocation3 + $0x1d8] sm:$0xf] %vm197_vm0, %v7621_v30  ;;  %7652 = vst.msk [vmem:[#allocation3 + $0x1c4] sm:$0xf] %vm197_vm0, %v7620_v25  ;;  %v6976_v3 = vrot.slane %v6975_v21, 4  ;;  %v7977_v58 = vrot.slane %v7975_v42, 4  ;;  %v7991_v10 = vor.u32 %v7990_v24, %v14895_v61  ;;  %v7963_v29 = vsel %vm11630_vm10, %v7958_v48, %v14852_v50  ;;  %v8107_v25 = vpop.permute.xlu0 %8106 }
 0x384   : > { %6746 = vst.msk [vmem:[#allocation3 + $0xf4] sm:$0xf] %vm308_vm9, %v6663_v41  ;;  %v6465_v57 = vrot.slane %v6463_v55, 4  ;;  %v6466_v14 = vrot.slane %v6331_v36, 5  ;;  %v7300_v34 = vld [vmem:[#allocation2 + $0xa4] sm:$0x1] }
 0x385   : > { %v7980_v52 = vrot.slane %v7978_v17, 5  ;;  %v7444_v4 = vrot.slane %v14889_v38, 5  ;;  %v7699_v6 = vld [vmem:[#allocation2 + $0xac] sm:$0xf]  ;;  %6281 = vst.msk [vmem:[#allocation3 + $0xdc] sm:$0xf] %vm308_vm9, %v6197_v49  ;;  %v6981_v5 = vsel %vm11630_vm10, %v6976_v3, %v6980_v23  ;;  %v7497_v41 = vpop.permute.xlu1 %7496 }
 0x386   : > { %v6467_v0 = vsel %vm12111_vm15, %v6465_v57, %v6466_v14  ;;  %v7298_v32 = vld [vmem:[#allocation2 + $0x9c] sm:$0xe]  ;;  %v6959_v20 = vshrl.u32 %v6784_v35, 16  ;;  %v7700_v15 = vld [vmem:[#allocation2 + $0xb0] sm:$0x1]  ;;  %v7992_v1 = vrot.slane %v7991_v10, 4  ;;  %8134 = vrot.lane.b32.xlu0 %v7963_v29, %s11422_s10  ;;  %7516 = vrot.lane.b32.xlu1 %v7441_v46, %s11422_s10 }
 0x387   : > { %7243 = vst.msk [vmem:[#allocation3 + $0x10c] sm:$0xf] %vm197_vm0, %v6981_v5  ;;  %v7996_v47 = vrot.slane %v7994_v13, 5  ;;  %6561 = vst.msk [vmem:[#allocation3 + $0x180] sm:$0xf] %vm197_vm0, %v6467_v0  ;;  %v6962_v22 = vshll.u32 %v6784_v35, 16  ;;  %v7981_v45 = vor.u32 %v7980_v52, %v7977_v58 }
 0x388   : > { %v7698_v63 = vld [vmem:[#allocation2 + $0xa8] sm:$0xf]  ;;  %v6961_v26 = vrot.slane %v6959_v20, 4  ;;  %v8008_v18 = vshll.u32 %v7699_v6, 16  ;;  %v8012_v27 = vshrl.u32 %v7699_v6, 16  ;;  %v7446_v7 = vrot.slane %v7444_v4, 4 }
 0x389   : > { %v14923_v12 = vld [vmem:[#allocation2 + $0xac] sm:$0xf]  ;;  %6280 = vst.msk [vmem:[#allocation3 + $0xc8] sm:$0xf] %vm308_vm9, %v6195_v53  ;;  %v7447_v50 = vrot.slane %v7300_v34, 5  ;;  %v10255_v44 = vrot.slane %v7298_v32, 9  ;;  %v7997_v8 = vsel %vm11630_vm10, %v7992_v1, %v7996_v47  ;;  %v6677_v47 = vpop.permute.xlu1 %6676 }
 0x38a   : > { %v6964_v54 = vrot.slane %v6962_v22, 5  ;;  %v14926_v9 = vld [vmem:[#allocation2 + $0xb0] sm:$0x1]  ;;  %8197 = vst.msk [vmem:[#allocation3 + $0x98] sm:$0xf] %vm308_vm9, %v8109_v56  ;;  %v14929_v40 = vrot.slane %v8008_v18, 5  ;;  %7514 = vrot.lane.b32.xlu0 %v14887_v59, %s11422_s10  ;;  %8140 = vrot.lane.b32.xlu1 %v7997_v8, %s11422_s10 }
 0x38b   : > { %v8014_v2 = vrot.slane %v8012_v27, 4  ;;  %v8018_v43 = vshll.u32 %v7700_v15, 16  ;;  %v7999_v28 = vshrl.u32 %v7698_v63, 16  ;;  %v14931_v39 = vld [vmem:[#allocation2 + $0xa8] sm:$0xe]  ;;  %v14937_v55 = vsel %vm12111_vm15, %v10255_v44, %v7444_v4  ;;  %v14964_v52 = vld [vmem:[#allocation3 + $0x104] sm:$0xff] }
 0x38c   : > { %v6327_v16 = vld [vmem:[#allocation2 + $0x64] sm:$0xf]  ;;  %v6965_v11 = vor.u32 %v6964_v54, %v6961_v26  ;;  %v8002_v36 = vshll.u32 %v7698_v63, 16  ;;  %v7451_v19 = vrot.slane %v14923_v12, 5  ;;  %v6328_v60 = vld [vmem:[#allocation2 + $0x68] sm:$0x1]  ;;  %v7448_v24 = vsel %vm12111_vm15, %v7446_v7, %v7447_v50 }
 0x38d   : > { %v6326_v23 = vld [vmem:[#allocation2 + $0x60] sm:$0xe]  ;;  %v7982_v38 = vrot.slane %v7981_v45, 4  ;;  %v8015_v21 = vor.u32 %v8014_v2, %v14929_v40  ;;  %v8001_v31 = vrot.slane %v7999_v28, 4  ;;  %v7702_v42 = vld [vmem:[#allocation2 + $0xb8] sm:$0xf] }
 0x38e   : > { %v7623_v30 = vld [vmem:[#allocation2 + $0xac] sm:$0xf]  ;;  %v8527_v48 = vld [vmem:[#allocation3 + $0xdc] sm:$0xff]  ;;  %v6966_v13 = vrot.slane %v6965_v11, 4  ;;  %v14945_v17 = vrot.slane %v8018_v43, 5  ;;  %v8004_v35 = vrot.slane %v8002_v36, 5  ;;  %7520 = vrot.lane.b32.xlu1 %v7448_v24, %s11422_s10 }
 0x38f   : > { %v14947_v3 = vld [vmem:[#allocation2 + $0xbc] sm:$0x1]  ;;  %v14949_v58 = vld [vmem:[#allocation2 + $0xb4] sm:$0xf]  ;;  %7655 = vst.msk [vmem:[#allocation3 + $0x200] sm:$0xf] %vm197_vm0, %v7623_v30  ;;  %v7987_v59 = vsel %vm11630_vm10, %v7982_v38, %v14895_v61 }
 0x390   : > { %8196 = vst.msk [vmem:[#allocation3 + $0x84] sm:$0xf] %vm308_vm9, %v8107_v25  ;;  %7579 = vst.msk [vmem:[#allocation3 + $0x10c] sm:$0xf] %vm308_vm9, %v7497_v41  ;;  %v14954_v57 = vrot.slane %v8015_v21, 4  ;;  %v7453_v14 = vrot.slane %v7451_v19, 4  ;;  %v6971_v4 = vsel %vm11630_vm10, %v6966_v13, %v14882_v37  ;;  %v8005_v6 = vor.u32 %v8004_v35, %v8001_v31  ;;  %v6675_v37 = vpop.permute.xlu0 %6674  ;;  %8138 = vrot.lane.b32.xlu0 %v7987_v59, %s11422_s10  ;;  %v6209_v25 = vpop.permute.xlu1 %6208 }
 0x391   : > { %v7454_v34 = vrot.slane %v14926_v9, 5  ;;  %v6456_v49 = vrot.slane %v6327_v16, 5  ;;  %v7622_v46 = vld [vmem:[#allocation2 + $0xa8] sm:$0xf]  ;;  %v10256_v33 = vrot.slane %v14931_v39, 9  ;;  %v10235_v5 = vrot.slane %v6326_v23, 9 }
 0x392   : > { %v14962_v10 = vld [vmem:[#allocation3 + $0xf0] sm:$0xff]  ;;  %v14970_v0 = vld [vmem:[#allocation2 + $0xb8] sm:$0xf]  ;;  %7654 = vst.msk [vmem:[#allocation3 + $0x1ec] sm:$0xf] %vm197_vm0, %v7622_v46  ;;  %v8524_v32 = vld [vmem:[#allocation3 + $0xc8] sm:$0xff]  ;;  %v8021_v36 = vsel %vm11630_vm10, %v14954_v57, %v14945_v17 }
 0x393   : > { %v11271_v20 = vld [vmem:[#allocation3 + $0xcc] ss:$20 sps:$4 sm:$0xff]   ;;  %7242 = vst.msk [vmem:[#allocation3 + $0xf8] sm:$0xf] %vm197_vm0, %v6971_v4  ;;  %v6458_v15 = vrot.slane %v6456_v49, 4  ;;  %v6459_v29 = vrot.slane %v6328_v60, 5  ;;  %v10301_v22 = vcombine.low %v8524_v32, %v8527_v48  ;;  %v6457_v45 = vsel %vm12111_vm15, %v10235_v5, %v6456_v49  ;;  %8144 = vrot.lane.b32.xlu1 %v8021_v36, %s11422_s10 }
 0x394   : > { %v8032_v1 = vshll.u32 %v7702_v42, 16  ;;  %v11273_v63 = vld [vmem:[#allocation3 + $0xf4] ss:$20 sps:$4 sm:$0xff]   ;;  %v14977_v53 = vrot.slane %v8005_v6, 4  ;;  %v8036_v26 = vshrl.u32 %v7702_v42, 16  ;;  %9402 = vmatprep.mubr.bf16.mxu1 %v11271_v20  ;;  %v8042_v7 = vshll.u32 %v14947_v3, 16  ;;  %v6207_v31 = vpop.permute.xlu0 %6206  ;;  %7518 = vrot.lane.b32.xlu0 %v14937_v55, %s11422_s10  ;;  %v8121_v32 = vpop.permute.xlu1 %8120 }
 0x395   : > { %v14981_v18 = vld [vmem:[#allocation2 + $0xbc] sm:$0x1]  ;;  %v7705_v61 = vld [vmem:[#allocation2 + $0xc4] sm:$0xf]  ;;  %6752 = vst.msk [vmem:[#allocation3 + $0x16c] sm:$0xf] %vm308_vm9, %v6675_v37  ;;  %v6460_v27 = vsel %vm12111_vm15, %v6458_v15, %v6459_v29  ;;  %9403 = vmatmul.mubr.bf16.gmra.mxu1 %v10301_v22  ;;  %v10306_v2 = vcombine.low %v14962_v10, %v14964_v52  ;;  %v7455_v60 = vsel %vm12111_vm15, %v7453_v14, %v7454_v34 }
 0x396   : > { %6753 = vst.msk [vmem:[#allocation3 + $0x180] sm:$0xf] %vm308_vm9, %v6677_v47  ;;  %v14988_v56 = vrot.slane %v8032_v1, 5  ;;  %v8023_v50 = vshrl.u32 %v14949_v58, 16  ;;  %v7304_v44 = vld [vmem:[#allocation2 + $0xb4] sm:$0xe]  ;;  %9410 = vmatprep.mubr.bf16.mxu1 %v11273_v63  ;;  %v15012_v23 = vsel %vm12111_vm15, %v10256_v33, %v7451_v19  ;;  %v8011_v41 = vsel %vm11630_vm10, %v14977_v53, %v14929_v40 }
 0x397   : > { %6558 = vst.msk [vmem:[#allocation3 + $0x144] sm:$0xf] %vm197_vm0, %v6457_v45  ;;  %v7625_v54 = vld [vmem:[#allocation2 + $0xb8] sm:$0xf]  ;;  %v8516_v9 = vld [vmem:[#allocation3 + $0x94] sm:$0xff]  ;;  %v8038_v43 = vrot.slane %v8036_v26, 4  ;;  %7524 = vrot.lane.b32.xlu1 %v7455_v60, %s11422_s10 }
 0x398   : > { %6559 = vst.msk [vmem:[#allocation3 + $0x158] sm:$0xf] %vm197_vm0, %v6460_v27  ;;  %v8026_v28 = vshll.u32 %v14949_v58, 16  ;;  %v7458_v39 = vrot.slane %v14970_v0, 5  ;;  %v14998_v16 = vld [vmem:[#allocation2 + $0xc8] sm:$0x1]  ;;  %v7495_v59 = vpop.permute.xlu0 %7494  ;;  %8142 = vrot.lane.b32.xlu0 %v8011_v41, %s11422_s10 }
 0x399   : > { %7657 = vst.msk [vmem:[#allocation3 + $0x228] sm:$0xf] %vm197_vm0, %v7625_v54  ;;  %v7624_v11 = vld [vmem:[#allocation2 + $0xb4] sm:$0xf]  ;;  %v8025_v8 = vrot.slane %v8023_v50, 4  ;;  %v8513_v42 = vld [vmem:[#allocation3 + $0x80] sm:$0xff]  ;;  %v8039_v12 = vor.u32 %v8038_v43, %v14988_v56 }
 0x39a   : > { %v7704_v38 = vld [vmem:[#allocation2 + $0xc0] sm:$0xf]  ;;  %v15014_v21 = vld [vmem:[#allocation2 + $0x88] sm:$0xf]  ;;  %7656 = vst.msk [vmem:[#allocation3 + $0x214] sm:$0xf] %vm197_vm0, %v7624_v11  ;;  %v10293_v13 = vcombine.low %v8513_v42, %v8516_v9 }
 0x39b   : > { %v11275_v30 = vld [vmem:[#allocation3 + $0x84] ss:$20 sps:$4 sm:$0xff]   ;;  %v8028_v48 = vrot.slane %v8026_v28, 5  ;;  %v8056_v19 = vshll.u32 %v7705_v61, 16  ;;  %v6335_v24 = vld [vmem:[#allocation2 + $0x84] sm:$0xe]  ;;  %v6673_v28 = vpop.permute.xlu1 %6672 }
 0x39c   : > { %6286 = vst.msk [vmem:[#allocation3 + $0x140] sm:$0xf] %vm308_vm9, %v6207_v31  ;;  %6287 = vst.msk [vmem:[#allocation3 + $0x154] sm:$0xf] %vm308_vm9, %v6209_v25  ;;  %v15024_v17 = vrot.slane %v8042_v7, 5  ;;  %v7461_v35 = vrot.slane %v14981_v18, 5  ;;  %9547 = vmatprep.mubr.bf16.mxu0 %v11275_v30  ;;  %v8119_v43 = vpop.permute.xlu0 %8118  ;;  %7522 = vrot.lane.b32.xlu0 %v15012_v23, %s11422_s10 }
 0x39d   : > { %v8060_v3 = vshrl.u32 %v7705_v61, 16  ;;  %v6337_v58 = vld [vmem:[#allocation2 + $0x8c] sm:$0x1]  ;;  %v15027_v57 = vld [vmem:[#allocation2 + $0xc4] sm:$0xf]  ;;  %v8029_v14 = vor.u32 %v8028_v48, %v8025_v8  ;;  %v7460_v34 = vrot.slane %v7458_v39, 4  ;;  %9548 = vmatmul.mubr.bf16.gmra.mxu0 %v10293_v13  ;;  %9411 = vmatmul.mubr.bf16.gmra.mxu1 %v10306_v2 }
 0x39e   : > { %v11279_v40 = vld [vmem:[#allocation3 + $0xac] ss:$20 sps:$4 sm:$0xff]   ;;  %v10257_v49 = vrot.slane %v7304_v44, 9  ;;  %v15031_v46 = vrot.slane %v8056_v19, 5  ;;  %v8066_v6 = vshll.u32 %v14998_v16, 16  ;;  %v8047_v33 = vshrl.u32 %v7704_v38, 16 }
 0x39f   : > { %v8062_v4 = vrot.slane %v8060_v3, 4  ;;  %v8050_v5 = vshll.u32 %v7704_v38, 16  ;;  %v7708_v0 = vld [vmem:[#allocation2 + $0xd0] sm:$0xf]  ;;  %9555 = vmatprep.mubr.bf16.mxu0 %v11279_v40  ;;  %v8040_v55 = vrot.slane %v8039_v12, 4  ;;  %v15035_v20 = vrot.slane %v8029_v14, 4  ;;  %v6205_v40 = vpop.permute.xlu1 %6204 }
 0x3a0   : > { %v15039_v15 = vsel %vm12111_vm15, %v10257_v49, %v7458_v39  ;;  %v6477_v29 = vrot.slane %v15014_v21, 5  ;;  %v15042_v1 = vld [vmem:[#allocation2 + $0xc8] sm:$0x1]  ;;  %v15044_v37 = vld [vmem:[#allocation2 + $0xc0] sm:$0xe]  ;;  %v8049_v63 = vrot.slane %v8047_v33, 4  ;;  %v15055_v18 = vsel %vm12111_vm15, %v7460_v34, %v7461_v35 }
 0x3a1   : > { %v7709_v47 = vld [vmem:[#allocation2 + $0xd4] sm:$0x1]  ;;  %7578 = vst.msk [vmem:[#allocation3 + $0xf8] sm:$0xf] %vm308_vm9, %v7495_v59  ;;  %8203 = vst.msk [vmem:[#allocation3 + $0x110] sm:$0xf] %vm308_vm9, %v8121_v32  ;;  %v8063_v22 = vor.u32 %v8062_v4, %v15031_v46  ;;  %v8045_v39 = vsel %vm11630_vm10, %v8040_v55, %v15024_v17  ;;  %v8035_v31 = vsel %vm11630_vm10, %v15035_v20, %v14988_v56 }
 0x3a2   : > { %v8052_v53 = vrot.slane %v8050_v5, 5  ;;  %v10238_v45 = vrot.slane %v6335_v24, 9  ;;  %v7627_v26 = vld [vmem:[#allocation2 + $0xc4] sm:$0xf]  ;;  %v6479_v61 = vrot.slane %v6477_v29, 4  ;;  %v6480_v27 = vrot.slane %v6337_v58, 5  ;;  %8148 = vrot.lane.b32.xlu1 %v8045_v39, %s11422_s10  ;;  %v6671_v58 = vpop.permute.xlu0 %6670  ;;  %8146 = vrot.lane.b32.xlu0 %v8035_v31, %s11422_s10 }
 0x3a3   : > { %v7465_v7 = vrot.slane %v15027_v57, 5  ;;  %7659 = vst.msk [vmem:[#allocation3 + $0x250] sm:$0xf] %vm197_vm0, %v7627_v26  ;;  %v7626_v50 = vld [vmem:[#allocation2 + $0xc0] sm:$0xf]  ;;  %v15060_v44 = vrot.slane %v8063_v22, 4 }
 0x3a4   : > { %v15062_v54 = vrot.slane %v8066_v6, 5  ;;  %v8053_v9 = vor.u32 %v8052_v53, %v8049_v63  ;;  %v6478_v10 = vsel %vm12111_vm15, %v10238_v45, %v6477_v29  ;;  %v7707_v52 = vld [vmem:[#allocation2 + $0xcc] sm:$0xf]  ;;  %v6333_v2 = vld [vmem:[#allocation2 + $0x7c] sm:$0xf]  ;;  %v6481_v16 = vsel %vm12111_vm15, %v6479_v61, %v6480_v27 }
 0x3a5   : > { %7658 = vst.msk [vmem:[#allocation3 + $0x23c] sm:$0xf] %vm197_vm0, %v7626_v50  ;;  %6564 = vst.msk [vmem:[#allocation3 + $0x1bc] sm:$0xf] %vm197_vm0, %v6478_v10  ;;  %v8080_v11 = vshll.u32 %v7708_v0, 16  ;;  %v8084_v36 = vshrl.u32 %v7708_v0, 16  ;;  %v8117_v50 = vpop.permute.xlu1 %8116 }
 0x3a6   : > { %v6334_v60 = vld [vmem:[#allocation2 + $0x80] sm:$0x1]  ;;  %v6332_v8 = vld [vmem:[#allocation2 + $0x78] sm:$0xe]  ;;  %8202 = vst.msk [vmem:[#allocation3 + $0xfc] sm:$0xf] %vm308_vm9, %v8119_v43  ;;  %v8069_v13 = vsel %vm11630_vm10, %v15060_v44, %v15062_v54  ;;  %7528 = vrot.lane.b32.xlu1 %v15055_v18, %s11422_s10  ;;  %v6203_v27 = vpop.permute.xlu0 %6202  ;;  %7526 = vrot.lane.b32.xlu0 %v15039_v15, %s11422_s10 }
 0x3a7   : > { %v6342_v38 = vld [vmem:[#allocation2 + $0xa0] sm:$0xf]  ;;  %6751 = vst.msk [vmem:[#allocation3 + $0x158] sm:$0xf] %vm308_vm9, %v6673_v28  ;;  %v7468_v42 = vrot.slane %v15042_v1, 5  ;;  %v10258_v30 = vrot.slane %v15044_v37, 9 }
 0x3a8   : > { %v11277_v21 = vld [vmem:[#allocation3 + $0xa8] ss:$20 sps:$4 sm:$0xff]   ;;  %6565 = vst.msk [vmem:[#allocation3 + $0x1d0] sm:$0xf] %vm197_vm0, %v6481_v16  ;;  %v8090_v25 = vshll.u32 %v7709_v47, 16  ;;  %v15086_v12 = vrot.slane %v7465_v7, 4 }
 0x3a9   : > { %v6343_v41 = vld [vmem:[#allocation2 + $0xa4] sm:$0x1]  ;;  %v15088_v48 = vrot.slane %v8080_v11, 5  ;;  %v8086_v19 = vrot.slane %v8084_v36, 4  ;;  %v8071_v24 = vshrl.u32 %v7707_v52, 16  ;;  %9556 = vmatmul.mubr.bf16.gmra.mxu0 %v11277_v21  ;;  %v15095_v17 = vrot.slane %v8053_v9, 4  ;;  %v6685_v1 = vpop.permute.xlu1 %6684 }
 0x3aa   : > { %v6341_v56 = vld [vmem:[#allocation2 + $0x9c] sm:$0xe]  ;;  %v8074_v23 = vshll.u32 %v7707_v52, 16  ;;  %v6470_v35 = vrot.slane %v6333_v2, 5  ;;  %v6339_v3 = vld [vmem:[#allocation2 + $0x94] sm:$0xf]  ;;  %v15121_v10 = vsel %vm12111_vm15, %v10258_v30, %v7465_v7  ;;  %8152 = vrot.lane.b32.xlu1 %v8069_v13, %s11422_s10  ;;  %v7469_v15 = vsel %vm12111_vm15, %v15086_v12, %v7468_v42  ;;  %v8115_v30 = vpop.permute.xlu0 %8114 }
 0x3ab   : > { %v8087_v14 = vor.u32 %v8086_v19, %v15088_v48  ;;  %v15098_v34 = vrot.slane %v8090_v25, 5  ;;  %v8073_v49 = vrot.slane %v8071_v24, 4  ;;  %v10237_v4 = vrot.slane %v6332_v8, 9  ;;  %v6340_v6 = vld [vmem:[#allocation2 + $0x98] sm:$0x1] }
 0x3ac   : > { %6750 = vst.msk [vmem:[#allocation3 + $0x144] sm:$0xf] %vm308_vm9, %v6671_v58  ;;  %6285 = vst.msk [vmem:[#allocation3 + $0x12c] sm:$0xf] %vm308_vm9, %v6205_v40  ;;  %v8076_v33 = vrot.slane %v8074_v23, 5  ;;  %v6472_v5 = vrot.slane %v6470_v35, 4  ;;  %v8059_v25 = vsel %vm11630_vm10, %v15095_v17, %v15031_v46 }
 0x3ad   : > { %v6473_v0 = vrot.slane %v6334_v60, 5  ;;  %v6491_v59 = vrot.slane %v6342_v38, 5  ;;  %v6338_v32 = vld [vmem:[#allocation2 + $0x90] sm:$0xe]  ;;  %v6471_v55 = vsel %vm12111_vm15, %v10237_v4, %v6470_v35  ;;  %v6494_v20 = vrot.slane %v6343_v41, 5  ;;  %8150 = vrot.lane.b32.xlu0 %v8059_v25, %s11422_s10 }
 0x3ae   : > { %v10240_v29 = vrot.slane %v6341_v56, 9  ;;  %v6484_v37 = vrot.slane %v6339_v3, 5  ;;  %v6788_v47 = vld [vmem:[#allocation2 + $0x64] sm:$0xf]  ;;  %v15107_v22 = vrot.slane %v8087_v14, 4  ;;  %v8077_v63 = vor.u32 %v8076_v33, %v8073_v49  ;;  %7532 = vrot.lane.b32.xlu1 %v7469_v15, %s11422_s10 }
 0x3af   : > { %v6474_v53 = vsel %vm12111_vm15, %v6472_v5, %v6473_v0  ;;  %6562 = vst.msk [vmem:[#allocation3 + $0x194] sm:$0xf] %vm197_vm0, %v6471_v55  ;;  %v6493_v45 = vrot.slane %v6491_v59, 4  ;;  %v6789_v26 = vld [vmem:[#allocation2 + $0x68] sm:$0x1]  ;;  %v6487_v18 = vrot.slane %v6340_v6, 5  ;;  %v6683_v5 = vpop.permute.xlu0 %6682 }
 0x3b0   : > { %v6787_v61 = vld [vmem:[#allocation2 + $0x60] sm:$0xf]  ;;  %6563 = vst.msk [vmem:[#allocation3 + $0x1a8] sm:$0xf] %vm197_vm0, %v6474_v53  ;;  %v6492_v44 = vsel %vm12111_vm15, %v10240_v29, %v6491_v59  ;;  %v6486_v54 = vrot.slane %v6484_v37, 4  ;;  %v10239_v9 = vrot.slane %v6338_v32, 9  ;;  %v8093_v42 = vsel %vm11630_vm10, %v15107_v22, %v15098_v34  ;;  %v6217_v32 = vpop.permute.xlu1 %6216 }
 0x3b1   : > { %6284 = vst.msk [vmem:[#allocation3 + $0x118] sm:$0xf] %vm308_vm9, %v6203_v27  ;;  %8201 = vst.msk [vmem:[#allocation3 + $0xe8] sm:$0xf] %vm308_vm9, %v8117_v50  ;;  %v6495_v52 = vsel %vm12111_vm15, %v6493_v45, %v6494_v20  ;;  %v6992_v2 = vshll.u32 %v6788_v47, 16  ;;  %v6996_v43 = vshrl.u32 %v6788_v47, 16  ;;  %7530 = vrot.lane.b32.xlu0 %v15121_v10, %s11422_s10 }
 0x3b2   : > { %6568 = vst.msk [vmem:[#allocation3 + $0x20c] sm:$0xf] %vm197_vm0, %v6492_v44  ;;  %v6345_v28 = vld [vmem:[#allocation2 + $0xac] sm:$0xf]  ;;  %v6346_v39 = vld [vmem:[#allocation2 + $0xb0] sm:$0x1]  ;;  %v6488_v57 = vsel %vm12111_vm15, %v6486_v54, %v6487_v18  ;;  %v6485_v7 = vsel %vm12111_vm15, %v10239_v9, %v6484_v37  ;;  %8156 = vrot.lane.b32.xlu1 %v8093_v42, %s11422_s10 }
 0x3b3   : > { %6569 = vst.msk [vmem:[#allocation3 + $0x220] sm:$0xf] %vm197_vm0, %v6495_v52  ;;  %v7002_v16 = vshll.u32 %v6789_v26, 16  ;;  %v6983_v11 = vshrl.u32 %v6787_v61, 16  ;;  %v6344_v36 = vld [vmem:[#allocation2 + $0xa8] sm:$0xe] }
 0x3b4   : > { %v6348_v60 = vld [vmem:[#allocation2 + $0xb8] sm:$0xf]  ;;  %6567 = vst.msk [vmem:[#allocation3 + $0x1f8] sm:$0xf] %vm197_vm0, %v6488_v57  ;;  %6566 = vst.msk [vmem:[#allocation3 + $0x1e4] sm:$0xf] %vm197_vm0, %v6485_v7 }
 0x3b5   : > { %v15141_v8 = vrot.slane %v6992_v2, 5  ;;  %v6998_v38 = vrot.slane %v6996_v43, 4  ;;  %v6986_v21 = vshll.u32 %v6787_v61, 16  ;;  %v6349_v31 = vld [vmem:[#allocation2 + $0xbc] sm:$0x1]  ;;  %v15151_v41 = vrot.slane %v8077_v63, 4 }
 0x3b6   : > { %v6985_v12 = vrot.slane %v6983_v11, 4  ;;  %v6347_v19 = vld [vmem:[#allocation2 + $0xb4] sm:$0xe]  ;;  %8200 = vst.msk [vmem:[#allocation3 + $0xd4] sm:$0xf] %vm308_vm9, %v8115_v30  ;;  %v7004_v56 = vrot.slane %v7002_v16, 5  ;;  %v6681_v16 = vpop.permute.xlu1 %6680 }
 0x3b7   : > { %6757 = vst.msk [vmem:[#allocation3 + $0x1d0] sm:$0xf] %vm308_vm9, %v6685_v1  ;;  %v6999_v24 = vor.u32 %v6998_v38, %v15141_v8  ;;  %v6988_v13 = vrot.slane %v6986_v21, 5  ;;  %v6498_v23 = vrot.slane %v6345_v28, 5  ;;  %v6791_v46 = vld [vmem:[#allocation2 + $0x70] sm:$0xf]  ;;  %v8083_v55 = vsel %vm11630_vm10, %v15151_v41, %v15088_v48 }
 0x3b8   : > { %v8539_v17 = vld [vmem:[#allocation3 + $0x12c] sm:$0xff]  ;;  %v6501_v35 = vrot.slane %v6346_v39, 5  ;;  %v10241_v3 = vrot.slane %v6344_v36, 9  ;;  %v6505_v58 = vrot.slane %v6348_v60, 5  ;;  %v6508_v40 = vrot.slane %v6349_v31, 5  ;;  %v8536_v0 = vld [vmem:[#allocation3 + $0x118] sm:$0xff]  ;;  %v6215_v39 = vpop.permute.xlu0 %6214  ;;  %8154 = vrot.lane.b32.xlu0 %v8083_v55, %s11422_s10 }
 0x3b9   : > { %v6792_v14 = vld [vmem:[#allocation2 + $0x74] sm:$0x1]  ;;  %v7000_v34 = vrot.slane %v6999_v24, 4  ;;  %v6989_v49 = vor.u32 %v6988_v13, %v6985_v12  ;;  %v6500_v4 = vrot.slane %v6498_v23, 4  ;;  %v10242_v6 = vrot.slane %v6347_v19, 9  ;;  %v15166_v22 = vld [vmem:[#allocation3 + $0x140] sm:$0xff] }
 0x3ba   : > { %v6790_v33 = vld [vmem:[#allocation2 + $0x6c] sm:$0xf]  ;;  %v11282_v59 = vld [vmem:[#allocation3 + $0x11c] ss:$20 sps:$4 sm:$0xff]   ;;  %v6499_v20 = vsel %vm12111_vm15, %v10241_v3, %v6498_v23  ;;  %v6507_v29 = vrot.slane %v6505_v58, 4  ;;  %v7016_v37 = vshll.u32 %v6791_v46, 16  ;;  %v10311_v47 = vcombine.low %v8536_v0, %v8539_v17 }
 0x3bb   : > { %6756 = vst.msk [vmem:[#allocation3 + $0x1bc] sm:$0xf] %vm308_vm9, %v6683_v5  ;;  %6291 = vst.msk [vmem:[#allocation3 + $0x1a4] sm:$0xf] %vm308_vm9, %v6217_v32  ;;  %v15168_v63 = vld [vmem:[#allocation3 + $0x154] sm:$0xff]  ;;  %v7005_v53 = vsel %vm11630_vm10, %v7000_v34, %v7004_v56  ;;  %v6990_v45 = vrot.slane %v6989_v49, 4  ;;  %v6502_v48 = vsel %vm12111_vm15, %v6500_v4, %v6501_v35  ;;  %9418 = vmatprep.mubr.bf16.mxu1 %v11282_v59 }
 0x3bc   : > { %6570 = vst.msk [vmem:[#allocation3 + $0x234] sm:$0xf] %vm197_vm0, %v6499_v20  ;;  %v6794_v26 = vld [vmem:[#allocation2 + $0x7c] sm:$0xf]  ;;  %7245 = vst.msk [vmem:[#allocation3 + $0x134] sm:$0xf] %vm197_vm0, %v7005_v53  ;;  %v6509_v27 = vsel %vm12111_vm15, %v6507_v29, %v6508_v40  ;;  %v6506_v50 = vsel %vm12111_vm15, %v10242_v6, %v6505_v58  ;;  %9419 = vmatmul.mubr.bf16.gmra.mxu1 %v10311_v47  ;;  %v10316_v11 = vcombine.low %v15166_v22, %v15168_v63  ;;  %v6679_v23 = vpop.permute.xlu0 %6678 }
 0x3bd   : > { %v11284_v61 = vld [vmem:[#allocation3 + $0x144] ss:$20 sps:$4 sm:$0xff]   ;;  %6571 = vst.msk [vmem:[#allocation3 + $0x248] sm:$0xf] %vm197_vm0, %v6502_v48  ;;  %v15183_v44 = vrot.slane %v7016_v37, 5  ;;  %v7020_v54 = vshrl.u32 %v6791_v46, 16  ;;  %v6995_v10 = vsel %vm11630_vm10, %v6990_v45, %v15141_v8  ;;  %v6213_v46 = vpop.permute.xlu1 %6212 }
 0x3be   : > { %v6795_v18 = vld [vmem:[#allocation2 + $0x80] sm:$0x1]  ;;  %v15185_v9 = vld [vmem:[#allocation2 + $0x18] sm:$0xe]  ;;  %6573 = vst.msk [vmem:[#allocation3 + $0x270] sm:$0xf] %vm197_vm0, %v6509_v27  ;;  %9426 = vmatprep.mubr.bf16.mxu1 %v11284_v61 }
 0x3bf   : > { %6572 = vst.msk [vmem:[#allocation3 + $0x25c] sm:$0xf] %vm197_vm0, %v6506_v50  ;;  %v7026_v52 = vshll.u32 %v6792_v14, 16  ;;  %v7007_v2 = vshrl.u32 %v6790_v33, 16  ;;  %v7010_v43 = vshll.u32 %v6790_v33, 16  ;;  %v7022_v36 = vrot.slane %v7020_v54, 4 }
 0x3c0   : > { %v6793_v28 = vld [vmem:[#allocation2 + $0x78] sm:$0xf]  ;;  %v11286_v57 = vld [vmem:[#allocation3 + $0xd0] ss:$20 sps:$4 sm:$0xff]   ;;  %v11288_v7 = vld [vmem:[#allocation3 + $0xd4] ss:$20 sps:$4 sm:$0xff]   ;;  %v6211_v22 = vpop.permute.xlu0 %6210 }
 0x3c1   : > { %7244 = vst.msk [vmem:[#allocation3 + $0x120] sm:$0xf] %vm197_vm0, %v6995_v10  ;;  %v8223_v60 = vld [vmem:[#allocation2 + $0x1c] sm:$0xf]  ;;  %v7028_v15 = vrot.slane %v7026_v52, 5  ;;  %v7009_v8 = vrot.slane %v7007_v2, 4  ;;  %9563 = vmatprep.mubr.bf16.mxu0 %v11288_v7  ;;  %v7023_v25 = vor.u32 %v7022_v36, %v15183_v44  ;;  %v6693_v63 = vpop.permute.xlu1 %6692 }
 0x3c2   : > { %6290 = vst.msk [vmem:[#allocation3 + $0x190] sm:$0xf] %vm308_vm9, %v6215_v39  ;;  %6755 = vst.msk [vmem:[#allocation3 + $0x1a8] sm:$0xf] %vm308_vm9, %v6681_v16  ;;  %v7012_v38 = vrot.slane %v7010_v43, 5  ;;  %v7040_v21 = vshll.u32 %v6794_v26, 16  ;;  %9564 = vmatmul.mubr.bf16.gmra.mxu0 %v11286_v57 }
 0x3c3   : > { %v8224_v31 = vld [vmem:[#allocation2 + $0x20] sm:$0x1]  ;;  %v11291_v30 = vld [vmem:[#allocation3 + $0xfc] ss:$20 sps:$4 sm:$0xff]   ;;  %v7044_v1 = vshrl.u32 %v6794_v26, 16  ;;  %v7050_v42 = vshll.u32 %v6795_v18, 16 }
 0x3c4   : > { %v7031_v41 = vshrl.u32 %v6793_v28, 16  ;;  %v7013_v12 = vor.u32 %v7012_v38, %v7009_v8  ;;  %v15200_v19 = vrot.slane %v7040_v21, 5  ;;  %v7034_v24 = vshll.u32 %v6793_v28, 16  ;;  %v6797_v13 = vld [vmem:[#allocation2 + $0x88] sm:$0xf]  ;;  %9571 = vmatprep.mubr.bf16.mxu0 %v11291_v30  ;;  %9427 = vmatmul.mubr.bf16.gmra.mxu1 %v10316_v11  ;;  %v6691_v11 = vpop.permute.xlu0 %6690 }
 0x3c5   : > { %v10259_v56 = vrot.slane %v15185_v9, 9  ;;  %v7024_v17 = vrot.slane %v7023_v25, 4  ;;  %v7046_v35 = vrot.slane %v7044_v1, 4  ;;  %v7052_v3 = vrot.slane %v7050_v42, 5  ;;  %6754 = vst.msk [vmem:[#allocation3 + $0x194] sm:$0xf] %vm308_vm9, %v6679_v23  ;;  %v6225_v36 = vpop.permute.xlu1 %6224 }
 0x3c6   : > { %v7033_v58 = vrot.slane %v7031_v41, 4  ;;  %6289 = vst.msk [vmem:[#allocation3 + $0x17c] sm:$0xf] %vm308_vm9, %v6213_v46  ;;  %v7014_v40 = vrot.slane %v7013_v12, 4  ;;  %v7036_v14 = vrot.slane %v7034_v24, 5  ;;  %v8320_v34 = vrot.slane %v8223_v60, 5 }
 0x3c7   : > { %v8323_v49 = vrot.slane %v8224_v31, 5  ;;  %v6798_v4 = vld [vmem:[#allocation2 + $0x8c] sm:$0x1]  ;;  %v7029_v6 = vsel %vm11630_vm10, %v7024_v17, %v7028_v15  ;;  %v7047_v33 = vor.u32 %v7046_v35, %v15200_v19  ;;  %v7064_v5 = vshll.u32 %v6797_v13, 16  ;;  %v6796_v59 = vld [vmem:[#allocation2 + $0x84] sm:$0xf] }
 0x3c8   : > { %v7068_v0 = vshrl.u32 %v6797_v13, 16  ;;  %7247 = vst.msk [vmem:[#allocation3 + $0x15c] sm:$0xf] %vm197_vm0, %v7029_v6  ;;  %v7019_v32 = vsel %vm11630_vm10, %v7014_v40, %v15183_v44  ;;  %v7037_v55 = vor.u32 %v7036_v14, %v7033_v58  ;;  %v8321_v20 = vsel %vm12111_vm15, %v10259_v56, %v8320_v34  ;;  %v8225_v37 = vld [vmem:[#allocation2 + $0x24] sm:$0xe] }
 0x3c9   : > { %v8322_v29 = vrot.slane %v8320_v34, 4  ;;  %v8226_v47 = vld [vmem:[#allocation2 + $0x28] sm:$0xf]  ;;  %7246 = vst.msk [vmem:[#allocation3 + $0x148] sm:$0xf] %vm197_vm0, %v7019_v32  ;;  %v7048_v53 = vrot.slane %v7047_v33, 4  ;;  %v6223_v34 = vpop.permute.xlu0 %6222  ;;  %v6689_v6 = vpop.permute.xlu1 %6688 }
 0x3ca   : > { %8462 = vst.msk [vmem:[#allocation3 + $0x10] sm:$0xf] %vm197_vm0, %v8321_v20  ;;  %v15216_v45 = vrot.slane %v7064_v5, 5  ;;  %v7070_v48 = vrot.slane %v7068_v0, 4  ;;  %v7074_v26 = vshll.u32 %v6798_v4, 16  ;;  %v7038_v50 = vrot.slane %v7037_v55, 4 }
 0x3cb   : > { %v8227_v61 = vld [vmem:[#allocation2 + $0x2c] sm:$0x1]  ;;  %v11289_v27 = vld [vmem:[#allocation3 + $0xf8] ss:$20 sps:$4 sm:$0xff]   ;;  %6288 = vst.msk [vmem:[#allocation3 + $0x168] sm:$0xf] %vm308_vm9, %v6211_v22  ;;  %v8324_v44 = vsel %vm12111_vm15, %v8322_v29, %v8323_v49  ;;  %v7053_v9 = vsel %vm11630_vm10, %v7048_v53, %v7052_v3 }
 0x3cc   : > { %6761 = vst.msk [vmem:[#allocation3 + $0x220] sm:$0xf] %vm308_vm9, %v6693_v63  ;;  %v7055_v54 = vshrl.u32 %v6796_v59, 16  ;;  %v7058_v18 = vshll.u32 %v6796_v59, 16  ;;  %v7071_v10 = vor.u32 %v7070_v48, %v15216_v45  ;;  %v10260_v52 = vrot.slane %v8225_v37, 9  ;;  %9572 = vmatmul.mubr.bf16.gmra.mxu0 %v11289_v27 }
 0x3cd   : > { %8463 = vst.msk [vmem:[#allocation3 + $0x24] sm:$0xf] %vm197_vm0, %v8324_v44  ;;  %v8228_v2 = vld [vmem:[#allocation2 + $0x30] sm:$0xe]  ;;  %v8229_v43 = vld [vmem:[#allocation2 + $0x34] sm:$0xf]  ;;  %v7043_v28 = vsel %vm11630_vm10, %v7038_v50, %v15200_v19  ;;  %v6687_v44 = vpop.permute.xlu0 %6686 }
 0x3ce   : > { %7249 = vst.msk [vmem:[#allocation3 + $0x184] sm:$0xf] %vm197_vm0, %v7053_v9  ;;  %v7057_v39 = vrot.slane %v7055_v54, 4  ;;  %v7060_v57 = vrot.slane %v7058_v18, 5  ;;  %v8327_v7 = vrot.slane %v8226_v47, 5  ;;  %v7072_v60 = vrot.slane %v7071_v10, 4  ;;  %v6221_v54 = vpop.permute.xlu1 %6220 }
 0x3cf   : > { %v8230_v16 = vld [vmem:[#allocation2 + $0x38] sm:$0x1]  ;;  %7248 = vst.msk [vmem:[#allocation3 + $0x170] sm:$0xf] %vm197_vm0, %v7043_v28  ;;  %v7076_v15 = vrot.slane %v7074_v26, 5  ;;  %v8330_v30 = vrot.slane %v8227_v61, 5 }
 0x3d0   : > { %v6800_v8 = vld [vmem:[#allocation2 + $0x94] sm:$0xf]  ;;  %6760 = vst.msk [vmem:[#allocation3 + $0x20c] sm:$0xf] %vm308_vm9, %v6691_v11  ;;  %6295 = vst.msk [vmem:[#allocation3 + $0x1f4] sm:$0xf] %vm308_vm9, %v6225_v36  ;;  %v7061_v38 = vor.u32 %v7060_v57, %v7057_v39  ;;  %v8328_v21 = vsel %vm12111_vm15, %v10260_v52, %v8327_v7 }
 0x3d1   : > { %v8329_v31 = vrot.slane %v8327_v7, 4  ;;  %v6801_v25 = vld [vmem:[#allocation2 + $0x98] sm:$0x1]  ;;  %v6799_v1 = vld [vmem:[#allocation2 + $0x90] sm:$0xf]  ;;  %v7077_v41 = vsel %vm11630_vm10, %v7072_v60, %v7076_v15  ;;  %v10261_v12 = vrot.slane %v8228_v2, 9 }
 0x3d2   : > { %v8551_v42 = vld [vmem:[#allocation3 + $0x17c] sm:$0xff]  ;;  %8464 = vst.msk [vmem:[#allocation3 + $0x38] sm:$0xf] %vm197_vm0, %v8328_v21  ;;  %v8334_v19 = vrot.slane %v8229_v43, 5  ;;  %v8337_v24 = vrot.slane %v8230_v16, 5  ;;  %v7062_v46 = vrot.slane %v7061_v38, 4 }
 0x3d3   : > { %v8231_v56 = vld [vmem:[#allocation2 + $0x3c] sm:$0xe]  ;;  %v8232_v13 = vld [vmem:[#allocation2 + $0x40] sm:$0xf]  ;;  %v15238_v23 = vld [vmem:[#allocation2 + $0x44] sm:$0x1]  ;;  %v8331_v17 = vsel %vm12111_vm15, %v8329_v31, %v8330_v30 }
 0x3d4   : > { %7251 = vst.msk [vmem:[#allocation3 + $0x1ac] sm:$0xf] %vm197_vm0, %v7077_v41  ;;  %v7088_v35 = vshll.u32 %v6800_v8, 16  ;;  %v7092_v3 = vshrl.u32 %v6800_v8, 16  ;;  %v8234_v58 = vld [vmem:[#allocation2 + $0x48] sm:$0xe]  ;;  %v8335_v33 = vsel %vm12111_vm15, %v10261_v12, %v8334_v19  ;;  %v7067_v55 = vsel %vm11630_vm10, %v7062_v46, %v15216_v45  ;;  %v6219_v12 = vpop.permute.xlu0 %6218 }
 0x3d5   : > { %v8235_v40 = vld [vmem:[#allocation2 + $0x4c] sm:$0xf]  ;;  %v15243_v14 = vld [vmem:[#allocation2 + $0x50] sm:$0x1]  ;;  %v8548_v49 = vld [vmem:[#allocation3 + $0x168] sm:$0xff]  ;;  %v8336_v5 = vrot.slane %v8334_v19, 4  ;;  %v7501_v19 = vpop.permute.xlu1 %7500 }
 0x3d6   : > { %v11293_v4 = vld [vmem:[#allocation3 + $0x16c] ss:$20 sps:$4 sm:$0xff]   ;;  %8465 = vst.msk [vmem:[#allocation3 + $0x4c] sm:$0xf] %vm197_vm0, %v8331_v17  ;;  %v7098_v0 = vshll.u32 %v6801_v25, 16  ;;  %v7079_v59 = vshrl.u32 %v6799_v1, 16  ;;  %v10321_v32 = vcombine.low %v8548_v49, %v8551_v42 }
 0x3d7   : > { %6294 = vst.msk [vmem:[#allocation3 + $0x1e0] sm:$0xf] %vm308_vm9, %v6223_v34  ;;  %6759 = vst.msk [vmem:[#allocation3 + $0x1f8] sm:$0xf] %vm308_vm9, %v6689_v6  ;;  %v15254_v20 = vrot.slane %v7088_v35, 5  ;;  %v7094_v29 = vrot.slane %v7092_v3, 4  ;;  %9434 = vmatprep.mubr.bf16.mxu1 %v11293_v4  ;;  %v8338_v22 = vsel %vm12111_vm15, %v8336_v5, %v8337_v24 }
 0x3d8   : > { %8466 = vst.msk [vmem:[#allocation3 + $0x60] sm:$0xf] %vm197_vm0, %v8335_v33  ;;  %v6803_v37 = vld [vmem:[#allocation2 + $0xa0] sm:$0xf]  ;;  %7250 = vst.msk [vmem:[#allocation3 + $0x198] sm:$0xf] %vm197_vm0, %v7067_v55  ;;  %9435 = vmatmul.mubr.bf16.gmra.mxu1 %v10321_v32 }
 0x3d9   : > { %v11295_v47 = vld [vmem:[#allocation3 + $0x194] ss:$20 sps:$4 sm:$0xff]   ;;  %v7100_v63 = vrot.slane %v7098_v0, 5  ;;  %v7081_v53 = vrot.slane %v7079_v59, 4  ;;  %v7082_v48 = vshll.u32 %v6799_v1, 16  ;;  %v7095_v45 = vor.u32 %v7094_v29, %v15254_v20  ;;  %v7499_v0 = vpop.permute.xlu0 %7498  ;;  %v6233_v59 = vpop.permute.xlu1 %6232 }
 0x3da   : > { %8467 = vst.msk [vmem:[#allocation3 + $0x74] sm:$0xf] %vm197_vm0, %v8338_v22  ;;  %v10262_v26 = vrot.slane %v8231_v56, 9  ;;  %v8341_v61 = vrot.slane %v8232_v13, 5  ;;  %v8344_v27 = vrot.slane %v15238_v23, 5  ;;  %9442 = vmatprep.mubr.bf16.mxu1 %v11295_v47  ;;  %v10263_v9 = vrot.slane %v8234_v58, 9 }
 0x3db   : > { %v6804_v50 = vld [vmem:[#allocation2 + $0xa4] sm:$0x1]  ;;  %v7084_v18 = vrot.slane %v7082_v48, 5  ;;  %v8348_v10 = vrot.slane %v8235_v40, 5  ;;  %v8351_v52 = vrot.slane %v15243_v14, 5  ;;  %v7096_v39 = vrot.slane %v7095_v45, 4 }
 0x3dc   : > { %v6802_v2 = vld [vmem:[#allocation2 + $0x9c] sm:$0xf]  ;;  %v8237_v43 = vld [vmem:[#allocation2 + $0x54] sm:$0xe]  ;;  %v8238_v28 = vld [vmem:[#allocation2 + $0x58] sm:$0xf]  ;;  %v8342_v57 = vsel %vm12111_vm15, %v10262_v26, %v8341_v61 }
 0x3dd   : > { %6758 = vst.msk [vmem:[#allocation3 + $0x1e4] sm:$0xf] %vm308_vm9, %v6687_v44  ;;  %6293 = vst.msk [vmem:[#allocation3 + $0x1cc] sm:$0xf] %vm308_vm9, %v6221_v54  ;;  %v8343_v7 = vrot.slane %v8341_v61, 4  ;;  %v7112_v16 = vshll.u32 %v6803_v37, 16  ;;  %v7085_v60 = vor.u32 %v7084_v18, %v7081_v53  ;;  %v8349_v15 = vsel %vm12111_vm15, %v10263_v9, %v8348_v10  ;;  %v10731_v18 = vpop.f32.mrf.mxu1 }
 0x3de   : > { %v8554_v11 = vld [vmem:[#allocation3 + $0x190] sm:$0xff]  ;;  %v8557_v36 = vld [vmem:[#allocation3 + $0x1a4] sm:$0xff]  ;;  %8468 = vst.msk [vmem:[#allocation3 + $0x88] sm:$0xf] %vm197_vm0, %v8342_v57  ;;  %v8350_v8 = vrot.slane %v8348_v10, 4  ;;  %v7116_v38 = vshrl.u32 %v6803_v37, 16  ;;  %v7101_v31 = vsel %vm11630_vm10, %v7096_v39, %v7100_v63  ;;  %v6697_v39 = vpop.permute.xlu1 %6696 }
 0x3df   : > { %v8239_v21 = vld [vmem:[#allocation2 + $0x5c] sm:$0x1]  ;;  %v8345_v30 = vsel %vm12111_vm15, %v8343_v7, %v8344_v27  ;;  %8470 = vst.msk [vmem:[#allocation3 + $0xb0] sm:$0xf] %vm197_vm0, %v8349_v15  ;;  %v15275_v25 = vrot.slane %v7112_v16, 5  ;;  %v7122_v1 = vshll.u32 %v6804_v50, 16  ;;  %v10326_v46 = vcombine.low %v8554_v11, %v8557_v36  ;;  %v10732_v11 = vpop.f32.mrf.mxu1 }
 0x3e0   : > { %v8240_v42 = vld [vmem:[#allocation2 + $0x60] sm:$0xe]  ;;  %v8241_v41 = vld [vmem:[#allocation2 + $0x64] sm:$0xf]  ;;  %7253 = vst.msk [vmem:[#allocation3 + $0x1d4] sm:$0xf] %vm197_vm0, %v7101_v31  ;;  %v8352_v56 = vsel %vm12111_vm15, %v8350_v8, %v8351_v52  ;;  %v15313_v31 = vadd.f32 %v10732_v11, %v10731_v18 }
 0x3e1   : > { %v7086_v24 = vrot.slane %v7085_v60, 4  ;;  %8469 = vst.msk [vmem:[#allocation3 + $0x9c] sm:$0xf] %vm197_vm0, %v8345_v30  ;;  %v7118_v13 = vrot.slane %v7116_v38, 4  ;;  %v7103_v23 = vshrl.u32 %v6802_v2, 16  ;;  %v7106_v17 = vshll.u32 %v6802_v2, 16  ;;  %9443 = vmatmul.mubr.bf16.gmra.mxu1 %v10326_v46  ;;  %v6231_v2 = vpop.permute.xlu0 %6230 }
 0x3e2   : > { %6292 = vst.msk [vmem:[#allocation3 + $0x1b8] sm:$0xf] %vm308_vm9, %v6219_v12  ;;  %7581 = vst.msk [vmem:[#allocation3 + $0x134] sm:$0xf] %vm308_vm9, %v7501_v19  ;;  %v10264_v35 = vrot.slane %v8237_v43, 9  ;;  %v8355_v3 = vrot.slane %v8238_v28, 5 }
 0x3e3   : > { %8471 = vst.msk [vmem:[#allocation3 + $0xc4] sm:$0xf] %vm197_vm0, %v8352_v56  ;;  %v8242_v58 = vld [vmem:[#allocation2 + $0x68] sm:$0x1]  ;;  %v7091_v40 = vsel %vm11630_vm10, %v7086_v24, %v15254_v20  ;;  %v7119_v14 = vor.u32 %v7118_v13, %v15275_v25  ;;  %v7105_v34 = vrot.slane %v7103_v23, 4  ;;  %v7108_v4 = vrot.slane %v7106_v17, 5  ;;  %v6229_v56 = vpop.permute.xlu1 %6228 }
 0x3e4   : > { %v6806_v49 = vld [vmem:[#allocation2 + $0xac] sm:$0xf]  ;;  %7252 = vst.msk [vmem:[#allocation3 + $0x1c0] sm:$0xf] %vm197_vm0, %v7091_v40  ;;  %v8356_v6 = vsel %vm12111_vm15, %v10264_v35, %v8355_v3  ;;  %v8357_v33 = vrot.slane %v8355_v3, 4  ;;  %v8358_v5 = vrot.slane %v8239_v21, 5 }
 0x3e5   : > { %v7120_v32 = vrot.slane %v7119_v14, 4  ;;  %v7124_v55 = vrot.slane %v7122_v1, 5  ;;  %8472 = vst.msk [vmem:[#allocation3 + $0xd8] sm:$0xf] %vm197_vm0, %v8356_v6  ;;  %v10265_v20 = vrot.slane %v8240_v42, 9  ;;  %v8362_v29 = vrot.slane %v8241_v41, 5  ;;  %v10734_v41 = vpop.f32.mrf.mxu1  ;;  %v6695_v24 = vpop.permute.xlu0 %6694 }
 0x3e6   : > { %v6807_v37 = vld [vmem:[#allocation2 + $0xb0] sm:$0x1]  ;;  %7580 = vst.msk [vmem:[#allocation3 + $0x120] sm:$0xf] %vm308_vm9, %v7499_v0  ;;  %6299 = vst.msk [vmem:[#allocation3 + $0x244] sm:$0xf] %vm308_vm9, %v6233_v59  ;;  %v7109_v47 = vor.u32 %v7108_v4, %v7105_v34  ;;  %v8359_v22 = vsel %vm12111_vm15, %v8357_v33, %v8358_v5 }
 0x3e7   : > { %v8365_v63 = vrot.slane %v8242_v58, 5  ;;  %v7136_v53 = vshll.u32 %v6806_v49, 16  ;;  %v6805_v48 = vld [vmem:[#allocation2 + $0xa8] sm:$0xf]  ;;  %v7125_v26 = vsel %vm11630_vm10, %v7120_v32, %v7124_v55  ;;  %8473 = vst.msk [vmem:[#allocation3 + $0xec] sm:$0xf] %vm197_vm0, %v8359_v22  ;;  %v8363_v61 = vsel %vm12111_vm15, %v10265_v20, %v8362_v29  ;;  %v10735_v3 = vpop.f32.mrf.mxu1 }
 0x3e8   : > { %v8563_v45 = vld [vmem:[#allocation3 + $0x1cc] sm:$0xff]  ;;  %v8364_v27 = vrot.slane %v8362_v29, 4  ;;  %v7140_v50 = vshrl.u32 %v6806_v49, 16  ;;  %v8243_v44 = vld [vmem:[#allocation2 + $0x6c] sm:$0xe]  ;;  %v7110_v9 = vrot.slane %v7109_v47, 4  ;;  %v15321_v49 = vadd.f32 %v10735_v3, %v10734_v41  ;;  %v8125_v47 = vpop.permute.xlu1 %8124 }
 0x3e9   : > { %v8244_v54 = vld [vmem:[#allocation2 + $0x70] sm:$0xf]  ;;  %7255 = vst.msk [vmem:[#allocation3 + $0x1fc] sm:$0xf] %vm197_vm0, %v7125_v26  ;;  %8474 = vst.msk [vmem:[#allocation3 + $0x100] sm:$0xf] %vm197_vm0, %v8363_v61 }
 0x3ea   : > { %v15303_v10 = vrot.slane %v7136_v53, 5  ;;  %v8245_v52 = vld [vmem:[#allocation2 + $0x74] sm:$0x1]  ;;  %v8366_v57 = vsel %vm12111_vm15, %v8364_v27, %v8365_v63  ;;  %v7142_v7 = vrot.slane %v7140_v50, 4  ;;  %6298 = vst.msk [vmem:[#allocation3 + $0x230] sm:$0xf] %vm308_vm9, %v6231_v2  ;;  %v7115_v36 = vsel %vm11630_vm10, %v7110_v9, %v15275_v25 }
 0x3eb   : > { %v8560_v43 = vld [vmem:[#allocation3 + $0x1b8] sm:$0xff]  ;;  %6763 = vst.msk [vmem:[#allocation3 + $0x248] sm:$0xf] %vm308_vm9, %v6697_v39  ;;  %v7146_v60 = vshll.u32 %v6807_v37, 16  ;;  %v7127_v15 = vshrl.u32 %v6805_v48, 16  ;;  %v7130_v1 = vshll.u32 %v6805_v48, 16  ;;  %v6227_v37 = vpop.permute.xlu0 %6226 }
 0x3ec   : > { %v11298_v28 = vld [vmem:[#allocation3 + $0x1bc] ss:$20 sps:$4 sm:$0xff]   ;;  %v10331_v16 = vcombine.low %v8560_v43, %v8563_v45  ;;  %8475 = vst.msk [vmem:[#allocation3 + $0x114] sm:$0xf] %vm197_vm0, %v8366_v57  ;;  %v8246_v8 = vld [vmem:[#allocation2 + $0x78] sm:$0xe]  ;;  %v7143_v30 = vor.u32 %v7142_v7, %v15303_v10  ;;  %v6701_v57 = vpop.permute.xlu1 %6700 }
 0x3ed   : > { %v8247_v38 = vld [vmem:[#allocation2 + $0x7c] sm:$0xf]  ;;  %9450 = vmatprep.mubr.bf16.mxu1 %v11298_v28  ;;  %7254 = vst.msk [vmem:[#allocation3 + $0x1e8] sm:$0xf] %vm197_vm0, %v7115_v36  ;;  %v8248_v42 = vld [vmem:[#allocation2 + $0x80] sm:$0x1] }
 0x3ee   : > { %v11302_v21 = vld [vmem:[#allocation3 + $0x1e4] ss:$20 sps:$4 sm:$0xff]   ;;  %9451 = vmatmul.mubr.bf16.gmra.mxu1 %v10331_v16  ;;  %v7129_v12 = vrot.slane %v7127_v15, 4  ;;  %v10266_v25 = vrot.slane %v8243_v44, 9  ;;  %v8369_v19 = vrot.slane %v8244_v54, 5  ;;  %v7144_v13 = vrot.slane %v7143_v30, 4 }
 0x3ef   : > { %9458 = vmatprep.mubr.bf16.mxu1 %v11302_v21  ;;  %v7148_v23 = vrot.slane %v7146_v60, 5  ;;  %v7132_v46 = vrot.slane %v7130_v1, 5  ;;  %v8372_v17 = vrot.slane %v8245_v52, 5  ;;  %v6809_v35 = vld [vmem:[#allocation2 + $0xb8] sm:$0xf]  ;;  %v10267_v14 = vrot.slane %v8246_v8, 9  ;;  %v8123_v39 = vpop.permute.xlu0 %8122 }
 0x3f0   : > { %6762 = vst.msk [vmem:[#allocation3 + $0x234] sm:$0xf] %vm308_vm9, %v6695_v24  ;;  %6297 = vst.msk [vmem:[#allocation3 + $0x21c] sm:$0xf] %vm308_vm9, %v6229_v56  ;;  %v8370_v58 = vsel %vm12111_vm15, %v10266_v25, %v8369_v19  ;;  %v8371_v40 = vrot.slane %v8369_v19, 4  ;;  %v8376_v34 = vrot.slane %v8247_v38, 5  ;;  %v7505_v56 = vpop.permute.xlu1 %7504 }
 0x3f1   : > { %v7149_v4 = vsel %vm11630_vm10, %v7144_v13, %v7148_v23  ;;  %v7133_v6 = vor.u32 %v7132_v46, %v7129_v12  ;;  %8476 = vst.msk [vmem:[#allocation3 + $0x128] sm:$0xf] %vm197_vm0, %v8370_v58  ;;  %v8379_v33 = vrot.slane %v8248_v42, 5  ;;  %v8249_v5 = vld [vmem:[#allocation2 + $0x84] sm:$0xe]  ;;  %v7160_v55 = vshll.u32 %v6809_v35, 16 }
 0x3f2   : > { %7257 = vst.msk [vmem:[#allocation3 + $0x224] sm:$0xf] %vm197_vm0, %v7149_v4  ;;  %v8373_v0 = vsel %vm12111_vm15, %v8371_v40, %v8372_v17  ;;  %v8377_v59 = vsel %vm12111_vm15, %v10267_v14, %v8376_v34  ;;  %v8378_v32 = vrot.slane %v8376_v34, 4  ;;  %v6808_v20 = vld [vmem:[#allocation2 + $0xb4] sm:$0xf]  ;;  %v7164_v26 = vshrl.u32 %v6809_v35, 16 }
 0x3f3   : > { %v8250_v29 = vld [vmem:[#allocation2 + $0x88] sm:$0xf]  ;;  %v7134_v22 = vrot.slane %v7133_v6, 4  ;;  %8477 = vst.msk [vmem:[#allocation3 + $0x13c] sm:$0xf] %vm197_vm0, %v8373_v0  ;;  %v15337_v45 = vrot.slane %v7160_v55, 5  ;;  %v6699_v25 = vpop.permute.xlu0 %6698 }
 0x3f4   : > { %8478 = vst.msk [vmem:[#allocation3 + $0x150] sm:$0xf] %vm197_vm0, %v8377_v59  ;;  %v6810_v63 = vld [vmem:[#allocation2 + $0xbc] sm:$0x1]  ;;  %v11300_v53 = vld [vmem:[#allocation3 + $0x1e0] ss:$20 sps:$4 sm:$0xff]   ;;  %v8380_v48 = vsel %vm12111_vm15, %v8378_v32, %v8379_v33 }
 0x3f5   : > { %6296 = vst.msk [vmem:[#allocation3 + $0x208] sm:$0xf] %vm308_vm9, %v6227_v37  ;;  %8205 = vst.msk [vmem:[#allocation3 + $0x138] sm:$0xf] %vm308_vm9, %v8125_v47  ;;  %v8251_v61 = vld [vmem:[#allocation2 + $0x8c] sm:$0x1]  ;;  %v7139_v27 = vsel %vm11630_vm10, %v7134_v22, %v15303_v10 }
 0x3f6   : > { %8479 = vst.msk [vmem:[#allocation3 + $0x164] sm:$0xf] %vm197_vm0, %v8380_v48  ;;  %v7151_v50 = vshrl.u32 %v6808_v20, 16  ;;  %v7154_v44 = vshll.u32 %v6808_v20, 16  ;;  %v8252_v54 = vld [vmem:[#allocation2 + $0x90] sm:$0xe]  ;;  %9459 = vmatmul.mubr.bf16.gmra.mxu1 %v11300_v53 }
 0x3f7   : > { %v8253_v18 = vld [vmem:[#allocation2 + $0x94] sm:$0xf]  ;;  %7256 = vst.msk [vmem:[#allocation3 + $0x210] sm:$0xf] %vm197_vm0, %v7139_v27  ;;  %v7166_v9 = vrot.slane %v7164_v26, 4  ;;  %v7170_v52 = vshll.u32 %v6810_v63, 16  ;;  %v7503_v37 = vpop.permute.xlu0 %7502  ;;  %v6237_v63 = vpop.permute.xlu1 %6236 }
 0x3f8   : > { %v10268_v2 = vrot.slane %v8249_v5, 9  ;;  %v8383_v43 = vrot.slane %v8250_v29, 5  ;;  %v6812_v28 = vld [vmem:[#allocation2 + $0xc4] sm:$0xf]  ;;  %v7153_v7 = vrot.slane %v7151_v50, 4  ;;  %v7156_v16 = vrot.slane %v7154_v44, 5 }
 0x3f9   : > { %8204 = vst.msk [vmem:[#allocation3 + $0x124] sm:$0xf] %vm308_vm9, %v8123_v39  ;;  %6765 = vst.msk [vmem:[#allocation3 + $0x270] sm:$0xf] %vm308_vm9, %v6701_v57  ;;  %v7167_v10 = vor.u32 %v7166_v9, %v15337_v45  ;;  %v8386_v60 = vrot.slane %v8251_v61, 5  ;;  %v10269_v38 = vrot.slane %v8252_v54, 9 }
 0x3fa   : > { %v8384_v11 = vsel %vm12111_vm15, %v10268_v2, %v8383_v43  ;;  %v8385_v36 = vrot.slane %v8383_v43, 4  ;;  %v8254_v15 = vld [vmem:[#allocation2 + $0x98] sm:$0x1]  ;;  %v7157_v8 = vor.u32 %v7156_v16, %v7153_v7  ;;  %v8390_v21 = vrot.slane %v8253_v18, 5  ;;  %v6813_v30 = vld [vmem:[#allocation2 + $0xc8] sm:$0x1] }
 0x3fb   : > { %8480 = vst.msk [vmem:[#allocation3 + $0x178] sm:$0xf] %vm197_vm0, %v8384_v11  ;;  %v7184_v1 = vshll.u32 %v6812_v28, 16  ;;  %v6811_v42 = vld [vmem:[#allocation2 + $0xc0] sm:$0xf]  ;;  %v7172_v41 = vrot.slane %v7170_v52, 5  ;;  %v6235_v7 = vpop.permute.xlu0 %6234  ;;  %v8129_v16 = vpop.permute.xlu1 %8128 }
 0x3fc   : > { %v8387_v12 = vsel %vm12111_vm15, %v8385_v36, %v8386_v60  ;;  %v11304_v19 = vld [vmem:[#allocation3 + $0x208] ss:$20 sps:$4 sm:$0xff]   ;;  %v11306_v24 = vld [vmem:[#allocation3 + $0x20c] ss:$20 sps:$4 sm:$0xff]   ;;  %v7168_v13 = vrot.slane %v7167_v10, 4  ;;  %v8391_v23 = vsel %vm12111_vm15, %v10269_v38, %v8390_v21  ;;  %v7158_v46 = vrot.slane %v7157_v8, 4 }
 0x3fd   : > { %8481 = vst.msk [vmem:[#allocation3 + $0x18c] sm:$0xf] %vm197_vm0, %v8387_v12  ;;  %v8393_v17 = vrot.slane %v8254_v15, 5  ;;  %8482 = vst.msk [vmem:[#allocation3 + $0x1a0] sm:$0xf] %vm197_vm0, %v8391_v23  ;;  %9466 = vmatprep.mubr.bf16.mxu1 %v11306_v24  ;;  %v8392_v34 = vrot.slane %v8390_v21, 4 }
 0x3fe   : > { %6764 = vst.msk [vmem:[#allocation3 + $0x25c] sm:$0xf] %vm308_vm9, %v6699_v25  ;;  %7583 = vst.msk [vmem:[#allocation3 + $0x15c] sm:$0xf] %vm308_vm9, %v7505_v56  ;;  %v8255_v35 = vld [vmem:[#allocation2 + $0x9c] sm:$0xe]  ;;  %v7173_v14 = vsel %vm11630_vm10, %v7168_v13, %v7172_v41  ;;  %9467 = vmatmul.mubr.bf16.gmra.mxu1 %v11304_v19  ;;  %v7163_v59 = vsel %vm11630_vm10, %v7158_v46, %v15337_v45 }
 0x3ff   : > { %v8256_v3 = vld [vmem:[#allocation2 + $0xa0] sm:$0xf]  ;;  %v8257_v58 = vld [vmem:[#allocation2 + $0xa4] sm:$0x1]  ;;  %v15360_v4 = vrot.slane %v7184_v1, 5  ;;  %v7188_v6 = vshrl.u32 %v6812_v28, 16  ;;  %v8394_v53 = vsel %vm12111_vm15, %v8392_v34, %v8393_v17  ;;  %v8127_v13 = vpop.permute.xlu0 %8126  ;;  %v7509_v23 = vpop.permute.xlu1 %7508 }
 0x400   : > { %v11309_v40 = vld [vmem:[#allocation3 + $0x234] ss:$20 sps:$4 sm:$0xff]   ;;  %v8258_v33 = vld [vmem:[#allocation2 + $0xa8] sm:$0xe]  ;;  %v8260_v0 = vld [vmem:[#allocation2 + $0xb0] sm:$0x1] }
 0x401   : > { %v8259_v5 = vld [vmem:[#allocation2 + $0xac] sm:$0xf]  ;;  %7259 = vst.msk [vmem:[#allocation3 + $0x24c] sm:$0xf] %vm197_vm0, %v7173_v14  ;;  %v7194_v32 = vshll.u32 %v6813_v30, 16  ;;  %v7175_v55 = vshrl.u32 %v6811_v42, 16  ;;  %9474 = vmatprep.mubr.bf16.mxu1 %v11309_v40 }
 0x402   : > { %v7178_v20 = vshll.u32 %v6811_v42, 16  ;;  %v8261_v29 = vld [vmem:[#allocation2 + $0xb4] sm:$0xe]  ;;  %v11310_v47 = vld [vmem:[#allocation3 + $0x120] ss:$20 sps:$4 sm:$0xff]   ;;  %v7190_v48 = vrot.slane %v7188_v6, 4 }
 0x403   : > { %v11312_v22 = vld [vmem:[#allocation3 + $0x124] ss:$20 sps:$4 sm:$0xff]   ;;  %7258 = vst.msk [vmem:[#allocation3 + $0x238] sm:$0xf] %vm197_vm0, %v7163_v59  ;;  %v8262_v26 = vld [vmem:[#allocation2 + $0xb8] sm:$0xf]  ;;  %v7507_v40 = vpop.permute.xlu0 %7506 }
 0x404   : > { %7582 = vst.msk [vmem:[#allocation3 + $0x148] sm:$0xf] %vm308_vm9, %v7503_v37  ;;  %6301 = vst.msk [vmem:[#allocation3 + $0x26c] sm:$0xf] %vm308_vm9, %v6237_v63  ;;  %v7196_v45 = vrot.slane %v7194_v32, 5  ;;  %v7177_v61 = vrot.slane %v7175_v55, 4  ;;  %9579 = vmatprep.mubr.bf16.mxu0 %v11312_v22  ;;  %v7191_v50 = vor.u32 %v7190_v48, %v15360_v4 }
 0x405   : > { %8483 = vst.msk [vmem:[#allocation3 + $0x1b4] sm:$0xf] %vm197_vm0, %v8394_v53  ;;  %v7180_v27 = vrot.slane %v7178_v20, 5  ;;  %v10270_v44 = vrot.slane %v8255_v35, 9  ;;  %v8397_v54 = vrot.slane %v8256_v3, 5  ;;  %v8400_v18 = vrot.slane %v8257_v58, 5  ;;  %9580 = vmatmul.mubr.bf16.gmra.mxu0 %v11310_v47 }
 0x406   : > { %v8263_v9 = vld [vmem:[#allocation2 + $0xbc] sm:$0x1]  ;;  %v10271_v2 = vrot.slane %v8258_v33, 9  ;;  %v8404_v43 = vrot.slane %v8259_v5, 5  ;;  %v8407_v28 = vrot.slane %v8260_v0, 5  ;;  %v7192_v10 = vrot.slane %v7191_v50, 4 }
 0x407   : > { %v7181_v52 = vor.u32 %v7180_v27, %v7177_v61  ;;  %v8264_v39 = vld [vmem:[#allocation2 + $0xc0] sm:$0xe]  ;;  %v8265_v57 = vld [vmem:[#allocation2 + $0xc4] sm:$0xf]  ;;  %v8398_v11 = vsel %vm12111_vm15, %v10270_v44, %v8397_v54  ;;  %v8399_v36 = vrot.slane %v8397_v54, 4  ;;  %v10272_v60 = vrot.slane %v8261_v29, 9  ;;  %v8131_v5 = vpop.permute.xlu0 %8130  ;;  %v10737_v54 = vpop.f32.mrf.mxu1 }
 0x408   : > { %v11307_v15 = vld [vmem:[#allocation3 + $0x230] ss:$20 sps:$4 sm:$0xff]   ;;  %6300 = vst.msk [vmem:[#allocation3 + $0x258] sm:$0xf] %vm308_vm9, %v6235_v7  ;;  %8207 = vst.msk [vmem:[#allocation3 + $0x160] sm:$0xf] %vm308_vm9, %v8129_v16  ;;  %v8405_v38 = vsel %vm12111_vm15, %v10271_v2, %v8404_v43  ;;  %v7197_v1 = vsel %vm11630_vm10, %v7192_v10, %v7196_v45 }
 0x409   : > { %v7182_v8 = vrot.slane %v7181_v52, 4  ;;  %8484 = vst.msk [vmem:[#allocation3 + $0x1c8] sm:$0xf] %vm197_vm0, %v8398_v11  ;;  %v8406_v21 = vrot.slane %v8404_v43, 4  ;;  %v8411_v30 = vrot.slane %v8262_v26, 5  ;;  %v8401_v42 = vsel %vm12111_vm15, %v8399_v36, %v8400_v18  ;;  %9475 = vmatmul.mubr.bf16.gmra.mxu1 %v11307_v15  ;;  %v10738_v43 = vpop.f32.mrf.mxu1 }
 0x40a   : > { %8486 = vst.msk [vmem:[#allocation3 + $0x1f0] sm:$0xf] %vm197_vm0, %v8405_v38  ;;  %v8414_v41 = vrot.slane %v8263_v9, 5  ;;  %7261 = vst.msk [vmem:[#allocation3 + $0x274] sm:$0xf] %vm197_vm0, %v7197_v1  ;;  %v10273_v51 = vrot.slane %v8264_v39, 9  ;;  %v10843_v9 = vpop.f32.mrf.mxu0 }
 0x40b   : > { %v7187_v12 = vsel %vm11630_vm10, %v7182_v8, %v15360_v4  ;;  %8485 = vst.msk [vmem:[#allocation3 + $0x1dc] sm:$0xf] %vm197_vm0, %v8401_v42  ;;  %v8408_v25 = vsel %vm12111_vm15, %v8406_v21, %v8407_v28  ;;  %v8412_v19 = vsel %vm12111_vm15, %v10272_v60, %v8411_v30  ;;  %v8413_v24 = vrot.slane %v8411_v30, 4  ;;  %v8266_v56 = vld [vmem:[#allocation2 + $0xc8] sm:$0x1]  ;;  %v8133_v4 = vpop.permute.xlu1 %8132  ;;  %v7511_v62 = vpop.permute.xlu0 %7510 }
 0x40c   : > { %7260 = vst.msk [vmem:[#allocation3 + $0x260] sm:$0xf] %vm197_vm0, %v7187_v12  ;;  %8487 = vst.msk [vmem:[#allocation3 + $0x204] sm:$0xf] %vm197_vm0, %v8408_v25  ;;  %v8418_v46 = vrot.slane %v8265_v57, 5  ;;  %v8421_v58 = vrot.slane %v8266_v56, 5  ;;  %v10844_v39 = vpop.f32.mrf.mxu0  ;;  %v15422_v57 = vadd.f32 %v10738_v43, %v10737_v54  ;;  %v10740_v16 = vpop.f32.mrf.mxu1 }
 0x40d   : > { %8488 = vst.msk [vmem:[#allocation3 + $0x218] sm:$0xf] %vm197_vm0, %v8412_v19  ;;  %v8415_v17 = vsel %vm12111_vm15, %v8413_v24, %v8414_v41  ;;  %v11316_v34 = vld [vmem:[#allocation3 + $0x25c] ss:$20 sps:$4 sm:$0xff]   ;;  %v11321_v20 = vld [vmem:[#allocation3 + $0x38] ss:$20 sps:$4 sm:$0xff]   ;;  %v15424_v7 = vadd.f32 %v10844_v39, %v10843_v9 }
 0x40e   : > { %8206 = vst.msk [vmem:[#allocation3 + $0x14c] sm:$0xf] %vm308_vm9, %v8127_v13  ;;  %7585 = vst.msk [vmem:[#allocation3 + $0x184] sm:$0xf] %vm308_vm9, %v7509_v23  ;;  %v8419_v35 = vsel %vm12111_vm15, %v10273_v51, %v8418_v46  ;;  %v8420_v3 = vrot.slane %v8418_v46, 4  ;;  %9482 = vmatprep.mubr.bf16.mxu1 %v11316_v34  ;;  %v10846_v60 = vpop.f32.mrf.mxu0  ;;  %v10741_v8 = vpop.f32.mrf.mxu1 }
 0x40f   : > { %8489 = vst.msk [vmem:[#allocation3 + $0x22c] sm:$0xf] %vm197_vm0, %v8415_v17  ;;  %8490 = vst.msk [vmem:[#allocation3 + $0x240] sm:$0xf] %vm197_vm0, %v8419_v35  ;;  %v11314_v14 = vld [vmem:[#allocation3 + $0x258] ss:$20 sps:$4 sm:$0xff]   ;;  %v7513_v32 = vpop.permute.xlu1 %7512  ;;  %v8135_v37 = vpop.permute.xlu0 %8134  ;;  %v15428_v21 = vadd.f32 %v10741_v8, %v10740_v16 }
 0x410   : > { %v8422_v6 = vsel %vm12111_vm15, %v8420_v3, %v8421_v58  ;;  %7584 = vst.msk [vmem:[#allocation3 + $0x170] sm:$0xf] %vm308_vm9, %v7507_v40  ;;  %8209 = vst.msk [vmem:[#allocation3 + $0x188] sm:$0xf] %vm308_vm9, %v8133_v4  ;;  %v11317_v33 = vld [vmem:[#allocation3 + $0x10] ss:$20 sps:$4 sm:$0xff]   ;;  %v10847_v38 = vpop.f32.mrf.mxu0  ;;  %v10743_v25 = vpop.f32.mrf.mxu1 }
 0x411   : > { %8491 = vst.msk [vmem:[#allocation3 + $0x254] sm:$0xf] %vm197_vm0, %v8422_v6  ;;  %9483 = vmatmul.mubr.bf16.gmra.mxu1 %v11314_v14  ;;  %v11318_v0 = vld [vmem:[#allocation3 + $0x148] ss:$20 sps:$4 sm:$0xff]   ;;  %v11322_v29 = vld [vmem:[#allocation3 + $0x60] ss:$20 sps:$4 sm:$0xff]   ;;  %v15430_v30 = vadd.f32 %v10847_v38, %v10846_v60 }
 0x412   : > { %11027 = vmatprep.mubr.bf16.mxu1 %v11317_v33  ;;  %8208 = vst.msk [vmem:[#allocation3 + $0x174] sm:$0xf] %vm308_vm9, %v8131_v5  ;;  %7587 = vst.msk [vmem:[#allocation3 + $0x1ac] sm:$0xf] %vm308_vm9, %v7513_v32  ;;  %v11326_v26 = vld [vmem:[#allocation3 + $0x88] ss:$20 sps:$4 sm:$0xff]   ;;  %v10744_v23 = vpop.f32.mrf.mxu1 }
 0x413   : > { %v8137_v55 = vpop.permute.xlu1 %8136  ;;  %7586 = vst.msk [vmem:[#allocation3 + $0x198] sm:$0xf] %vm308_vm9, %v7511_v62  ;;  %8210 = vst.msk [vmem:[#allocation3 + $0x19c] sm:$0xf] %vm308_vm9, %v8135_v37  ;;  %v7515_v53 = vpop.permute.xlu0 %7514  ;;  %v11327_v45 = vld [vmem:[#allocation3 + $0xb0] ss:$20 sps:$4 sm:$0xff]   ;;  %v15436_v51 = vadd.f32 %v10744_v23, %v10743_v25 }
 0x414   : > { %8211 = vst.msk [vmem:[#allocation3 + $0x1b0] sm:$0xf] %vm308_vm9, %v8137_v55  ;;  %7588 = vst.msk [vmem:[#allocation3 + $0x1c0] sm:$0xf] %vm308_vm9, %v7515_v53  ;;  %v11331_v2 = vld [vmem:[#allocation3 + $0xd8] ss:$20 sps:$4 sm:$0xff]   ;;  %v10746_v46 = vpop.f32.mrf.mxu1 }
 0x415   : > { %v11320_v59 = vld [vmem:[#allocation3 + $0x14c] ss:$20 sps:$4 sm:$0xff]   ;;  %v11336_v41 = vld [vmem:[#allocation3 + $0x128] ss:$20 sps:$4 sm:$0xff]   ;;  %v11337_v12 = vld [vmem:[#allocation3 + $0x150] ss:$20 sps:$4 sm:$0xff]  }
 0x416   : > { %9587 = vmatprep.mubr.bf16.mxu0 %v11320_v59  ;;  %v11332_v28 = vld [vmem:[#allocation3 + $0x100] ss:$20 sps:$4 sm:$0xff]   ;;  %v11341_v3 = vld [vmem:[#allocation3 + $0x178] ss:$20 sps:$4 sm:$0xff]   ;;  %v10747_v58 = vpop.f32.mrf.mxu1  ;;  %v11346_v59 = vld [vmem:[#allocation3 + $0x1c8] ss:$20 sps:$4 sm:$0xff]  }
 0x417   : > { %9588 = vmatmul.mubr.bf16.gmra.mxu0 %v11318_v0  ;;  %v11323_v47 = vld [vmem:[#allocation3 + $0x170] ss:$20 sps:$4 sm:$0xff]   ;;  %v7517_v63 = vpop.permute.xlu1 %7516  ;;  %v8139_v61 = vpop.permute.xlu0 %8138  ;;  %v11342_v40 = vld [vmem:[#allocation3 + $0x1a0] ss:$20 sps:$4 sm:$0xff]   ;;  %v15440_v14 = vadd.f32 %v10747_v58, %v10746_v46  ;;  %v11351_v37 = vld [vmem:[#allocation3 + $0x218] ss:$20 sps:$4 sm:$0xff]  }
 0x418   : > { %7589 = vst.msk [vmem:[#allocation3 + $0x1d4] sm:$0xf] %vm308_vm9, %v7517_v63  ;;  %8212 = vst.msk [vmem:[#allocation3 + $0x1c4] sm:$0xf] %vm308_vm9, %v8139_v61  ;;  %v11347_v32 = vld [vmem:[#allocation3 + $0x1f0] ss:$20 sps:$4 sm:$0xff]  }
 0x419   : > { %11028 = vmatmul.mubr.bf16.vlgmr.msra.gmra.mxu1 %v11321_v20  ;;  %v11325_v22 = vld [vmem:[#allocation3 + $0x174] ss:$20 sps:$4 sm:$0xff]   ;;  %vm9877_vm0 = vcmask 523264  }
 0x41a   : > { %11031 = vmatprep.mubr.bf16.mxu1 %v11322_v29  ;;  %9595 = vmatprep.mubr.bf16.mxu0 %v11325_v22  ;;  %v11328_v27 = vld [vmem:[#allocation3 + $0x198] ss:$20 sps:$4 sm:$0xff]   ;;  %v11352_v22 = vld [vmem:[#allocation3 + $0x240] ss:$20 sps:$4 sm:$0xff]  }
 0x41b   : > { %v8141_v48 = vpop.permute.xlu1 %8140  ;;  %v11330_v50 = vld [vmem:[#allocation3 + $0x19c] ss:$20 sps:$4 sm:$0xff]   ;;  %v7519_v18 = vpop.permute.xlu0 %7518 }
 0x41c   : > { %8213 = vst.msk [vmem:[#allocation3 + $0x1d8] sm:$0xf] %vm308_vm9, %v8141_v48  ;;  %7590 = vst.msk [vmem:[#allocation3 + $0x1e8] sm:$0xf] %vm308_vm9, %v7519_v18 }
 0x41f   : > { %9596 = vmatmul.mubr.bf16.gmra.mxu0 %v11323_v47  ;;  %v7521_v44 = vpop.permute.xlu1 %7520  ;;  %v8143_v10 = vpop.permute.xlu0 %8142  ;;  %v11333_v11 = vld [vmem:[#allocation3 + $0x1c0] ss:$20 sps:$4 sm:$0xff]  }
 0x420   : > { %9603 = vmatprep.mubr.bf16.mxu0 %v11330_v50  ;;  %7591 = vst.msk [vmem:[#allocation3 + $0x1fc] sm:$0xf] %vm308_vm9, %v7521_v44  ;;  %8214 = vst.msk [vmem:[#allocation3 + $0x1ec] sm:$0xf] %vm308_vm9, %v8143_v10  ;;  %v10749_v29 = vpop.f32.mrf.mxu1 }
 0x421   : > { %11032 = vmatmul.mubr.bf16.gmra.mxu1 %v11326_v26 }
 0x422   : > { %11035 = vmatprep.mubr.bf16.mxu1 %v11327_v45  ;;  %v10750_v47 = vpop.f32.mrf.mxu1 }
 0x423   : > { %v8145_v52 = vpop.permute.xlu1 %8144  ;;  %v11335_v36 = vld [vmem:[#allocation3 + $0x1c4] ss:$20 sps:$4 sm:$0xff]   ;;  %v7523_v1 = vpop.permute.xlu0 %7522  ;;  %v15447_v63 = vadd.f32 %v10750_v47, %v10749_v29 }
 0x424   : > { %8215 = vst.msk [vmem:[#allocation3 + $0x200] sm:$0xf] %vm308_vm9, %v8145_v52  ;;  %7592 = vst.msk [vmem:[#allocation3 + $0x210] sm:$0xf] %vm308_vm9, %v7523_v1  ;;  %v10752_v53 = vpop.f32.mrf.mxu1 }
 0x426   : > { %v10753_v45 = vpop.f32.mrf.mxu1  ;;  %v15470_v10 = vpop.f32.mrf.mxu0 }
 0x427   : > { %9604 = vmatmul.mubr.bf16.gmra.mxu0 %v11328_v27  ;;  %v7525_v15 = vpop.permute.xlu1 %7524  ;;  %v8147_v19 = vpop.permute.xlu0 %8146  ;;  %v11338_v24 = vld [vmem:[#allocation3 + $0x1e8] ss:$20 sps:$4 sm:$0xff]   ;;  %v15449_v61 = vadd.f32 %v10753_v45, %v10752_v53 }
 0x428   : > { %9611 = vmatprep.mubr.bf16.mxu0 %v11335_v36  ;;  %7593 = vst.msk [vmem:[#allocation3 + $0x224] sm:$0xf] %vm308_vm9, %v7525_v15  ;;  %8216 = vst.msk [vmem:[#allocation3 + $0x214] sm:$0xf] %vm308_vm9, %v8147_v19  ;;  %v11356_v27 = vld [vmem:[#allocation3 + $0x268] ss:$20 sps:$4 sm:$0xff]   ;;  %v10755_v50 = vpop.f32.mrf.mxu1  ;;  %v15472_v36 = vpop.f32.mrf.mxu0 }
 0x429   : > { %11036 = vmatmul.mubr.bf16.gmra.mxu1 %v11331_v2  ;;  %v15458_v2 = vld [vmem:[%s15875_s3 + $0x1] ss:$0 sm:$0xff] }
 0x42a   : > { %11039 = vmatprep.mubr.bf16.mxu1 %v11332_v28  ;;  %v10756_v44 = vpop.f32.mrf.mxu1  ;;  %v9365_v43 = vadd.f32 %v15313_v31, %v15458_v2  ;;  %v9368_v39 = vadd.f32 %v15321_v49, %v15458_v2  ;;  %v15476_v38 = vpop.f32.mrf.mxu0 }
 0x42b   : > { %v8149_v42 = vpop.permute.xlu1 %8148  ;;  %v11340_v56 = vld [vmem:[#allocation3 + $0x1ec] ss:$20 sps:$4 sm:$0xff]   ;;  %v7527_v17 = vpop.permute.xlu0 %7526  ;;  %v15451_v54 = vadd.f32 %v10756_v44, %v10755_v50 }
 0x42c   : > { %8217 = vst.msk [vmem:[#allocation3 + $0x228] sm:$0xf] %vm308_vm9, %v8149_v42  ;;  %7594 = vst.msk [vmem:[#allocation3 + $0x238] sm:$0xf] %vm308_vm9, %v7527_v17  ;;  %v10758_v18 = vpop.f32.mrf.mxu1  ;;  %v15463_v28 = vadd.f32 %v15424_v7, %v9365_v43  ;;  %v15468_v16 = vadd.f32 %v15430_v30, %v9368_v39  ;;  %v15480_v42 = vpop.f32.mrf.mxu0 }
 0x42e   : > { %v10759_v9 = vpop.f32.mrf.mxu1 }
 0x42f   : > { %9612 = vmatmul.mubr.bf16.gmra.mxu0 %v11333_v11  ;;  %v7529_v13 = vpop.permute.xlu1 %7528  ;;  %v8151_v34 = vpop.permute.xlu0 %8150  ;;  %v11343_v4 = vld [vmem:[#allocation3 + $0x210] ss:$20 sps:$4 sm:$0xff]   ;;  %v15453_v52 = vadd.f32 %v10759_v9, %v10758_v18 }
 0x430   : > { %9619 = vmatprep.mubr.bf16.mxu0 %v11340_v56  ;;  %7595 = vst.msk [vmem:[#allocation3 + $0x24c] sm:$0xf] %vm308_vm9, %v7529_v13  ;;  %8218 = vst.msk [vmem:[#allocation3 + $0x23c] sm:$0xf] %vm308_vm9, %v8151_v34 }
 0x431   : > { %11040 = vmatmul.mubr.bf16.gmra.mxu1 %v11336_v41 }
 0x432   : > { %11043 = vmatprep.mubr.bf16.mxu1 %v11337_v12  ;;  %v15484_v12 = vpop.f32.mrf.mxu0 }
 0x433   : > { %v8153_v35 = vpop.permute.xlu1 %8152  ;;  %v11345_v6 = vld [vmem:[#allocation3 + $0x214] ss:$20 sps:$4 sm:$0xff]   ;;  %v7531_v5 = vpop.permute.xlu0 %7530 }
 0x434   : > { %8219 = vst.msk [vmem:[#allocation3 + $0x250] sm:$0xf] %vm308_vm9, %v8153_v35  ;;  %7596 = vst.msk [vmem:[#allocation3 + $0x260] sm:$0xf] %vm308_vm9, %v7531_v5 }
 0x437   : > { %9620 = vmatmul.mubr.bf16.gmra.mxu0 %v11338_v24  ;;  %v7533_v33 = vpop.permute.xlu1 %7532  ;;  %v8155_v62 = vpop.permute.xlu0 %8154  ;;  %v11348_v55 = vld [vmem:[#allocation3 + $0x238] ss:$20 sps:$4 sm:$0xff]  }
 0x438   : > { %9627 = vmatprep.mubr.bf16.mxu0 %v11345_v6  ;;  %7597 = vst.msk [vmem:[#allocation3 + $0x274] sm:$0xf] %vm308_vm9, %v7533_v33  ;;  %8220 = vst.msk [vmem:[#allocation3 + $0x264] sm:$0xf] %vm308_vm9, %v8155_v62  ;;  %v15488_v24 = vpop.f32.mrf.mxu0 }
 0x439   : > { %11044 = vmatmul.mubr.bf16.gmra.mxu1 %v11341_v3 }
 0x43a   : > { %11047 = vmatprep.mubr.bf16.mxu1 %v11342_v40  ;;  %v15490_v56 = vpop.f32.mrf.mxu0 }
 0x43b   : > { %v8157_v0 = vpop.permute.xlu1 %8156  ;;  %v11350_v20 = vld [vmem:[#allocation3 + $0x23c] ss:$20 sps:$4 sm:$0xff]  }
 0x43c   : > { %8221 = vst.msk [vmem:[#allocation3 + $0x278] sm:$0xf] %vm308_vm9, %v8157_v0  ;;  %v15492_v13 = vpop.f32.mrf.mxu0 }
 0x43f   : > { %9628 = vmatmul.mubr.bf16.gmra.mxu0 %v11343_v4  ;;  %v11353_v48 = vld [vmem:[#allocation3 + $0x260] ss:$20 sps:$4 sm:$0xff]  }
 0x440   : > { %9635 = vmatprep.mubr.bf16.mxu0 %v11350_v20 }
 0x441   : > { %11048 = vmatmul.mubr.bf16.gmra.mxu1 %v11346_v59 }
 0x442   : > { %11051 = vmatprep.mubr.bf16.mxu1 %v11347_v32 }
 0x443   : > { %v11355_v26 = vld [vmem:[#allocation3 + $0x264] ss:$20 sps:$4 sm:$0xff]  }
 0x447   : > { %9636 = vmatmul.mubr.bf16.gmra.mxu0 %v11348_v55 }
 0x448   : > { %9643 = vmatprep.mubr.bf16.mxu0 %v11355_v26 }
 0x449   : > { %11052 = vmatmul.mubr.bf16.gmra.mxu1 %v11351_v37 }
 0x44a   : > { %11055 = vmatprep.mubr.bf16.mxu1 %v11352_v22 }
 0x44f   : > { %9644 = vmatmul.mubr.bf16.gmra.mxu0 %v11353_v48 }
 0x451   : > { %11056 = vmatmul.mubr.bf16.gmra.mxu1 %v11356_v27 }
 0x455   : > { %v10761_v11 = vpop.f32.mrf.mxu1 }
 0x457   : > { %v10762_v60 = vpop.f32.mrf.mxu1 }
 0x458   : > { %v15474_v15 = vadd.f32 %v10762_v60, %v10761_v11 }
 0x459   : > { %v10764_v8 = vpop.f32.mrf.mxu1 }
 0x45b   : > { %v10765_v31 = vpop.f32.mrf.mxu1 }
 0x45c   : > { %v15478_v7 = vadd.f32 %v10765_v31, %v10764_v8 }
 0x45d   : > { %v10767_v1 = vpop.f32.mrf.mxu1  ;;  %v15494_v23 = vpop.f32.mrf.mxu0 }
 0x45f   : > { %v10768_v49 = vpop.f32.mrf.mxu1  ;;  %v15496_v17 = vpop.f32.mrf.mxu0 }
 0x460   : > { %v15482_v30 = vadd.f32 %v10768_v49, %v10767_v1 }
 0x461   : > { %v10770_v41 = vpop.f32.mrf.mxu1  ;;  %v15500_v40 = vpop.f32.mrf.mxu0 }
 0x463   : > { %v10771_v25 = vpop.f32.mrf.mxu1  ;;  %v15504_v33 = vpop.f32.mrf.mxu0 }
 0x464   : > { %v15486_v19 = vadd.f32 %v10771_v25, %v10770_v41 }
 0x469   : > { %v15508_v32 = vpop.f32.mrf.mxu0 }
 0x46b   : > { %v15512_v20 = vpop.f32.mrf.mxu0 }
 0x46d   : > { %v15514_v37 = vpop.f32.mrf.mxu0 }
 0x46f   : > { %v15518_v48 = vpop.f32.mrf.mxu0 }
 0x47c   : > { %v10773_v46 = vpop.f32.mrf.mxu1 }
 0x47e   : > { %v10774_v35 = vpop.f32.mrf.mxu1 }
 0x47f   : > { %v15498_v3 = vadd.f32 %v10774_v35, %v10773_v46 }
 0x480   : > { %v10776_v58 = vpop.f32.mrf.mxu1 }
 0x482   : > { %v10777_v34 = vpop.f32.mrf.mxu1  ;;  %v15522_v27 = vpop.f32.mrf.mxu0 }
 0x483   : > { %v15502_v4 = vadd.f32 %v10777_v34, %v10776_v58 }
 0x484   : > { %v10779_v6 = vpop.f32.mrf.mxu1  ;;  %v15526_v9 = vpop.f32.mrf.mxu0 }
 0x486   : > { %v10780_v5 = vpop.f32.mrf.mxu1  ;;  %v15530_v60 = vpop.f32.mrf.mxu0 }
 0x487   : > { %v15506_v0 = vadd.f32 %v10780_v5, %v10779_v6 }
 0x488   : > { %v10782_v59 = vpop.f32.mrf.mxu1  ;;  %v15534_v49 = vpop.f32.mrf.mxu0 }
 0x48a   : > { %v10783_v62 = vpop.f32.mrf.mxu1 }
 0x48b   : > { %v15510_v55 = vadd.f32 %v10783_v62, %v10782_v59 }
 0x48c   : > { %v15538_v35 = vpop.f32.mrf.mxu0 }
 0x48e   : > { %v15542_v5 = vpop.f32.mrf.mxu0 }
 0x498   : > { %v10785_v29 = vpop.f32.mrf.mxu1 }
 0x49a   : > { %v10786_v47 = vpop.f32.mrf.mxu1 }
 0x49b   : > { %v15516_v22 = vadd.f32 %v10786_v47, %v10785_v29  ;;  %v15546_v47 = vpop.f32.mrf.mxu0 }
 0x49c   : > { %v10788_v53 = vpop.f32.mrf.mxu1 }
 0x49e   : > { %v10789_v26 = vpop.f32.mrf.mxu1 }
 0x49f   : > { %v15520_v45 = vadd.f32 %v10789_v26, %v10788_v53 }
 0x4a1   : > { %v10791_v50 = vpop.f32.mrf.mxu1 }
 0x4a3   : > { %v10792_v44 = vpop.f32.mrf.mxu1 }
 0x4a4   : > { %v15524_v18 = vadd.f32 %v10792_v44, %v10791_v50  ;;  %v15550_v44 = vpop.f32.mrf.mxu0 }
 0x4a5   : > { %v10794_v43 = vpop.f32.mrf.mxu1 }
 0x4a6   : > { %15891 = vst [vmem:[#allocation7_spill] sm:$0xff] %v15524_v18  ;;  %v9816_v18 = vld [vmem:[%s11541_s7 + $0x18] sm:$0xff] }
 0x4a7   : > { %v10795_v39 = vpop.f32.mrf.mxu1 }
 0x4a8   : > { %v15528_v11 = vadd.f32 %v10795_v39, %v10794_v43 }
 0x4aa   : > { %15892 = vst [vmem:[#allocation8_spill] sm:$0xff] %v15528_v11 }
 0x4ae   : > { %v10797_v8 = vpop.f32.mrf.mxu1 }
 0x4b0   : > { %v10798_v31 = vpop.f32.mrf.mxu1 }
 0x4b1   : > { %v15532_v1 = vadd.f32 %v10798_v31, %v10797_v8 }
 0x4b2   : > { %v10800_v41 = vpop.f32.mrf.mxu1 }
 0x4b4   : > { %v10801_v25 = vpop.f32.mrf.mxu1 }
 0x4b5   : > { %v15536_v46 = vadd.f32 %v10801_v25, %v10800_v41 }
 0x4b6   : > { %v10803_v58 = vpop.f32.mrf.mxu1 }
 0x4b7   : > { %15893 = vst [vmem:[#allocation9_spill] sm:$0xff] %v15536_v46 }
 0x4b8   : > { %v10804_v34 = vpop.f32.mrf.mxu1 }
 0x4b9   : > { %v15540_v6 = vadd.f32 %v10804_v34, %v10803_v58 }
 0x4ba   : > { %v10806_v59 = vpop.f32.mrf.mxu1 }
 0x4bb   : > { %15894 = vst [vmem:[#allocation10_spill] sm:$0xff] %v15540_v6 }
 0x4bc   : > { %v10807_v62 = vpop.f32.mrf.mxu1 }
 0x4bd   : > { %v15544_v29 = vadd.f32 %v10807_v62, %v10806_v59 }
 0x4be   : > { %v10809_v53 = vpop.f32.mrf.mxu1 }
 0x4bf   : > { %15895 = vst [vmem:[#allocation11_spill] sm:$0xff] %v15544_v29 }
 0x4c0   : > { %v10810_v26 = vpop.f32.mrf.mxu1 }
 0x4c1   : > { %v15548_v50 = vadd.f32 %v10810_v26, %v10809_v53 }
 0x4c2   : > { %v10812_v43 = vpop.f32.mrf.mxu1 }
 0x4c3   : > { %15896 = vst [vmem:[#allocation12_spill] sm:$0xff] %v15548_v50  ;;  %v9813_v50 = vld [vmem:[%s11541_s7] sm:$0xff] }
 0x4c4   : > { %v10813_v8 = vpop.f32.mrf.mxu1 }
 0x4c5   : > { %v15552_v39 = vpop.f32.mrf.mxu0  ;;  %v15554_v31 = vadd.f32 %v10813_v8, %v10812_v43  ;;  %v10851_v8 = vadd.f32 %v15472_v36, %v15470_v10 }
 0x4c7   : > { %15897 = vst [vmem:[#allocation13_spill] sm:$0xff] %v15554_v31  ;;  %v15556_v25 = vpop.f32.mrf.mxu0 }
 0x4c9   : > { %v10815_v41 = vpop.f32.mrf.mxu1  ;;  %v15560_v62 = vpop.f32.mrf.mxu0 }
 0x4cb   : > { %v10816_v58 = vpop.f32.mrf.mxu1  ;;  %v15566_v6 = vpop.f32.mrf.mxu0 }
 0x4cc   : > { %v15558_v34 = vadd.f32 %v10816_v58, %v10815_v41  ;;  %v9373_v58 = vadd.f32 %v15422_v57, %v15458_v2 }
 0x4cd   : > { %v10818_v59 = vpop.f32.mrf.mxu1 }
 0x4ce   : > { %15898 = vst [vmem:[#allocation14_spill] sm:$0xff] %v15558_v34  ;;  %v9534_v34 = vadd.f32 %v10851_v8, %v9373_v58 }
 0x4cf   : > { %v10819_v53 = vpop.f32.mrf.mxu1 }
 0x4d0   : > { %v15562_v26 = vadd.f32 %v10819_v53, %v10818_v59 }
 0x4d1   : > { %v15564_v29 = vpop.f32.mrf.mxu1 }
 0x4d2   : > { %15899 = vst [vmem:[#allocation15_spill] sm:$0xff] %v15562_v26  ;;  %15900 = vst [vmem:[#allocation16_spill] sm:$0xff] %v15564_v29  ;;  %v10854_v26 = vadd.f32 %v15480_v42, %v15476_v38  ;;  %v10863_v38 = vadd.f32 %v15496_v17, %v15494_v23  ;;  %v9381_v17 = vadd.f32 %v15436_v51, %v15458_v2 }
 0x4d3   : > { %v15568_v43 = vpop.f32.mrf.mxu1 }
 0x4d4   : > { %15901 = vst [vmem:[#allocation17_spill] sm:$0xff] %v15568_v43  ;;  %v9376_v43 = vadd.f32 %v15428_v21, %v15458_v2  ;;  %v9389_v21 = vadd.f32 %v15447_v63, %v15458_v2  ;;  %v9814_v63 = vld [vmem:[%s11541_s7 + $0x8] sm:$0xff] }
 0x4d5   : > { %v15572_v31 = vpop.f32.mrf.mxu1 }
 0x4d6   : > { %15902 = vst [vmem:[#allocation18_spill] sm:$0xff] %v15572_v31  ;;  %v9815_v31 = vld [vmem:[%s11541_s7 + $0x10] sm:$0xff]  ;;  %v9537_v58 = vadd.f32 %v10854_v26, %v9376_v43 }
 0x4d7   : > { %v15574_v41 = vpop.f32.mrf.mxu0  ;;  %v15579_v59 = vpop.f32.mrf.mxu1 }
 0x4d8   : > { %15903 = vst [vmem:[#allocation19_spill] sm:$0xff] %v15579_v59 }
 0x4d9   : > { %v15581_v53 = vpop.f32.mrf.mxu0  ;;  %v11029_v36 = vpop.f32.mrf.mxu1 }
 0x4da   : > { %v9695_v29 = vadd.f32 %v11029_v36, %v9534_v34  ;;  %v10857_v34 = vadd.f32 %v15488_v24, %v15484_v12  ;;  %v10866_v12 = vadd.f32 %v15504_v33, %v15500_v40  ;;  %v9392_v36 = vadd.f32 %v15449_v61, %v15458_v2 }
 0x4db   : > { %v15587_v10 = vpop.f32.mrf.mxu0  ;;  %v9686_v59 = vpop.f32.mrf.mxu1 }
 0x4dc   : > { %v9847_v42 = vadd.f32 %v9815_v31, %v9695_v29  ;;  %v9687_v8 = vadd.f32 %v9686_v59, %v15463_v28  ;;  %v9819_v59 = vld [vmem:[%s11541_s7 + $0x30] sm:$0xff] }
 0x4dd   : > { %v15592_v57 = vpop.f32.mrf.mxu0  ;;  %v11030_v46 = vpop.f32.mrf.mxu1 }
 0x4de   : > { %9880 = vst.msk [vmem:[%s15605_s13 + $0x10] sm:$0xff] %vm9877_vm0, %v9847_v42  ;;  %v9845_v23 = vadd.f32 %v9813_v50, %v9687_v8  ;;  %v9698_v28 = vadd.f32 %v11030_v46, %v9537_v58  ;;  %v9550_v50 = vadd.f32 %v10863_v38, %v9389_v21  ;;  %v10860_v46 = vadd.f32 %v15492_v13, %v15490_v56  ;;  %v9817_v13 = vld [vmem:[%s11541_s7 + $0x20] sm:$0xff] }
 0x4df   : > { %v15598_v11 = vpop.f32.mrf.mxu0  ;;  %v9689_v31 = vpop.f32.mrf.mxu1  ;;  %v10875_v42 = vadd.f32 %v15526_v9, %v15522_v27  ;;  %v9553_v58 = vadd.f32 %v10866_v12, %v9392_v36 }
 0x4e0   : > { %9878 = vst.msk [vmem:[%s15605_s13] sm:$0xff] %vm9877_vm0, %v9845_v23  ;;  %v9848_v24 = vadd.f32 %v9816_v18, %v9698_v28  ;;  %v9690_v26 = vadd.f32 %v9689_v31, %v15468_v16  ;;  %v9542_v18 = vadd.f32 %v10857_v34, %v9381_v17  ;;  %v9384_v16 = vadd.f32 %v15440_v14, %v15458_v2  ;;  %v9820_v23 = vld [vmem:[%s11541_s7 + $0x38] sm:$0xff] }
 0x4e1   : > { %v15611_v29 = vpop.f32.mrf.mxu0  ;;  %v11033_v51 = vpop.f32.mrf.mxu1  ;;  %v9405_v14 = vadd.f32 %v15474_v15, %v15458_v2  ;;  %v10869_v17 = vadd.f32 %v15512_v20, %v15508_v32  ;;  %v9397_v31 = vadd.f32 %v15451_v54, %v15458_v2 }
 0x4e2   : > { %9881 = vst.msk [vmem:[%s15605_s13 + $0x18] sm:$0xff] %vm9877_vm0, %v9848_v24  ;;  %v9846_v40 = vadd.f32 %v9814_v63, %v9690_v26  ;;  %v9711_v33 = vadd.f32 %v11033_v51, %v9550_v50  ;;  %v9545_v28 = vadd.f32 %v10860_v46, %v9384_v16  ;;  %v9818_v24 = vld [vmem:[%s11541_s7 + $0x28] sm:$0xff]  ;;  %v10878_v26 = vadd.f32 %v15534_v49, %v15530_v60  ;;  %v9823_v51 = vld [vmem:[%s11541_s7 + $0x50] sm:$0xff] }
 0x4e3   : > { %v15621_v43 = vpop.f32.mrf.mxu0  ;;  %v9702_v56 = vpop.f32.mrf.mxu1  ;;  %v9566_v20 = vadd.f32 %v10875_v42, %v9405_v14  ;;  %v10872_v50 = vadd.f32 %v15518_v48, %v15514_v37  ;;  %v9558_v36 = vadd.f32 %v10869_v17, %v9397_v31  ;;  %v9821_v48 = vld [vmem:[%s11541_s7 + $0x40] sm:$0xff]  ;;  %v9822_v14 = vld [vmem:[%s11541_s7 + $0x48] sm:$0xff]  ;;  %v10890_v17 = vadd.f32 %v15566_v6, %v15560_v62 }
 0x4e4   : > { %9879 = vst.msk [vmem:[%s15605_s13 + $0x8] sm:$0xff] %vm9877_vm0, %v9846_v40  ;;  %v9851_v61 = vadd.f32 %v9819_v59, %v9711_v33  ;;  %v9703_v8 = vadd.f32 %v9702_v56, %v9542_v18  ;;  %v9408_v59 = vadd.f32 %v15478_v7, %v15458_v2  ;;  %v9400_v40 = vadd.f32 %v15453_v52, %v15458_v2 }
 0x4e5   : > { %v15630_v38 = vpop.f32.mrf.mxu0  ;;  %v11034_v34 = vpop.f32.mrf.mxu1  ;;  %v10887_v18 = vadd.f32 %v15556_v25, %v15552_v39  ;;  %v9421_v52 = vadd.f32 %v15498_v3, %v15458_v2 }
 0x4e6   : > { %9884 = vst.msk [vmem:[%s15605_s13 + $0x30] sm:$0xff] %vm9877_vm0, %v9851_v61  ;;  %v9849_v27 = vadd.f32 %v9817_v13, %v9703_v8  ;;  %v9714_v9 = vadd.f32 %v11034_v34, %v9553_v58  ;;  %v9569_v56 = vadd.f32 %v10878_v26, %v9408_v59  ;;  %v9824_v61 = vld [vmem:[%s11541_s7 + $0x58] sm:$0xff]  ;;  %v9561_v8 = vadd.f32 %v10872_v50, %v9400_v40 }
 0x4e7   : > { %v15637_v21 = vpop.f32.mrf.mxu0  ;;  %v9705_v12 = vpop.f32.mrf.mxu1  ;;  %v10881_v58 = vadd.f32 %v15542_v5, %v15538_v35  ;;  %v9413_v34 = vadd.f32 %v15482_v30, %v15458_v2  ;;  %v9582_v5 = vadd.f32 %v10887_v18, %v9421_v52  ;;  %v9827_v30 = vld [vmem:[%s11541_s7 + $0x70] sm:$0xff]  ;;  %v9416_v26 = vadd.f32 %v15486_v19, %v15458_v2  ;;  %v9828_v59 = vld [vmem:[%s11541_s7 + $0x78] sm:$0xff] }
 0x4e8   : > { %9882 = vst.msk [vmem:[%s15605_s13 + $0x20] sm:$0xff] %vm9877_vm0, %v9849_v27  ;;  %v9852_v15 = vadd.f32 %v9820_v23, %v9714_v9  ;;  %v9706_v32 = vadd.f32 %v9705_v12, %v9545_v28  ;;  %v10884_v27 = vadd.f32 %v15550_v44, %v15546_v47  ;;  %v9424_v12 = vadd.f32 %v15502_v4, %v15458_v2  ;;  %v9825_v47 = vld [vmem:[%s11541_s7 + $0x60] sm:$0xff] }
 0x4e9   : > { %v15648_v63 = vpop.f32.mrf.mxu0  ;;  %v11037_v54 = vpop.f32.mrf.mxu1  ;;  %v10899_v44 = vadd.f32 %v15611_v29, %v15598_v11  ;;  %v9437_v19 = vadd.f32 %v15516_v22, %v15458_v2  ;;  %v10902_v18 = vadd.f32 %v15630_v38, %v15621_v43 }
 0x4ea   : > { %9885 = vst.msk [vmem:[%s15605_s13 + $0x38] sm:$0xff] %vm9877_vm0, %v9852_v15  ;;  %v9850_v60 = vadd.f32 %v9818_v24, %v9706_v32  ;;  %v9727_v49 = vadd.f32 %v11037_v54, %v9566_v20  ;;  %v9574_v24 = vadd.f32 %v10881_v58, %v9413_v34  ;;  %v9585_v50 = vadd.f32 %v10890_v17, %v9424_v12  ;;  %v9829_v58 = vld [vmem:[%s11541_s7 + $0x80] sm:$0xff]  ;;  %v9832_v17 = vld [vmem:[%s11541_s7 + $0x98] sm:$0xff] }
 0x4eb   : > { %v15657_v46 = vpop.f32.mrf.mxu0  ;;  %v9718_v37 = vpop.f32.mrf.mxu1  ;;  %v9453_v34 = vadd.f32 %v15532_v1, %v15458_v2 }
 0x4ec   : > { %9883 = vst.msk [vmem:[%s15605_s13 + $0x28] sm:$0xff] %vm9877_vm0, %v9850_v60  ;;  %v9855_v7 = vadd.f32 %v9823_v51, %v9727_v49  ;;  %v9719_v16 = vadd.f32 %v9718_v37, %v9558_v36  ;;  %v9577_v60 = vadd.f32 %v10884_v27, %v9416_v26  ;;  %v10893_v49 = vadd.f32 %v15581_v53, %v15574_v41 }
 0x4ed   : > { %v15666_v33 = vpop.f32.mrf.mxu0  ;;  %v11038_v42 = vpop.f32.mrf.mxu1  ;;  %v9429_v36 = vadd.f32 %v15506_v0, %v15458_v2  ;;  %v9598_v53 = vadd.f32 %v10899_v44, %v9437_v19 }
 0x4ee   : > { %9888 = vst.msk [vmem:[%s15605_s13 + $0x50] sm:$0xff] %vm9877_vm0, %v9855_v7  ;;  %v9853_v39 = vadd.f32 %v9821_v48, %v9719_v16  ;;  %v9730_v25 = vadd.f32 %v11038_v42, %v9569_v56  ;;  %v9826_v48 = vld [vmem:[%s11541_s7 + $0x68] sm:$0xff]  ;;  %v9440_v7 = vadd.f32 %v15520_v45, %v15458_v2  ;;  %v9831_v56 = vld [vmem:[%s11541_s7 + $0x90] sm:$0xff]  ;;  %v10896_v42 = vadd.f32 %v15592_v57, %v15587_v10 }
 0x4ef   : > { %v15673_v13 = vpop.f32.mrf.mxu0  ;;  %v9721_v28 = vpop.f32.mrf.mxu1 }
 0x4f0   : > { %9886 = vst.msk [vmem:[%s15605_s13 + $0x40] sm:$0xff] %vm9877_vm0, %v9853_v39  ;;  %v9856_v3 = vadd.f32 %v9824_v61, %v9730_v25  ;;  %v9722_v35 = vadd.f32 %v9721_v28, %v9561_v8  ;;  %v9590_v61 = vadd.f32 %v10893_v49, %v9429_v36  ;;  %v9432_v8 = vadd.f32 %v15510_v55, %v15458_v2 }
 0x4f1   : > { %v10910_v23 = vpop.f32.mrf.mxu0  ;;  %v11041_v31 = vpop.f32.mrf.mxu1  ;;  %v9601_v25 = vadd.f32 %v10902_v18, %v9440_v7  ;;  %v10905_v55 = vadd.f32 %v15648_v63, %v15637_v21 }
 0x4f2   : > { %9889 = vst.msk [vmem:[%s15605_s13 + $0x58] sm:$0xff] %vm9877_vm0, %v9856_v3  ;;  %v9854_v6 = vadd.f32 %v9822_v14, %v9722_v35  ;;  %v9743_v62 = vadd.f32 %v11041_v31, %v9582_v5  ;;  %v10911_v39 = vadd.f32 %v10910_v23, %v15673_v13  ;;  %v9593_v3 = vadd.f32 %v10896_v42, %v9432_v8  ;;  %v15904_v35 = vld [vmem:[#allocation7_spill] sm:$0xff]  ;;  %v9834_v42 = vld [vmem:[%s11541_s7 + $0xa8] sm:$0xff] }
 0x4f3   : > { %v15691_v9 = vpop.f32.mrf.mxu0  ;;  %v9734_v32 = vpop.f32.mrf.mxu1  ;;  %v9445_v5 = vadd.f32 %v15904_v35, %v15458_v2 }
 0x4f4   : > { %9887 = vst.msk [vmem:[%s15605_s13 + $0x48] sm:$0xff] %vm9877_vm0, %v9854_v6  ;;  %v9859_v4 = vadd.f32 %v9827_v30, %v9743_v62  ;;  %v9735_v20 = vadd.f32 %v9734_v32, %v9574_v24  ;;  %v9830_v30 = vld [vmem:[%s11541_s7 + $0x88] sm:$0xff]  ;;  %v9614_v63 = vadd.f32 %v10911_v39, %v9453_v34  ;;  %v9835_v32 = vld [vmem:[%s11541_s7 + $0xb0] sm:$0xff] }
 0x4f5   : > { %v10913_v15 = vpop.f32.mrf.mxu0  ;;  %v11042_v51 = vpop.f32.mrf.mxu1  ;;  %v15905_v6 = vld [vmem:[#allocation9_spill] sm:$0xff]  ;;  %v9606_v44 = vadd.f32 %v10905_v55, %v9445_v5  ;;  %v9839_v39 = vld [vmem:[%s11541_s7 + $0xd0] sm:$0xff] }
 0x4f6   : > { %9892 = vst.msk [vmem:[%s15605_s13 + $0x70] sm:$0xff] %vm9877_vm0, %v9859_v4  ;;  %v9857_v11 = vadd.f32 %v9825_v47, %v9735_v20  ;;  %v9746_v29 = vadd.f32 %v11042_v51, %v9585_v50  ;;  %v10914_v1 = vadd.f32 %v10913_v15, %v15691_v9  ;;  %v9456_v62 = vadd.f32 %v15905_v6, %v15458_v2  ;;  %v15906_v4 = vld [vmem:[#allocation8_spill] sm:$0xff]  ;;  %v15913_v6 = vld [vmem:[#allocation14_spill] sm:$0xff] }
 0x4f7   : > { %v15705_v54 = vpop.f32.mrf.mxu0  ;;  %v9737_v37 = vpop.f32.mrf.mxu1  ;;  %v10908_v47 = vadd.f32 %v15666_v33, %v15657_v46  ;;  %v9448_v20 = vadd.f32 %v15906_v4, %v15458_v2  ;;  %v15907_v33 = vld [vmem:[#allocation12_spill] sm:$0xff] }
 0x4f8   : > { %9890 = vst.msk [vmem:[%s15605_s13 + $0x60] sm:$0xff] %vm9877_vm0, %v9857_v11  ;;  %v9860_v22 = vadd.f32 %v9828_v59, %v9746_v29  ;;  %v9738_v41 = vadd.f32 %v9737_v37, %v9577_v60  ;;  %v9833_v59 = vld [vmem:[%s11541_s7 + $0xa0] sm:$0xff]  ;;  %v9617_v46 = vadd.f32 %v10914_v1, %v9456_v62  ;;  %v9469_v11 = vadd.f32 %v15907_v33, %v15458_v2  ;;  %v9836_v37 = vld [vmem:[%s11541_s7 + $0xb8] sm:$0xff] }
 0x4f9   : > { %v15716_v40 = vpop.f32.mrf.mxu0  ;;  %v11045_v0 = vpop.f32.mrf.mxu1  ;;  %v9477_v62 = vadd.f32 %v15913_v6, %v15458_v2  ;;  %v15916_v33 = vld [vmem:[#allocation15_spill] sm:$0xff] }
 0x4fa   : > { %9893 = vst.msk [vmem:[%s15605_s13 + $0x78] sm:$0xff] %vm9877_vm0, %v9860_v22  ;;  %v9858_v43 = vadd.f32 %v9826_v48, %v9738_v41  ;;  %v9759_v38 = vadd.f32 %v11045_v0, %v9598_v53  ;;  %v10917_v48 = vadd.f32 %v15716_v40, %v15705_v54  ;;  %v9609_v41 = vadd.f32 %v10908_v47, %v9448_v20  ;;  %v15908_v53 = vld [vmem:[#allocation10_spill] sm:$0xff]  ;;  %v15909_v40 = vld [vmem:[#allocation13_spill] sm:$0xff] }
 0x4fb   : > { %v15725_v16 = vpop.f32.mrf.mxu0  ;;  %v9750_v45 = vpop.f32.mrf.mxu1  ;;  %v9461_v7 = vadd.f32 %v15908_v53, %v15458_v2  ;;  %v9472_v8 = vadd.f32 %v15909_v40, %v15458_v2  ;;  %v9838_v47 = vld [vmem:[%s11541_s7 + $0xc8] sm:$0xff] }
 0x4fc   : > { %9891 = vst.msk [vmem:[%s15605_s13 + $0x68] sm:$0xff] %vm9877_vm0, %v9858_v43  ;;  %v9863_v10 = vadd.f32 %v9831_v56, %v9759_v38  ;;  %v9751_v57 = vadd.f32 %v9750_v45, %v9590_v61 }
 0x4fd   : > { %v15734_v52 = vpop.f32.mrf.mxu0  ;;  %v11046_v14 = vpop.f32.mrf.mxu1  ;;  %v9622_v34 = vadd.f32 %v10917_v48, %v9461_v7  ;;  %v9841_v48 = vld [vmem:[%s11541_s7 + $0xe0] sm:$0xff] }
 0x4fe   : > { %9896 = vst.msk [vmem:[%s15605_s13 + $0x90] sm:$0xff] %vm9877_vm0, %v9863_v10  ;;  %v9861_v13 = vadd.f32 %v9829_v58, %v9751_v57  ;;  %v9762_v23 = vadd.f32 %v11046_v14, %v9601_v25  ;;  %v10920_v10 = vadd.f32 %v15734_v52, %v15725_v16  ;;  %v15911_v14 = vld [vmem:[#allocation17_spill] sm:$0xff] }
 0x4ff   : > { %v10921_v28 = vpop.f32.mrf.mxu0  ;;  %v9753_v31 = vpop.f32.mrf.mxu1 }
 0x500   : > { %9894 = vst.msk [vmem:[%s15605_s13 + $0x80] sm:$0xff] %vm9877_vm0, %v9861_v13  ;;  %v9864_v12 = vadd.f32 %v9832_v17, %v9762_v23  ;;  %v9754_v21 = vadd.f32 %v9753_v31, %v9593_v3  ;;  %v9837_v23 = vld [vmem:[%s11541_s7 + $0xc0] sm:$0xff]  ;;  %v15912_v3 = vld [vmem:[#allocation11_spill] sm:$0xff] }
 0x501   : > { %v10922_v27 = vpop.f32.mrf.mxu0  ;;  %v11049_v26 = vpop.f32.mrf.mxu1  ;;  %v9464_v35 = vadd.f32 %v15912_v3, %v15458_v2 }
 0x502   : > { %9897 = vst.msk [vmem:[%s15605_s13 + $0x98] sm:$0xff] %vm9877_vm0, %v9864_v12  ;;  %v9862_v9 = vadd.f32 %v9830_v30, %v9754_v21  ;;  %v9775_v15 = vadd.f32 %v11049_v26, %v9614_v63  ;;  %v10923_v60 = vadd.f32 %v10922_v27, %v10921_v28  ;;  %v15910_v28 = vld [vmem:[#allocation16_spill] sm:$0xff]  ;;  %v9840_v30 = vld [vmem:[%s11541_s7 + $0xd8] sm:$0xff] }
 0x503   : > { %v10924_v24 = vpop.f32.mrf.mxu0  ;;  %v9766_v51 = vpop.f32.mrf.mxu1  ;;  %v10823_v17 = vadd.f32 %v15911_v14, %v15910_v28  ;;  %v9625_v63 = vadd.f32 %v10920_v10, %v9464_v35 }
 0x504   : > { %9895 = vst.msk [vmem:[%s15605_s13 + $0x88] sm:$0xff] %vm9877_vm0, %v9862_v9  ;;  %v9867_v19 = vadd.f32 %v9835_v32, %v9775_v15  ;;  %v9767_v49 = vadd.f32 %v9766_v51, %v9606_v44  ;;  %v9630_v54 = vadd.f32 %v10923_v60, %v9469_v11  ;;  %v15914_v9 = vld [vmem:[#allocation18_spill] sm:$0xff]  ;;  %v15915_v15 = vld [vmem:[#allocation19_spill] sm:$0xff]  ;;  %v9480_v11 = vadd.f32 %v15916_v33, %v15458_v2 }
 0x505   : > { %v10925_v50 = vpop.f32.mrf.mxu0  ;;  %v11050_v36 = vpop.f32.mrf.mxu1  ;;  %v10826_v44 = vadd.f32 %v15915_v15, %v15914_v9 }
 0x506   : > { %9900 = vst.msk [vmem:[%s15605_s13 + $0xb0] sm:$0xff] %vm9877_vm0, %v9867_v19  ;;  %v9865_v18 = vadd.f32 %v9833_v59, %v9767_v49  ;;  %v9778_v22 = vadd.f32 %v11050_v36, %v9617_v46  ;;  %v10926_v43 = vadd.f32 %v10925_v50, %v10924_v24  ;;  %v9485_v24 = vadd.f32 %v10823_v17, %v15458_v2 }
 0x507   : > { %v10927_v29 = vpop.f32.mrf.mxu0  ;;  %v9769_v56 = vpop.f32.mrf.mxu1 }
 0x508   : > { %9898 = vst.msk [vmem:[%s15605_s13 + $0xa0] sm:$0xff] %vm9877_vm0, %v9865_v18  ;;  %v9868_v38 = vadd.f32 %v9836_v37, %v9778_v22  ;;  %v9770_v61 = vadd.f32 %v9769_v56, %v9609_v41  ;;  %v9633_v5 = vadd.f32 %v10926_v43, %v9472_v8  ;;  %v9488_v18 = vadd.f32 %v10826_v44, %v15458_v2  ;;  %v9842_v2 = vld [vmem:[%s11541_s7 + $0xe8] sm:$0xff] }
 0x509   : > { %v10928_v0 = vpop.f32.mrf.mxu0  ;;  %v11053_v58 = vpop.f32.mrf.mxu1 }
 0x50a   : > { %9901 = vst.msk [vmem:[%s15605_s13 + $0xb8] sm:$0xff] %vm9877_vm0, %v9868_v38  ;;  %v9866_v57 = vadd.f32 %v9834_v42, %v9770_v61  ;;  %v9791_v25 = vadd.f32 %v11053_v58, %v9630_v54  ;;  %v10929_v1 = vadd.f32 %v10928_v0, %v10927_v29  ;;  %v9843_v29 = vld [vmem:[%s11541_s7 + $0xf0] sm:$0xff]  ;;  %v9844_v38 = vld [vmem:[%s11541_s7 + $0xf8] sm:$0xff]  ;;  %s11359_s7 = scalar_lea.vmem %s15824_s20, 4096 }
 0x50b   : > { %v10930_v45 = vpop.f32.mrf.mxu0  ;;  %v9782_v13 = vpop.f32.mrf.mxu1  ;;  %p11360_p11 = scmp.ne.s32.totalorder %s15824_s20, %s11359_s7  ;;  %p11367_p1 = scmp.lt.s32.totalorder %s11365_s30, %s11359_s7 }
 0x50c   : > { %9899 = vst.msk [vmem:[%s15605_s13 + $0xa8] sm:$0xff] %vm9877_vm0, %v9866_v57  ;;  %v9871_v16 = vadd.f32 %v9839_v39, %v9791_v25  ;;  %v9783_v52 = vadd.f32 %v9782_v13, %v9622_v34  ;;  %v9638_v46 = vadd.f32 %v10929_v1, %v9477_v62 }
 0x50d   : > { %v10931_v55 = vpop.f32.mrf.mxu0  ;;  %v11054_v31 = vpop.f32.mrf.mxu1  ;;  %p11361_p12 = pnand %p11360_p11, %p11489_p5  ;;  %p11368_p2 = por %p11367_p1, %p11366_p0 }
 0x50e   : > { %9904 = vst.msk [vmem:[%s15605_s13 + $0xd0] sm:$0xff] %vm9877_vm0, %v9871_v16  ;;  %v9869_v12 = vadd.f32 %v9837_v23, %v9783_v52  ;;  %v9794_v21 = vadd.f32 %v11054_v31, %v9633_v5  ;;  %v10932_v60 = vadd.f32 %v10931_v55, %v10930_v45 }
 0x50f   : > { %v10933_v27 = vpop.f32.mrf.mxu0  ;;  %v9785_v32 = vpop.f32.mrf.mxu1  ;;  %p11362_p13 = pneg %p11361_p12 }
 0x510   : > { %9902 = vst.msk [vmem:[%s15605_s13 + $0xc0] sm:$0xff] %vm9877_vm0, %v9869_v12  ;;  %v9872_v4 = vadd.f32 %v9840_v30, %v9794_v21  ;;  %v9786_v50 = vadd.f32 %v9785_v32, %v9625_v63  ;;  %v9641_v43 = vadd.f32 %v10932_v60, %v9480_v11 }
 0x511   : > { %v10934_v26 = vpop.f32.mrf.mxu0  ;;  %v11057_v59 = vpop.f32.mrf.mxu1  ;;  %p11369_p3 = pnand %p11368_p2, %p11362_p13 }
 0x512   : > { %v10935_v20 = vadd.f32 %v10934_v26, %v10933_v27  ;;  %9905 = vst.msk [vmem:[%s15605_s13 + $0xd8] sm:$0xff] %vm9877_vm0, %v9872_v4  ;;  %v9870_v19 = vadd.f32 %v9838_v47, %v9786_v50 }
 0x513   : > { %v10936_v51 = vpop.f32.mrf.mxu0  ;;  %v9798_v37 = vpop.f32.mrf.mxu1 }
 0x514   : > { %v9646_v49 = vadd.f32 %v10935_v20, %v9485_v24  ;;  %9903 = vst.msk [vmem:[%s15605_s13 + $0xc8] sm:$0xff] %vm9877_vm0, %v9870_v19  ;;  %v9799_v53 = vadd.f32 %v9798_v37, %v9638_v46 }
 0x515   : > { %v10937_v36 = vpop.f32.mrf.mxu0  ;;  %v11058_v7 = vpop.f32.mrf.mxu1 }
 0x516   : > { %v9807_v22 = vadd.f32 %v11057_v59, %v9646_v49  ;;  %v10938_v41 = vadd.f32 %v10937_v36, %v10936_v51  ;;  %v9873_v56 = vadd.f32 %v9841_v48, %v9799_v53 }
 0x517   : > { %v9801_v61 = vpop.f32.mrf.mxu1 }
 0x518   : > { %v9875_v0 = vadd.f32 %v9843_v29, %v9807_v22  ;;  %v9649_v42 = vadd.f32 %v10938_v41, %v9488_v18  ;;  %9906 = vst.msk [vmem:[%s15605_s13 + $0xe0] sm:$0xff] %vm9877_vm0, %v9873_v56  ;;  %v9802_v40 = vadd.f32 %v9801_v61, %v9641_v43 }
 0x51a   : > { %9908 = vst.msk [vmem:[%s15605_s13 + $0xf0] sm:$0xff] %vm9877_vm0, %v9875_v0  ;;  %v9810_v54 = vadd.f32 %v11058_v7, %v9649_v42  ;;  %v9874_v45 = vadd.f32 %v9842_v2, %v9802_v40 }
 0x51c   : > { %v9876_v8 = vadd.f32 %v9844_v38, %v9810_v54  ;;  %9907 = vst.msk [vmem:[%s15605_s13 + $0xe8] sm:$0xff] %vm9877_vm0, %v9874_v45 }
 0x51e   : > { %9909 = vst.msk [vmem:[%s15605_s13 + $0xf8] sm:$0xff] %vm9877_vm0, %v9876_v8 }
 0x51f   : > { %11372 = shalt.err (!%p11369_p3)
}
 0x520   : > { %s11373_s5 = scalar_lea.hbm %s15822_s27, 4096  ;;  %s11377_s10 = scalar_lea.hbm %s15876_s4, 8192 }
 0x521   : > { %p11374_p4 = scmp.ne.s32.totalorder %s15822_s27, %s11373_s5  ;;  %p11378_p9 = scmp.lt.s32.totalorder %s15822_s27, %s15876_s4 }
 0x522   : > { %p11379_p10 = scmp.lt.s32.totalorder %s11377_s10, %s11373_s5 }
 0x523   : > { %p11375_p7 = pnand %p11374_p4, %p11489_p5 }
 0x524   : > { %p11380_p11 = por %p11379_p10, %p11378_p9 }
 0x525   : > { %p11376_p8 = pneg %p11375_p7 }
 0x527   : > { %p11381_p12 = pnand %p11380_p11, %p11376_p8 }
 0x529   : > { %11384 = shalt.err (!%p11381_p12)
}
 0x52a   : > { %s11424_s12 = smov 128   ;;  %s11425_s13 = smov 8  }
 0x52b   : > { %11059 = dma.vmem_to_hbm [thread:$0]  (%p11489_p5), %s15824_s20, 4096, %s15822_s27, %s15832_s19, %s11424_s12, %s11424_s12, %s11425_s13  }
 0x52c PF: > { %p11065_p13 = scmp.ge.s32.totalorder %s11419_s18, 2  ;;  %s9939_s14 = sand.u32 1, %s11407_s15  }
 0x52d   : > { %s9940_s22 = scalar_lea.sflag [#allocation5], %s9939_s14 }
 0x52e   : > { %p11062_p0 = pnand %p11065_p13, %p11493_p6 }
 0x530   : > { %p11063_p1 = pneg %p11062_p0 }
 0x532   : > { %11402 = dma.done.wait (%p11063_p1), %s9940_s22, 4096  }
 0x533   : > { %11404 = vsyncadd (%p11063_p1), %s9940_s22, 4294963200  ;;  %p14_p2 = scmp.ge.s32.totalorder %s11476_s21, 4   ;;  %s15917_s15 = smov %s11411_s16 }
 0x534   : > { %s15918_s16 = smov %s11415_s17  ;;  %s15919_s17 = smov %s11487_s24 }
 0x535   : > { %s15920_s18 = smov %s11476_s21  ;;  %16 = sbr.rel (!%p14_p2) target bundleno = 3 (0x3), region = 74 }
 0x53a   :  { %9945 = vsyncpa [#allocation5], 1 }
 0x53b   :  { %9947 = vsyncpa [#allocation5 + $0x1], 1 }

</bundles_post_ra>
